<compile_context>
chip_gen: v7x
topology: tpu7x:2x2x1
jax: 0.10.0
libtpu: 0.0.40
codegen_flags: <defaults>
</compile_context>

<pallas_src>
import jax
import jax.numpy as jnp
from jax.experimental import pallas as pl
from jax.experimental.pallas import tpu as pltpu

_EPS = 1e-5


def _fused_vgg_block_kernel(x_ref, w_ref, g_ref, b_ref, o_ref, act_ref):
    """Grid axis 0 = layer index.  act_ref holds the zero-halo'd activation (bf16)."""
    l = pl.program_id(0)
    n_layers = pl.num_programs(0)

    N, Hp, Wp, Cp = act_ref.shape
    H, W = Hp - 2, Wp - 2
    M = N * H * W

    # Layer 0: zero only the 1-pixel halo (the interior is rewritten every layer, so a
    # full-buffer zero fill would be pure vector-store waste), then copy the input in.
    @pl.when(l == 0)
    def _():
        zrow = jnp.zeros((N, 1, Wp, Cp), act_ref.dtype)
        act_ref[:, 0:1, :, :] = zrow
        act_ref[:, H + 1:H + 2, :, :] = zrow
        zcol = jnp.zeros((N, Hp, 1, Cp), act_ref.dtype)
        act_ref[:, :, 0:1, :] = zcol
        act_ref[:, :, W + 1:W + 2, :] = zcol
        act_ref[:, 1:H + 1, 1:W + 1, :] = x_ref[...]

    # 3x3 conv as 9 accumulated MXU matmuls on shifted views (no [M, 9*Cp] im2col buffer,
    # no concatenate traffic).  Each tap is a static [Cp, Cp] slice of this layer's weights.
    acc = jnp.zeros((M, Cp), jnp.float32)
    for kh in range(3):
        for kw in range(3):
            lhs = act_ref[:, kh:kh + H, kw:kw + W, :].reshape(M, Cp)
            acc = acc + jnp.dot(lhs, w_ref[0, kh * 3 + kw],
                                preferred_element_type=jnp.float32)
    # Conv bias intentionally omitted: a per-channel additive bias cancels exactly under
    # training-mode BatchNorm batch statistics (mean(acc + b) = mean(acc) + b).  NOTE: only
    # valid for batch-stats BN; eval-mode / running-stats would need the bias restored.

    # BatchNorm2d with biased batch statistics, two-pass (matches the reference's
    # mean / mean((x-mean)^2) and is numerically safer than E[x^2]-E[x]^2), f32 math,
    # then fused scale/shift + ReLU.
    inv_m = 1.0 / M
    mean = jnp.sum(acc, axis=0, keepdims=True) * inv_m                    # [1, Cp]
    centered = acc - mean
    var = jnp.sum(centered * centered, axis=0, keepdims=True) * inv_m     # [1, Cp]
    scale = g_ref[0] * jax.lax.rsqrt(var + _EPS)                          # [1, Cp]
    y = jnp.maximum(centered * scale + b_ref[0], 0.0)                     # fused BN + ReLU

    # Feed the next layer (interior of the halo'd scratch) or emit the final output.
    @pl.when(l < n_layers - 1)
    def _():
        act_ref[:, 1:H + 1, 1:W + 1, :] = y.reshape(N, H, W, Cp).astype(act_ref.dtype)

    @pl.when(l == n_layers - 1)
    def _():
        o_ref[...] = y.reshape(N, H, W, Cp).astype(o_ref.dtype)


def _round_up(x, m):
    return (x + m - 1) // m * m


def _vmem_limit_bytes():
    """Generation-aware VMEM budget: ~75% of physical (v5e/v6e 128 MiB, v7x 64 MiB)."""
    try:
        cap = pltpu.get_tpu_info().vmem_capacity_bytes
    except Exception:
        cap = 64 * 1024 * 1024
    return int(cap) * 3 // 4


def init_vgg_decoder_block(key, block_index, layer_data):
    """Deterministic synthetic parameters mirroring VGGDecoderBlock.__init__ shapes (HWIO conv)."""
    layer_count, _, out_channels, deeper_channels = layer_data
    in0 = out_channels * (block_index + 1) + deeper_channels
    in_channels = [in0] + [out_channels] * (layer_count - 1)

    params = []
    for cin in in_channels:
        key, kw, kb, kg, kbe = jax.random.split(key, 5)
        w = jax.random.normal(kw, (3, 3, cin, out_channels), jnp.float32) * 0.1
        b = jax.random.normal(kb, (out_channels,), jnp.float32) * 0.1
        gamma = 1.0 + 0.1 * jax.random.normal(kg, (out_channels,), jnp.float32)
        beta = 0.1 * jax.random.normal(kbe, (out_channels,), jnp.float32)
        params.append((w, b, gamma, beta))
    return params


@jax.jit
def vgg_decoder_block_forward(x_nchw, params):
    """Forward pass of VGGDecoderBlock.  Input/output are NCHW like PyTorch."""
    N, Cin0, H, W = x_nchw.shape
    L = len(params)
    Cout = params[0][0].shape[-1]

    # One lane-dense channel width shared by all layers (real VGG decoder channels of
    # 256/512 naturally give 256-wide MXU output tiles on v6e/v7x; 128 matches v5e).
    Cp = _round_up(max([Cin0] + [p[0].shape[-1] for p in params]), 128)

    # --- glue: layout + channel padding + bf16 cast, done once outside the kernel ---
    x_nhwc = jnp.transpose(x_nchw, (0, 2, 3, 1))                           # NCHW -> NHWC
    x_p = jnp.pad(x_nhwc, ((0, 0), (0, 0), (0, 0), (0, Cp - Cin0))).astype(jnp.bfloat16)

    # Padded-channel invariant (relied on for correctness): gamma padded with 1.0, beta with
    # 0.0, and padded weight rows/cols are 0 => padded output channels stay exactly 0 through
    # conv + BN + ReLU at every layer.
    w_stack, g_stack, b_stack = [], [], []
    for (w, _b, gamma, beta) in params:   # conv bias _b is dropped (cancels under training BN)
        cin, cout = w.shape[2], w.shape[3]
        wp = jnp.pad(w, ((0, 0), (0, 0), (0, Cp - cin), (0, Cp - cout)))
        w_stack.append(wp.reshape(9, Cp, Cp))                              # tap-major taps
        g_stack.append(jnp.pad(gamma, (0, Cp - cout), constant_values=1.0))
        b_stack.append(jnp.pad(beta, (0, Cp - cout)))
    w_all = jnp.stack(w_stack).astype(jnp.bfloat16)                        # [L, 9, Cp, Cp]
    g_all = jnp.stack(g_stack).reshape(L, 1, Cp).astype(jnp.float32)       # [L, 1, Cp]
    b_all = jnp.stack(b_stack).reshape(L, 1, Cp).astype(jnp.float32)       # [L, 1, Cp]

    cost = pl.CostEstimate(
        flops=int(2 * L * N * H * W * 9 * Cp * Cp),
        transcendentals=int(L * Cp),
        bytes_accessed=int(x_p.size * 2 + w_all.size * 2 + g_all.size * 4
                           + b_all.size * 4 + N * H * W * Cp * 2),
    )

    out = pl.pallas_call(
        _fused_vgg_block_kernel,
        out_shape=jax.ShapeDtypeStruct((N, H, W, Cp), jnp.bfloat16),
        grid=(L,),
        in_specs=[
            pl.BlockSpec((N, H, W, Cp), lambda l: (0, 0, 0, 0)),      # input (fetched once)
            pl.BlockSpec((1, 9, Cp, Cp), lambda l: (l, 0, 0, 0)),     # per-layer taps (pipelined)
            pl.BlockSpec((1, 1, Cp), lambda l: (l, 0, 0)),            # per-layer gamma
            pl.BlockSpec((1, 1, Cp), lambda l: (l, 0, 0)),            # per-layer beta
        ],
        out_specs=pl.BlockSpec((N, H, W, Cp), lambda l: (0, 0, 0, 0)),
        scratch_shapes=[pltpu.VMEM((N, H + 2, W + 2, Cp), jnp.bfloat16)],
        compiler_params=pltpu.CompilerParams(
            dimension_semantics=("arbitrary",),      # layer axis carries a dependency
            vmem_limit_bytes=_vmem_limit_bytes(),
        ),
        cost_estimate=cost,
    )(x_p, w_all, g_all, b_all)

    out = out[..., :Cout].astype(jnp.float32)                             # drop channel padding
    return jnp.transpose(out, (0, 3, 1, 2))                               # NHWC -> NCHW


def _reference_forward(x_nchw, params):
    """Pure-JAX reference (training-mode BatchNorm, conv bias kept)."""
    x = jnp.transpose(x_nchw, (0, 2, 3, 1))
    for (w, b, gamma, beta) in params:
        y = jax.lax.conv_general_dilated(
            x, w, window_strides=(1, 1), padding=((1, 1), (1, 1)),
            dimension_numbers=("NHWC", "HWIO", "NHWC")) + b
        mean = jnp.mean(y, axis=(0, 1, 2))
        var = jnp.mean((y - mean) ** 2, axis=(0, 1, 2))
        y = (y - mean) * jax.lax.rsqrt(var + _EPS) * gamma + beta
        x = jnp.maximum(y, 0.0)
    return jnp.transpose(x, (0, 3, 1, 2))


if __name__ == "__main__":
    # Small config: block_index=1, layer_data=(layer_count=2, _, out_channels=8, deeper_channels=8)
    # -> first conv in_channels = 8*(1+1) + 8 = 24, then 8 -> 8.
    block_index = 1
    layer_data = (2, None, 8, 8)

    key = jax.random.PRNGKey(0)
    k_x, k_p = jax.random.split(key)

    N, H, W = 2, 16, 16
    cin0 = layer_data[2] * (block_index + 1) + layer_data[3]   # 24
    x = jax.random.normal(k_x, (N, cin0, H, W), jnp.float32)   # NCHW like PyTorch

    params = init_vgg_decoder_block(k_p, block_index, layer_data)

    out = vgg_decoder_block_forward(x, params)
    out = jax.block_until_ready(out)

    ref = _reference_forward(x, params)
    assert out.shape == (N, layer_data[2], H, W), out.shape
    # Tolerance sized for bf16 MXU operands / bf16 inter-layer activations / bf16 output
    # with f32 accumulation and f32 BN (kernel) vs f32 reference.
    err = float(jnp.max(jnp.abs(out - ref)))
    assert jnp.allclose(out, ref, atol=3e-2, rtol=3e-2), err

    print("KERNEL_OK")
</pallas_src>

<mosaic_0001>
module attributes {stable_mosaic.version = 11 : i64} {
  func.func @_fused_vgg_block_kernel(%arg0: i32, %arg1: memref<2x16x16x128xbf16, #tpu.memory_space<vmem>>, %arg2: memref<1x9x128x128xbf16, #tpu.memory_space<vmem>>, %arg3: memref<1x1x128xf32, #tpu.memory_space<vmem>>, %arg4: memref<1x1x128xf32, #tpu.memory_space<vmem>>, %arg5: memref<2x16x16x128xbf16, #tpu.memory_space<vmem>>, %arg6: memref<2x18x18x128xbf16, #tpu.memory_space<vmem>>) attributes {dimension_semantics = [#tpu.dimension_semantics<arbitrary>], iteration_bounds = array<i64: 2>, scalar_prefetch = 0 : i64, scratch_operands = 1 : i64, tpu.core_type = #tpu.core_type<tc>, window_params = [{pipeline_mode = #tpu.pipeline_mode<synchronous>, transform_indices = @transform_0, window_bounds = array<i64: 2, 16, 16, 128>}, {transform_indices = @transform_1, window_bounds = array<i64: 1, 9, 128, 128>}, {transform_indices = @transform_2, window_bounds = array<i64: 1, 1, 128>}, {transform_indices = @transform_3, window_bounds = array<i64: 1, 1, 128>}, {pipeline_mode = #tpu.pipeline_mode<synchronous>, transform_indices = @transform_4, window_bounds = array<i64: 2, 16, 16, 128>}]} {
    %c0_i32 = arith.constant 0 : i32
    %0 = arith.cmpi eq, %arg0, %c0_i32 : i32
    %1 = arith.extui %0 : i1 to i32
    %c0_i32_0 = arith.constant 0 : i32
    %2 = arith.cmpi ne, %1, %c0_i32_0 : i32
    scf.if %2 {
      %cst_88 = arith.constant 0.000000e+00 : bf16
      %89 = vector.broadcast %cst_88 : bf16 to vector<2x1x18x128xbf16>
      %c0_89 = arith.constant 0 : index
      %c0_90 = arith.constant 0 : index
      %c0_91 = arith.constant 0 : index
      %c0_92 = arith.constant 0 : index
      %90 = vector.load %arg6[%c0_89, %c0_90, %c0_91, %c0_92] : memref<2x18x18x128xbf16, #tpu.memory_space<vmem>>, vector<2x1x18x128xbf16>
      tpu.vector_store %arg6[%c0_89, %c0_90, %c0_91, %c0_92], %89 {strides = array<i32>} : memref<2x18x18x128xbf16, #tpu.memory_space<vmem>>, vector<2x1x18x128xbf16>,
      %c0_93 = arith.constant 0 : index
      %c17 = arith.constant 17 : index
      %c0_94 = arith.constant 0 : index
      %c0_95 = arith.constant 0 : index
      %91 = vector.load %arg6[%c0_93, %c17, %c0_94, %c0_95] : memref<2x18x18x128xbf16, #tpu.memory_space<vmem>>, vector<2x1x18x128xbf16>
      tpu.vector_store %arg6[%c0_93, %c17, %c0_94, %c0_95], %89 {strides = array<i32>} : memref<2x18x18x128xbf16, #tpu.memory_space<vmem>>, vector<2x1x18x128xbf16>,
      %cst_96 = arith.constant 0.000000e+00 : bf16
      %92 = vector.broadcast %cst_96 : bf16 to vector<2x18x1x128xbf16>
      %c0_97 = arith.constant 0 : index
      %c0_98 = arith.constant 0 : index
      %c0_99 = arith.constant 0 : index
      %c0_100 = arith.constant 0 : index
      %93 = vector.load %arg6[%c0_97, %c0_98, %c0_99, %c0_100] : memref<2x18x18x128xbf16, #tpu.memory_space<vmem>>, vector<2x18x1x128xbf16>
      tpu.vector_store %arg6[%c0_97, %c0_98, %c0_99, %c0_100], %92 {strides = array<i32>} : memref<2x18x18x128xbf16, #tpu.memory_space<vmem>>, vector<2x18x1x128xbf16>,
      %c0_101 = arith.constant 0 : index
      %c0_102 = arith.constant 0 : index
      %c17_103 = arith.constant 17 : index
      %c0_104 = arith.constant 0 : index
      %94 = vector.load %arg6[%c0_101, %c0_102, %c17_103, %c0_104] : memref<2x18x18x128xbf16, #tpu.memory_space<vmem>>, vector<2x18x1x128xbf16>
      tpu.vector_store %arg6[%c0_101, %c0_102, %c17_103, %c0_104], %92 {strides = array<i32>} : memref<2x18x18x128xbf16, #tpu.memory_space<vmem>>, vector<2x18x1x128xbf16>,
      %c0_105 = arith.constant 0 : index
      %c0_106 = arith.constant 0 : index
      %c0_107 = arith.constant 0 : index
      %c0_108 = arith.constant 0 : index
      %95 = vector.load %arg1[%c0_105, %c0_106, %c0_107, %c0_108] : memref<2x16x16x128xbf16, #tpu.memory_space<vmem>>, vector<2x16x16x128xbf16>
      %c0_109 = arith.constant 0 : index
      %c1_110 = arith.constant 1 : index
      %c1_111 = arith.constant 1 : index
      %c0_112 = arith.constant 0 : index
      %96 = vector.load %arg6[%c0_109, %c1_110, %c1_111, %c0_112] : memref<2x18x18x128xbf16, #tpu.memory_space<vmem>>, vector<2x16x16x128xbf16>
      tpu.vector_store %arg6[%c0_109, %c1_110, %c1_111, %c0_112], %95 {strides = array<i32>} : memref<2x18x18x128xbf16, #tpu.memory_space<vmem>>, vector<2x16x16x128xbf16>,
    } else {
    }
    %cst = arith.constant 0.000000e+00 : f32
    %3 = vector.broadcast %cst : f32 to vector<512x128xf32>
    %c0 = arith.constant 0 : index
    %c0_1 = arith.constant 0 : index
    %c0_2 = arith.constant 0 : index
    %c0_3 = arith.constant 0 : index
    %4 = vector.load %arg6[%c0, %c0_1, %c0_2, %c0_3] : memref<2x18x18x128xbf16, #tpu.memory_space<vmem>>, vector<2x16x16x128xbf16>
    %5 = vector.shape_cast %4 : vector<2x16x16x128xbf16> to vector<512x128xbf16>
    %c0_4 = arith.constant 0 : index
    %c0_5 = arith.constant 0 : index
    %c0_6 = arith.constant 0 : index
    %c0_7 = arith.constant 0 : index
    %6 = vector.load %arg2[%c0_4, %c0_5, %c0_6, %c0_7] : memref<1x9x128x128xbf16, #tpu.memory_space<vmem>>, vector<1x1x128x128xbf16>
    %7 = vector.shape_cast %6 : vector<1x1x128x128xbf16> to vector<128x128xbf16>
    %cst_8 = arith.constant dense<0.000000e+00> : vector<512x128xf32>
    %8 = tpu.matmul %5, %7, %cst_8 {dimension_numbers = #tpu.dot_dimension_numbers<[1], [0], [0], [1], [0, 0, 1, 1], [], []>} : vector<512x128xbf16>, vector<128x128xbf16>, vector<512x128xf32> -> vector<512x128xf32>
    %9 = arith.addf %3, %8 : vector<512x128xf32>
    %c0_9 = arith.constant 0 : index
    %c0_10 = arith.constant 0 : index
    %c1 = arith.constant 1 : index
    %c0_11 = arith.constant 0 : index
    %10 = vector.load %arg6[%c0_9, %c0_10, %c1, %c0_11] : memref<2x18x18x128xbf16, #tpu.memory_space<vmem>>, vector<2x16x16x128xbf16>
    %11 = vector.shape_cast %10 : vector<2x16x16x128xbf16> to vector<512x128xbf16>
    %c0_12 = arith.constant 0 : index
    %c1_13 = arith.constant 1 : index
    %c0_14 = arith.constant 0 : index
    %c0_15 = arith.constant 0 : index
    %12 = vector.load %arg2[%c0_12, %c1_13, %c0_14, %c0_15] : memref<1x9x128x128xbf16, #tpu.memory_space<vmem>>, vector<1x1x128x128xbf16>
    %13 = vector.shape_cast %12 : vector<1x1x128x128xbf16> to vector<128x128xbf16>
    %cst_16 = arith.constant dense<0.000000e+00> : vector<512x128xf32>
    %14 = tpu.matmul %11, %13, %cst_16 {dimension_numbers = #tpu.dot_dimension_numbers<[1], [0], [0], [1], [0, 0, 1, 1], [], []>} : vector<512x128xbf16>, vector<128x128xbf16>, vector<512x128xf32> -> vector<512x128xf32>
    %15 = arith.addf %9, %14 : vector<512x128xf32>
    %c0_17 = arith.constant 0 : index
    %c0_18 = arith.constant 0 : index
    %c2 = arith.constant 2 : index
    %c0_19 = arith.constant 0 : index
    %16 = vector.load %arg6[%c0_17, %c0_18, %c2, %c0_19] : memref<2x18x18x128xbf16, #tpu.memory_space<vmem>>, vector<2x16x16x128xbf16>
    %17 = vector.shape_cast %16 : vector<2x16x16x128xbf16> to vector<512x128xbf16>
    %c0_20 = arith.constant 0 : index
    %c2_21 = arith.constant 2 : index
    %c0_22 = arith.constant 0 : index
    %c0_23 = arith.constant 0 : index
    %18 = vector.load %arg2[%c0_20, %c2_21, %c0_22, %c0_23] : memref<1x9x128x128xbf16, #tpu.memory_space<vmem>>, vector<1x1x128x128xbf16>
    %19 = vector.shape_cast %18 : vector<1x1x128x128xbf16> to vector<128x128xbf16>
    %cst_24 = arith.constant dense<0.000000e+00> : vector<512x128xf32>
    %20 = tpu.matmul %17, %19, %cst_24 {dimension_numbers = #tpu.dot_dimension_numbers<[1], [0], [0], [1], [0, 0, 1, 1], [], []>} : vector<512x128xbf16>, vector<128x128xbf16>, vector<512x128xf32> -> vector<512x128xf32>
    %21 = arith.addf %15, %20 : vector<512x128xf32>
    %c0_25 = arith.constant 0 : index
    %c1_26 = arith.constant 1 : index
    %c0_27 = arith.constant 0 : index
    %c0_28 = arith.constant 0 : index
    %22 = vector.load %arg6[%c0_25, %c1_26, %c0_27, %c0_28] : memref<2x18x18x128xbf16, #tpu.memory_space<vmem>>, vector<2x16x16x128xbf16>
    %23 = vector.shape_cast %22 : vector<2x16x16x128xbf16> to vector<512x128xbf16>
    %c0_29 = arith.constant 0 : index
    %c3 = arith.constant 3 : index
    %c0_30 = arith.constant 0 : index
    %c0_31 = arith.constant 0 : index
    %24 = vector.load %arg2[%c0_29, %c3, %c0_30, %c0_31] : memref<1x9x128x128xbf16, #tpu.memory_space<vmem>>, vector<1x1x128x128xbf16>
    %25 = vector.shape_cast %24 : vector<1x1x128x128xbf16> to vector<128x128xbf16>
    %cst_32 = arith.constant dense<0.000000e+00> : vector<512x128xf32>
    %26 = tpu.matmul %23, %25, %cst_32 {dimension_numbers = #tpu.dot_dimension_numbers<[1], [0], [0], [1], [0, 0, 1, 1], [], []>} : vector<512x128xbf16>, vector<128x128xbf16>, vector<512x128xf32> -> vector<512x128xf32>
    %27 = arith.addf %21, %26 : vector<512x128xf32>
    %c0_33 = arith.constant 0 : index
    %c1_34 = arith.constant 1 : index
    %c1_35 = arith.constant 1 : index
    %c0_36 = arith.constant 0 : index
    %28 = vector.load %arg6[%c0_33, %c1_34, %c1_35, %c0_36] : memref<2x18x18x128xbf16, #tpu.memory_space<vmem>>, vector<2x16x16x128xbf16>
    %29 = vector.shape_cast %28 : vector<2x16x16x128xbf16> to vector<512x128xbf16>
    %c0_37 = arith.constant 0 : index
    %c4 = arith.constant 4 : index
    %c0_38 = arith.constant 0 : index
    %c0_39 = arith.constant 0 : index
    %30 = vector.load %arg2[%c0_37, %c4, %c0_38, %c0_39] : memref<1x9x128x128xbf16, #tpu.memory_space<vmem>>, vector<1x1x128x128xbf16>
    %31 = vector.shape_cast %30 : vector<1x1x128x128xbf16> to vector<128x128xbf16>
    %cst_40 = arith.constant dense<0.000000e+00> : vector<512x128xf32>
    %32 = tpu.matmul %29, %31, %cst_40 {dimension_numbers = #tpu.dot_dimension_numbers<[1], [0], [0], [1], [0, 0, 1, 1], [], []>} : vector<512x128xbf16>, vector<128x128xbf16>, vector<512x128xf32> -> vector<512x128xf32>
    %33 = arith.addf %27, %32 : vector<512x128xf32>
    %c0_41 = arith.constant 0 : index
    %c1_42 = arith.constant 1 : index
    %c2_43 = arith.constant 2 : index
    %c0_44 = arith.constant 0 : index
    %34 = vector.load %arg6[%c0_41, %c1_42, %c2_43, %c0_44] : memref<2x18x18x128xbf16, #tpu.memory_space<vmem>>, vector<2x16x16x128xbf16>
    %35 = vector.shape_cast %34 : vector<2x16x16x128xbf16> to vector<512x128xbf16>
    %c0_45 = arith.constant 0 : index
    %c5 = arith.constant 5 : index
    %c0_46 = arith.constant 0 : index
    %c0_47 = arith.constant 0 : index
    %36 = vector.load %arg2[%c0_45, %c5, %c0_46, %c0_47] : memref<1x9x128x128xbf16, #tpu.memory_space<vmem>>, vector<1x1x128x128xbf16>
    %37 = vector.shape_cast %36 : vector<1x1x128x128xbf16> to vector<128x128xbf16>
    %cst_48 = arith.constant dense<0.000000e+00> : vector<512x128xf32>
    %38 = tpu.matmul %35, %37, %cst_48 {dimension_numbers = #tpu.dot_dimension_numbers<[1], [0], [0], [1], [0, 0, 1, 1], [], []>} : vector<512x128xbf16>, vector<128x128xbf16>, vector<512x128xf32> -> vector<512x128xf32>
    %39 = arith.addf %33, %38 : vector<512x128xf32>
    %c0_49 = arith.constant 0 : index
    %c2_50 = arith.constant 2 : index
    %c0_51 = arith.constant 0 : index
    %c0_52 = arith.constant 0 : index
    %40 = vector.load %arg6[%c0_49, %c2_50, %c0_51, %c0_52] : memref<2x18x18x128xbf16, #tpu.memory_space<vmem>>, vector<2x16x16x128xbf16>
    %41 = vector.shape_cast %40 : vector<2x16x16x128xbf16> to vector<512x128xbf16>
    %c0_53 = arith.constant 0 : index
    %c6 = arith.constant 6 : index
    %c0_54 = arith.constant 0 : index
    %c0_55 = arith.constant 0 : index
    %42 = vector.load %arg2[%c0_53, %c6, %c0_54, %c0_55] : memref<1x9x128x128xbf16, #tpu.memory_space<vmem>>, vector<1x1x128x128xbf16>
    %43 = vector.shape_cast %42 : vector<1x1x128x128xbf16> to vector<128x128xbf16>
    %cst_56 = arith.constant dense<0.000000e+00> : vector<512x128xf32>
    %44 = tpu.matmul %41, %43, %cst_56 {dimension_numbers = #tpu.dot_dimension_numbers<[1], [0], [0], [1], [0, 0, 1, 1], [], []>} : vector<512x128xbf16>, vector<128x128xbf16>, vector<512x128xf32> -> vector<512x128xf32>
    %45 = arith.addf %39, %44 : vector<512x128xf32>
    %c0_57 = arith.constant 0 : index
    %c2_58 = arith.constant 2 : index
    %c1_59 = arith.constant 1 : index
    %c0_60 = arith.constant 0 : index
    %46 = vector.load %arg6[%c0_57, %c2_58, %c1_59, %c0_60] : memref<2x18x18x128xbf16, #tpu.memory_space<vmem>>, vector<2x16x16x128xbf16>
    %47 = vector.shape_cast %46 : vector<2x16x16x128xbf16> to vector<512x128xbf16>
    %c0_61 = arith.constant 0 : index
    %c7 = arith.constant 7 : index
    %c0_62 = arith.constant 0 : index
    %c0_63 = arith.constant 0 : index
    %48 = vector.load %arg2[%c0_61, %c7, %c0_62, %c0_63] : memref<1x9x128x128xbf16, #tpu.memory_space<vmem>>, vector<1x1x128x128xbf16>
    %49 = vector.shape_cast %48 : vector<1x1x128x128xbf16> to vector<128x128xbf16>
    %cst_64 = arith.constant dense<0.000000e+00> : vector<512x128xf32>
    %50 = tpu.matmul %47, %49, %cst_64 {dimension_numbers = #tpu.dot_dimension_numbers<[1], [0], [0], [1], [0, 0, 1, 1], [], []>} : vector<512x128xbf16>, vector<128x128xbf16>, vector<512x128xf32> -> vector<512x128xf32>
    %51 = arith.addf %45, %50 : vector<512x128xf32>
    %c0_65 = arith.constant 0 : index
    %c2_66 = arith.constant 2 : index
    %c2_67 = arith.constant 2 : index
    %c0_68 = arith.constant 0 : index
    %52 = vector.load %arg6[%c0_65, %c2_66, %c2_67, %c0_68] : memref<2x18x18x128xbf16, #tpu.memory_space<vmem>>, vector<2x16x16x128xbf16>
    %53 = vector.shape_cast %52 : vector<2x16x16x128xbf16> to vector<512x128xbf16>
    %c0_69 = arith.constant 0 : index
    %c8 = arith.constant 8 : index
    %c0_70 = arith.constant 0 : index
    %c0_71 = arith.constant 0 : index
    %54 = vector.load %arg2[%c0_69, %c8, %c0_70, %c0_71] : memref<1x9x128x128xbf16, #tpu.memory_space<vmem>>, vector<1x1x128x128xbf16>
    %55 = vector.shape_cast %54 : vector<1x1x128x128xbf16> to vector<128x128xbf16>
    %cst_72 = arith.constant dense<0.000000e+00> : vector<512x128xf32>
    %56 = tpu.matmul %53, %55, %cst_72 {dimension_numbers = #tpu.dot_dimension_numbers<[1], [0], [0], [1], [0, 0, 1, 1], [], []>} : vector<512x128xbf16>, vector<128x128xbf16>, vector<512x128xf32> -> vector<512x128xf32>
    %57 = arith.addf %51, %56 : vector<512x128xf32>
    %cst_73 = arith.constant dense<0.000000e+00> : vector<128xf32>
    %58 = vector.multi_reduction <add>, %57, %cst_73 [0] : vector<512x128xf32> to vector<128xf32>
    %59 = vector.shape_cast %58 : vector<128xf32> to vector<1x128xf32>
    %cst_74 = arith.constant 0.001953125 : f32
    %60 = vector.broadcast %cst_74 : f32 to vector<1x128xf32>
    %61 = arith.mulf %59, %60 : vector<1x128xf32>
    %62 = vector.broadcast %61 : vector<1x128xf32> to vector<512x128xf32>
    %63 = arith.subf %57, %62 : vector<512x128xf32>
    %64 = arith.mulf %63, %63 : vector<512x128xf32>
    %cst_75 = arith.constant dense<0.000000e+00> : vector<128xf32>
    %65 = vector.multi_reduction <add>, %64, %cst_75 [0] : vector<512x128xf32> to vector<128xf32>
    %66 = vector.shape_cast %65 : vector<128xf32> to vector<1x128xf32>
    %cst_76 = arith.constant 0.001953125 : f32
    %67 = vector.broadcast %cst_76 : f32 to vector<1x128xf32>
    %68 = arith.mulf %66, %67 : vector<1x128xf32>
    %c0_77 = arith.constant 0 : index
    %c0_78 = arith.constant 0 : index
    %c0_79 = arith.constant 0 : index
    %69 = vector.load %arg3[%c0_77, %c0_78, %c0_79] : memref<1x1x128xf32, #tpu.memory_space<vmem>>, vector<1x1x128xf32>
    %70 = vector.shape_cast %69 : vector<1x1x128xf32> to vector<1x128xf32>
    %cst_80 = arith.constant 9.99999974E-6 : f32
    %71 = vector.broadcast %cst_80 : f32 to vector<1x128xf32>
    %72 = arith.addf %68, %71 : vector<1x128xf32>
    %73 = math.rsqrt %72 : vector<1x128xf32>
    %74 = arith.mulf %70, %73 : vector<1x128xf32>
    %75 = vector.broadcast %74 : vector<1x128xf32> to vector<512x128xf32>
    %76 = arith.mulf %63, %75 : vector<512x128xf32>
    %c0_81 = arith.constant 0 : index
    %c0_82 = arith.constant 0 : index
    %c0_83 = arith.constant 0 : index
    %77 = vector.load %arg4[%c0_81, %c0_82, %c0_83] : memref<1x1x128xf32, #tpu.memory_space<vmem>>, vector<1x1x128xf32>
    %78 = vector.shape_cast %77 : vector<1x1x128xf32> to vector<1x128xf32>
    %79 = vector.broadcast %78 : vector<1x128xf32> to vector<512x128xf32>
    %80 = arith.addf %76, %79 : vector<512x128xf32>
    %cst_84 = arith.constant 0.000000e+00 : f32
    %81 = vector.broadcast %cst_84 : f32 to vector<512x128xf32>
    %82 = arith.maximumf %80, %81 : vector<512x128xf32>
    %c1_i32 = arith.constant 1 : i32
    %83 = arith.cmpi slt, %arg0, %c1_i32 : i32
    %84 = arith.extui %83 : i1 to i32
    %c0_i32_85 = arith.constant 0 : i32
    %85 = arith.cmpi ne, %84, %c0_i32_85 : i32
    scf.if %85 {
      %89 = vector.shape_cast %82 : vector<512x128xf32> to vector<2x16x16x128xf32>
      %90 = arith.truncf %89 : vector<2x16x16x128xf32> to vector<2x16x16x128xbf16>
      %c0_88 = arith.constant 0 : index
      %c1_89 = arith.constant 1 : index
      %c1_90 = arith.constant 1 : index
      %c0_91 = arith.constant 0 : index
      %91 = vector.load %arg6[%c0_88, %c1_89, %c1_90, %c0_91] : memref<2x18x18x128xbf16, #tpu.memory_space<vmem>>, vector<2x16x16x128xbf16>
      tpu.vector_store %arg6[%c0_88, %c1_89, %c1_90, %c0_91], %90 {strides = array<i32>} : memref<2x18x18x128xbf16, #tpu.memory_space<vmem>>, vector<2x16x16x128xbf16>,
    } else {
    }
    %c1_i32_86 = arith.constant 1 : i32
    %86 = arith.cmpi eq, %arg0, %c1_i32_86 : i32
    %87 = arith.extui %86 : i1 to i32
    %c0_i32_87 = arith.constant 0 : i32
    %88 = arith.cmpi ne, %87, %c0_i32_87 : i32
    scf.if %88 {
      %89 = vector.shape_cast %82 : vector<512x128xf32> to vector<2x16x16x128xf32>
      %90 = arith.truncf %89 : vector<2x16x16x128xf32> to vector<2x16x16x128xbf16>
      %c0_88 = arith.constant 0 : index
      %c0_89 = arith.constant 0 : index
      %c0_90 = arith.constant 0 : index
      %c0_91 = arith.constant 0 : index
      %91 = vector.load %arg5[%c0_88, %c0_89, %c0_90, %c0_91] : memref<2x16x16x128xbf16, #tpu.memory_space<vmem>>, vector<2x16x16x128xbf16>
      tpu.vector_store %arg5[%c0_88, %c0_89, %c0_90, %c0_91], %90 {strides = array<i32>} : memref<2x16x16x128xbf16, #tpu.memory_space<vmem>>, vector<2x16x16x128xbf16>,
    } else {
    }
    return
  }
  func.func @transform_0(%arg0: i32) -> (i32, i32, i32, i32) {
    %c0_i32 = arith.constant 0 : i32
    %c0_i32_0 = arith.constant 0 : i32
    %c0_i32_1 = arith.constant 0 : i32
    %c0_i32_2 = arith.constant 0 : i32
    %c0_i32_3 = arith.constant 0 : i32
    return %c0_i32, %c0_i32_0, %c0_i32_1, %c0_i32_2 : i32, i32, i32, i32
  }
  func.func @transform_1(%arg0: i32) -> (i32, i32, i32, i32) {
    %c0_i32 = arith.constant 0 : i32
    %c0_i32_0 = arith.constant 0 : i32
    %c0_i32_1 = arith.constant 0 : i32
    %c0_i32_2 = arith.constant 0 : i32
    return %arg0, %c0_i32, %c0_i32_0, %c0_i32_1 : i32, i32, i32, i32
  }
  func.func @transform_2(%arg0: i32) -> (i32, i32, i32) {
    %c0_i32 = arith.constant 0 : i32
    %c0_i32_0 = arith.constant 0 : i32
    %c0_i32_1 = arith.constant 0 : i32
    return %arg0, %c0_i32, %c0_i32_0 : i32, i32, i32
  }
  func.func @transform_3(%arg0: i32) -> (i32, i32, i32) {
    %c0_i32 = arith.constant 0 : i32
    %c0_i32_0 = arith.constant 0 : i32
    %c0_i32_1 = arith.constant 0 : i32
    return %arg0, %c0_i32, %c0_i32_0 : i32, i32, i32
  }
  func.func @transform_4(%arg0: i32) -> (i32, i32, i32, i32) {
    %c0_i32 = arith.constant 0 : i32
    %c0_i32_0 = arith.constant 0 : i32
    %c0_i32_1 = arith.constant 0 : i32
    %c0_i32_2 = arith.constant 0 : i32
    %c0_i32_3 = arith.constant 0 : i32
    return %c0_i32, %c0_i32_0, %c0_i32_1, %c0_i32_2 : i32, i32, i32, i32
  }
}

</mosaic_0001>

<bundles_post_ra>
// kernel: vgg_decoder_block_forward.1
= control target key start
LH: loop header
LB: loop body
LE: loop exit
PB: predicated region body
PF: predicated region fallthrough
CT: control target
= control target key end

     0   :  { %s15129_s15 = smov 0   ;;  %s19358_s0 = inlined_call_operand.vmem [shape: bf16[2,16,16,128], index: 0, kind: input, shape index: {}]   ;;  %s19359_s1 = inlined_call_operand.vmem [shape: bf16[2,9,128,128], index: 1, kind: input, shape index: {}]   ;;  %s19360_s2 = inlined_call_operand.vmem [shape: f32[2,1,128], index: 2, kind: input, shape index: {}]   ;;  %s19361_s3 = inlined_call_operand.vmem [shape: f32[2,1,128], index: 3, kind: input, shape index: {}]   ;;  %s19362_s4 = inlined_call_operand.vmem [shape: bf16[2,16,16,128], index: 4, kind: output, shape index: {}]  }
   0x1 LB: > { %s15135_s16 = sadd.s32 4294967295, %s15101_s15   ;;  %p12030_p0 = scmp.ge.s32.totalorder %s15101_s15, 1  ;;  %s15101_s15 = sphi %s15129_s15, %s14_s15  }
   0x2   : > { %p173_p1 = scmp.lt.s32.totalorder %s15101_s15, 3 }
   0x4   : > { %p174_p2 = pnand %p12030_p0, %p173_p1 }
   0x6   : > { %177 = sbr.rel (%p174_p2) target bundleno = 1498 (0x5da), region = 36 }
   0xd   : > { %p200_p3 = scmp.lt.s32.totalorder %s15135_s16, 1  ;;  %p12032_p4 = scmp.ne.s32.totalorder %s15135_s16, 0 }
   0xe   : > { %vm229_vm0 = vcmask (!%p12032_p4), 1040384   ;;  %vm230_vm1 = vsmask.f32 (!%p12032_p4), 256  ;;  %v235_v0 = vld [vmem:[#allocation2 + $0xc] sm:$0x1] (!%p12032_p4)  ;;  %v15103_v1 = vmov (!%p12032_p4), 0  }
   0xf   : > { %s15141_s17 = scalar_select %p200_p3, %s15135_s16, 1 }
  0x10   : > { %215 = sbr.rel (%p12032_p4) target bundleno = 208 (0xd0), region = 40  ;;  %216 = vst [vmem:[#allocation2] sm:$0xf] (!%p12032_p4), %v15103_v1  ;;  %217 = vst [vmem:[#allocation2 + $0x4] sm:$0xf] (!%p12032_p4), %v15103_v1  ;;  %vm1157_vm5 = vcmask (!%p12032_p4), 1043456  }
  0x11   : > { %s14677_s18 = smul.u32 576, %s15141_s17  ;;  %s207_s21 = scalar_lea.vmem %s19360_s2, %s15141_s17  ;;  %218 = vst [vmem:[#allocation2 + $0x8] sm:$0x1] (!%p12032_p4), %v15103_v1  ;;  %219 = vst [vmem:[#allocation2 + $0xd8] sm:$0xf] (!%p12032_p4), %v15103_v1 }
  0x12   : > { %s210_s24 = scalar_lea.vmem %s19361_s3, %s15141_s17  ;;  %220 = vst [vmem:[#allocation2 + $0xdc] sm:$0xf] (!%p12032_p4), %v15103_v1  ;;  %221 = vst [vmem:[#allocation2 + $0xe0] sm:$0x1] (!%p12032_p4), %v15103_v1  ;;  %v238_v3 = vld [vmem:[#allocation2 + $0x18] sm:$0x1] (!%p12032_p4) }
  0x13   : > { %s15155_s27 = scalar_lea.vmem %s19359_s1, %s14677_s18  ;;  %223 = vst [vmem:[#allocation2 + $0xcc] sm:$0xf] (!%p12032_p4), %v15103_v1  ;;  %224 = vst [vmem:[#allocation2 + $0xd0] sm:$0xf] (!%p12032_p4), %v15103_v1  ;;  %v241_v4 = vld [vmem:[#allocation2 + $0x24] sm:$0x1] (!%p12032_p4) }
  0x14   : > { %225 = vst [vmem:[#allocation2 + $0xd4] sm:$0x1] (!%p12032_p4), %v15103_v1  ;;  %226 = vst [vmem:[#allocation2 + $0x1a4] sm:$0xf] (!%p12032_p4), %v15103_v1  ;;  %v244_v8 = vld [vmem:[#allocation2 + $0x30] sm:$0x1] (!%p12032_p4) }
  0x15   : > { %227 = vst [vmem:[#allocation2 + $0x1a8] sm:$0xf] (!%p12032_p4), %v15103_v1  ;;  %228 = vst [vmem:[#allocation2 + $0x1ac] sm:$0x1] (!%p12032_p4), %v15103_v1  ;;  %v247_v10 = vld [vmem:[#allocation2 + $0x3c] sm:$0x1] (!%p12032_p4) }
  0x16   : > { %vm15160_vm2 = vmand (!%p12032_p4), %vm229_vm0, %vm230_vm1  ;;  %v250_v11 = vld [vmem:[#allocation2 + $0x48] sm:$0x1] (!%p12032_p4)  ;;  %v253_v14 = vld [vmem:[#allocation2 + $0x54] sm:$0x1] (!%p12032_p4)  ;;  %vm340_vm3 = vsmask.f32 (!%p12032_p4), 7938 }
  0x17   : > { %v236_v5 = vsel %vm15160_vm2, 0, %v235_v0  ;;  %v239_v6 = vsel %vm15160_vm2, 0, %v238_v3  ;;  %v242_v7 = vsel %vm15160_vm2, 0, %v241_v4  ;;  %v245_v9 = vsel %vm15160_vm2, 0, %v244_v8  ;;  %v256_v15 = vld [vmem:[#allocation2 + $0x60] sm:$0x1]  ;;  %vm15222_vm4 = vmand %vm229_vm0, %vm340_vm3 }
  0x18   : > { %237 = vst [vmem:[#allocation2 + $0xc] sm:$0x1] %v236_v5  ;;  %240 = vst [vmem:[#allocation2 + $0x18] sm:$0x1] %v239_v6  ;;  %v248_v12 = vsel %vm15160_vm2, 0, %v247_v10  ;;  %v251_v13 = vsel %vm15160_vm2, 0, %v250_v11 }
  0x19   : > { %243 = vst [vmem:[#allocation2 + $0x24] sm:$0x1] %v242_v7  ;;  %246 = vst [vmem:[#allocation2 + $0x30] sm:$0x1] %v245_v9  ;;  %v254_v16 = vsel %vm15160_vm2, 0, %v253_v14  ;;  %v257_v17 = vsel %vm15160_vm2, 0, %v256_v15 }
  0x1a   : > { %249 = vst [vmem:[#allocation2 + $0x3c] sm:$0x1] %v248_v12  ;;  %252 = vst [vmem:[#allocation2 + $0x48] sm:$0x1] %v251_v13  ;;  %v259_v18 = vld [vmem:[#allocation2 + $0x6c] sm:$0x1] }
  0x1b   : > { %v262_v19 = vld [vmem:[#allocation2 + $0x78] sm:$0x1]  ;;  %255 = vst [vmem:[#allocation2 + $0x54] sm:$0x1] %v254_v16  ;;  %258 = vst [vmem:[#allocation2 + $0x60] sm:$0x1] %v257_v17 }
  0x1c   : > { %v260_v20 = vsel %vm15160_vm2, 0, %v259_v18  ;;  %v263_v21 = vsel %vm15160_vm2, 0, %v262_v19  ;;  %v265_v22 = vld [vmem:[#allocation2 + $0x84] sm:$0x1]  ;;  %v268_v23 = vld [vmem:[#allocation2 + $0x90] sm:$0x1]  ;;  %vm15324_vm7 = vmand %vm1157_vm5, %vm340_vm3 }
  0x1d   : > { %261 = vst [vmem:[#allocation2 + $0x6c] sm:$0x1] %v260_v20  ;;  %264 = vst [vmem:[#allocation2 + $0x78] sm:$0x1] %v263_v21  ;;  %v266_v24 = vsel %vm15160_vm2, 0, %v265_v22  ;;  %v269_v25 = vsel %vm15160_vm2, 0, %v268_v23 }
  0x1e   : > { %v271_v26 = vld [vmem:[#allocation2 + $0x9c] sm:$0x1]  ;;  %v274_v27 = vld [vmem:[#allocation2 + $0xa8] sm:$0x1]  ;;  %267 = vst [vmem:[#allocation2 + $0x84] sm:$0x1] %v266_v24 }
  0x1f   : > { %270 = vst [vmem:[#allocation2 + $0x90] sm:$0x1] %v269_v25  ;;  %v272_v28 = vsel %vm15160_vm2, 0, %v271_v26  ;;  %v275_v29 = vsel %vm15160_vm2, 0, %v274_v27  ;;  %v277_v30 = vld [vmem:[#allocation2 + $0xb4] sm:$0x1] }
  0x20   : > { %v280_v31 = vld [vmem:[#allocation2 + $0xc0] sm:$0x1]  ;;  %273 = vst [vmem:[#allocation2 + $0x9c] sm:$0x1] %v272_v28  ;;  %276 = vst [vmem:[#allocation2 + $0xa8] sm:$0x1] %v275_v29 }
  0x21   : > { %v278_v32 = vsel %vm15160_vm2, 0, %v277_v30  ;;  %v281_v33 = vsel %vm15160_vm2, 0, %v280_v31  ;;  %v289_v34 = vld [vmem:[#allocation2 + $0xe4] sm:$0x1]  ;;  %v292_v35 = vld [vmem:[#allocation2 + $0xf0] sm:$0x1] }
  0x22   : > { %279 = vst [vmem:[#allocation2 + $0xb4] sm:$0x1] %v278_v32  ;;  %282 = vst [vmem:[#allocation2 + $0xc0] sm:$0x1] %v281_v33  ;;  %v290_v36 = vsel %vm15160_vm2, 0, %v289_v34  ;;  %v293_v37 = vsel %vm15160_vm2, 0, %v292_v35 }
  0x23   : > { %v295_v38 = vld [vmem:[#allocation2 + $0xfc] sm:$0x1]  ;;  %v298_v39 = vld [vmem:[#allocation2 + $0x108] sm:$0x1]  ;;  %291 = vst [vmem:[#allocation2 + $0xe4] sm:$0x1] %v290_v36 }
  0x24   : > { %294 = vst [vmem:[#allocation2 + $0xf0] sm:$0x1] %v293_v37  ;;  %v296_v40 = vsel %vm15160_vm2, 0, %v295_v38  ;;  %v299_v41 = vsel %vm15160_vm2, 0, %v298_v39  ;;  %v301_v42 = vld [vmem:[#allocation2 + $0x114] sm:$0x1] }
  0x25   : > { %v304_v43 = vld [vmem:[#allocation2 + $0x120] sm:$0x1]  ;;  %297 = vst [vmem:[#allocation2 + $0xfc] sm:$0x1] %v296_v40  ;;  %300 = vst [vmem:[#allocation2 + $0x108] sm:$0x1] %v299_v41 }
  0x26   : > { %v302_v44 = vsel %vm15160_vm2, 0, %v301_v42  ;;  %v305_v45 = vsel %vm15160_vm2, 0, %v304_v43  ;;  %v307_v46 = vld [vmem:[#allocation2 + $0x12c] sm:$0x1]  ;;  %v310_v47 = vld [vmem:[#allocation2 + $0x138] sm:$0x1] }
  0x27   : > { %303 = vst [vmem:[#allocation2 + $0x114] sm:$0x1] %v302_v44  ;;  %306 = vst [vmem:[#allocation2 + $0x120] sm:$0x1] %v305_v45  ;;  %v308_v48 = vsel %vm15160_vm2, 0, %v307_v46  ;;  %v311_v49 = vsel %vm15160_vm2, 0, %v310_v47 }
  0x28   : > { %v313_v50 = vld [vmem:[#allocation2 + $0x144] sm:$0x1]  ;;  %v316_v51 = vld [vmem:[#allocation2 + $0x150] sm:$0x1]  ;;  %309 = vst [vmem:[#allocation2 + $0x12c] sm:$0x1] %v308_v48 }
  0x29   : > { %312 = vst [vmem:[#allocation2 + $0x138] sm:$0x1] %v311_v49  ;;  %v314_v52 = vsel %vm15160_vm2, 0, %v313_v50  ;;  %v317_v53 = vsel %vm15160_vm2, 0, %v316_v51  ;;  %v319_v54 = vld [vmem:[#allocation2 + $0x15c] sm:$0x1] }
  0x2a   : > { %v322_v55 = vld [vmem:[#allocation2 + $0x168] sm:$0x1]  ;;  %315 = vst [vmem:[#allocation2 + $0x144] sm:$0x1] %v314_v52  ;;  %318 = vst [vmem:[#allocation2 + $0x150] sm:$0x1] %v317_v53 }
  0x2b   : > { %v320_v56 = vsel %vm15160_vm2, 0, %v319_v54  ;;  %v323_v57 = vsel %vm15160_vm2, 0, %v322_v55  ;;  %v325_v58 = vld [vmem:[#allocation2 + $0x174] sm:$0x1]  ;;  %v328_v59 = vld [vmem:[#allocation2 + $0x180] sm:$0x1] }
  0x2c   : > { %321 = vst [vmem:[#allocation2 + $0x15c] sm:$0x1] %v320_v56  ;;  %324 = vst [vmem:[#allocation2 + $0x168] sm:$0x1] %v323_v57  ;;  %v326_v61 = vsel %vm15160_vm2, 0, %v325_v58  ;;  %v329_v62 = vsel %vm15160_vm2, 0, %v328_v59 }
  0x2d   : > { %v331_v63 = vld [vmem:[#allocation2 + $0x18c] sm:$0x1]  ;;  %v334_v0 = vld [vmem:[#allocation2 + $0x198] sm:$0x1]  ;;  %327 = vst [vmem:[#allocation2 + $0x174] sm:$0x1] %v326_v61 }
  0x2e   : > { %330 = vst [vmem:[#allocation2 + $0x180] sm:$0x1] %v329_v62  ;;  %v332_v1 = vsel %vm15160_vm2, 0, %v331_v63  ;;  %v335_v3 = vsel %vm15160_vm2, 0, %v334_v0  ;;  %v345_v4 = vld [vmem:[#allocation2 + $0x14] sm:$0x1] }
  0x2f   : > { %v348_v5 = vld [vmem:[#allocation2 + $0x20] sm:$0x1]  ;;  %333 = vst [vmem:[#allocation2 + $0x18c] sm:$0x1] %v332_v1  ;;  %336 = vst [vmem:[#allocation2 + $0x198] sm:$0x1] %v335_v3 }
  0x30   : > { %v346_v6 = vsel %vm15222_vm4, 0, %v345_v4  ;;  %v349_v7 = vsel %vm15222_vm4, 0, %v348_v5  ;;  %v351_v8 = vld [vmem:[#allocation2 + $0x2c] sm:$0x1]  ;;  %v354_v9 = vld [vmem:[#allocation2 + $0x38] sm:$0x1] }
  0x31   : > { %347 = vst [vmem:[#allocation2 + $0x14] sm:$0x1] %v346_v6  ;;  %350 = vst [vmem:[#allocation2 + $0x20] sm:$0x1] %v349_v7  ;;  %v352_v10 = vsel %vm15222_vm4, 0, %v351_v8  ;;  %v355_v11 = vsel %vm15222_vm4, 0, %v354_v9 }
  0x32   : > { %v357_v12 = vld [vmem:[#allocation2 + $0x44] sm:$0x1]  ;;  %v360_v13 = vld [vmem:[#allocation2 + $0x50] sm:$0x1]  ;;  %353 = vst [vmem:[#allocation2 + $0x2c] sm:$0x1] %v352_v10 }
  0x33   : > { %356 = vst [vmem:[#allocation2 + $0x38] sm:$0x1] %v355_v11  ;;  %v358_v14 = vsel %vm15222_vm4, 0, %v357_v12  ;;  %v361_v15 = vsel %vm15222_vm4, 0, %v360_v13  ;;  %v363_v16 = vld [vmem:[#allocation2 + $0x5c] sm:$0x1] }
  0x34   : > { %v366_v17 = vld [vmem:[#allocation2 + $0x68] sm:$0x1]  ;;  %359 = vst [vmem:[#allocation2 + $0x44] sm:$0x1] %v358_v14  ;;  %362 = vst [vmem:[#allocation2 + $0x50] sm:$0x1] %v361_v15 }
  0x35   : > { %v364_v18 = vsel %vm15222_vm4, 0, %v363_v16  ;;  %v367_v19 = vsel %vm15222_vm4, 0, %v366_v17  ;;  %v369_v20 = vld [vmem:[#allocation2 + $0x74] sm:$0x1]  ;;  %v372_v21 = vld [vmem:[#allocation2 + $0x80] sm:$0x1] }
  0x36   : > { %365 = vst [vmem:[#allocation2 + $0x5c] sm:$0x1] %v364_v18  ;;  %368 = vst [vmem:[#allocation2 + $0x68] sm:$0x1] %v367_v19  ;;  %v370_v22 = vsel %vm15222_vm4, 0, %v369_v20  ;;  %v373_v23 = vsel %vm15222_vm4, 0, %v372_v21 }
  0x37   : > { %v375_v24 = vld [vmem:[#allocation2 + $0x8c] sm:$0x1]  ;;  %v378_v25 = vld [vmem:[#allocation2 + $0x98] sm:$0x1]  ;;  %371 = vst [vmem:[#allocation2 + $0x74] sm:$0x1] %v370_v22 }
  0x38   : > { %374 = vst [vmem:[#allocation2 + $0x80] sm:$0x1] %v373_v23  ;;  %v376_v26 = vsel %vm15222_vm4, 0, %v375_v24  ;;  %v379_v27 = vsel %vm15222_vm4, 0, %v378_v25  ;;  %v381_v28 = vld [vmem:[#allocation2 + $0xa4] sm:$0x1] }
  0x39   : > { %v384_v29 = vld [vmem:[#allocation2 + $0xb0] sm:$0x1]  ;;  %377 = vst [vmem:[#allocation2 + $0x8c] sm:$0x1] %v376_v26  ;;  %380 = vst [vmem:[#allocation2 + $0x98] sm:$0x1] %v379_v27 }
  0x3a   : > { %v382_v30 = vsel %vm15222_vm4, 0, %v381_v28  ;;  %v385_v31 = vsel %vm15222_vm4, 0, %v384_v29  ;;  %v387_v32 = vld [vmem:[#allocation2 + $0xbc] sm:$0x1]  ;;  %v390_v33 = vld [vmem:[#allocation2 + $0xc8] sm:$0x1] }
  0x3b   : > { %383 = vst [vmem:[#allocation2 + $0xa4] sm:$0x1] %v382_v30  ;;  %386 = vst [vmem:[#allocation2 + $0xb0] sm:$0x1] %v385_v31  ;;  %v388_v34 = vsel %vm15222_vm4, 0, %v387_v32  ;;  %v391_v35 = vsel %vm15222_vm4, 0, %v390_v33 }
  0x3c   : > { %v399_v36 = vld [vmem:[#allocation2 + $0xec] sm:$0x1]  ;;  %v402_v37 = vld [vmem:[#allocation2 + $0xf8] sm:$0x1]  ;;  %389 = vst [vmem:[#allocation2 + $0xbc] sm:$0x1] %v388_v34 }
  0x3d   : > { %392 = vst [vmem:[#allocation2 + $0xc8] sm:$0x1] %v391_v35  ;;  %v400_v38 = vsel %vm15222_vm4, 0, %v399_v36  ;;  %v403_v39 = vsel %vm15222_vm4, 0, %v402_v37  ;;  %v405_v40 = vld [vmem:[#allocation2 + $0x104] sm:$0x1] }
  0x3e   : > { %v408_v41 = vld [vmem:[#allocation2 + $0x110] sm:$0x1]  ;;  %401 = vst [vmem:[#allocation2 + $0xec] sm:$0x1] %v400_v38  ;;  %404 = vst [vmem:[#allocation2 + $0xf8] sm:$0x1] %v403_v39 }
  0x3f   : > { %v406_v42 = vsel %vm15222_vm4, 0, %v405_v40  ;;  %v409_v43 = vsel %vm15222_vm4, 0, %v408_v41  ;;  %v411_v44 = vld [vmem:[#allocation2 + $0x11c] sm:$0x1]  ;;  %v414_v45 = vld [vmem:[#allocation2 + $0x128] sm:$0x1] }
  0x40   : > { %407 = vst [vmem:[#allocation2 + $0x104] sm:$0x1] %v406_v42  ;;  %410 = vst [vmem:[#allocation2 + $0x110] sm:$0x1] %v409_v43  ;;  %v412_v46 = vsel %vm15222_vm4, 0, %v411_v44  ;;  %v415_v47 = vsel %vm15222_vm4, 0, %v414_v45 }
  0x41   : > { %v417_v48 = vld [vmem:[#allocation2 + $0x134] sm:$0x1]  ;;  %v420_v49 = vld [vmem:[#allocation2 + $0x140] sm:$0x1]  ;;  %413 = vst [vmem:[#allocation2 + $0x11c] sm:$0x1] %v412_v46 }
  0x42   : > { %416 = vst [vmem:[#allocation2 + $0x128] sm:$0x1] %v415_v47  ;;  %v418_v50 = vsel %vm15222_vm4, 0, %v417_v48  ;;  %v421_v51 = vsel %vm15222_vm4, 0, %v420_v49  ;;  %v423_v52 = vld [vmem:[#allocation2 + $0x14c] sm:$0x1] }
  0x43   : > { %v426_v53 = vld [vmem:[#allocation2 + $0x158] sm:$0x1]  ;;  %419 = vst [vmem:[#allocation2 + $0x134] sm:$0x1] %v418_v50  ;;  %422 = vst [vmem:[#allocation2 + $0x140] sm:$0x1] %v421_v51 }
  0x44   : > { %v424_v54 = vsel %vm15222_vm4, 0, %v423_v52  ;;  %v427_v55 = vsel %vm15222_vm4, 0, %v426_v53  ;;  %v429_v56 = vld [vmem:[#allocation2 + $0x164] sm:$0x1]  ;;  %v432_v57 = vld [vmem:[#allocation2 + $0x170] sm:$0x1] }
  0x45   : > { %425 = vst [vmem:[#allocation2 + $0x14c] sm:$0x1] %v424_v54  ;;  %428 = vst [vmem:[#allocation2 + $0x158] sm:$0x1] %v427_v55  ;;  %v430_v58 = vsel %vm15222_vm4, 0, %v429_v56  ;;  %v433_v59 = vsel %vm15222_vm4, 0, %v432_v57 }
  0x46   : > { %v435_v61 = vld [vmem:[#allocation2 + $0x17c] sm:$0x1]  ;;  %v438_v62 = vld [vmem:[#allocation2 + $0x188] sm:$0x1]  ;;  %431 = vst [vmem:[#allocation2 + $0x164] sm:$0x1] %v430_v58 }
  0x47   : > { %434 = vst [vmem:[#allocation2 + $0x170] sm:$0x1] %v433_v59  ;;  %v436_v63 = vsel %vm15222_vm4, 0, %v435_v61  ;;  %v439_v0 = vsel %vm15222_vm4, 0, %v438_v62  ;;  %v441_v1 = vld [vmem:[#allocation2 + $0x194] sm:$0x1] }
  0x48   : > { %v444_v3 = vld [vmem:[#allocation2 + $0x1a0] sm:$0x1]  ;;  %437 = vst [vmem:[#allocation2 + $0x17c] sm:$0x1] %v436_v63  ;;  %440 = vst [vmem:[#allocation2 + $0x188] sm:$0x1] %v439_v0 }
  0x49   : > { %v442_v4 = vsel %vm15222_vm4, 0, %v441_v1  ;;  %v445_v5 = vsel %vm15222_vm4, 0, %v444_v3  ;;  %v232_v6 = vld [vmem:[#allocation2] sm:$0x1]  ;;  %v283_v7 = vld [vmem:[#allocation2 + $0xcc] sm:$0x1] }
  0x4a   : > { %443 = vst [vmem:[#allocation2 + $0x194] sm:$0x1] %v442_v4  ;;  %446 = vst [vmem:[#allocation2 + $0x1a0] sm:$0x1] %v445_v5  ;;  %v233_v8 = vsel %vm15160_vm2, 0, %v232_v6  ;;  %v284_v9 = vsel %vm15160_vm2, 0, %v283_v7 }
  0x4b   : > { %v286_v10 = vld [vmem:[#allocation2 + $0xd8] sm:$0x1]  ;;  %v337_v11 = vld [vmem:[#allocation2 + $0x1a4] sm:$0x1]  ;;  %234 = vst [vmem:[#allocation2] sm:$0x1] %v233_v8 }
  0x4c   : > { %285 = vst [vmem:[#allocation2 + $0xcc] sm:$0x1] %v284_v9  ;;  %v287_v12 = vsel %vm15160_vm2, 0, %v286_v10  ;;  %v338_v13 = vsel %vm15160_vm2, 0, %v337_v11  ;;  %v342_v14 = vld [vmem:[#allocation2 + $0x8] sm:$0x1] }
  0x4d   : > { %v393_v15 = vld [vmem:[#allocation2 + $0xd4] sm:$0x1]  ;;  %288 = vst [vmem:[#allocation2 + $0xd8] sm:$0x1] %v287_v12  ;;  %339 = vst [vmem:[#allocation2 + $0x1a4] sm:$0x1] %v338_v13 }
  0x4e   : > { %v343_v16 = vsel %vm15222_vm4, 0, %v342_v14  ;;  %v394_v17 = vsel %vm15222_vm4, 0, %v393_v15  ;;  %v396_v18 = vld [vmem:[#allocation2 + $0xe0] sm:$0x1]  ;;  %v447_v19 = vld [vmem:[#allocation2 + $0x1ac] sm:$0x1] }
  0x4f   : > { %344 = vst [vmem:[#allocation2 + $0x8] sm:$0x1] %v343_v16  ;;  %395 = vst [vmem:[#allocation2 + $0xd4] sm:$0x1] %v394_v17  ;;  %v397_v20 = vsel %vm15222_vm4, 0, %v396_v18  ;;  %v448_v21 = vsel %vm15222_vm4, 0, %v447_v19 }
  0x50   : > { %v450_v22 = vld [vmem:[%s19358_s0] sm:$0xf]  ;;  %398 = vst [vmem:[#allocation2 + $0xe0] sm:$0x1] %v397_v20  ;;  %449 = vst [vmem:[#allocation2 + $0x1ac] sm:$0x1] %v448_v21 }
  0x51   : > { %v517_v23 = vshrl.u32 %v450_v22, 16  ;;  %v520_v24 = vshll.u32 %v450_v22, 16  ;;  %v451_v25 = vld [vmem:[%s19358_s0 + $0x4] sm:$0xf]  ;;  %vm514_vm6 = vsmask.f32 4368 }
  0x52   : > { %v525_v26 = vshrl.u32 %v451_v25, 16  ;;  %v528_v27 = vshll.u32 %v451_v25, 16  ;;  %v452_v60 = vld [vmem:[%s19358_s0 + $0x8] sm:$0xf]  ;;  %v1159_v29 = vld [vmem:[#allocation2 + $0xc] sm:$0xf]  ;;  %vm15332_vm8 = vmor %vm230_vm1, %vm514_vm6 }
  0x53   : > { %v519_v28 = vrot.slane %v517_v23, 7  ;;  %v534_v30 = vshrl.u32 %v452_v60, 16  ;;  %v537_v31 = vshll.u32 %v452_v60, 16  ;;  %v1163_v34 = vld [vmem:[#allocation2 + $0x14] sm:$0x1] }
  0x54   : > { %v527_v33 = vrot.slane %v525_v26, 7  ;;  %v453_v35 = vld [vmem:[%s19358_s0 + $0xc] sm:$0xf]  ;;  %v454_v41 = vld [vmem:[%s19358_s0 + $0x10] sm:$0xf] }
  0x55   : > { %v522_v36 = vor.u32 %v520_v24, %v519_v28  ;;  %v523_v38 = vrot.slane %v519_v28, 4  ;;  %v536_v39 = vrot.slane %v534_v30, 7  ;;  %v542_v40 = vshrl.u32 %v453_v35, 16  ;;  %v1166_v44 = vld [vmem:[#allocation2 + $0x18] sm:$0xf] }
  0x56   : > { %v530_v42 = vor.u32 %v528_v27, %v527_v33  ;;  %v532_v43 = vrot.slane %v527_v33, 4  ;;  %v545_v45 = vshll.u32 %v453_v35, 16  ;;  %v551_v46 = vshrl.u32 %v454_v41, 16  ;;  %v455_v51 = vld [vmem:[%s19358_s0 + $0x14] sm:$0xf] }
  0x57   : > { %v1160_v47 = vsel %vm15324_vm7, %v522_v36, %v1159_v29  ;;  %v539_v48 = vor.u32 %v537_v31, %v536_v39  ;;  %v540_v49 = vrot.slane %v536_v39, 4  ;;  %v544_v50 = vrot.slane %v542_v40, 7  ;;  %v1170_v54 = vld [vmem:[#allocation2 + $0x20] sm:$0x1]  ;;  %v456_v57 = vld [vmem:[%s19358_s0 + $0x18] sm:$0xf] }
  0x58   : > { %1161 = vst [vmem:[#allocation2 + $0xc] sm:$0xf] %v1160_v47  ;;  %v531_v52 = vsel %vm15332_vm8, %v523_v38, %v530_v42  ;;  %v1164_v53 = vsel %vm15160_vm2, %v532_v43, %v1163_v34  ;;  %v553_v55 = vrot.slane %v551_v46, 7  ;;  %v554_v56 = vshll.u32 %v454_v41, 16  ;;  %v1173_v62 = vld [vmem:[#allocation2 + $0x24] sm:$0xf] }
  0x59   : > { %1162 = vst [vmem:[#allocation2 + $0x10] sm:$0xf] %v531_v52  ;;  %1165 = vst [vmem:[#allocation2 + $0x14] sm:$0x1] %v1164_v53  ;;  %v1167_v58 = vsel %vm15324_vm7, %v539_v48, %v1166_v44  ;;  %v547_v59 = vor.u32 %v545_v45, %v544_v50  ;;  %v549_v61 = vrot.slane %v544_v50, 4  ;;  %v559_v63 = vshrl.u32 %v455_v51, 16 }
  0x5a   : > { %v457_v0 = vld [vmem:[%s19358_s0 + $0x1c] sm:$0xf]  ;;  %1168 = vst [vmem:[#allocation2 + $0x18] sm:$0xf] %v1167_v58  ;;  %v556_v1 = vor.u32 %v554_v56, %v553_v55  ;;  %v557_v3 = vrot.slane %v553_v55, 4  ;;  %v562_v4 = vshll.u32 %v455_v51, 16 }
  0x5b   : > { %v568_v5 = vshrl.u32 %v456_v57, 16  ;;  %v458_v6 = vld [vmem:[%s19358_s0 + $0x20] sm:$0xf]  ;;  %v548_v7 = vsel %vm15332_vm8, %v540_v49, %v547_v59  ;;  %v1171_v8 = vsel %vm15160_vm2, %v549_v61, %v1170_v54  ;;  %v561_v9 = vrot.slane %v559_v63, 7  ;;  %v459_v11 = vld [vmem:[%s19358_s0 + $0x24] sm:$0xf] }
  0x5c   : > { %v571_v10 = vshll.u32 %v456_v57, 16  ;;  %1169 = vst [vmem:[#allocation2 + $0x1c] sm:$0xf] %v548_v7  ;;  %1172 = vst [vmem:[#allocation2 + $0x20] sm:$0x1] %v1171_v8  ;;  %v1174_v12 = vsel %vm15324_vm7, %v556_v1, %v1173_v62  ;;  %v576_v15 = vshrl.u32 %v457_v0, 16 }
  0x5d   : > { %v1177_v13 = vld [vmem:[#allocation2 + $0x2c] sm:$0x1]  ;;  %v570_v14 = vrot.slane %v568_v5, 7  ;;  %v579_v16 = vshll.u32 %v457_v0, 16  ;;  %1175 = vst [vmem:[#allocation2 + $0x24] sm:$0xf] %v1174_v12  ;;  %v564_v17 = vor.u32 %v562_v4, %v561_v9 }
  0x5e   : > { %v566_v18 = vrot.slane %v561_v9, 4  ;;  %v1180_v19 = vld [vmem:[#allocation2 + $0x30] sm:$0xf]  ;;  %v585_v20 = vshrl.u32 %v458_v6, 16  ;;  %v588_v21 = vshll.u32 %v458_v6, 16  ;;  %v578_v24 = vrot.slane %v576_v15, 7 }
  0x5f   : > { %v573_v22 = vor.u32 %v571_v10, %v570_v14  ;;  %v574_v23 = vrot.slane %v570_v14, 4  ;;  %v593_v25 = vshrl.u32 %v459_v11, 16  ;;  %v460_v26 = vld [vmem:[%s19358_s0 + $0x28] sm:$0xf]  ;;  %v565_v27 = vsel %vm15332_vm8, %v557_v3, %v564_v17  ;;  %v1184_v28 = vld [vmem:[#allocation2 + $0x38] sm:$0x1] }
  0x60   : > { %v1178_v60 = vsel %vm15160_vm2, %v566_v18, %v1177_v13  ;;  %v587_v29 = vrot.slane %v585_v20, 7  ;;  %v1187_v30 = vld [vmem:[#allocation2 + $0x3c] sm:$0xf]  ;;  %v596_v31 = vshll.u32 %v459_v11, 16  ;;  %1176 = vst [vmem:[#allocation2 + $0x28] sm:$0xf] %v565_v27  ;;  %v581_v34 = vor.u32 %v579_v16, %v578_v24 }
  0x61   : > { %1179 = vst [vmem:[#allocation2 + $0x2c] sm:$0x1] %v1178_v60  ;;  %v1181_v33 = vsel %vm15324_vm7, %v573_v22, %v1180_v19  ;;  %v583_v35 = vrot.slane %v578_v24, 4  ;;  %v595_v36 = vrot.slane %v593_v25, 7  ;;  %v1191_v38 = vld [vmem:[#allocation2 + $0x44] sm:$0x1] }
  0x62   : > { %v461_v39 = vld [vmem:[%s19358_s0 + $0x2c] sm:$0xf]  ;;  %1182 = vst [vmem:[#allocation2 + $0x30] sm:$0xf] %v1181_v33  ;;  %v590_v40 = vor.u32 %v588_v21, %v587_v29  ;;  %v591_v41 = vrot.slane %v587_v29, 4  ;;  %v602_v42 = vshrl.u32 %v460_v26, 16  ;;  %v582_v45 = vsel %vm15332_vm8, %v574_v23, %v581_v34 }
  0x63   : > { %v605_v43 = vshll.u32 %v460_v26, 16  ;;  %v462_v44 = vld [vmem:[%s19358_s0 + $0x30] sm:$0xf]  ;;  %v1185_v46 = vsel %vm15160_vm2, %v583_v35, %v1184_v28  ;;  %v598_v47 = vor.u32 %v596_v31, %v595_v36  ;;  %v600_v48 = vrot.slane %v595_v36, 4  ;;  %v463_v49 = vld [vmem:[%s19358_s0 + $0x34] sm:$0xf] }
  0x64   : > { %1183 = vst [vmem:[#allocation2 + $0x34] sm:$0xf] %v582_v45  ;;  %1186 = vst [vmem:[#allocation2 + $0x38] sm:$0x1] %v1185_v46  ;;  %v1188_v50 = vsel %vm15324_vm7, %v590_v40, %v1187_v30  ;;  %v604_v51 = vrot.slane %v602_v42, 7  ;;  %v610_v52 = vshrl.u32 %v461_v39, 16 }
  0x65   : > { %v613_v53 = vshll.u32 %v461_v39, 16  ;;  %v464_v54 = vld [vmem:[%s19358_s0 + $0x38] sm:$0xf]  ;;  %1189 = vst [vmem:[#allocation2 + $0x3c] sm:$0xf] %v1188_v50  ;;  %v599_v55 = vsel %vm15332_vm8, %v591_v41, %v598_v47  ;;  %v1192_v56 = vsel %vm15160_vm2, %v600_v48, %v1191_v38  ;;  %v619_v58 = vshrl.u32 %v462_v44, 16 }
  0x66   : > { %v1194_v57 = vld [vmem:[#allocation2 + $0x48] sm:$0xf]  ;;  %v622_v59 = vshll.u32 %v462_v44, 16  ;;  %1190 = vst [vmem:[#allocation2 + $0x40] sm:$0xf] %v599_v55  ;;  %v607_v61 = vor.u32 %v605_v43, %v604_v51  ;;  %v608_v62 = vrot.slane %v604_v51, 4 }
  0x67   : > { %1193 = vst [vmem:[#allocation2 + $0x44] sm:$0x1] %v1192_v56  ;;  %v612_v63 = vrot.slane %v610_v52, 7  ;;  %v627_v0 = vshrl.u32 %v463_v49, 16  ;;  %v465_v1 = vld [vmem:[%s19358_s0 + $0x3c] sm:$0xf] }
  0x68   : > { %v1198_v3 = vld [vmem:[#allocation2 + $0x50] sm:$0x1]  ;;  %v621_v4 = vrot.slane %v619_v58, 7  ;;  %v630_v5 = vshll.u32 %v463_v49, 16  ;;  %v636_v6 = vshrl.u32 %v464_v54, 16  ;;  %v639_v7 = vshll.u32 %v464_v54, 16 }
  0x69   : > { %v1195_v8 = vsel %vm15324_vm7, %v607_v61, %v1194_v57  ;;  %v615_v9 = vor.u32 %v613_v53, %v612_v63  ;;  %v617_v10 = vrot.slane %v612_v63, 4  ;;  %v1201_v11 = vld [vmem:[#allocation2 + $0x54] sm:$0xf]  ;;  %v629_v12 = vrot.slane %v627_v0, 7  ;;  %v1205_v13 = vld [vmem:[#allocation2 + $0x5c] sm:$0x1] }
  0x6a   : > { %1196 = vst [vmem:[#allocation2 + $0x48] sm:$0xf] %v1195_v8  ;;  %v624_v14 = vor.u32 %v622_v59, %v621_v4  ;;  %v625_v15 = vrot.slane %v621_v4, 4  ;;  %v638_v16 = vrot.slane %v636_v6, 7  ;;  %v644_v17 = vshrl.u32 %v465_v1, 16 }
  0x6b   : > { %v466_v18 = vld [vmem:[%s19358_s0 + $0x40] sm:$0xf]  ;;  %v616_v19 = vsel %vm15332_vm8, %v608_v62, %v615_v9  ;;  %v1199_v20 = vsel %vm15160_vm2, %v617_v10, %v1198_v3  ;;  %v632_v21 = vor.u32 %v630_v5, %v629_v12  ;;  %v634_v22 = vrot.slane %v629_v12, 4  ;;  %v467_v24 = vld [vmem:[%s19358_s0 + $0x44] sm:$0xf] }
  0x6c   : > { %v1208_v23 = vld [vmem:[#allocation2 + $0x60] sm:$0xf]  ;;  %1197 = vst [vmem:[#allocation2 + $0x4c] sm:$0xf] %v616_v19  ;;  %1200 = vst [vmem:[#allocation2 + $0x50] sm:$0x1] %v1199_v20  ;;  %v1202_v25 = vsel %vm15324_vm7, %v624_v14, %v1201_v11  ;;  %v641_v26 = vor.u32 %v639_v7, %v638_v16 }
  0x6d   : > { %v642_v27 = vrot.slane %v638_v16, 4  ;;  %v646_v60 = vrot.slane %v644_v17, 7  ;;  %v468_v28 = vld [vmem:[%s19358_s0 + $0x48] sm:$0xf]  ;;  %1203 = vst [vmem:[#allocation2 + $0x54] sm:$0xf] %v1202_v25  ;;  %v633_v29 = vsel %vm15332_vm8, %v625_v15, %v632_v21  ;;  %v1206_v30 = vsel %vm15160_vm2, %v634_v22, %v1205_v13 }
  0x6e   : > { %v647_v31 = vshll.u32 %v465_v1, 16  ;;  %v1212_v33 = vld [vmem:[#allocation2 + $0x68] sm:$0x1]  ;;  %v653_v34 = vshrl.u32 %v466_v18, 16  ;;  %v469_v35 = vld [vmem:[%s19358_s0 + $0x4c] sm:$0xf]  ;;  %v1209_v36 = vsel %vm15324_vm7, %v641_v26, %v1208_v23 }
  0x6f   : > { %1204 = vst [vmem:[#allocation2 + $0x58] sm:$0xf] %v633_v29  ;;  %1207 = vst [vmem:[#allocation2 + $0x5c] sm:$0x1] %v1206_v30  ;;  %v651_v38 = vrot.slane %v646_v60, 4  ;;  %v656_v39 = vshll.u32 %v466_v18, 16 }
  0x70   : > { %v661_v40 = vshrl.u32 %v467_v24, 16  ;;  %1210 = vst [vmem:[#allocation2 + $0x60] sm:$0xf] %v1209_v36  ;;  %v649_v41 = vor.u32 %v647_v31, %v646_v60  ;;  %v655_v42 = vrot.slane %v653_v34, 7  ;;  %v1215_v43 = vld [vmem:[#allocation2 + $0x6c] sm:$0xf] }
  0x71   : > { %v664_v44 = vshll.u32 %v467_v24, 16  ;;  %v670_v45 = vshrl.u32 %v468_v28, 16  ;;  %v1213_v46 = vsel %vm15160_vm2, %v651_v38, %v1212_v33  ;;  %v673_v48 = vshll.u32 %v468_v28, 16  ;;  %v470_v50 = vld [vmem:[%s19358_s0 + $0x50] sm:$0xf] }
  0x72   : > { %v663_v47 = vrot.slane %v661_v40, 7  ;;  %v678_v49 = vshrl.u32 %v469_v35, 16  ;;  %v650_v51 = vsel %vm15332_vm8, %v642_v27, %v649_v41  ;;  %1214 = vst [vmem:[#allocation2 + $0x68] sm:$0x1] %v1213_v46  ;;  %v658_v52 = vor.u32 %v656_v39, %v655_v42  ;;  %v1219_v54 = vld [vmem:[#allocation2 + $0x74] sm:$0x1] }
  0x73   : > { %v659_v53 = vrot.slane %v655_v42, 4  ;;  %v672_v55 = vrot.slane %v670_v45, 7  ;;  %v1222_v56 = vld [vmem:[#allocation2 + $0x78] sm:$0xf]  ;;  %1211 = vst [vmem:[#allocation2 + $0x64] sm:$0xf] %v650_v51 }
  0x74   : > { %v666_v57 = vor.u32 %v664_v44, %v663_v47  ;;  %v668_v58 = vrot.slane %v663_v47, 4  ;;  %v680_v59 = vrot.slane %v678_v49, 7  ;;  %v681_v61 = vshll.u32 %v469_v35, 16  ;;  %v471_v62 = vld [vmem:[%s19358_s0 + $0x54] sm:$0xf] }
  0x75   : > { %v1216_v63 = vsel %vm15324_vm7, %v658_v52, %v1215_v43  ;;  %v675_v0 = vor.u32 %v673_v48, %v672_v55  ;;  %v676_v1 = vrot.slane %v672_v55, 4  ;;  %v1226_v3 = vld [vmem:[#allocation2 + $0x80] sm:$0x1]  ;;  %v687_v4 = vshrl.u32 %v470_v50, 16  ;;  %v472_v5 = vld [vmem:[%s19358_s0 + $0x58] sm:$0xf] }
  0x76   : > { %1217 = vst [vmem:[#allocation2 + $0x6c] sm:$0xf] %v1216_v63  ;;  %v667_v6 = vsel %vm15332_vm8, %v659_v53, %v666_v57  ;;  %v1220_v7 = vsel %vm15160_vm2, %v668_v58, %v1219_v54  ;;  %v683_v8 = vor.u32 %v681_v61, %v680_v59  ;;  %v685_v9 = vrot.slane %v680_v59, 4  ;;  %v473_v10 = vld [vmem:[%s19358_s0 + $0x5c] sm:$0xf] }
  0x77   : > { %1218 = vst [vmem:[#allocation2 + $0x70] sm:$0xf] %v667_v6  ;;  %1221 = vst [vmem:[#allocation2 + $0x74] sm:$0x1] %v1220_v7  ;;  %v1223_v11 = vsel %vm15324_vm7, %v675_v0, %v1222_v56  ;;  %v689_v12 = vrot.slane %v687_v4, 7  ;;  %v690_v13 = vshll.u32 %v470_v50, 16 }
  0x78   : > { %v695_v14 = vshrl.u32 %v471_v62, 16  ;;  %v474_v15 = vld [vmem:[%s19358_s0 + $0x60] sm:$0xf]  ;;  %1224 = vst [vmem:[#allocation2 + $0x78] sm:$0xf] %v1223_v11  ;;  %v684_v16 = vsel %vm15332_vm8, %v676_v1, %v683_v8  ;;  %v1227_v17 = vsel %vm15160_vm2, %v685_v9, %v1226_v3  ;;  %v698_v19 = vshll.u32 %v471_v62, 16 }
  0x79   : > { %v1229_v18 = vld [vmem:[#allocation2 + $0x84] sm:$0xf]  ;;  %v704_v20 = vshrl.u32 %v472_v5, 16  ;;  %1225 = vst [vmem:[#allocation2 + $0x7c] sm:$0xf] %v684_v16  ;;  %v692_v21 = vor.u32 %v690_v13, %v689_v12  ;;  %v693_v22 = vrot.slane %v689_v12, 4 }
  0x7a   : > { %1228 = vst [vmem:[#allocation2 + $0x80] sm:$0x1] %v1227_v17  ;;  %v697_v23 = vrot.slane %v695_v14, 7  ;;  %v1233_v24 = vld [vmem:[#allocation2 + $0x8c] sm:$0x1]  ;;  %v707_v25 = vshll.u32 %v472_v5, 16 }
  0x7b   : > { %v706_v26 = vrot.slane %v704_v20, 7  ;;  %v712_v27 = vshrl.u32 %v473_v10, 16  ;;  %v715_v60 = vshll.u32 %v473_v10, 16  ;;  %v721_v28 = vshrl.u32 %v474_v15, 16  ;;  %v475_v29 = vld [vmem:[%s19358_s0 + $0x64] sm:$0xf] }
  0x7c   : > { %v1230_v30 = vsel %vm15324_vm7, %v692_v21, %v1229_v18  ;;  %v700_v31 = vor.u32 %v698_v19, %v697_v23  ;;  %v702_v33 = vrot.slane %v697_v23, 4  ;;  %v1236_v34 = vld [vmem:[#allocation2 + $0x90] sm:$0xf]  ;;  %v1240_v35 = vld [vmem:[#allocation2 + $0x98] sm:$0x1]  ;;  %v724_v36 = vshll.u32 %v474_v15, 16 }
  0x7d   : > { %1231 = vst [vmem:[#allocation2 + $0x84] sm:$0xf] %v1230_v30  ;;  %v709_v38 = vor.u32 %v707_v25, %v706_v26  ;;  %v710_v39 = vrot.slane %v706_v26, 4  ;;  %v714_v40 = vrot.slane %v712_v27, 7  ;;  %v723_v41 = vrot.slane %v721_v28, 7 }
  0x7e   : > { %v476_v42 = vld [vmem:[%s19358_s0 + $0x68] sm:$0xf]  ;;  %v701_v43 = vsel %vm15332_vm8, %v693_v22, %v700_v31  ;;  %v1234_v44 = vsel %vm15160_vm2, %v702_v33, %v1233_v24  ;;  %v1243_v45 = vld [vmem:[#allocation2 + $0x9c] sm:$0xf]  ;;  %v729_v46 = vshrl.u32 %v475_v29, 16  ;;  %v732_v47 = vshll.u32 %v475_v29, 16 }
  0x7f   : > { %v477_v48 = vld [vmem:[%s19358_s0 + $0x6c] sm:$0xf]  ;;  %1232 = vst [vmem:[#allocation2 + $0x88] sm:$0xf] %v701_v43  ;;  %1235 = vst [vmem:[#allocation2 + $0x8c] sm:$0x1] %v1234_v44  ;;  %v1237_v49 = vsel %vm15324_vm7, %v709_v38, %v1236_v34  ;;  %v717_v50 = vor.u32 %v715_v60, %v714_v40  ;;  %v726_v52 = vor.u32 %v724_v36, %v723_v41 }
  0x80   : > { %v719_v51 = vrot.slane %v714_v40, 4  ;;  %v478_v53 = vld [vmem:[%s19358_s0 + $0x70] sm:$0xf]  ;;  %1238 = vst [vmem:[#allocation2 + $0x90] sm:$0xf] %v1237_v49  ;;  %v727_v54 = vrot.slane %v723_v41, 4 }
  0x81   : > { %v731_v55 = vrot.slane %v729_v46, 7  ;;  %v738_v56 = vshrl.u32 %v476_v42, 16  ;;  %v741_v57 = vshll.u32 %v476_v42, 16  ;;  %v479_v58 = vld [vmem:[%s19358_s0 + $0x74] sm:$0xf]  ;;  %v718_v59 = vsel %vm15332_vm8, %v710_v39, %v717_v50 }
  0x82   : > { %v1241_v61 = vsel %vm15160_vm2, %v719_v51, %v1240_v35  ;;  %v1244_v62 = vsel %vm15324_vm7, %v726_v52, %v1243_v45  ;;  %v1247_v63 = vld [vmem:[#allocation2 + $0xa4] sm:$0x1]  ;;  %v746_v0 = vshrl.u32 %v477_v48, 16  ;;  %1239 = vst [vmem:[#allocation2 + $0x94] sm:$0xf] %v718_v59  ;;  %v749_v6 = vshll.u32 %v477_v48, 16 }
  0x83   : > { %1242 = vst [vmem:[#allocation2 + $0x98] sm:$0x1] %v1241_v61  ;;  %1245 = vst [vmem:[#allocation2 + $0x9c] sm:$0xf] %v1244_v62  ;;  %v734_v1 = vor.u32 %v732_v47, %v731_v55  ;;  %v736_v3 = vrot.slane %v731_v55, 4  ;;  %v740_v4 = vrot.slane %v738_v56, 7 }
  0x84   : > { %v1250_v5 = vld [vmem:[#allocation2 + $0xa8] sm:$0xf]  ;;  %v748_v7 = vrot.slane %v746_v0, 7  ;;  %v755_v8 = vshrl.u32 %v478_v53, 16  ;;  %v758_v9 = vshll.u32 %v478_v53, 16  ;;  %v763_v10 = vshrl.u32 %v479_v58, 16 }
  0x85   : > { %v480_v11 = vld [vmem:[%s19358_s0 + $0x78] sm:$0xf]  ;;  %v735_v12 = vsel %vm15332_vm8, %v727_v54, %v734_v1  ;;  %v1248_v13 = vsel %vm15160_vm2, %v736_v3, %v1247_v63  ;;  %v743_v14 = vor.u32 %v741_v57, %v740_v4  ;;  %v744_v15 = vrot.slane %v740_v4, 4  ;;  %v1254_v16 = vld [vmem:[#allocation2 + $0xb0] sm:$0x1] }
  0x86   : > { %v1257_v17 = vld [vmem:[#allocation2 + $0xb4] sm:$0xf]  ;;  %1246 = vst [vmem:[#allocation2 + $0xa0] sm:$0xf] %v735_v12  ;;  %1249 = vst [vmem:[#allocation2 + $0xa4] sm:$0x1] %v1248_v13  ;;  %v751_v18 = vor.u32 %v749_v6, %v748_v7 }
  0x87   : > { %v753_v19 = vrot.slane %v748_v7, 4  ;;  %v757_v20 = vrot.slane %v755_v8, 7  ;;  %v765_v21 = vrot.slane %v763_v10, 7  ;;  %v1261_v22 = vld [vmem:[#allocation2 + $0xbc] sm:$0x1]  ;;  %v1251_v24 = vsel %vm15324_vm7, %v743_v14, %v1250_v5 }
  0x88   : > { %v481_v23 = vld [vmem:[%s19358_s0 + $0x7c] sm:$0xf]  ;;  %v766_v25 = vshll.u32 %v479_v58, 16  ;;  %v772_v26 = vshrl.u32 %v480_v11, 16  ;;  %v775_v27 = vshll.u32 %v480_v11, 16  ;;  %v752_v28 = vsel %vm15332_vm8, %v744_v15, %v751_v18 }
  0x89   : > { %v482_v60 = vld [vmem:[%s19358_s0 + $0x80] sm:$0xf]  ;;  %1252 = vst [vmem:[#allocation2 + $0xa8] sm:$0xf] %v1251_v24  ;;  %v1255_v29 = vsel %vm15160_vm2, %v753_v19, %v1254_v16  ;;  %v760_v30 = vor.u32 %v758_v9, %v757_v20  ;;  %v761_v31 = vrot.slane %v757_v20, 4  ;;  %v770_v36 = vrot.slane %v765_v21, 4 }
  0x8a   : > { %v1264_v33 = vld [vmem:[#allocation2 + $0xc0] sm:$0xf]  ;;  %v483_v34 = vld [vmem:[%s19358_s0 + $0x84] sm:$0xf]  ;;  %1253 = vst [vmem:[#allocation2 + $0xac] sm:$0xf] %v752_v28  ;;  %v768_v35 = vor.u32 %v766_v25, %v765_v21 }
  0x8b   : > { %1256 = vst [vmem:[#allocation2 + $0xb0] sm:$0x1] %v1255_v29  ;;  %v774_v38 = vrot.slane %v772_v26, 7  ;;  %v780_v39 = vshrl.u32 %v481_v23, 16  ;;  %v484_v40 = vld [vmem:[%s19358_s0 + $0x88] sm:$0xf]  ;;  %v1258_v41 = vsel %vm15324_vm7, %v760_v30, %v1257_v17  ;;  %v1262_v47 = vsel %vm15160_vm2, %v770_v36, %v1261_v22 }
  0x8c   : > { %v783_v42 = vshll.u32 %v481_v23, 16  ;;  %v789_v43 = vshrl.u32 %v482_v60, 16  ;;  %v792_v44 = vshll.u32 %v482_v60, 16  ;;  %v485_v45 = vld [vmem:[%s19358_s0 + $0x8c] sm:$0xf]  ;;  %v769_v46 = vsel %vm15332_vm8, %v761_v31, %v768_v35 }
  0x8d   : > { %1259 = vst [vmem:[#allocation2 + $0xb4] sm:$0xf] %v1258_v41  ;;  %v777_v48 = vor.u32 %v775_v27, %v774_v38  ;;  %v778_v49 = vrot.slane %v774_v38, 4  ;;  %v1268_v50 = vld [vmem:[#allocation2 + $0xc8] sm:$0x1]  ;;  %v782_v51 = vrot.slane %v780_v39, 7 }
  0x8e   : > { %1260 = vst [vmem:[#allocation2 + $0xb8] sm:$0xf] %v769_v46  ;;  %1263 = vst [vmem:[#allocation2 + $0xbc] sm:$0x1] %v1262_v47  ;;  %v791_v52 = vrot.slane %v789_v43, 7  ;;  %v797_v54 = vshrl.u32 %v483_v34, 16 }
  0x8f   : > { %v1271_v53 = vld [vmem:[#allocation2 + $0xe4] sm:$0xf]  ;;  %v800_v55 = vshll.u32 %v483_v34, 16  ;;  %v1265_v56 = vsel %vm15324_vm7, %v777_v48, %v1264_v33  ;;  %v806_v57 = vshrl.u32 %v484_v40, 16  ;;  %v809_v58 = vshll.u32 %v484_v40, 16 }
  0x90   : > { %v814_v59 = vshrl.u32 %v485_v45, 16  ;;  %v486_v61 = vld [vmem:[%s19358_s0 + $0x90] sm:$0xf]  ;;  %1266 = vst [vmem:[#allocation2 + $0xc0] sm:$0xf] %v1265_v56  ;;  %v785_v62 = vor.u32 %v783_v42, %v782_v51  ;;  %v787_v63 = vrot.slane %v782_v51, 4  ;;  %v794_v0 = vor.u32 %v792_v44, %v791_v52 }
  0x91   : > { %v795_v1 = vrot.slane %v791_v52, 4  ;;  %v799_v3 = vrot.slane %v797_v54, 7  ;;  %v1275_v4 = vld [vmem:[#allocation2 + $0xec] sm:$0x1]  ;;  %v808_v5 = vrot.slane %v806_v57, 7  ;;  %v817_v7 = vshll.u32 %v485_v45, 16 }
  0x92   : > { %v816_v6 = vrot.slane %v814_v59, 7  ;;  %v786_v8 = vsel %vm15332_vm8, %v778_v49, %v785_v62  ;;  %v1269_v9 = vsel %vm15160_vm2, %v787_v63, %v1268_v50  ;;  %v1272_v10 = vsel %vm15324_vm7, %v794_v0, %v1271_v53  ;;  %v1278_v11 = vld [vmem:[#allocation2 + $0xf0] sm:$0xf]  ;;  %v487_v13 = vld [vmem:[%s19358_s0 + $0x94] sm:$0xf] }
  0x93   : > { %v823_v12 = vshrl.u32 %v486_v61, 16  ;;  %1267 = vst [vmem:[#allocation2 + $0xc4] sm:$0xf] %v786_v8  ;;  %1270 = vst [vmem:[#allocation2 + $0xc8] sm:$0x1] %v1269_v9  ;;  %v802_v14 = vor.u32 %v800_v55, %v799_v3  ;;  %v804_v15 = vrot.slane %v799_v3, 4  ;;  %v811_v16 = vor.u32 %v809_v58, %v808_v5 }
  0x94   : > { %1273 = vst [vmem:[#allocation2 + $0xe4] sm:$0xf] %v1272_v10  ;;  %v812_v17 = vrot.slane %v808_v5, 4  ;;  %v1282_v18 = vld [vmem:[#allocation2 + $0xf8] sm:$0x1]  ;;  %v819_v20 = vor.u32 %v817_v7, %v816_v6  ;;  %v821_v21 = vrot.slane %v816_v6, 4 }
  0x95   : > { %v1285_v19 = vld [vmem:[#allocation2 + $0xfc] sm:$0xf]  ;;  %v825_v22 = vrot.slane %v823_v12, 7  ;;  %v826_v23 = vshll.u32 %v486_v61, 16  ;;  %v488_v24 = vld [vmem:[%s19358_s0 + $0x98] sm:$0xf]  ;;  %v803_v25 = vsel %vm15332_vm8, %v795_v1, %v802_v14  ;;  %v1276_v26 = vsel %vm15160_vm2, %v804_v15, %v1275_v4 }
  0x96   : > { %v1279_v27 = vsel %vm15324_vm7, %v811_v16, %v1278_v11  ;;  %v831_v60 = vshrl.u32 %v487_v13, 16  ;;  %v489_v28 = vld [vmem:[%s19358_s0 + $0x9c] sm:$0xf]  ;;  %v490_v29 = vld [vmem:[%s19358_s0 + $0xa0] sm:$0xf]  ;;  %v820_v30 = vsel %vm15332_vm8, %v812_v17, %v819_v20  ;;  %v1283_v31 = vsel %vm15160_vm2, %v821_v21, %v1282_v18 }
  0x97   : > { %1274 = vst [vmem:[#allocation2 + $0xe8] sm:$0xf] %v803_v25  ;;  %1277 = vst [vmem:[#allocation2 + $0xec] sm:$0x1] %v1276_v26  ;;  %v828_v33 = vor.u32 %v826_v23, %v825_v22  ;;  %v829_v34 = vrot.slane %v825_v22, 4  ;;  %v834_v38 = vshll.u32 %v487_v13, 16 }
  0x98   : > { %1280 = vst [vmem:[#allocation2 + $0xf0] sm:$0xf] %v1279_v27  ;;  %v1289_v35 = vld [vmem:[#allocation2 + $0x104] sm:$0x1]  ;;  %1281 = vst [vmem:[#allocation2 + $0xf4] sm:$0xf] %v820_v30 }
  0x99   : > { %1284 = vst [vmem:[#allocation2 + $0xf8] sm:$0x1] %v1283_v31  ;;  %v833_v36 = vrot.slane %v831_v60, 7  ;;  %v840_v39 = vshrl.u32 %v488_v24, 16  ;;  %v843_v40 = vshll.u32 %v488_v24, 16  ;;  %v1286_v42 = vsel %vm15324_vm7, %v828_v33, %v1285_v19 }
  0x9a   : > { %v491_v41 = vld [vmem:[%s19358_s0 + $0xa4] sm:$0xf]  ;;  %v1292_v43 = vld [vmem:[#allocation2 + $0x108] sm:$0xf]  ;;  %v848_v44 = vshrl.u32 %v489_v28, 16  ;;  %v851_v45 = vshll.u32 %v489_v28, 16 }
  0x9b   : > { %v857_v46 = vshrl.u32 %v490_v29, 16  ;;  %1287 = vst [vmem:[#allocation2 + $0xfc] sm:$0xf] %v1286_v42  ;;  %v836_v47 = vor.u32 %v834_v38, %v833_v36  ;;  %v838_v48 = vrot.slane %v833_v36, 4  ;;  %v842_v49 = vrot.slane %v840_v39, 7 }
  0x9c   : > { %v1296_v50 = vld [vmem:[#allocation2 + $0x110] sm:$0x1]  ;;  %v860_v51 = vshll.u32 %v490_v29, 16  ;;  %v850_v52 = vrot.slane %v848_v44, 7  ;;  %v865_v54 = vshrl.u32 %v491_v41, 16  ;;  %v868_v55 = vshll.u32 %v491_v41, 16 }
  0x9d   : > { %v859_v53 = vrot.slane %v857_v46, 7  ;;  %v492_v56 = vld [vmem:[%s19358_s0 + $0xa8] sm:$0xf]  ;;  %v837_v57 = vsel %vm15332_vm8, %v829_v34, %v836_v47  ;;  %v1290_v58 = vsel %vm15160_vm2, %v838_v48, %v1289_v35  ;;  %v845_v59 = vor.u32 %v843_v40, %v842_v49  ;;  %v1299_v62 = vld [vmem:[#allocation2 + $0x114] sm:$0xf] }
  0x9e   : > { %v846_v61 = vrot.slane %v842_v49, 4  ;;  %v493_v63 = vld [vmem:[%s19358_s0 + $0xac] sm:$0xf]  ;;  %1288 = vst [vmem:[#allocation2 + $0x100] sm:$0xf] %v837_v57  ;;  %v853_v0 = vor.u32 %v851_v45, %v850_v52  ;;  %v855_v1 = vrot.slane %v850_v52, 4 }
  0x9f   : > { %1291 = vst [vmem:[#allocation2 + $0x104] sm:$0x1] %v1290_v58  ;;  %v862_v3 = vor.u32 %v860_v51, %v859_v53  ;;  %v863_v4 = vrot.slane %v859_v53, 4  ;;  %v494_v5 = vld [vmem:[%s19358_s0 + $0xb0] sm:$0xf]  ;;  %v1293_v6 = vsel %vm15324_vm7, %v845_v59, %v1292_v43  ;;  %v867_v7 = vrot.slane %v865_v54, 7 }
  0xa0   : > { %v874_v8 = vshrl.u32 %v492_v56, 16  ;;  %v877_v9 = vshll.u32 %v492_v56, 16  ;;  %v495_v10 = vld [vmem:[%s19358_s0 + $0xb4] sm:$0xf]  ;;  %1294 = vst [vmem:[#allocation2 + $0x108] sm:$0xf] %v1293_v6  ;;  %v854_v11 = vsel %vm15332_vm8, %v846_v61, %v853_v0  ;;  %v1297_v12 = vsel %vm15160_vm2, %v855_v1, %v1296_v50 }
  0xa1   : > { %v1300_v13 = vsel %vm15324_vm7, %v862_v3, %v1299_v62  ;;  %v1303_v14 = vld [vmem:[#allocation2 + $0x11c] sm:$0x1]  ;;  %v882_v15 = vshrl.u32 %v493_v63, 16  ;;  %1295 = vst [vmem:[#allocation2 + $0x10c] sm:$0xf] %v854_v11  ;;  %v870_v16 = vor.u32 %v868_v55, %v867_v7  ;;  %v872_v17 = vrot.slane %v867_v7, 4 }
  0xa2   : > { %1298 = vst [vmem:[#allocation2 + $0x110] sm:$0x1] %v1297_v12  ;;  %1301 = vst [vmem:[#allocation2 + $0x114] sm:$0xf] %v1300_v13  ;;  %v876_v18 = vrot.slane %v874_v8, 7  ;;  %v885_v20 = vshll.u32 %v493_v63, 16 }
  0xa3   : > { %v1306_v19 = vld [vmem:[#allocation2 + $0x120] sm:$0xf]  ;;  %v884_v21 = vrot.slane %v882_v15, 7  ;;  %v891_v22 = vshrl.u32 %v494_v5, 16  ;;  %v894_v23 = vshll.u32 %v494_v5, 16  ;;  %v899_v24 = vshrl.u32 %v495_v10, 16 }
  0xa4   : > { %v496_v25 = vld [vmem:[%s19358_s0 + $0xb8] sm:$0xf]  ;;  %v871_v26 = vsel %vm15332_vm8, %v863_v4, %v870_v16  ;;  %v1304_v27 = vsel %vm15160_vm2, %v872_v17, %v1303_v14  ;;  %v879_v60 = vor.u32 %v877_v9, %v876_v18  ;;  %v880_v28 = vrot.slane %v876_v18, 4  ;;  %v1310_v29 = vld [vmem:[#allocation2 + $0x128] sm:$0x1] }
  0xa5   : > { %v1313_v30 = vld [vmem:[#allocation2 + $0x12c] sm:$0xf]  ;;  %1302 = vst [vmem:[#allocation2 + $0x118] sm:$0xf] %v871_v26  ;;  %1305 = vst [vmem:[#allocation2 + $0x11c] sm:$0x1] %v1304_v27  ;;  %v887_v31 = vor.u32 %v885_v20, %v884_v21 }
  0xa6   : > { %v889_v33 = vrot.slane %v884_v21, 4  ;;  %v893_v34 = vrot.slane %v891_v22, 7  ;;  %v901_v35 = vrot.slane %v899_v24, 7  ;;  %v1317_v36 = vld [vmem:[#allocation2 + $0x134] sm:$0x1]  ;;  %v1307_v39 = vsel %vm15324_vm7, %v879_v60, %v1306_v19 }
  0xa7   : > { %v497_v38 = vld [vmem:[%s19358_s0 + $0xbc] sm:$0xf]  ;;  %v902_v40 = vshll.u32 %v495_v10, 16  ;;  %v908_v41 = vshrl.u32 %v496_v25, 16  ;;  %v911_v42 = vshll.u32 %v496_v25, 16  ;;  %v888_v44 = vsel %vm15332_vm8, %v880_v28, %v887_v31 }
  0xa8   : > { %v498_v43 = vld [vmem:[%s19358_s0 + $0xc0] sm:$0xf]  ;;  %1308 = vst [vmem:[#allocation2 + $0x120] sm:$0xf] %v1307_v39  ;;  %v1311_v45 = vsel %vm15160_vm2, %v889_v33, %v1310_v29  ;;  %v896_v46 = vor.u32 %v894_v23, %v893_v34  ;;  %v897_v47 = vrot.slane %v893_v34, 4  ;;  %v906_v51 = vrot.slane %v901_v35, 4 }
  0xa9   : > { %v1320_v48 = vld [vmem:[#allocation2 + $0x138] sm:$0xf]  ;;  %v499_v49 = vld [vmem:[%s19358_s0 + $0xc4] sm:$0xf]  ;;  %1309 = vst [vmem:[#allocation2 + $0x124] sm:$0xf] %v888_v44  ;;  %v904_v50 = vor.u32 %v902_v40, %v901_v35 }
  0xaa   : > { %1312 = vst [vmem:[#allocation2 + $0x128] sm:$0x1] %v1311_v45  ;;  %v910_v52 = vrot.slane %v908_v41, 7  ;;  %v916_v53 = vshrl.u32 %v497_v38, 16  ;;  %v500_v54 = vld [vmem:[%s19358_s0 + $0xc8] sm:$0xf]  ;;  %v1314_v55 = vsel %vm15324_vm7, %v896_v46, %v1313_v30  ;;  %v1318_v62 = vsel %vm15160_vm2, %v906_v51, %v1317_v36 }
  0xab   : > { %v919_v56 = vshll.u32 %v497_v38, 16  ;;  %v925_v57 = vshrl.u32 %v498_v43, 16  ;;  %v928_v58 = vshll.u32 %v498_v43, 16  ;;  %v501_v59 = vld [vmem:[%s19358_s0 + $0xcc] sm:$0xf]  ;;  %v905_v61 = vsel %vm15332_vm8, %v897_v47, %v904_v50 }
  0xac   : > { %1315 = vst [vmem:[#allocation2 + $0x12c] sm:$0xf] %v1314_v55  ;;  %v913_v63 = vor.u32 %v911_v42, %v910_v52  ;;  %v914_v0 = vrot.slane %v910_v52, 4  ;;  %v1324_v1 = vld [vmem:[#allocation2 + $0x140] sm:$0x1]  ;;  %v918_v3 = vrot.slane %v916_v53, 7 }
  0xad   : > { %1316 = vst [vmem:[#allocation2 + $0x130] sm:$0xf] %v905_v61  ;;  %1319 = vst [vmem:[#allocation2 + $0x134] sm:$0x1] %v1318_v62  ;;  %v927_v4 = vrot.slane %v925_v57, 7  ;;  %v933_v6 = vshrl.u32 %v499_v49, 16 }
  0xae   : > { %v1327_v5 = vld [vmem:[#allocation2 + $0x144] sm:$0xf]  ;;  %v936_v7 = vshll.u32 %v499_v49, 16  ;;  %v1321_v8 = vsel %vm15324_vm7, %v913_v63, %v1320_v48  ;;  %v942_v9 = vshrl.u32 %v500_v54, 16  ;;  %v945_v10 = vshll.u32 %v500_v54, 16 }
  0xaf   : > { %v950_v11 = vshrl.u32 %v501_v59, 16  ;;  %v502_v12 = vld [vmem:[%s19358_s0 + $0xd0] sm:$0xf]  ;;  %1322 = vst [vmem:[#allocation2 + $0x138] sm:$0xf] %v1321_v8  ;;  %v921_v13 = vor.u32 %v919_v56, %v918_v3  ;;  %v923_v14 = vrot.slane %v918_v3, 4  ;;  %v930_v15 = vor.u32 %v928_v58, %v927_v4 }
  0xb0   : > { %v931_v16 = vrot.slane %v927_v4, 4  ;;  %v935_v17 = vrot.slane %v933_v6, 7  ;;  %v1331_v18 = vld [vmem:[#allocation2 + $0x14c] sm:$0x1]  ;;  %v944_v19 = vrot.slane %v942_v9, 7  ;;  %v953_v21 = vshll.u32 %v501_v59, 16 }
  0xb1   : > { %v952_v20 = vrot.slane %v950_v11, 7  ;;  %v922_v22 = vsel %vm15332_vm8, %v914_v0, %v921_v13  ;;  %v1325_v23 = vsel %vm15160_vm2, %v923_v14, %v1324_v1  ;;  %v1328_v24 = vsel %vm15324_vm7, %v930_v15, %v1327_v5  ;;  %v1334_v25 = vld [vmem:[#allocation2 + $0x150] sm:$0xf]  ;;  %v503_v27 = vld [vmem:[%s19358_s0 + $0xd4] sm:$0xf] }
  0xb2   : > { %v959_v26 = vshrl.u32 %v502_v12, 16  ;;  %1323 = vst [vmem:[#allocation2 + $0x13c] sm:$0xf] %v922_v22  ;;  %1326 = vst [vmem:[#allocation2 + $0x140] sm:$0x1] %v1325_v23  ;;  %v938_v60 = vor.u32 %v936_v7, %v935_v17  ;;  %v940_v28 = vrot.slane %v935_v17, 4  ;;  %v947_v29 = vor.u32 %v945_v10, %v944_v19 }
  0xb3   : > { %1329 = vst [vmem:[#allocation2 + $0x144] sm:$0xf] %v1328_v24  ;;  %v948_v30 = vrot.slane %v944_v19, 4  ;;  %v1338_v31 = vld [vmem:[#allocation2 + $0x158] sm:$0x1]  ;;  %v955_v34 = vor.u32 %v953_v21, %v952_v20  ;;  %v957_v35 = vrot.slane %v952_v20, 4 }
  0xb4   : > { %v1341_v33 = vld [vmem:[#allocation2 + $0x15c] sm:$0xf]  ;;  %v961_v36 = vrot.slane %v959_v26, 7  ;;  %v962_v38 = vshll.u32 %v502_v12, 16  ;;  %v504_v39 = vld [vmem:[%s19358_s0 + $0xd8] sm:$0xf]  ;;  %v939_v40 = vsel %vm15332_vm8, %v931_v16, %v938_v60  ;;  %v1332_v41 = vsel %vm15160_vm2, %v940_v28, %v1331_v18 }
  0xb5   : > { %v1335_v42 = vsel %vm15324_vm7, %v947_v29, %v1334_v25  ;;  %v967_v43 = vshrl.u32 %v503_v27, 16  ;;  %v505_v44 = vld [vmem:[%s19358_s0 + $0xdc] sm:$0xf]  ;;  %v506_v45 = vld [vmem:[%s19358_s0 + $0xe0] sm:$0xf]  ;;  %v956_v46 = vsel %vm15332_vm8, %v948_v30, %v955_v34  ;;  %v1339_v47 = vsel %vm15160_vm2, %v957_v35, %v1338_v31 }
  0xb6   : > { %1330 = vst [vmem:[#allocation2 + $0x148] sm:$0xf] %v939_v40  ;;  %1333 = vst [vmem:[#allocation2 + $0x14c] sm:$0x1] %v1332_v41  ;;  %v964_v48 = vor.u32 %v962_v38, %v961_v36  ;;  %v965_v49 = vrot.slane %v961_v36, 4  ;;  %v970_v52 = vshll.u32 %v503_v27, 16 }
  0xb7   : > { %1336 = vst [vmem:[#allocation2 + $0x150] sm:$0xf] %v1335_v42  ;;  %v1345_v50 = vld [vmem:[#allocation2 + $0x164] sm:$0x1]  ;;  %1337 = vst [vmem:[#allocation2 + $0x154] sm:$0xf] %v956_v46 }
  0xb8   : > { %1340 = vst [vmem:[#allocation2 + $0x158] sm:$0x1] %v1339_v47  ;;  %v969_v51 = vrot.slane %v967_v43, 7  ;;  %v976_v53 = vshrl.u32 %v504_v39, 16  ;;  %v979_v54 = vshll.u32 %v504_v39, 16  ;;  %v1342_v56 = vsel %vm15324_vm7, %v964_v48, %v1341_v33 }
  0xb9   : > { %v507_v55 = vld [vmem:[%s19358_s0 + $0xe4] sm:$0xf]  ;;  %v1348_v57 = vld [vmem:[#allocation2 + $0x168] sm:$0xf]  ;;  %v984_v58 = vshrl.u32 %v505_v44, 16  ;;  %v987_v59 = vshll.u32 %v505_v44, 16 }
  0xba   : > { %v993_v61 = vshrl.u32 %v506_v45, 16  ;;  %1343 = vst [vmem:[#allocation2 + $0x15c] sm:$0xf] %v1342_v56  ;;  %v972_v62 = vor.u32 %v970_v52, %v969_v51  ;;  %v974_v63 = vrot.slane %v969_v51, 4  ;;  %v978_v0 = vrot.slane %v976_v53, 7 }
  0xbb   : > { %v1352_v1 = vld [vmem:[#allocation2 + $0x170] sm:$0x1]  ;;  %v996_v3 = vshll.u32 %v506_v45, 16  ;;  %v986_v4 = vrot.slane %v984_v58, 7  ;;  %v1001_v6 = vshrl.u32 %v507_v55, 16  ;;  %v1004_v7 = vshll.u32 %v507_v55, 16 }
  0xbc   : > { %v995_v5 = vrot.slane %v993_v61, 7  ;;  %v508_v8 = vld [vmem:[%s19358_s0 + $0xe8] sm:$0xf]  ;;  %v973_v9 = vsel %vm15332_vm8, %v965_v49, %v972_v62  ;;  %v1346_v10 = vsel %vm15160_vm2, %v974_v63, %v1345_v50  ;;  %v981_v11 = vor.u32 %v979_v54, %v978_v0  ;;  %v1355_v13 = vld [vmem:[#allocation2 + $0x174] sm:$0xf] }
  0xbd   : > { %v982_v12 = vrot.slane %v978_v0, 4  ;;  %v509_v14 = vld [vmem:[%s19358_s0 + $0xec] sm:$0xf]  ;;  %1344 = vst [vmem:[#allocation2 + $0x160] sm:$0xf] %v973_v9  ;;  %v989_v15 = vor.u32 %v987_v59, %v986_v4  ;;  %v991_v16 = vrot.slane %v986_v4, 4 }
  0xbe   : > { %1347 = vst [vmem:[#allocation2 + $0x164] sm:$0x1] %v1346_v10  ;;  %v998_v17 = vor.u32 %v996_v3, %v995_v5  ;;  %v999_v18 = vrot.slane %v995_v5, 4  ;;  %v510_v19 = vld [vmem:[%s19358_s0 + $0xf0] sm:$0xf]  ;;  %v1349_v20 = vsel %vm15324_vm7, %v981_v11, %v1348_v57  ;;  %v1003_v21 = vrot.slane %v1001_v6, 7 }
  0xbf   : > { %v1010_v22 = vshrl.u32 %v508_v8, 16  ;;  %v1013_v23 = vshll.u32 %v508_v8, 16  ;;  %v511_v24 = vld [vmem:[%s19358_s0 + $0xf4] sm:$0xf]  ;;  %1350 = vst [vmem:[#allocation2 + $0x168] sm:$0xf] %v1349_v20  ;;  %v990_v25 = vsel %vm15332_vm8, %v982_v12, %v989_v15  ;;  %v1353_v26 = vsel %vm15160_vm2, %v991_v16, %v1352_v1 }
  0xc0   : > { %v1356_v27 = vsel %vm15324_vm7, %v998_v17, %v1355_v13  ;;  %v1359_v60 = vld [vmem:[#allocation2 + $0x17c] sm:$0x1]  ;;  %v1018_v28 = vshrl.u32 %v509_v14, 16  ;;  %1351 = vst [vmem:[#allocation2 + $0x16c] sm:$0xf] %v990_v25  ;;  %v1006_v29 = vor.u32 %v1004_v7, %v1003_v21  ;;  %v1008_v30 = vrot.slane %v1003_v21, 4 }
  0xc1   : > { %1354 = vst [vmem:[#allocation2 + $0x170] sm:$0x1] %v1353_v26  ;;  %1357 = vst [vmem:[#allocation2 + $0x174] sm:$0xf] %v1356_v27  ;;  %v1012_v31 = vrot.slane %v1010_v22, 7  ;;  %v1021_v34 = vshll.u32 %v509_v14, 16 }
  0xc2   : > { %v1362_v33 = vld [vmem:[#allocation2 + $0x180] sm:$0xf]  ;;  %v1020_v35 = vrot.slane %v1018_v28, 7  ;;  %v1027_v36 = vshrl.u32 %v510_v19, 16  ;;  %v1030_v38 = vshll.u32 %v510_v19, 16  ;;  %v1035_v39 = vshrl.u32 %v511_v24, 16 }
  0xc3   : > { %v512_v40 = vld [vmem:[%s19358_s0 + $0xf8] sm:$0xf]  ;;  %v1007_v41 = vsel %vm15332_vm8, %v999_v18, %v1006_v29  ;;  %v1360_v42 = vsel %vm15160_vm2, %v1008_v30, %v1359_v60  ;;  %v1015_v43 = vor.u32 %v1013_v23, %v1012_v31  ;;  %v1016_v44 = vrot.slane %v1012_v31, 4  ;;  %v1366_v45 = vld [vmem:[#allocation2 + $0x188] sm:$0x1] }
  0xc4   : > { %1358 = vst [vmem:[#allocation2 + $0x178] sm:$0xf] %v1007_v41  ;;  %1361 = vst [vmem:[#allocation2 + $0x17c] sm:$0x1] %v1360_v42  ;;  %v1023_v46 = vor.u32 %v1021_v34, %v1020_v35  ;;  %v1025_v47 = vrot.slane %v1020_v35, 4  ;;  %v1029_v48 = vrot.slane %v1027_v36, 7 }
  0xc5   : > { %v1037_v49 = vrot.slane %v1035_v39, 7  ;;  %v513_v50 = vld [vmem:[%s19358_s0 + $0xfc] sm:$0xf]  ;;  %v1363_v51 = vsel %vm15324_vm7, %v1015_v43, %v1362_v33  ;;  %v1369_v52 = vld [vmem:[#allocation2 + $0x18c] sm:$0xf]  ;;  %v1038_v53 = vshll.u32 %v511_v24, 16 }
  0xc6   : > { %v1044_v54 = vshrl.u32 %v512_v40, 16  ;;  %v1047_v55 = vshll.u32 %v512_v40, 16  ;;  %1364 = vst [vmem:[#allocation2 + $0x180] sm:$0xf] %v1363_v51  ;;  %v1024_v56 = vsel %vm15332_vm8, %v1016_v44, %v1023_v46  ;;  %v1367_v57 = vsel %vm15160_vm2, %v1025_v47, %v1366_v45  ;;  %v1373_v61 = vld [vmem:[#allocation2 + $0x194] sm:$0x1] }
  0xc7   : > { %v1032_v58 = vor.u32 %v1030_v38, %v1029_v48  ;;  %v1033_v59 = vrot.slane %v1029_v48, 4  ;;  %1365 = vst [vmem:[#allocation2 + $0x184] sm:$0xf] %v1024_v56  ;;  %1368 = vst [vmem:[#allocation2 + $0x188] sm:$0x1] %v1367_v57  ;;  %v1040_v62 = vor.u32 %v1038_v53, %v1037_v49  ;;  %v1042_v63 = vrot.slane %v1037_v49, 4 }
  0xc8   : > { %v1046_v0 = vrot.slane %v1044_v54, 7  ;;  %v1052_v1 = vshrl.u32 %v513_v50, 16  ;;  %v1376_v4 = vld [vmem:[#allocation2 + $0x198] sm:$0xf]  ;;  %v1055_v5 = vshll.u32 %v513_v50, 16 }
  0xc9   : > { %v1370_v3 = vsel %vm15324_vm7, %v1032_v58, %v1369_v52  ;;  %v1041_v6 = vsel %vm15332_vm8, %v1033_v59, %v1040_v62  ;;  %v1374_v7 = vsel %vm15160_vm2, %v1042_v63, %v1373_v61  ;;  %v1380_v12 = vld [vmem:[#allocation2 + $0x1a0] sm:$0x1] }
  0xca   : > { %1371 = vst [vmem:[#allocation2 + $0x18c] sm:$0xf] %v1370_v3  ;;  %v1049_v8 = vor.u32 %v1047_v55, %v1046_v0  ;;  %1372 = vst [vmem:[#allocation2 + $0x190] sm:$0xf] %v1041_v6  ;;  %v1050_v9 = vrot.slane %v1046_v0, 4  ;;  %v1054_v10 = vrot.slane %v1052_v1, 7 }
  0xcb   : > { %1375 = vst [vmem:[#allocation2 + $0x194] sm:$0x1] %v1374_v7 }
  0xcc   : > { %v1377_v11 = vsel %vm15324_vm7, %v1049_v8, %v1376_v4  ;;  %v1057_v13 = vor.u32 %v1055_v5, %v1054_v10  ;;  %v1059_v14 = vrot.slane %v1054_v10, 4 }
  0xcd   : > { %1378 = vst [vmem:[#allocation2 + $0x198] sm:$0xf] %v1377_v11 }
  0xce   : > { %v1058_v15 = vsel %vm15332_vm8, %v1050_v9, %v1057_v13  ;;  %v1381_v16 = vsel %vm15160_vm2, %v1059_v14, %v1380_v12 }
  0xcf   : > { %1379 = vst [vmem:[#allocation2 + $0x19c] sm:$0xf] %v1058_v15  ;;  %1382 = vst [vmem:[#allocation2 + $0x1a0] sm:$0x1] %v1381_v16 }
  0xd0 PF: > { %v14687_v32 = vld [vmem:[%s15155_s27 + $0x40] sm:$0xff]   ;;  %v14689_v18 = vld [vmem:[%s15155_s27 + $0x48] sm:$0xff]   ;;  %v14691_v37 = vld [vmem:[%s15155_s27 + $0x50] sm:$0xff]   ;;  %vm1495_vm9 = vsmask.f32 3328  ;;  %vm3373_vm12 = vcmask 1042432  }
  0xd1   : > { %v14688_v17 = vld [vmem:[%s15155_s27 + $0x100] sm:$0xff]   ;;  %13429 = vmatprep.subr.bf16.mxu1 %v14687_v32  ;;  %v14690_v2 = vld [vmem:[%s15155_s27 + $0x108] sm:$0xff]   ;;  %v14692_v19 = vld [vmem:[%s15155_s27 + $0x110] sm:$0xff]   ;;  %vm1496_vm10 = vsmask.f32 7440  ;;  %vm3374_vm13 = vcmask 1046532  }
  0xd2   : > { %13749 = vmatprep.subr.bf16.mxu0 %v14688_v17  ;;  %13430 = vmatpush3.bf16.msra.mxu1 %v14687_v32  ;;  %v14693_v20 = vld [vmem:[%s15155_s27 + $0x58] sm:$0xff]   ;;  %v14695_v22 = vld [vmem:[%s15155_s27 + $0x60] sm:$0xff]   ;;  %v14697_v24 = vld [vmem:[%s15155_s27 + $0x68] sm:$0xff]   ;;  %p12618_p5 = scmp.ge.s32.totalorder %s15135_s16, 1 }
  0xd3   : > { %13750 = vmatpush3.bf16.msra.mxu0 %v14688_v17  ;;  %13431 = vmatprep.subr.bf16.mxu1 %v14689_v18  ;;  %v14694_v21 = vld [vmem:[%s15155_s27 + $0x118] sm:$0xff]   ;;  %v14696_v23 = vld [vmem:[%s15155_s27 + $0x120] sm:$0xff]   ;;  %v14698_v25 = vld [vmem:[%s15155_s27 + $0x128] sm:$0xff]   ;;  %vm11428_vm15 = vcmask (!%p12618_p5), 1043456   ;;  %vm11429_vm0 = vsmask.f32 (!%p12618_p5), 7938 }
  0xd4   : > { %13751 = vmatprep.subr.bf16.mxu0 %v14690_v2  ;;  %v1383_v26 = vld [vmem:[#allocation2] sm:$0xf]  ;;  %v1384_v27 = vld [vmem:[#allocation2 + $0x4] sm:$0xf]  ;;  %v1463_v60 = vld [vmem:[#allocation2 + $0x8] sm:$0x1] }
  0xd5   : > { %v1499_v28 = vshrl.u32 %v1383_v26, 16  ;;  %v1502_v29 = vshll.u32 %v1383_v26, 16  ;;  %v1508_v30 = vshll.u32 %v1384_v27, 16  ;;  %v1512_v31 = vshrl.u32 %v1384_v27, 16  ;;  %v4821_v34 = vld [vmem:[#allocation2 + $0xc] sm:$0xf]  ;;  %vm15727_vm11 = vmor %vm1495_vm9, %vm1496_vm10 }
  0xd6   : > { %13432 = vmatpush3.bf16.msra.mxu1 %v14689_v18  ;;  %v1518_v33 = vshll.u32 %v1463_v60, 16  ;;  %v4822_v38 = vld [vmem:[#allocation2 + $0x10] sm:$0xf]  ;;  %v15720_v39 = vld [vmem:[#allocation2 + $0x14] sm:$0x1]  ;;  %v4918_v44 = vshrl.u32 %v4821_v34, 16  ;;  %vm15895_vm14 = vmor %vm3373_vm12, %vm3374_vm13 }
  0xd7   : > { %13752 = vmatpush3.bf16.msra.mxu0 %v14690_v2  ;;  %13433 = vmatprep.subr.bf16.mxu1 %v14691_v37  ;;  %v1501_v35 = vrot.slane %v1499_v28, 4  ;;  %v1504_v36 = vrot.slane %v1502_v29, 5  ;;  %v14699_v40 = vld [vmem:[%s15155_s27 + $0x70] sm:$0xff]   ;;  %v1510_v41 = vrot.slane %v1508_v30, 5  ;;  %v1514_v42 = vrot.slane %v1512_v31, 4  ;;  %v14701_v51 = vld [vmem:[%s15155_s27 + $0x78] sm:$0xff]   ;;  %vm18865_vm4 = vmand (!%p12618_p5), %vm11428_vm15, %vm11429_vm0 }
  0xd8   : > { %13753 = vmatprep.subr.bf16.mxu0 %v14692_v19  ;;  %v1520_v43 = vrot.slane %v1518_v33, 5  ;;  %v14700_v45 = vld [vmem:[%s15155_s27 + $0x130] sm:$0xff]   ;;  %v4921_v47 = vshll.u32 %v4821_v34, 16  ;;  %v4927_v48 = vshll.u32 %v4822_v38, 16  ;;  %v4931_v49 = vshrl.u32 %v4822_v38, 16  ;;  %v14702_v4 = vld [vmem:[%s15155_s27 + $0x138] sm:$0xff]  }
  0xd9   : > { %v1505_v46 = vor.u32 %v1504_v36, %v1501_v35  ;;  %v1385_v50 = vld [vmem:[#allocation2 + $0xc] sm:$0xf]  ;;  %v1515_v53 = vor.u32 %v1514_v42, %v1510_v41  ;;  %v4920_v54 = vrot.slane %v4918_v44, 4  ;;  %v4937_v55 = vshll.u32 %v15720_v39, 16  ;;  %v1386_v57 = vld [vmem:[#allocation2 + $0x10] sm:$0xf] }
  0xda   : > { %13434 = vmatpush3.bf16.msra.mxu1 %v14691_v37  ;;  %v6364_v56 = vrot.slane %v15720_v39, 5  ;;  %v4923_v59 = vrot.slane %v4921_v47, 5  ;;  %v4929_v61 = vrot.slane %v4927_v48, 5  ;;  %v4933_v62 = vrot.slane %v4931_v49, 4  ;;  %v1464_v8 = vld [vmem:[#allocation2 + $0x14] sm:$0x1] }
  0xdb   : > { %13754 = vmatpush3.bf16.msra.mxu0 %v14692_v19  ;;  %13435 = vmatprep.subr.bf16.mxu1 %v14693_v20  ;;  %v1506_v58 = vrot.slane %v1505_v46, 4  ;;  %v1516_v63 = vrot.slane %v1515_v53, 4  ;;  %v4939_v0 = vrot.slane %v4937_v55, 5  ;;  %v1523_v1 = vshrl.u32 %v1385_v50, 16  ;;  %v4824_v14 = vld [vmem:[#allocation2 + $0x18] sm:$0xf] }
  0xdc   : > { %13755 = vmatprep.subr.bf16.mxu0 %v14694_v21  ;;  %v1526_v3 = vshll.u32 %v1385_v50, 16  ;;  %v4924_v6 = vor.u32 %v4923_v59, %v4920_v54  ;;  %v4934_v7 = vor.u32 %v4933_v62, %v4929_v61  ;;  %v1532_v9 = vshll.u32 %v1386_v57, 16  ;;  %v15738_v19 = vld [vmem:[#allocation2 + $0x1c] sm:$0xf]  ;;  %v15748_v26 = vld [vmem:[%s15155_s27 + $0x140] sm:$0xff]  }
  0xdd   : > { %v1511_v5 = vsel %vm15727_vm11, %v1506_v58, %v1510_v41  ;;  %v1521_v10 = vsel %vm15727_vm11, %v1516_v63, %v1520_v43  ;;  %v1525_v11 = vrot.slane %v1523_v1, 4  ;;  %v1536_v13 = vshrl.u32 %v1386_v57, 16  ;;  %v1387_v35 = vld [vmem:[#allocation2 + $0x18] sm:$0xf]  ;;  %v1388_v42 = vld [vmem:[#allocation2 + $0x1c] sm:$0xf] }
  0xde   : > { %13436 = vmatpush3.bf16.msra.mxu1 %v14693_v20  ;;  %v1528_v12 = vrot.slane %v1526_v3, 5  ;;  %v12049_v15 = vcombine.low %v1511_v5, %v1521_v10  ;;  %v4925_v16 = vrot.slane %v4924_v6, 4  ;;  %v4935_v32 = vrot.slane %v4934_v7, 4  ;;  %v1465_v47 = vld [vmem:[#allocation2 + $0x20] sm:$0x1] }
  0xdf   : > { %13756 = vmatpush3.bf16.msra.mxu0 %v14694_v21  ;;  %13437 = vmatprep.subr.bf16.mxu1 %v14695_v22  ;;  %v1534_v17 = vrot.slane %v1532_v9, 5  ;;  %v1538_v2 = vrot.slane %v1536_v13, 4  ;;  %v1542_v37 = vshll.u32 %v1464_v8, 16  ;;  %v4951_v33 = vshll.u32 %v15738_v19, 16  ;;  %v4827_v53 = vld [vmem:[#allocation2 + $0x24] sm:$0xf] }
  0xe0   : > { %13757 = vmatprep.subr.bf16.mxu0 %v14696_v23  ;;  %v1529_v18 = vor.u32 %v1528_v12, %v1525_v11  ;;  %13445 = vmatprep.mubr.bf16.mxu1 %v12049_v15  ;;  %v4930_v20 = vsel %vm15727_vm11, %v4925_v16, %v4929_v61  ;;  %v4940_v21 = vsel %vm15727_vm11, %v4935_v32, %v4939_v0  ;;  %v4955_v34 = vshrl.u32 %v15738_v19, 16  ;;  %v4828_v59 = vld [vmem:[#allocation2 + $0x28] sm:$0xf]  ;;  %v4829_v3 = vld [vmem:[#allocation2 + $0x2c] sm:$0x1]  ;;  %v14709_v32 = vld [vmem:[%s15155_s27 + $0x10] sm:$0xff]  }
  0xe1   : > { %v12289_v27 = vcombine.low %v4930_v20, %v4940_v21  ;;  %v1539_v28 = vor.u32 %v1538_v2, %v1534_v17  ;;  %v1544_v29 = vrot.slane %v1542_v37, 5  ;;  %v6368_v41 = vrot.slane %v15738_v19, 5  ;;  %v14706_v61 = vld [vmem:[%s15155_s27 + $0x8] sm:$0xff]   ;;  %v1389_v8 = vld [vmem:[#allocation2 + $0x24] sm:$0xf] }
  0xe2   : > { %13438 = vmatpush3.bf16.msra.mxu1 %v14695_v22  ;;  %v14703_v22 = vld [vmem:[%s15155_s27] sm:$0xff]   ;;  %v1530_v60 = vrot.slane %v1529_v18, 4  ;;  %v4953_v44 = vrot.slane %v4951_v33, 5  ;;  %v1550_v58 = vshll.u32 %v1387_v35, 16  ;;  %v1556_v63 = vshll.u32 %v1388_v42, 16  ;;  %v14705_v21 = vld [vmem:[%s15155_s27 + $0x148] sm:$0xff]  }
  0xe3   : > { %13758 = vmatpush3.bf16.msra.mxu0 %v14696_v23  ;;  %13439 = vmatprep.subr.bf16.mxu1 %v14697_v24  ;;  %v15745_v23 = vld [vmem:[#allocation2 + $0x20] sm:$0x1]  ;;  %v1540_v38 = vrot.slane %v1539_v28, 4  ;;  %v15762_v50 = vrot.slane %v6368_v41, 4  ;;  %v1560_v0 = vshrl.u32 %v1388_v42, 16  ;;  %v1566_v1 = vshll.u32 %v1465_v47, 16 }
  0xe4   : > { %13759 = vmatprep.subr.bf16.mxu0 %v14698_v25  ;;  %13765 = vmatprep.mubr.bf16.mxu0 %v12289_v27  ;;  %v1535_v36 = vsel %vm15727_vm11, %v1530_v60, %v1534_v17  ;;  %v6371_v46 = vrot.slane %v15745_v23, 5  ;;  %v1552_v6 = vrot.slane %v1550_v58, 5  ;;  %v4966_v7 = vshrl.u32 %v4827_v53, 16  ;;  %v1390_v20 = vld [vmem:[#allocation2 + $0x28] sm:$0xf]  ;;  %v14707_v47 = vld [vmem:[%s15155_s27 + $0x150] sm:$0xff]  }
  0xe5   : > { %v1545_v48 = vsel %vm15727_vm11, %v1540_v38, %v1544_v29  ;;  %v1558_v9 = vrot.slane %v1556_v63, 5  ;;  %v1562_v10 = vrot.slane %v1560_v0, 4  ;;  %v1568_v11 = vrot.slane %v1566_v1, 5  ;;  %v4830_v38 = vld [vmem:[#allocation2 + $0x30] sm:$0xf] }
  0xe6   : > { %13440 = vmatpush3.bf16.msra.mxu1 %v14697_v24  ;;  %v4942_v24 = vshrl.u32 %v4824_v14, 16  ;;  %v12050_v54 = vcombine.low %v1535_v36, %v1545_v48  ;;  %v4969_v12 = vshll.u32 %v4827_v53, 16  ;;  %v4968_v15 = vrot.slane %v4966_v7, 4  ;;  %v14712_v48 = vld [vmem:[%s15155_s27 + $0x18] sm:$0xff]   ;;  %v1422_v19 = vld [vmem:[#allocation2 + $0x100] sm:$0xf] }
  0xe7   : > { %13760 = vmatpush3.bf16.msra.mxu0 %v14698_v25  ;;  %13441 = vmatprep.subr.bf16.mxu1 %v14699_v40  ;;  %v4945_v25 = vshll.u32 %v4824_v14, 16  ;;  %v4975_v16 = vshll.u32 %v4828_v59, 16  ;;  %v1563_v18 = vor.u32 %v1562_v10, %v1558_v9  ;;  %v4979_v37 = vshrl.u32 %v4828_v59, 16 }
  0xe8   : > { %13761 = vmatprep.subr.bf16.mxu0 %v14700_v45  ;;  %v4944_v30 = vrot.slane %v4942_v24, 4  ;;  %v4971_v2 = vrot.slane %v4969_v12, 5  ;;  %v1571_v27 = vshrl.u32 %v1389_v8, 16  ;;  %v1580_v36 = vshll.u32 %v1390_v20, 16 }
  0xe9   : > { %v4947_v31 = vrot.slane %v4945_v25, 5  ;;  %v4977_v24 = vrot.slane %v4975_v16, 5  ;;  %v4985_v25 = vshll.u32 %v4829_v3, 16  ;;  %v1564_v60 = vrot.slane %v1563_v18, 4  ;;  %v1391_v3 = vld [vmem:[#allocation2 + $0x30] sm:$0xf] }
  0xea   : > { %13442 = vmatpush3.bf16.msra.mxu1 %v14699_v40  ;;  %v4961_v40 = vshll.u32 %v15745_v23, 16  ;;  %v4972_v28 = vor.u32 %v4971_v2, %v4968_v15  ;;  %v4981_v29 = vrot.slane %v4979_v37, 4  ;;  %v4990_v59 = vshrl.u32 %v4830_v38, 16  ;;  %v1467_v2 = vld [vmem:[#allocation2 + $0x38] sm:$0x1] }
  0xeb   : > { %13762 = vmatpush3.bf16.msra.mxu0 %v14700_v45  ;;  %13443 = vmatprep.subr.bf16.mxu1 %v14701_v51  ;;  %v4948_v43 = vor.u32 %v4947_v31, %v4944_v30  ;;  %v4957_v45 = vrot.slane %v4955_v34, 4  ;;  %v1466_v30 = vld [vmem:[#allocation2 + $0x2c] sm:$0x1]  ;;  %v1574_v31 = vshll.u32 %v1389_v8, 16  ;;  %v4987_v34 = vrot.slane %v4985_v25, 5 }
  0xec   : > { %13763 = vmatprep.subr.bf16.mxu0 %v14702_v4  ;;  %v4963_v49 = vrot.slane %v4961_v40, 5  ;;  %v1569_v40 = vsel %vm15727_vm11, %v1564_v60, %v1568_v11  ;;  %v4973_v42 = vrot.slane %v4972_v28, 4  ;;  %v1590_v53 = vshll.u32 %v1466_v30, 16  ;;  %v1392_v8 = vld [vmem:[#allocation2 + $0x34] sm:$0xf]  ;;  %v14710_v60 = vld [vmem:[%s15155_s27 + $0x160] sm:$0xff]  }
  0xed   : > { %v4949_v55 = vrot.slane %v4948_v43, 4  ;;  %v4958_v57 = vor.u32 %v4957_v45, %v4953_v44  ;;  %v4982_v43 = vor.u32 %v4981_v29, %v4977_v24  ;;  %v4831_v45 = vld [vmem:[#allocation2 + $0x34] sm:$0xf]  ;;  %v4993_v0 = vshll.u32 %v4830_v38, 16  ;;  %v6233_v23 = vld [vmem:[#allocation2 + $0x24] sm:$0xe] }
  0xee   : > { %13444 = vmatpush3.bf16.msra.mxu1 %v14701_v51  ;;  %v1547_v51 = vshrl.u32 %v1387_v35, 16  ;;  %v1573_v35 = vrot.slane %v1571_v27, 4  ;;  %v1592_v63 = vrot.slane %v1590_v53, 5  ;;  %v4999_v1 = vshll.u32 %v4831_v45, 16  ;;  %v4833_v27 = vld [vmem:[#allocation2 + $0x3c] sm:$0xf] }
  0xef   : > { %13764 = vmatpush3.bf16.msra.mxu0 %v14702_v4  ;;  %13509 = vmatprep.subr.bf16.mxu1 %v14703_v22  ;;  %v4954_v4 = vsel %vm15727_vm11, %v4949_v55, %v4953_v44  ;;  %v4959_v5 = vrot.slane %v4958_v57, 4  ;;  %v1576_v44 = vrot.slane %v1574_v31, 5  ;;  %v4978_v55 = vsel %vm15727_vm11, %v4973_v42, %v4977_v24 }
  0xf0   : > { %13829 = vmatprep.subr.bf16.mxu0 %v15748_v26  ;;  %v1549_v62 = vrot.slane %v1547_v51, 4  ;;  %v1584_v51 = vshrl.u32 %v1390_v20, 16  ;;  %v4983_v57 = vrot.slane %v4982_v43, 4  ;;  %v5003_v7 = vshrl.u32 %v4831_v45, 16  ;;  %v4835_v43 = vld [vmem:[#allocation2 + $0x44] sm:$0x1] }
  0xf1   : > { %13446 = vmatmul.mubr.bf16.vlgmr.msra.gmra.mrb[0].mxu1 %v12050_v54  ;;  %v4964_v13 = vsel %vm15727_vm11, %v4959_v5, %v4963_v49  ;;  %v1582_v49 = vrot.slane %v1580_v36, 5  ;;  %v4832_v54 = vld [vmem:[#allocation2 + $0x38] sm:$0x1]  ;;  %v1577_v58 = vor.u32 %v1576_v44, %v1573_v35  ;;  %v4995_v12 = vrot.slane %v4993_v0, 5 }
  0xf2   : > { %13510 = vmatpush3.bf16.msra.mxu1 %v14703_v22  ;;  %v1553_v14 = vor.u32 %v1552_v6, %v1549_v62  ;;  %v12290_v17 = vcombine.low %v4954_v4, %v4964_v13  ;;  %v1586_v62 = vrot.slane %v1584_v51, 4  ;;  %v4988_v4 = vsel %vm15727_vm11, %v4983_v57, %v4987_v34  ;;  %v1393_v51 = vld [vmem:[#allocation2 + $0x3c] sm:$0xf] }
  0xf3   : > { %13511 = vmatprep.subr.bf16.mxu1 %v14706_v61  ;;  %v1578_v5 = vrot.slane %v1577_v58, 4  ;;  %v4992_v6 = vrot.slane %v4990_v59, 4  ;;  %v12291_v10 = vcombine.low %v4978_v55, %v4988_v4  ;;  %v5001_v13 = vrot.slane %v4999_v1, 5  ;;  %v1394_v58 = vld [vmem:[#allocation2 + $0x40] sm:$0xf]  ;;  %v14711_v59 = vld [vmem:[%s15155_s27 + $0x168] sm:$0xff]  }
  0xf4   : > { %v1554_v22 = vrot.slane %v1553_v14, 4  ;;  %13766 = vmatmul.mubr.bf16.vlgmr.msra.gmra.mrb[0].mxu0 %v12290_v17  ;;  %v1587_v11 = vor.u32 %v1586_v62, %v1582_v49  ;;  %v5005_v15 = vrot.slane %v5003_v7, 4  ;;  %v5009_v16 = vshll.u32 %v4832_v54, 16  ;;  %v4836_v7 = vld [vmem:[#allocation2 + $0x48] sm:$0xf] }
  0xf5   : > { %13830 = vmatpush3.bf16.msra.mxu0 %v15748_v26  ;;  %v1583_v14 = vsel %vm15727_vm11, %v1578_v5, %v1582_v49  ;;  %13769 = vmatprep.mubr.bf16.mxu0 %v12291_v10  ;;  %v4996_v18 = vor.u32 %v4995_v12, %v4992_v6  ;;  %v1598_v37 = vshll.u32 %v1391_v3, 16  ;;  %v1604_v20 = vshll.u32 %v1392_v8, 16 }
  0xf6   : > { %13512 = vmatpush3.bf16.msra.mxu1 %v14706_v61  ;;  %v1559_v33 = vsel %vm15727_vm11, %v1554_v22, %v1558_v9  ;;  %13831 = vmatprep.subr.bf16.mxu0 %v14705_v21  ;;  %v14708_v61 = vld [vmem:[%s15155_s27 + $0x158] sm:$0xff]   ;;  %v14715_v9 = vld [vmem:[%s15155_s27 + $0x20] sm:$0xff]   ;;  %v1588_v17 = vrot.slane %v1587_v11, 4  ;;  %v5011_v22 = vrot.slane %v5009_v16, 5  ;;  %v1608_v25 = vshrl.u32 %v1392_v8, 16 }
  0xf7   : > { %13513 = vmatprep.subr.bf16.mxu1 %v14709_v32  ;;  %v12051_v26 = vcombine.low %v1559_v33, %v1569_v40  ;;  %v4997_v29 = vrot.slane %v4996_v18, 4  ;;  %v1600_v30 = vrot.slane %v1598_v37, 5  ;;  %v1606_v31 = vrot.slane %v1604_v20, 5  ;;  %v4834_v33 = vld [vmem:[#allocation2 + $0x40] sm:$0xf] }
  0xf8   : > { %v1593_v28 = vsel %vm15727_vm11, %v1588_v17, %v1592_v63  ;;  %v1610_v36 = vrot.slane %v1608_v25, 4  ;;  %v1614_v38 = vshll.u32 %v1467_v2, 16  ;;  %v5014_v44 = vshrl.u32 %v4833_v27, 16  ;;  %v4837_v8 = vld [vmem:[#allocation2 + $0x4c] sm:$0xf] }
  0xf9   : > { %13449 = vmatprep.mubr.bf16.mxu1 %v12051_v26  ;;  %13832 = vmatpush3.bf16.msra.mxu0 %v14705_v21  ;;  %v5006_v21 = vor.u32 %v5005_v15, %v5001_v13  ;;  %v12052_v34 = vcombine.low %v1583_v14, %v1593_v28  ;;  %v5002_v40 = vsel %vm15727_vm11, %v4997_v29, %v5001_v13  ;;  %v5017_v45 = vshll.u32 %v4833_v27, 16 }
  0xfa   : > { %13514 = vmatpush3.bf16.msra.mxu1 %v14709_v32  ;;  %13833 = vmatprep.subr.bf16.mxu0 %v14707_v47  ;;  %v1595_v32 = vshrl.u32 %v1391_v3, 16  ;;  %v1616_v26 = vrot.slane %v1614_v38, 5  ;;  %v5023_v49 = vshll.u32 %v4834_v33, 16  ;;  %v5016_v55 = vrot.slane %v5014_v44, 4  ;;  %v1396_v44 = vld [vmem:[#allocation2 + $0x4c] sm:$0xf] }
  0xfb   : > { %13515 = vmatprep.subr.bf16.mxu1 %v14712_v48  ;;  %v5007_v35 = vrot.slane %v5006_v21, 4  ;;  %13450 = vmatmul.mubr.bf16.gmra.mrb[4].mxu1 %v12052_v34  ;;  %v5019_v57 = vrot.slane %v5017_v45, 5  ;;  %v5027_v0 = vshrl.u32 %v4834_v33, 16  ;;  %v5033_v1 = vshll.u32 %v4835_v43, 16 }
  0xfc   : > { %v1597_v24 = vrot.slane %v1595_v32, 4  ;;  %v5025_v63 = vrot.slane %v5023_v49, 5  ;;  %v1619_v5 = vshrl.u32 %v1393_v51, 16  ;;  %v1622_v6 = vshll.u32 %v1393_v51, 16  ;;  %v14713_v32 = vld [vmem:[%s15155_s27 + $0x170] sm:$0xff]  }
  0xfd   : > { %13834 = vmatpush3.bf16.msra.mxu0 %v14707_v47  ;;  %v5012_v47 = vsel %vm15727_vm11, %v5007_v35, %v5011_v22  ;;  %v5020_v4 = vor.u32 %v5019_v57, %v5016_v55  ;;  %v5029_v10 = vrot.slane %v5027_v0, 4  ;;  %v5035_v11 = vrot.slane %v5033_v1, 5  ;;  %v4838_v22 = vld [vmem:[#allocation2 + $0x50] sm:$0x1]  ;;  %v4839_v51 = vld [vmem:[#allocation2 + $0x54] sm:$0xf] }
  0xfe   : > { %13516 = vmatpush3.bf16.msra.mxu1 %v14712_v48  ;;  %13835 = vmatprep.subr.bf16.mxu0 %v14708_v61  ;;  %v1601_v42 = vor.u32 %v1600_v30, %v1597_v24  ;;  %v1611_v48 = vor.u32 %v1610_v36, %v1606_v31  ;;  %v12292_v53 = vcombine.low %v5002_v40, %v5012_v47  ;;  %v1628_v12 = vshll.u32 %v1394_v58, 16  ;;  %v14714_v30 = vld [vmem:[%s15155_s27 + $0x178] sm:$0xff]   ;;  %v1395_v36 = vld [vmem:[#allocation2 + $0x48] sm:$0xf]  ;;  %v1469_v49 = vld [vmem:[#allocation2 + $0x50] sm:$0x1] }
  0xff   : > { %13517 = vmatprep.subr.bf16.mxu1 %v14715_v9  ;;  %v5021_v14 = vrot.slane %v5020_v4, 4  ;;  %v1621_v15 = vrot.slane %v1619_v5, 4  ;;  %v1624_v16 = vrot.slane %v1622_v6, 5  ;;  %v5030_v17 = vor.u32 %v5029_v10, %v5025_v63  ;;  %v14717_v1 = vld [vmem:[%s15155_s27 + $0x28] sm:$0xff]   ;;  %v4840_v6 = vld [vmem:[#allocation2 + $0x58] sm:$0xf] }
 0x100   : > { %v1602_v54 = vrot.slane %v1601_v42, 4  ;;  %v1612_v62 = vrot.slane %v1611_v48, 4  ;;  %13770 = vmatmul.mubr.bf16.gmra.mrb[4].mxu0 %v12292_v53  ;;  %v1630_v18 = vrot.slane %v1628_v12, 5  ;;  %v1632_v2 = vshrl.u32 %v1394_v58, 16  ;;  %v14716_v53 = vld [vmem:[%s15155_s27 + $0x180] sm:$0xff]  }
 0x101   : > { %13836 = vmatpush3.bf16.msra.mxu0 %v14708_v61  ;;  %v1468_v61 = vld [vmem:[#allocation2 + $0x44] sm:$0x1]  ;;  %v5026_v20 = vsel %vm15727_vm11, %v5021_v14, %v5025_v63  ;;  %v1625_v21 = vor.u32 %v1624_v16, %v1621_v15  ;;  %v5038_v24 = vshrl.u32 %v4836_v7, 16  ;;  %v5041_v25 = vshll.u32 %v4836_v7, 16  ;;  %v1397_v12 = vld [vmem:[#allocation2 + $0x54] sm:$0xf] }
 0x102   : > { %13518 = vmatpush3.bf16.msra.mxu1 %v14715_v9  ;;  %13837 = vmatprep.subr.bf16.mxu0 %v14710_v60  ;;  %v1607_v3 = vsel %vm15727_vm11, %v1602_v54, %v1606_v31  ;;  %v1617_v9 = vsel %vm15727_vm11, %v1612_v62, %v1616_v26  ;;  %v1638_v37 = vshll.u32 %v1468_v61, 16  ;;  %v5031_v27 = vrot.slane %v5030_v17, 4 }
 0x103   : > { %v12053_v13 = vcombine.low %v1607_v3, %v1617_v9  ;;  %v5047_v29 = vshll.u32 %v4837_v8, 16  ;;  %v1626_v31 = vrot.slane %v1625_v21, 4  ;;  %v5040_v33 = vrot.slane %v5038_v24, 4  ;;  %13519 = vmatprep.subr.bf16.mxu1 %v14717_v1  ;;  %v1398_v24 = vld [vmem:[#allocation2 + $0x58] sm:$0xf] }
 0x104   : > { %v1640_v28 = vrot.slane %v1638_v37, 5  ;;  %v5043_v34 = vrot.slane %v5041_v25, 5  ;;  %v5051_v35 = vshrl.u32 %v4837_v8, 16  ;;  %v5036_v38 = vsel %vm15727_vm11, %v5031_v27, %v5035_v11  ;;  %v4841_v11 = vld [vmem:[#allocation2 + $0x5c] sm:$0x1] }
 0x105   : > { %13838 = vmatpush3.bf16.msra.mxu0 %v14710_v60  ;;  %13453 = vmatprep.mubr.bf16.mxu1 %v12053_v13  ;;  %v1634_v60 = vrot.slane %v1632_v2, 4  ;;  %v5049_v42 = vrot.slane %v5047_v29, 5  ;;  %v5057_v43 = vshll.u32 %v4838_v22, 16  ;;  %v12293_v45 = vcombine.low %v5026_v20, %v5036_v38  ;;  %v1470_v38 = vld [vmem:[#allocation2 + $0x5c] sm:$0x1] }
 0x106   : > { %13839 = vmatprep.subr.bf16.mxu0 %v14711_v59  ;;  %v1631_v47 = vsel %vm15727_vm11, %v1626_v31, %v1630_v18  ;;  %v5044_v48 = vor.u32 %v5043_v34, %v5040_v33  ;;  %v5053_v26 = vrot.slane %v5051_v35, 4  ;;  %v1643_v57 = vshrl.u32 %v1395_v36, 16  ;;  %13520 = vmatpush3.bf16.msra.mxu1 %v14717_v1 }
 0x107   : > { %v1635_v40 = vor.u32 %v1634_v60, %v1630_v18  ;;  %v5059_v55 = vrot.slane %v5057_v43, 5  ;;  %v1646_v58 = vshll.u32 %v1395_v36, 16  ;;  %13773 = vmatprep.mubr.bf16.mxu0 %v12293_v45  ;;  %v1652_v63 = vshll.u32 %v1396_v44, 16 }
 0x108   : > { %v5054_v62 = vor.u32 %v5053_v26, %v5049_v42  ;;  %v1656_v0 = vshrl.u32 %v1396_v44, 16  ;;  %v1645_v3 = vrot.slane %v1643_v57, 4  ;;  %v1662_v5 = vshll.u32 %v1469_v49, 16 }
 0x109   : > { %13840 = vmatpush3.bf16.msra.mxu0 %v14711_v59  ;;  %v1636_v54 = vrot.slane %v1635_v40, 4  ;;  %v5045_v59 = vrot.slane %v5044_v48, 4  ;;  %v1648_v4 = vrot.slane %v1646_v58, 5  ;;  %v1654_v10 = vrot.slane %v1652_v63, 5  ;;  %v4843_v48 = vld [vmem:[#allocation2 + $0x64] sm:$0xf] }
 0x10a   : > { %13841 = vmatprep.subr.bf16.mxu0 %v14713_v32  ;;  %v5055_v9 = vrot.slane %v5054_v62, 4  ;;  %v1658_v14 = vrot.slane %v1656_v0, 4  ;;  %v1664_v15 = vrot.slane %v1662_v5, 5  ;;  %v5062_v16 = vshrl.u32 %v4839_v51, 16  ;;  %v4844_v63 = vld [vmem:[#allocation2 + $0x68] sm:$0x1] }
 0x10b   : > { %v1641_v61 = vsel %vm15727_vm11, %v1636_v54, %v1640_v28  ;;  %v5050_v8 = vsel %vm15727_vm11, %v5045_v59, %v5049_v42  ;;  %v1649_v13 = vor.u32 %v1648_v4, %v1645_v3  ;;  %v5065_v17 = vshll.u32 %v4839_v51, 16  ;;  %v4842_v42 = vld [vmem:[#allocation2 + $0x60] sm:$0xf] }
 0x10c   : > { %v12054_v7 = vcombine.low %v1631_v47, %v1641_v61  ;;  %v5071_v18 = vshll.u32 %v4840_v6, 16  ;;  %v5075_v2 = vshrl.u32 %v4840_v6, 16  ;;  %v1659_v21 = vor.u32 %v1658_v14, %v1654_v10  ;;  %v1399_v61 = vld [vmem:[#allocation2 + $0x60] sm:$0xf] }
 0x10d   : > { %13842 = vmatpush3.bf16.msra.mxu0 %v14713_v32  ;;  %v5060_v32 = vsel %vm15727_vm11, %v5055_v9, %v5059_v55  ;;  %v1650_v20 = vrot.slane %v1649_v13, 4  ;;  %v5064_v22 = vrot.slane %v5062_v16, 4  ;;  %v5067_v25 = vrot.slane %v5065_v17, 5 }
 0x10e   : > { %13843 = vmatprep.subr.bf16.mxu0 %v14714_v30  ;;  %13454 = vmatmul.mubr.bf16.gmra.mrb[8].mxu1 %v12054_v7  ;;  %v12294_v37 = vcombine.low %v5050_v8, %v5060_v32  ;;  %v5073_v27 = vrot.slane %v5071_v18, 5  ;;  %v5077_v60 = vrot.slane %v5075_v2, 4  ;;  %v5081_v28 = vshll.u32 %v4841_v11, 16  ;;  %v1400_v7 = vld [vmem:[#allocation2 + $0x64] sm:$0xf] }
 0x10f   : > { %v1655_v29 = vsel %vm15727_vm11, %v1650_v20, %v1654_v10  ;;  %v1667_v31 = vshrl.u32 %v1397_v12, 16  ;;  %v1670_v33 = vshll.u32 %v1397_v12, 16  ;;  %v5068_v34 = vor.u32 %v5067_v25, %v5064_v22 }
 0x110   : > { %13774 = vmatmul.mubr.bf16.gmra.mrb[8].mxu0 %v12294_v37  ;;  %v5078_v35 = vor.u32 %v5077_v60, %v5073_v27  ;;  %v5083_v36 = vrot.slane %v5081_v28, 5  ;;  %v1676_v40 = vshll.u32 %v1398_v24, 16  ;;  %v1680_v47 = vshrl.u32 %v1398_v24, 16  ;;  %v4845_v37 = vld [vmem:[#allocation2 + $0x6c] sm:$0xf] }
 0x111   : > { %13844 = vmatpush3.bf16.msra.mxu0 %v14714_v30  ;;  %v1660_v30 = vrot.slane %v1659_v21, 4  ;;  %v1669_v44 = vrot.slane %v1667_v31, 4  ;;  %v1672_v45 = vrot.slane %v1670_v33, 5  ;;  %v5069_v49 = vrot.slane %v5068_v34, 4 }
 0x112   : > { %13909 = vmatprep.subr.bf16.mxu0 %v14716_v53  ;;  %v5079_v51 = vrot.slane %v5078_v35, 4  ;;  %v1678_v53 = vrot.slane %v1676_v40, 5  ;;  %v1682_v55 = vrot.slane %v1680_v47, 4  ;;  %v1686_v57 = vshll.u32 %v1470_v38, 16  ;;  %v4847_v40 = vld [vmem:[#allocation2 + $0x74] sm:$0x1] }
 0x113   : > { %v1665_v43 = vsel %vm15727_vm11, %v1660_v30, %v1664_v15  ;;  %v1673_v54 = vor.u32 %v1672_v45, %v1669_v44  ;;  %v5086_v58 = vshrl.u32 %v4842_v42, 16  ;;  %v5074_v59 = vsel %vm15727_vm11, %v5069_v49, %v5073_v27  ;;  %v1471_v15 = vld [vmem:[#allocation2 + $0x68] sm:$0x1] }
 0x114   : > { %v12055_v26 = vcombine.low %v1655_v29, %v1665_v43  ;;  %v5084_v62 = vsel %vm15727_vm11, %v5079_v51, %v5083_v36  ;;  %v5089_v0 = vshll.u32 %v4842_v42, 16  ;;  %v5095_v1 = vshll.u32 %v4843_v48, 16  ;;  %v4846_v29 = vld [vmem:[#allocation2 + $0x70] sm:$0xf]  ;;  %v1401_v43 = vld [vmem:[#allocation2 + $0x6c] sm:$0xf] }
 0x115   : > { %v12295_v3 = vcombine.low %v5074_v59, %v5084_v62  ;;  %v1674_v4 = vrot.slane %v1673_v54, 4  ;;  %v1683_v5 = vor.u32 %v1682_v55, %v1678_v53  ;;  %v1688_v6 = vrot.slane %v1686_v57, 5  ;;  %v14719_v55 = vld [vmem:[%s15155_s27 + $0x30] sm:$0xff]  }
 0x116   : > { %13457 = vmatprep.mubr.bf16.mxu1 %v12055_v26  ;;  %v5088_v8 = vrot.slane %v5086_v58, 4  ;;  %v5091_v9 = vrot.slane %v5089_v0, 5  ;;  %v5097_v10 = vrot.slane %v5095_v1, 5  ;;  %v5099_v11 = vshrl.u32 %v4843_v48, 16  ;;  %v1402_v26 = vld [vmem:[#allocation2 + $0x70] sm:$0xf]  ;;  %13521 = vmatprep.subr.bf16.mxu1 %v14719_v55 }
 0x117   : > { %13777 = vmatprep.mubr.bf16.mxu0 %v12295_v3  ;;  %v1679_v12 = vsel %vm15727_vm11, %v1674_v4, %v1678_v53  ;;  %v1684_v13 = vrot.slane %v1683_v5, 4  ;;  %v5105_v14 = vshll.u32 %v4844_v63, 16  ;;  %v1691_v16 = vshrl.u32 %v1399_v61, 16  ;;  %v4848_v4 = vld [vmem:[#allocation2 + $0x78] sm:$0xf]  ;;  %13522 = vmatpush3.bf16.msra.mxu1 %v14719_v55 }
 0x118   : > { %v5092_v32 = vor.u32 %v5091_v9, %v5088_v8  ;;  %v5101_v17 = vrot.slane %v5099_v11, 4  ;;  %v1694_v18 = vshll.u32 %v1399_v61, 16  ;;  %v1700_v2 = vshll.u32 %v1400_v7, 16  ;;  %v1472_v61 = vld [vmem:[#allocation2 + $0x74] sm:$0x1] }
 0x119   : > { %v1689_v20 = vsel %vm15727_vm11, %v1684_v13, %v1688_v6  ;;  %v5107_v21 = vrot.slane %v5105_v14, 5  ;;  %v1693_v22 = vrot.slane %v1691_v16, 4  ;;  %v1704_v24 = vshrl.u32 %v1400_v7, 16  ;;  %v4849_v9 = vld [vmem:[#allocation2 + $0x7c] sm:$0xf] }
 0x11a   : > { %v12056_v25 = vcombine.low %v1679_v12, %v1689_v20  ;;  %v5093_v27 = vrot.slane %v5092_v32, 4  ;;  %v5102_v60 = vor.u32 %v5101_v17, %v5097_v10  ;;  %v1696_v28 = vrot.slane %v1694_v18, 5  ;;  %v4851_v55 = vld [vmem:[#allocation2 + $0x84] sm:$0xf] }
 0x11b   : > { %v1702_v30 = vrot.slane %v1700_v2, 5  ;;  %v1706_v31 = vrot.slane %v1704_v24, 4  ;;  %v1710_v33 = vshll.u32 %v1471_v15, 16  ;;  %v5110_v34 = vshrl.u32 %v4845_v37, 16  ;;  %v4850_v2 = vld [vmem:[#allocation2 + $0x80] sm:$0x1] }
 0x11c   : > { %13458 = vmatmul.mubr.bf16.gmra.mrb[12].mxu1 %v12056_v25  ;;  %v5098_v35 = vsel %vm15727_vm11, %v5093_v27, %v5097_v10  ;;  %v5103_v36 = vrot.slane %v5102_v60, 4  ;;  %v1697_v38 = vor.u32 %v1696_v28, %v1693_v22  ;;  %v5113_v42 = vshll.u32 %v4845_v37, 16  ;;  %v1403_v27 = vld [vmem:[#allocation2 + $0x78] sm:$0xf] }
 0x11d   : > { %v1707_v44 = vor.u32 %v1706_v31, %v1702_v30  ;;  %v1712_v45 = vrot.slane %v1710_v33, 5  ;;  %v5112_v47 = vrot.slane %v5110_v34, 4  ;;  %v5119_v48 = vshll.u32 %v4846_v29, 16  ;;  %v1404_v31 = vld [vmem:[#allocation2 + $0x7c] sm:$0xf] }
 0x11e   : > { %v5108_v49 = vsel %vm15727_vm11, %v5103_v36, %v5107_v21  ;;  %v1698_v51 = vrot.slane %v1697_v38, 4  ;;  %v5115_v53 = vrot.slane %v5113_v42, 5  ;;  %v5123_v54 = vshrl.u32 %v4846_v29, 16 }
 0x11f   : > { %v12296_v57 = vcombine.low %v5098_v35, %v5108_v49  ;;  %v1708_v58 = vrot.slane %v1707_v44, 4  ;;  %v5121_v59 = vrot.slane %v5119_v48, 5  ;;  %v5129_v62 = vshll.u32 %v4847_v40, 16 }
 0x120   : > { %v1703_v63 = vsel %vm15727_vm11, %v1698_v51, %v1702_v30  ;;  %v5116_v0 = vor.u32 %v5115_v53, %v5112_v47  ;;  %v5125_v1 = vrot.slane %v5123_v54, 4  ;;  %v1715_v3 = vshrl.u32 %v1401_v43, 16  ;;  %v1473_v47 = vld [vmem:[#allocation2 + $0x80] sm:$0x1] }
 0x121   : > { %13778 = vmatmul.mubr.bf16.gmra.mrb[12].mxu0 %v12296_v57  ;;  %v1713_v5 = vsel %vm15727_vm11, %v1708_v58, %v1712_v45  ;;  %v5131_v6 = vrot.slane %v5129_v62, 5  ;;  %v1718_v7 = vshll.u32 %v1401_v43, 16  ;;  %v1724_v8 = vshll.u32 %v1402_v26, 16 }
 0x122   : > { %v12057_v10 = vcombine.low %v1703_v63, %v1713_v5  ;;  %v5117_v11 = vrot.slane %v5116_v0, 4  ;;  %v5126_v12 = vor.u32 %v5125_v1, %v5121_v59  ;;  %v1717_v13 = vrot.slane %v1715_v3, 4  ;;  %v4852_v63 = vld [vmem:[#allocation2 + $0x88] sm:$0xf]  ;;  %v1405_v5 = vld [vmem:[#allocation2 + $0x84] sm:$0xf] }
 0x123   : > { %v1720_v14 = vrot.slane %v1718_v7, 5  ;;  %v1726_v15 = vrot.slane %v1724_v8, 5  ;;  %v1728_v16 = vshrl.u32 %v1402_v26, 16  ;;  %v1734_v32 = vshll.u32 %v1472_v61, 16 }
 0x124   : > { %13461 = vmatprep.mubr.bf16.mxu1 %v12057_v10  ;;  %v5122_v17 = vsel %vm15727_vm11, %v5117_v11, %v5121_v59  ;;  %v5127_v18 = vrot.slane %v5126_v12, 4  ;;  %v5134_v37 = vshrl.u32 %v4848_v4, 16  ;;  %v5137_v20 = vshll.u32 %v4848_v4, 16  ;;  %v4853_v4 = vld [vmem:[#allocation2 + $0x8c] sm:$0x1] }
 0x125   : > { %v1721_v21 = vor.u32 %v1720_v14, %v1717_v13  ;;  %v1730_v22 = vrot.slane %v1728_v16, 4  ;;  %v1736_v24 = vrot.slane %v1734_v32, 5  ;;  %v5143_v25 = vshll.u32 %v4849_v9, 16 }
 0x126   : > { %v5132_v60 = vsel %vm15727_vm11, %v5127_v18, %v5131_v6  ;;  %v5136_v28 = vrot.slane %v5134_v37, 4  ;;  %v5139_v29 = vrot.slane %v5137_v20, 5  ;;  %v5147_v30 = vshrl.u32 %v4849_v9, 16 }
 0x127   : > { %v12297_v33 = vcombine.low %v5122_v17, %v5132_v60  ;;  %v1722_v34 = vrot.slane %v1721_v21, 4  ;;  %v1731_v35 = vor.u32 %v1730_v22, %v1726_v15  ;;  %v5145_v36 = vrot.slane %v5143_v25, 5  ;;  %v1406_v17 = vld [vmem:[#allocation2 + $0x88] sm:$0xf] }
 0x128   : > { %v5140_v38 = vor.u32 %v5139_v29, %v5136_v28  ;;  %v5149_v40 = vrot.slane %v5147_v30, 4  ;;  %v5153_v42 = vshll.u32 %v4850_v2, 16  ;;  %v1739_v43 = vshrl.u32 %v1403_v27, 16  ;;  %v1474_v29 = vld [vmem:[#allocation2 + $0x8c] sm:$0x1] }
 0x129   : > { %13781 = vmatprep.mubr.bf16.mxu0 %v12297_v33  ;;  %v1727_v44 = vsel %vm15727_vm11, %v1722_v34, %v1726_v15  ;;  %v1732_v45 = vrot.slane %v1731_v35, 4  ;;  %v1742_v48 = vshll.u32 %v1403_v27, 16  ;;  %v1748_v26 = vshll.u32 %v1404_v31, 16 }
 0x12a   : > { %v5141_v49 = vrot.slane %v5140_v38, 4  ;;  %v5150_v51 = vor.u32 %v5149_v40, %v5145_v36  ;;  %v5155_v53 = vrot.slane %v5153_v42, 5  ;;  %v1741_v54 = vrot.slane %v1739_v43, 4  ;;  %v4855_v38 = vld [vmem:[#allocation2 + $0x94] sm:$0xf] }
 0x12b   : > { %v1737_v57 = vsel %vm15727_vm11, %v1732_v45, %v1736_v24  ;;  %v1744_v58 = vrot.slane %v1742_v48, 5  ;;  %v1750_v59 = vrot.slane %v1748_v26, 5  ;;  %v1752_v62 = vshrl.u32 %v1404_v31, 16  ;;  %v4854_v31 = vld [vmem:[#allocation2 + $0x90] sm:$0xf] }
 0x12c   : > { %v12058_v0 = vcombine.low %v1727_v44, %v1737_v57  ;;  %v5146_v1 = vsel %vm15727_vm11, %v5141_v49, %v5145_v36  ;;  %v5151_v61 = vrot.slane %v5150_v51, 4  ;;  %v1758_v3 = vshll.u32 %v1473_v47, 16  ;;  %v4856_v45 = vld [vmem:[#allocation2 + $0x98] sm:$0x1]  ;;  %v1407_v57 = vld [vmem:[#allocation2 + $0x90] sm:$0xf] }
 0x12d   : > { %v1745_v6 = vor.u32 %v1744_v58, %v1741_v54  ;;  %v1754_v7 = vrot.slane %v1752_v62, 4  ;;  %v5158_v8 = vshrl.u32 %v4851_v55, 16  ;;  %v5161_v9 = vshll.u32 %v4851_v55, 16 }
 0x12e   : > { %13462 = vmatmul.mubr.bf16.gmra.mrb[16].mxu1 %v12058_v0  ;;  %v5156_v10 = vsel %vm15727_vm11, %v5151_v61, %v5155_v53  ;;  %v1760_v11 = vrot.slane %v1758_v3, 5  ;;  %v5167_v12 = vshll.u32 %v4852_v63, 16  ;;  %v5171_v13 = vshrl.u32 %v4852_v63, 16  ;;  %v1408_v0 = vld [vmem:[#allocation2 + $0x94] sm:$0xf] }
 0x12f   : > { %v12298_v14 = vcombine.low %v5146_v1, %v5156_v10  ;;  %v1746_v15 = vrot.slane %v1745_v6, 4  ;;  %v1755_v16 = vor.u32 %v1754_v7, %v1750_v59  ;;  %v5160_v32 = vrot.slane %v5158_v8, 4  ;;  %v1475_v8 = vld [vmem:[#allocation2 + $0x98] sm:$0x1] }
 0x130   : > { %v5163_v18 = vrot.slane %v5161_v9, 5  ;;  %v5169_v2 = vrot.slane %v5167_v12, 5  ;;  %v5173_v37 = vrot.slane %v5171_v13, 4  ;;  %v5177_v20 = vshll.u32 %v4853_v4, 16  ;;  %v14721_v10 = vld [vmem:[%s15155_s27 + $0x38] sm:$0xff]  }
 0x131   : > { %13782 = vmatmul.mubr.bf16.gmra.mrb[16].mxu0 %v12298_v14  ;;  %v1751_v21 = vsel %vm15727_vm11, %v1746_v15, %v1750_v59  ;;  %v1756_v22 = vrot.slane %v1755_v16, 4  ;;  %v1763_v24 = vshrl.u32 %v1405_v5, 16  ;;  %v1766_v25 = vshll.u32 %v1405_v5, 16  ;;  %v4857_v15 = vld [vmem:[#allocation2 + $0x9c] sm:$0xf]  ;;  %13523 = vmatprep.subr.bf16.mxu1 %v14721_v10 }
 0x132   : > { %v5164_v27 = vor.u32 %v5163_v18, %v5160_v32  ;;  %v5174_v60 = vor.u32 %v5173_v37, %v5169_v2  ;;  %v5179_v28 = vrot.slane %v5177_v20, 5  ;;  %v1772_v30 = vshll.u32 %v1406_v17, 16  ;;  %13524 = vmatpush3.bf16.msra.mxu1 %v14721_v10 }
 0x133   : > { %v1761_v33 = vsel %vm15727_vm11, %v1756_v22, %v1760_v11  ;;  %v1765_v34 = vrot.slane %v1763_v24, 4  ;;  %v1768_v35 = vrot.slane %v1766_v25, 5  ;;  %v1776_v36 = vshrl.u32 %v1406_v17, 16  ;;  %v4858_v22 = vld [vmem:[#allocation2 + $0xa0] sm:$0xf] }
 0x134   : > { %v12059_v40 = vcombine.low %v1751_v21, %v1761_v33  ;;  %v5165_v42 = vrot.slane %v5164_v27, 4  ;;  %v5175_v43 = vrot.slane %v5174_v60, 4  ;;  %v1774_v44 = vrot.slane %v1772_v30, 5 }
 0x135   : > { %v1769_v47 = vor.u32 %v1768_v35, %v1765_v34  ;;  %v1778_v48 = vrot.slane %v1776_v36, 4  ;;  %v1782_v26 = vshll.u32 %v1474_v29, 16  ;;  %v5182_v49 = vshrl.u32 %v4854_v31, 16 }
 0x136   : > { %13465 = vmatprep.mubr.bf16.mxu1 %v12059_v40  ;;  %v5170_v51 = vsel %vm15727_vm11, %v5165_v42, %v5169_v2  ;;  %v5180_v53 = vsel %vm15727_vm11, %v5175_v43, %v5179_v28  ;;  %v5185_v54 = vshll.u32 %v4854_v31, 16  ;;  %v5191_v55 = vshll.u32 %v4855_v38, 16  ;;  %v4859_v31 = vld [vmem:[#allocation2 + $0xa4] sm:$0x1]  ;;  %v1409_v40 = vld [vmem:[#allocation2 + $0x9c] sm:$0xf] }
 0x137   : > { %v12299_v58 = vcombine.low %v5170_v51, %v5180_v53  ;;  %v1770_v59 = vrot.slane %v1769_v47, 4  ;;  %v1779_v62 = vor.u32 %v1778_v48, %v1774_v44  ;;  %v1784_v63 = vrot.slane %v1782_v26, 5  ;;  %v1410_v47 = vld [vmem:[#allocation2 + $0xa0] sm:$0xf] }
 0x138   : > { %v5184_v1 = vrot.slane %v5182_v49, 4  ;;  %v5187_v61 = vrot.slane %v5185_v54, 5  ;;  %v5193_v3 = vrot.slane %v5191_v55, 5  ;;  %v5195_v4 = vshrl.u32 %v4855_v38, 16 }
 0x139   : > { %13785 = vmatprep.mubr.bf16.mxu0 %v12299_v58  ;;  %v1775_v5 = vsel %vm15727_vm11, %v1770_v59, %v1774_v44  ;;  %v1780_v6 = vrot.slane %v1779_v62, 4  ;;  %v5201_v7 = vshll.u32 %v4856_v45, 16  ;;  %v1787_v9 = vshrl.u32 %v1407_v57, 16  ;;  %v4860_v59 = vld [vmem:[#allocation2 + $0xa8] sm:$0xf] }
 0x13a   : > { %v5188_v11 = vor.u32 %v5187_v61, %v5184_v1  ;;  %v5197_v12 = vrot.slane %v5195_v4, 4  ;;  %v1790_v13 = vshll.u32 %v1407_v57, 16  ;;  %v1796_v14 = vshll.u32 %v1408_v0, 16  ;;  %v1476_v57 = vld [vmem:[#allocation2 + $0xa4] sm:$0x1] }
 0x13b   : > { %v1785_v16 = vsel %vm15727_vm11, %v1780_v6, %v1784_v63  ;;  %v5203_v32 = vrot.slane %v5201_v7, 5  ;;  %v1789_v17 = vrot.slane %v1787_v9, 4  ;;  %v1800_v18 = vshrl.u32 %v1408_v0, 16  ;;  %v4861_v6 = vld [vmem:[#allocation2 + $0xac] sm:$0xf] }
 0x13c   : > { %v12060_v2 = vcombine.low %v1775_v5, %v1785_v16  ;;  %v5189_v37 = vrot.slane %v5188_v11, 4  ;;  %v5198_v20 = vor.u32 %v5197_v12, %v5193_v3  ;;  %v1792_v21 = vrot.slane %v1790_v13, 5  ;;  %v4862_v11 = vld [vmem:[#allocation2 + $0xb0] sm:$0x1] }
 0x13d   : > { %v1798_v24 = vrot.slane %v1796_v14, 5  ;;  %v1802_v25 = vrot.slane %v1800_v18, 4  ;;  %v1806_v27 = vshll.u32 %v1475_v8, 16  ;;  %v5206_v60 = vshrl.u32 %v4857_v15, 16 }
 0x13e   : > { %13466 = vmatmul.mubr.bf16.gmra.mrb[20].mxu1 %v12060_v2  ;;  %v5194_v28 = vsel %vm15727_vm11, %v5189_v37, %v5193_v3  ;;  %v5199_v29 = vrot.slane %v5198_v20, 4  ;;  %v1793_v30 = vor.u32 %v1792_v21, %v1789_v17  ;;  %v5209_v33 = vshll.u32 %v4857_v15, 16  ;;  %v1411_v2 = vld [vmem:[#allocation2 + $0xa8] sm:$0xf] }
 0x13f   : > { %v1803_v34 = vor.u32 %v1802_v25, %v1798_v24  ;;  %v1808_v35 = vrot.slane %v1806_v27, 5  ;;  %v5208_v36 = vrot.slane %v5206_v60, 4  ;;  %v5215_v38 = vshll.u32 %v4858_v22, 16 }
 0x140   : > { %v5204_v42 = vsel %vm15727_vm11, %v5199_v29, %v5203_v32  ;;  %v1794_v43 = vrot.slane %v1793_v30, 4  ;;  %v5211_v44 = vrot.slane %v5209_v33, 5  ;;  %v5219_v45 = vshrl.u32 %v4858_v22, 16 }
 0x141   : > { %v12300_v48 = vcombine.low %v5194_v28, %v5204_v42  ;;  %v1804_v26 = vrot.slane %v1803_v34, 4  ;;  %v5217_v49 = vrot.slane %v5215_v38, 5  ;;  %v5225_v51 = vshll.u32 %v4859_v31, 16  ;;  %v14725_v34 = vld [vmem:[%s15155_s27 + $0x80] sm:$0xff]   ;;  %v1477_v38 = vld [vmem:[#allocation2 + $0xb0] sm:$0x1] }
 0x142   : > { %v1799_v53 = vsel %vm15727_vm11, %v1794_v43, %v1798_v24  ;;  %v5212_v54 = vor.u32 %v5211_v44, %v5208_v36  ;;  %v5221_v55 = vrot.slane %v5219_v45, 4  ;;  %v1811_v58 = vshrl.u32 %v1409_v40, 16  ;;  %v1412_v24 = vld [vmem:[#allocation2 + $0xac] sm:$0xf]  ;;  %13589 = vmatprep.subr.bf16.mxu1 %v14725_v34 }
 0x143   : > { %13786 = vmatmul.mubr.bf16.gmra.mrb[20].mxu0 %v12300_v48  ;;  %v1809_v62 = vsel %vm15727_vm11, %v1804_v26, %v1808_v35  ;;  %v5227_v63 = vrot.slane %v5225_v51, 5  ;;  %v1814_v0 = vshll.u32 %v1409_v40, 16  ;;  %v1820_v1 = vshll.u32 %v1410_v47, 16  ;;  %v4863_v48 = vld [vmem:[#allocation2 + $0xb4] sm:$0xf] }
 0x144   : > { %v12061_v61 = vcombine.low %v1799_v53, %v1809_v62  ;;  %v5213_v3 = vrot.slane %v5212_v54, 4  ;;  %v5222_v4 = vor.u32 %v5221_v55, %v5217_v49  ;;  %v1813_v5 = vrot.slane %v1811_v58, 4  ;;  %v4864_v54 = vld [vmem:[#allocation2 + $0xb8] sm:$0xf] }
 0x145   : > { %v1816_v7 = vrot.slane %v1814_v0, 5  ;;  %v1822_v8 = vrot.slane %v1820_v1, 5  ;;  %v1824_v9 = vshrl.u32 %v1410_v47, 16  ;;  %v1830_v10 = vshll.u32 %v1476_v57, 16  ;;  %v4865_v0 = vld [vmem:[#allocation2 + $0xbc] sm:$0x1] }
 0x146   : > { %13469 = vmatprep.mubr.bf16.mxu1 %v12061_v61  ;;  %v5218_v12 = vsel %vm15727_vm11, %v5213_v3, %v5217_v49  ;;  %v5223_v13 = vrot.slane %v5222_v4, 4  ;;  %v5230_v14 = vshrl.u32 %v4860_v59, 16  ;;  %v5233_v15 = vshll.u32 %v4860_v59, 16 }
 0x147   : > { %v1817_v16 = vor.u32 %v1816_v7, %v1813_v5  ;;  %v1826_v32 = vrot.slane %v1824_v9, 4  ;;  %v1832_v17 = vrot.slane %v1830_v10, 5  ;;  %v5239_v18 = vshll.u32 %v4861_v6, 16  ;;  %v1413_v7 = vld [vmem:[#allocation2 + $0xb4] sm:$0xf] }
 0x148   : > { %v5228_v37 = vsel %vm15727_vm11, %v5223_v13, %v5227_v63  ;;  %v5232_v20 = vrot.slane %v5230_v14, 4  ;;  %v5235_v21 = vrot.slane %v5233_v15, 5  ;;  %v5243_v22 = vshrl.u32 %v4861_v6, 16 }
 0x149   : > { %v12301_v25 = vcombine.low %v5218_v12, %v5228_v37  ;;  %v1818_v27 = vrot.slane %v1817_v16, 4  ;;  %v1827_v60 = vor.u32 %v1826_v32, %v1822_v8  ;;  %v5241_v28 = vrot.slane %v5239_v18, 5  ;;  %v1414_v12 = vld [vmem:[#allocation2 + $0xb8] sm:$0xf]  ;;  %v1478_v32 = vld [vmem:[#allocation2 + $0xbc] sm:$0x1] }
 0x14a   : > { %v5236_v29 = vor.u32 %v5235_v21, %v5232_v20  ;;  %v5245_v30 = vrot.slane %v5243_v22, 4  ;;  %v5249_v31 = vshll.u32 %v4862_v11, 16  ;;  %v1835_v33 = vshrl.u32 %v1411_v2, 16 }
 0x14b   : > { %13789 = vmatprep.mubr.bf16.mxu0 %v12301_v25  ;;  %v1823_v35 = vsel %vm15727_vm11, %v1818_v27, %v1822_v8  ;;  %v1828_v36 = vrot.slane %v1827_v60, 4  ;;  %v1838_v40 = vshll.u32 %v1411_v2, 16  ;;  %v1844_v42 = vshll.u32 %v1412_v24, 16  ;;  %v4867_v27 = vld [vmem:[#allocation2 + $0xc4] sm:$0xf] }
 0x14c   : > { %v5237_v43 = vrot.slane %v5236_v29, 4  ;;  %v5246_v44 = vor.u32 %v5245_v30, %v5241_v28  ;;  %v5251_v45 = vrot.slane %v5249_v31, 5  ;;  %v1837_v47 = vrot.slane %v1835_v33, 4 }
 0x14d   : > { %v1833_v26 = vsel %vm15727_vm11, %v1828_v36, %v1832_v17  ;;  %v1840_v49 = vrot.slane %v1838_v40, 5  ;;  %v1846_v51 = vrot.slane %v1844_v42, 5  ;;  %v1848_v53 = vshrl.u32 %v1412_v24, 16  ;;  %v4866_v17 = vld [vmem:[#allocation2 + $0xc0] sm:$0xf] }
 0x14e   : > { %v12062_v55 = vcombine.low %v1823_v35, %v1833_v26  ;;  %v5242_v57 = vsel %vm15727_vm11, %v5237_v43, %v5241_v28  ;;  %v5247_v58 = vrot.slane %v5246_v44, 4  ;;  %v1854_v59 = vshll.u32 %v1477_v38, 16  ;;  %v1415_v26 = vld [vmem:[#allocation2 + $0xd8] sm:$0xf] }
 0x14f   : > { %v1841_v62 = vor.u32 %v1840_v49, %v1837_v47  ;;  %v1850_v63 = vrot.slane %v1848_v53, 4  ;;  %v5254_v1 = vshrl.u32 %v4863_v48, 16  ;;  %v5257_v61 = vshll.u32 %v4863_v48, 16 }
 0x150   : > { %13470 = vmatmul.mubr.bf16.gmra.mrb[24].mxu1 %v12062_v55  ;;  %v5252_v3 = vsel %vm15727_vm11, %v5247_v58, %v5251_v45  ;;  %v1856_v4 = vrot.slane %v1854_v59, 5  ;;  %v5263_v5 = vshll.u32 %v4864_v54, 16  ;;  %v5267_v6 = vshrl.u32 %v4864_v54, 16  ;;  %v4868_v45 = vld [vmem:[#allocation2 + $0xc8] sm:$0x1] }
 0x151   : > { %v12302_v8 = vcombine.low %v5242_v57, %v5252_v3  ;;  %v1842_v9 = vrot.slane %v1841_v62, 4  ;;  %v1851_v10 = vor.u32 %v1850_v63, %v1846_v51  ;;  %v5256_v11 = vrot.slane %v5254_v1, 4  ;;  %v1416_v55 = vld [vmem:[#allocation2 + $0xdc] sm:$0xf] }
 0x152   : > { %v5259_v13 = vrot.slane %v5257_v61, 5  ;;  %v5265_v14 = vrot.slane %v5263_v5, 5  ;;  %v5269_v15 = vrot.slane %v5267_v6, 4  ;;  %v5273_v16 = vshll.u32 %v4865_v0, 16  ;;  %v1479_v5 = vld [vmem:[#allocation2 + $0xe0] sm:$0x1] }
 0x153   : > { %13790 = vmatmul.mubr.bf16.gmra.mrb[24].mxu0 %v12302_v8  ;;  %v1847_v18 = vsel %vm15727_vm11, %v1842_v9, %v1846_v51  ;;  %v1852_v2 = vrot.slane %v1851_v10, 4  ;;  %v1859_v37 = vshrl.u32 %v1413_v7, 16  ;;  %v1862_v20 = vshll.u32 %v1413_v7, 16 }
 0x154   : > { %v5260_v21 = vor.u32 %v5259_v13, %v5256_v11  ;;  %v5270_v22 = vor.u32 %v5269_v15, %v5265_v14  ;;  %v5275_v24 = vrot.slane %v5273_v16, 5  ;;  %v1868_v25 = vshll.u32 %v1414_v12, 16  ;;  %v6231_v16 = vld [vmem:[#allocation2 + $0xc] sm:$0xe] }
 0x155   : > { %v1857_v60 = vsel %vm15727_vm11, %v1852_v2, %v1856_v4  ;;  %v1861_v28 = vrot.slane %v1859_v37, 4  ;;  %v1864_v29 = vrot.slane %v1862_v20, 5  ;;  %v1872_v30 = vshrl.u32 %v1414_v12, 16  ;;  %v1417_v2 = vld [vmem:[#allocation2 + $0xe4] sm:$0xf] }
 0x156   : > { %v12063_v31 = vcombine.low %v1847_v18, %v1857_v60  ;;  %v5261_v33 = vrot.slane %v5260_v21, 4  ;;  %v5271_v34 = vrot.slane %v5270_v22, 4  ;;  %v1870_v35 = vrot.slane %v1868_v25, 5  ;;  %v1418_v22 = vld [vmem:[#allocation2 + $0xe8] sm:$0xf] }
 0x157   : > { %v1865_v36 = vor.u32 %v1864_v29, %v1861_v28  ;;  %v1874_v38 = vrot.slane %v1872_v30, 4  ;;  %v1878_v40 = vshll.u32 %v1478_v32, 16  ;;  %v5278_v42 = vshrl.u32 %v4866_v17, 16  ;;  %v14857_v28 = vld [vmem:[#allocation2 + $0x10] sm:$0xf] }
 0x158   : > { %13473 = vmatprep.mubr.bf16.mxu1 %v12063_v31  ;;  %v5266_v43 = vsel %vm15727_vm11, %v5261_v33, %v5265_v14  ;;  %v5276_v44 = vsel %vm15727_vm11, %v5271_v34, %v5275_v24  ;;  %v5281_v47 = vshll.u32 %v4866_v17, 16  ;;  %v5287_v48 = vshll.u32 %v4867_v27, 16  ;;  %v1480_v30 = vld [vmem:[#allocation2 + $0xec] sm:$0x1] }
 0x159   : > { %v12303_v49 = vcombine.low %v5266_v43, %v5276_v44  ;;  %v1866_v51 = vrot.slane %v1865_v36, 4  ;;  %v1875_v53 = vor.u32 %v1874_v38, %v1870_v35  ;;  %v1880_v54 = vrot.slane %v1878_v40, 5  ;;  %v6232_v36 = vld [vmem:[#allocation2 + $0x18] sm:$0xe]  ;;  %v1419_v44 = vld [vmem:[#allocation2 + $0xf0] sm:$0xf] }
 0x15a   : > { %v5280_v57 = vrot.slane %v5278_v42, 4  ;;  %v5283_v58 = vrot.slane %v5281_v47, 5  ;;  %v5289_v59 = vrot.slane %v5287_v48, 5  ;;  %v5291_v62 = vshrl.u32 %v4867_v27, 16 }
 0x15b   : > { %13793 = vmatprep.mubr.bf16.mxu0 %v12303_v49  ;;  %v1871_v63 = vsel %vm15727_vm11, %v1866_v51, %v1870_v35  ;;  %v1876_v0 = vrot.slane %v1875_v53, 4  ;;  %v5297_v1 = vshll.u32 %v4868_v45, 16  ;;  %v1883_v61 = vshrl.u32 %v1415_v26, 16 }
 0x15c   : > { %v5284_v3 = vor.u32 %v5283_v58, %v5280_v57  ;;  %v5293_v4 = vrot.slane %v5291_v62, 4  ;;  %v1886_v6 = vshll.u32 %v1415_v26, 16  ;;  %v1892_v7 = vshll.u32 %v1416_v55, 16 }
 0x15d   : > { %v1881_v8 = vsel %vm15727_vm11, %v1876_v0, %v1880_v54  ;;  %v5299_v9 = vrot.slane %v5297_v1, 5  ;;  %v1885_v10 = vrot.slane %v1883_v61, 4  ;;  %v1896_v11 = vshrl.u32 %v1416_v55, 16  ;;  %v1420_v55 = vld [vmem:[#allocation2 + $0xf4] sm:$0xf] }
 0x15e   : > { %v12064_v12 = vcombine.low %v1871_v63, %v1881_v8  ;;  %v5285_v13 = vrot.slane %v5284_v3, 4  ;;  %v5294_v14 = vor.u32 %v5293_v4, %v5289_v59  ;;  %v1888_v15 = vrot.slane %v1886_v6, 5  ;;  %v1481_v63 = vld [vmem:[#allocation2 + $0xf8] sm:$0x1] }
 0x15f   : > { %v1894_v32 = vrot.slane %v1892_v7, 5  ;;  %v1898_v17 = vrot.slane %v1896_v11, 4  ;;  %v1902_v18 = vshll.u32 %v1479_v5, 16  ;;  %v12329_v60 = vrot.slane %v6231_v16, 9 }
 0x160   : > { %13474 = vmatmul.mubr.bf16.gmra.mrb[28].mxu1 %v12064_v12  ;;  %v5290_v37 = vsel %vm15727_vm11, %v5285_v13, %v5289_v59  ;;  %v5295_v20 = vrot.slane %v5294_v14, 4  ;;  %v1889_v21 = vor.u32 %v1888_v15, %v1885_v10  ;;  %v6361_v29 = vrot.slane %v14857_v28, 5  ;;  %v1421_v12 = vld [vmem:[#allocation2 + $0xfc] sm:$0xf]  ;;  %v14718_v13 = vld [vmem:[%s15155_s27 + $0x188] sm:$0xff]  }
 0x161   : > { %v1899_v24 = vor.u32 %v1898_v17, %v1894_v32  ;;  %v1904_v25 = vrot.slane %v1902_v18, 5  ;;  %v1907_v34 = vshrl.u32 %v1417_v2, 16  ;;  %v1910_v35 = vshll.u32 %v1417_v2, 16 }
 0x162   : > { %v5300_v31 = vsel %vm15727_vm11, %v5295_v20, %v5299_v9  ;;  %v1890_v33 = vrot.slane %v1889_v21, 4  ;;  %v6362_v42 = vsel %vm15895_vm14, %v12329_v60, %v6361_v29  ;;  %v6363_v43 = vrot.slane %v6361_v29, 4  ;;  %v1482_v21 = vld [vmem:[#allocation2 + $0x104] sm:$0x1] }
 0x163   : > { %v12304_v38 = vcombine.low %v5290_v37, %v5300_v31  ;;  %v1900_v40 = vrot.slane %v1899_v24, 4  ;;  %v1909_v47 = vrot.slane %v1907_v34, 4  ;;  %v1912_v48 = vrot.slane %v1910_v35, 5  ;;  %v14859_v37 = vld [vmem:[#allocation2 + $0x2c] sm:$0x1]  ;;  %v14860_v29 = vld [vmem:[%s15155_s27 + $0x180] sm:$0xff]  }
 0x164   : > { %v1895_v45 = vsel %vm15727_vm11, %v1890_v33, %v1894_v32  ;;  %v1916_v26 = vshll.u32 %v1418_v22, 16  ;;  %v6365_v51 = vsel %vm15895_vm14, %v6363_v43, %v6364_v56  ;;  %v1920_v53 = vshrl.u32 %v1418_v22, 16  ;;  %v6234_v34 = vld [vmem:[#allocation2 + $0x30] sm:$0xe]  ;;  %v1423_v43 = vld [vmem:[#allocation2 + $0x108] sm:$0xf] }
 0x165   : > { %13794 = vmatmul.mubr.bf16.gmra.mrb[28].mxu0 %v12304_v38  ;;  %v1905_v49 = vsel %vm15727_vm11, %v1900_v40, %v1904_v25  ;;  %v1926_v54 = vshll.u32 %v1480_v30, 16  ;;  %v12377_v58 = vcombine.low %v6362_v42, %v6365_v51  ;;  %v1913_v59 = vor.u32 %v1912_v48, %v1909_v47  ;;  %v14720_v35 = vld [vmem:[%s15155_s27 + $0x190] sm:$0xff]  }
 0x166   : > { %v12065_v57 = vcombine.low %v1895_v45, %v1905_v49  ;;  %v1918_v62 = vrot.slane %v1916_v26, 5  ;;  %v1922_v0 = vrot.slane %v1920_v53, 4  ;;  %v12330_v61 = vrot.slane %v6232_v36, 9 }
 0x167   : > { %v1928_v1 = vrot.slane %v1926_v54, 5  ;;  %v6372_v39 = vsel %vm15895_vm14, %v15762_v50, %v6371_v46  ;;  %13845 = vmatprep.mubr.bf16.mxu0 %v12377_v58  ;;  %v1914_v56 = vrot.slane %v1913_v59, 4  ;;  %v1931_v3 = vshrl.u32 %v1419_v44, 16  ;;  %v1424_v54 = vld [vmem:[#allocation2 + $0x10c] sm:$0xf] }
 0x168   : > { %13477 = vmatprep.mubr.bf16.mxu1 %v12065_v57  ;;  %v1934_v4 = vshll.u32 %v1419_v44, 16  ;;  %v1940_v5 = vshll.u32 %v1420_v55, 16  ;;  %v1923_v6 = vor.u32 %v1922_v0, %v1918_v62  ;;  %v6369_v7 = vsel %vm15895_vm14, %v12330_v61, %v6368_v41  ;;  %v14858_v41 = vld [vmem:[#allocation2 + $0x28] sm:$0xf]  ;;  %v14861_v0 = vld [vmem:[#allocation2 + $0x34] sm:$0xf] }
 0x169   : > { %v1944_v8 = vshrl.u32 %v1420_v55, 16  ;;  %v1950_v9 = vshll.u32 %v1481_v63, 16  ;;  %v1919_v10 = vsel %vm15727_vm11, %v1914_v56, %v1918_v62  ;;  %v12378_v46 = vcombine.low %v6369_v7, %v6372_v39  ;;  %v14722_v62 = vld [vmem:[%s15155_s27 + $0x198] sm:$0xff]   ;;  %v1483_v56 = vld [vmem:[#allocation2 + $0x110] sm:$0x1] }
 0x16a   : > { %v1933_v50 = vrot.slane %v1931_v3, 4  ;;  %v1936_v11 = vrot.slane %v1934_v4, 5  ;;  %v1924_v14 = vrot.slane %v1923_v6, 4  ;;  %v1942_v15 = vrot.slane %v1940_v5, 5  ;;  %v14862_v61 = vld [vmem:[#allocation2 + $0x38] sm:$0x1] }
 0x16b   : > { %v1946_v16 = vrot.slane %v1944_v8, 4  ;;  %v1952_v32 = vrot.slane %v1950_v9, 5  ;;  %v12331_v18 = vrot.slane %v6233_v23, 9  ;;  %v6375_v2 = vrot.slane %v14858_v41, 5  ;;  %v6235_v8 = vld [vmem:[#allocation2 + $0x3c] sm:$0xe] }
 0x16c   : > { %v1937_v17 = vor.u32 %v1936_v11, %v1933_v50  ;;  %v6378_v20 = vrot.slane %v14859_v37, 5  ;;  %v1929_v22 = vsel %vm15727_vm11, %v1924_v14, %v1928_v1  ;;  %v1955_v25 = vshrl.u32 %v1421_v12, 16  ;;  %v1425_v50 = vld [vmem:[#allocation2 + $0x114] sm:$0xf]  ;;  %v1484_v41 = vld [vmem:[#allocation2 + $0x11c] sm:$0x1] }
 0x16d   : > { %13846 = vmatmul.mubr.bf16.vlgmr.msra.gmra.mrb[0].mxu0 %v12378_v46  ;;  %v1947_v24 = vor.u32 %v1946_v16, %v1942_v15  ;;  %v1958_v60 = vshll.u32 %v1421_v12, 16  ;;  %v12066_v28 = vcombine.low %v1919_v10, %v1929_v22  ;;  %v6376_v31 = vsel %vm15895_vm14, %v12331_v18, %v6375_v2  ;;  %v14726_v22 = vld [vmem:[%s15155_s27 + $0x1a0] sm:$0xff]  }
 0x16e   : > { %13910 = vmatpush3.bf16.msra.mxu0 %v14860_v29  ;;  %v1938_v30 = vrot.slane %v1937_v17, 4  ;;  %v6377_v33 = vrot.slane %v6375_v2, 4  ;;  %v1957_v38 = vrot.slane %v1955_v25, 4  ;;  %v1964_v42 = vshll.u32 %v1422_v19, 16  ;;  %v14863_v17 = vld [vmem:[#allocation2 + $0x40] sm:$0xf] }
 0x16f   : > { %v1948_v36 = vrot.slane %v1947_v24, 4  ;;  %v1960_v40 = vrot.slane %v1958_v60, 5  ;;  %13911 = vmatprep.subr.bf16.mxu0 %v14718_v13  ;;  %13478 = vmatmul.mubr.bf16.gmra.mrb[32].mxu1 %v12066_v28  ;;  %v1968_v47 = vshrl.u32 %v1422_v19, 16  ;;  %v1974_v48 = vshll.u32 %v1482_v21, 16  ;;  %v6236_v29 = vld [vmem:[#allocation2 + $0x48] sm:$0xe] }
 0x170   : > { %v1943_v44 = vsel %vm15727_vm11, %v1938_v30, %v1942_v15  ;;  %v6379_v45 = vsel %vm15895_vm14, %v6377_v33, %v6378_v20  ;;  %v1966_v53 = vrot.slane %v1964_v42, 5  ;;  %v12332_v59 = vrot.slane %v6234_v34, 9  ;;  %v1426_v15 = vld [vmem:[#allocation2 + $0x118] sm:$0xf]  ;;  %v14864_v33 = vld [vmem:[#allocation2 + $0x44] sm:$0x1] }
 0x171   : > { %v1953_v26 = vsel %vm15727_vm11, %v1948_v36, %v1952_v32  ;;  %v12379_v49 = vcombine.low %v6376_v31, %v6379_v45  ;;  %v1961_v51 = vor.u32 %v1960_v40, %v1957_v38  ;;  %v1970_v57 = vrot.slane %v1968_v47, 4 }
 0x172   : > { %v12067_v55 = vcombine.low %v1943_v44, %v1953_v26  ;;  %v1976_v58 = vrot.slane %v1974_v48, 5  ;;  %13912 = vmatpush3.bf16.msra.mxu0 %v14718_v13  ;;  %v6382_v1 = vrot.slane %v14861_v0, 5  ;;  %v6385_v39 = vrot.slane %v14862_v61, 5  ;;  %v1427_v48 = vld [vmem:[#allocation2 + $0x120] sm:$0xf] }
 0x173   : > { %13849 = vmatprep.mubr.bf16.mxu0 %v12379_v49  ;;  %v1962_v63 = vrot.slane %v1961_v51, 4  ;;  %v1979_v3 = vshrl.u32 %v1423_v43, 16  ;;  %13913 = vmatprep.subr.bf16.mxu0 %v14720_v35  ;;  %v1971_v4 = vor.u32 %v1970_v57, %v1966_v53  ;;  %v1982_v5 = vshll.u32 %v1423_v43, 16 }
 0x174   : > { %13481 = vmatprep.mubr.bf16.mxu1 %v12067_v55  ;;  %v1988_v6 = vshll.u32 %v1424_v54, 16  ;;  %v1992_v7 = vshrl.u32 %v1424_v54, 16  ;;  %v6383_v23 = vsel %vm15895_vm14, %v12332_v59, %v6382_v1  ;;  %v6384_v10 = vrot.slane %v6382_v1, 4  ;;  %v1428_v54 = vld [vmem:[#allocation2 + $0x124] sm:$0xf]  ;;  %v14732_v55 = vld [vmem:[%s15155_s27 + $0x1a8] sm:$0xff]  }
 0x175   : > { %v1967_v9 = vsel %vm15727_vm11, %v1962_v63, %v1966_v53  ;;  %v1981_v46 = vrot.slane %v1979_v3, 4  ;;  %v1972_v11 = vrot.slane %v1971_v4, 4  ;;  %v1984_v12 = vrot.slane %v1982_v5, 5  ;;  %v14866_v1 = vld [vmem:[#allocation2 + $0x50] sm:$0x1] }
 0x176   : > { %v1990_v13 = vrot.slane %v1988_v6, 5  ;;  %v1994_v14 = vrot.slane %v1992_v7, 4  ;;  %13914 = vmatpush3.bf16.msra.mxu0 %v14720_v35  ;;  %v6386_v16 = vsel %vm15895_vm14, %v6384_v10, %v6385_v39  ;;  %v1998_v32 = vshll.u32 %v1483_v56, 16  ;;  %v1485_v39 = vld [vmem:[#allocation2 + $0x128] sm:$0x1] }
 0x177   : > { %v12333_v19 = vrot.slane %v6235_v8, 9  ;;  %v6389_v18 = vrot.slane %v14863_v17, 5  ;;  %13915 = vmatprep.subr.bf16.mxu0 %v14722_v62  ;;  %v1977_v2 = vsel %vm15727_vm11, %v1972_v11, %v1976_v58  ;;  %v12380_v37 = vcombine.low %v6383_v23, %v6386_v16  ;;  %v6237_v8 = vld [vmem:[#allocation2 + $0x54] sm:$0xe] }
 0x178   : > { %v1985_v20 = vor.u32 %v1984_v12, %v1981_v46  ;;  %v1995_v21 = vor.u32 %v1994_v14, %v1990_v13  ;;  %v12068_v24 = vcombine.low %v1967_v9, %v1977_v2  ;;  %v2000_v25 = vrot.slane %v1998_v32, 5  ;;  %v14738_v11 = vld [vmem:[%s15155_s27 + $0x1b0] sm:$0xff]  }
 0x179   : > { %v6390_v60 = vsel %vm15895_vm14, %v12333_v19, %v6389_v18  ;;  %v6391_v28 = vrot.slane %v6389_v18, 4  ;;  %13850 = vmatmul.mubr.bf16.gmra.mrb[4].mxu0 %v12380_v37  ;;  %v6392_v34 = vrot.slane %v14864_v33, 5  ;;  %v2003_v35 = vshrl.u32 %v1425_v50, 16  ;;  %v1430_v18 = vld [vmem:[#allocation2 + $0x130] sm:$0xf] }
 0x17a   : > { %v1986_v30 = vrot.slane %v1985_v20, 4  ;;  %v1996_v31 = vrot.slane %v1995_v21, 4  ;;  %13482 = vmatmul.mubr.bf16.gmra.mrb[36].mxu1 %v12068_v24  ;;  %v2006_v36 = vshll.u32 %v1425_v50, 16  ;;  %v2012_v38 = vshll.u32 %v1426_v15, 16  ;;  %13916 = vmatpush3.bf16.msra.mxu0 %v14722_v62  ;;  %v14865_v62 = vld [vmem:[#allocation2 + $0x4c] sm:$0xf] }
 0x17b   : > { %v2016_v40 = vshrl.u32 %v1426_v15, 16  ;;  %v2022_v42 = vshll.u32 %v1484_v41, 16  ;;  %v6393_v45 = vsel %vm15895_vm14, %v6391_v28, %v6392_v34  ;;  %v2005_v47 = vrot.slane %v2003_v35, 4  ;;  %13917 = vmatprep.subr.bf16.mxu0 %v14726_v22  ;;  %v1429_v50 = vld [vmem:[#allocation2 + $0x12c] sm:$0xf] }
 0x17c   : > { %v1991_v43 = vsel %vm15727_vm11, %v1986_v30, %v1990_v13  ;;  %v2001_v44 = vsel %vm15727_vm11, %v1996_v31, %v2000_v25  ;;  %v12381_v49 = vcombine.low %v6390_v60, %v6393_v45  ;;  %v2008_v51 = vrot.slane %v2006_v36, 5  ;;  %v14867_v20 = vld [vmem:[#allocation2 + $0x58] sm:$0xf]  ;;  %v14868_v28 = vld [vmem:[#allocation2 + $0x5c] sm:$0x1] }
 0x17d   : > { %v12069_v26 = vcombine.low %v1991_v43, %v2001_v44  ;;  %v2014_v53 = vrot.slane %v2012_v38, 5  ;;  %v2018_v57 = vrot.slane %v2016_v40, 4  ;;  %v2024_v58 = vrot.slane %v2022_v42, 5  ;;  %v14744_v30 = vld [vmem:[%s15155_s27 + $0x1b8] sm:$0xff]   ;;  %v6238_v43 = vld [vmem:[#allocation2 + $0x60] sm:$0xe] }
 0x17e   : > { %v12334_v59 = vrot.slane %v6236_v29, 9  ;;  %v6396_v63 = vrot.slane %v14865_v62, 5  ;;  %13853 = vmatprep.mubr.bf16.mxu0 %v12381_v49  ;;  %v2009_v0 = vor.u32 %v2008_v51, %v2005_v47  ;;  %v6399_v61 = vrot.slane %v14866_v1, 5  ;;  %13918 = vmatpush3.bf16.msra.mxu0 %v14726_v22  ;;  %v1486_v22 = vld [vmem:[#allocation2 + $0x134] sm:$0x1] }
 0x17f   : > { %13485 = vmatprep.mubr.bf16.mxu1 %v12069_v26  ;;  %v2027_v56 = vshrl.u32 %v1427_v48, 16  ;;  %v2030_v3 = vshll.u32 %v1427_v48, 16  ;;  %v2019_v4 = vor.u32 %v2018_v57, %v2014_v53  ;;  %v2036_v7 = vshll.u32 %v1428_v54, 16  ;;  %13919 = vmatprep.subr.bf16.mxu0 %v14732_v55  ;;  %v1431_v26 = vld [vmem:[#allocation2 + $0x138] sm:$0xf] }
 0x180   : > { %v6397_v5 = vsel %vm15895_vm14, %v12334_v59, %v6396_v63  ;;  %v6398_v6 = vrot.slane %v6396_v63, 4  ;;  %v2010_v9 = vrot.slane %v2009_v0, 4  ;;  %v2040_v46 = vshrl.u32 %v1428_v54, 16  ;;  %v14869_v0 = vld [vmem:[#allocation2 + $0x64] sm:$0xf] }
 0x181   : > { %v2029_v23 = vrot.slane %v2027_v56, 4  ;;  %v2032_v10 = vrot.slane %v2030_v3, 5  ;;  %v2020_v12 = vrot.slane %v2019_v4, 4  ;;  %v2038_v14 = vrot.slane %v2036_v7, 5  ;;  %v1487_v56 = vld [vmem:[#allocation2 + $0x140] sm:$0x1] }
 0x182   : > { %v6400_v13 = vsel %vm15895_vm14, %v6398_v6, %v6399_v61  ;;  %v2046_v15 = vshll.u32 %v1485_v39, 16  ;;  %v2015_v16 = vsel %vm15727_vm11, %v2010_v9, %v2014_v53  ;;  %v2042_v17 = vrot.slane %v2040_v46, 4  ;;  %13920 = vmatpush3.bf16.msra.mxu0 %v14732_v55  ;;  %v1432_v55 = vld [vmem:[#allocation2 + $0x13c] sm:$0xf]  ;;  %v14870_v61 = vld [vmem:[#allocation2 + $0x68] sm:$0x1] }
 0x183   : > { %v12382_v32 = vcombine.low %v6397_v5, %v6400_v13  ;;  %v2033_v19 = vor.u32 %v2032_v10, %v2029_v23  ;;  %v2025_v41 = vsel %vm15727_vm11, %v2020_v12, %v2024_v58  ;;  %v12335_v37 = vrot.slane %v6237_v8, 9  ;;  %13921 = vmatprep.subr.bf16.mxu0 %v14738_v11  ;;  %v6239_v8 = vld [vmem:[#allocation2 + $0x6c] sm:$0xe] }
 0x184   : > { %v2048_v2 = vrot.slane %v2046_v15, 5  ;;  %v6403_v21 = vrot.slane %v14867_v20, 5  ;;  %v12070_v24 = vcombine.low %v2015_v16, %v2025_v41  ;;  %v2043_v60 = vor.u32 %v2042_v17, %v2038_v14 }
 0x185   : > { %13854 = vmatmul.mubr.bf16.gmra.mrb[8].mxu0 %v12382_v32  ;;  %v2034_v25 = vrot.slane %v2033_v19, 4  ;;  %v6406_v29 = vrot.slane %v14868_v28, 5  ;;  %v2051_v34 = vshrl.u32 %v1429_v50, 16  ;;  %v2054_v35 = vshll.u32 %v1429_v50, 16  ;;  %v1433_v50 = vld [vmem:[#allocation2 + $0x144] sm:$0xf] }
 0x186   : > { %v6404_v31 = vsel %vm15895_vm14, %v12335_v37, %v6403_v21  ;;  %v6405_v33 = vrot.slane %v6403_v21, 4  ;;  %13486 = vmatmul.mubr.bf16.gmra.mrb[40].mxu1 %v12070_v24  ;;  %v2044_v38 = vrot.slane %v2043_v60, 4  ;;  %v2060_v40 = vshll.u32 %v1430_v18, 16  ;;  %13922 = vmatpush3.bf16.msra.mxu0 %v14738_v11  ;;  %v14752_v11 = vld [vmem:[%s15155_s27 + $0x1c0] sm:$0xff]  }
 0x187   : > { %v2039_v36 = vsel %vm15727_vm11, %v2034_v25, %v2038_v14  ;;  %v2064_v42 = vshrl.u32 %v1430_v18, 16  ;;  %v2053_v45 = vrot.slane %v2051_v34, 4  ;;  %v2056_v47 = vrot.slane %v2054_v35, 5  ;;  %13923 = vmatprep.subr.bf16.mxu0 %v14744_v30  ;;  %v1434_v18 = vld [vmem:[#allocation2 + $0x148] sm:$0xf] }
 0x188   : > { %v6407_v44 = vsel %vm15895_vm14, %v6405_v33, %v6406_v29  ;;  %v2070_v48 = vshll.u32 %v1486_v22, 16  ;;  %v2049_v49 = vsel %vm15727_vm11, %v2044_v38, %v2048_v2  ;;  %v2062_v53 = vrot.slane %v2060_v40, 5  ;;  %v14871_v22 = vld [vmem:[#allocation2 + $0x70] sm:$0xf]  ;;  %v14872_v25 = vld [vmem:[#allocation2 + $0x74] sm:$0x1] }
 0x189   : > { %v12383_v51 = vcombine.low %v6404_v31, %v6407_v44  ;;  %v2066_v54 = vrot.slane %v2064_v42, 4  ;;  %v12071_v57 = vcombine.low %v2039_v36, %v2049_v49  ;;  %v2057_v58 = vor.u32 %v2056_v47, %v2053_v45  ;;  %v1488_v31 = vld [vmem:[#allocation2 + $0x14c] sm:$0x1]  ;;  %v6240_v42 = vld [vmem:[#allocation2 + $0x78] sm:$0xe] }
 0x18a   : > { %v2072_v59 = vrot.slane %v2070_v48, 5  ;;  %v12336_v62 = vrot.slane %v6238_v43, 9  ;;  %v6410_v1 = vrot.slane %v14869_v0, 5  ;;  %v6413_v39 = vrot.slane %v14870_v61, 5  ;;  %13924 = vmatpush3.bf16.msra.mxu0 %v14744_v30  ;;  %v1435_v48 = vld [vmem:[#allocation2 + $0x150] sm:$0xf] }
 0x18b   : > { %13857 = vmatprep.mubr.bf16.mxu0 %v12383_v51  ;;  %v2067_v63 = vor.u32 %v2066_v54, %v2062_v53  ;;  %v2075_v3 = vshrl.u32 %v1431_v26, 16  ;;  %13489 = vmatprep.mubr.bf16.mxu1 %v12071_v57  ;;  %v2058_v4 = vrot.slane %v2057_v58, 4  ;;  %v2078_v5 = vshll.u32 %v1431_v26, 16  ;;  %v1436_v54 = vld [vmem:[#allocation2 + $0x154] sm:$0xf] }
 0x18c   : > { %v2084_v6 = vshll.u32 %v1432_v55, 16  ;;  %v2088_v7 = vshrl.u32 %v1432_v55, 16  ;;  %v6411_v23 = vsel %vm15895_vm14, %v12336_v62, %v6410_v1  ;;  %v6412_v10 = vrot.slane %v6410_v1, 4  ;;  %13989 = vmatprep.subr.bf16.mxu0 %v14752_v11  ;;  %v1489_v55 = vld [vmem:[#allocation2 + $0x158] sm:$0x1] }
 0x18d   : > { %v2068_v9 = vrot.slane %v2067_v63, 4  ;;  %v2077_v46 = vrot.slane %v2075_v3, 4  ;;  %v2063_v12 = vsel %vm15727_vm11, %v2058_v4, %v2062_v53  ;;  %v2080_v13 = vrot.slane %v2078_v5, 5  ;;  %v14873_v62 = vld [vmem:[#allocation2 + $0x7c] sm:$0xf] }
 0x18e   : > { %v2086_v14 = vrot.slane %v2084_v6, 5  ;;  %v2090_v15 = vrot.slane %v2088_v7, 4  ;;  %v6414_v32 = vsel %vm15895_vm14, %v6412_v10, %v6413_v39  ;;  %v2094_v19 = vshll.u32 %v1487_v56, 16  ;;  %v14874_v61 = vld [vmem:[#allocation2 + $0x80] sm:$0x1] }
 0x18f   : > { %v2073_v16 = vsel %vm15727_vm11, %v2068_v9, %v2072_v59  ;;  %v12337_v17 = vrot.slane %v6239_v8, 9  ;;  %v12384_v2 = vcombine.low %v6411_v23, %v6414_v32  ;;  %v2081_v37 = vor.u32 %v2080_v13, %v2077_v46  ;;  %v6241_v3 = vld [vmem:[#allocation2 + $0x84] sm:$0xe]  ;;  %v1437_v8 = vld [vmem:[#allocation2 + $0x15c] sm:$0xf] }
 0x190   : > { %v12072_v41 = vcombine.low %v2063_v12, %v2073_v16  ;;  %v2091_v20 = vor.u32 %v2090_v15, %v2086_v14  ;;  %v2096_v21 = vrot.slane %v2094_v19, 5  ;;  %v6417_v24 = vrot.slane %v14871_v22, 5  ;;  %v14875_v22 = vld [vmem:[#allocation2 + $0x88] sm:$0xf] }
 0x191   : > { %v6420_v60 = vrot.slane %v14872_v25, 5  ;;  %v2099_v28 = vshrl.u32 %v1433_v50, 16  ;;  %13858 = vmatmul.mubr.bf16.gmra.mrb[12].mxu0 %v12384_v2  ;;  %v2082_v29 = vrot.slane %v2081_v37, 4  ;;  %v2102_v33 = vshll.u32 %v1433_v50, 16  ;;  %v1438_v50 = vld [vmem:[#allocation2 + $0x160] sm:$0xf] }
 0x192   : > { %13490 = vmatmul.mubr.bf16.gmra.mrb[44].mxu1 %v12072_v41  ;;  %v2092_v30 = vrot.slane %v2091_v20, 4  ;;  %v2108_v34 = vshll.u32 %v1434_v18, 16  ;;  %v6418_v35 = vsel %vm15895_vm14, %v12337_v17, %v6417_v24  ;;  %v6419_v36 = vrot.slane %v6417_v24, 4  ;;  %v1490_v37 = vld [vmem:[#allocation2 + $0x164] sm:$0x1] }
 0x193   : > { %v2101_v38 = vrot.slane %v2099_v28, 4  ;;  %v2112_v40 = vshrl.u32 %v1434_v18, 16  ;;  %v2087_v43 = vsel %vm15727_vm11, %v2082_v29, %v2086_v14  ;;  %v2104_v45 = vrot.slane %v2102_v33, 5  ;;  %v6242_v20 = vld [vmem:[#allocation2 + $0x90] sm:$0xe] }
 0x194   : > { %v2097_v44 = vsel %vm15727_vm11, %v2092_v30, %v2096_v21  ;;  %v2110_v47 = vrot.slane %v2108_v34, 5  ;;  %v6421_v49 = vsel %vm15895_vm14, %v6419_v36, %v6420_v60  ;;  %v2118_v53 = vshll.u32 %v1488_v31, 16  ;;  %v14876_v25 = vld [vmem:[#allocation2 + $0x8c] sm:$0x1]  ;;  %v1439_v34 = vld [vmem:[#allocation2 + $0x168] sm:$0xf] }
 0x195   : > { %v12073_v26 = vcombine.low %v2087_v43, %v2097_v44  ;;  %v2114_v51 = vrot.slane %v2112_v40, 4  ;;  %v12385_v57 = vcombine.low %v6418_v35, %v6421_v49  ;;  %v2105_v58 = vor.u32 %v2104_v45, %v2101_v38 }
 0x196   : > { %v12338_v59 = vrot.slane %v6240_v42, 9  ;;  %v6424_v63 = vrot.slane %v14873_v62, 5  ;;  %v2120_v1 = vrot.slane %v2118_v53, 5  ;;  %v6427_v39 = vrot.slane %v14874_v61, 5  ;;  %v1440_v42 = vld [vmem:[#allocation2 + $0x16c] sm:$0xf] }
 0x197   : > { %13493 = vmatprep.mubr.bf16.mxu1 %v12073_v26  ;;  %v2115_v0 = vor.u32 %v2114_v51, %v2110_v47  ;;  %v2123_v56 = vshrl.u32 %v1435_v48, 16  ;;  %13861 = vmatprep.mubr.bf16.mxu0 %v12385_v57  ;;  %v2106_v4 = vrot.slane %v2105_v58, 4  ;;  %v2126_v7 = vshll.u32 %v1435_v48, 16  ;;  %v1491_v58 = vld [vmem:[#allocation2 + $0x170] sm:$0x1] }
 0x198   : > { %v6425_v5 = vsel %vm15895_vm14, %v12338_v59, %v6424_v63  ;;  %v6426_v6 = vrot.slane %v6424_v63, 4  ;;  %v2132_v10 = vshll.u32 %v1436_v54, 16  ;;  %v2136_v46 = vshrl.u32 %v1436_v54, 16  ;;  %v14877_v62 = vld [vmem:[#allocation2 + $0x94] sm:$0xf] }
 0x199   : > { %v2116_v9 = vrot.slane %v2115_v0, 4  ;;  %v2125_v23 = vrot.slane %v2123_v56, 4  ;;  %v2111_v11 = vsel %vm15727_vm11, %v2106_v4, %v2110_v47  ;;  %v2128_v13 = vrot.slane %v2126_v7, 5  ;;  %v14878_v0 = vld [vmem:[#allocation2 + $0x98] sm:$0x1] }
 0x19a   : > { %v6428_v12 = vsel %vm15895_vm14, %v6426_v6, %v6427_v39  ;;  %v2142_v14 = vshll.u32 %v1489_v55, 16  ;;  %v2134_v32 = vrot.slane %v2132_v10, 5  ;;  %v2138_v19 = vrot.slane %v2136_v46, 4  ;;  %v6243_v39 = vld [vmem:[#allocation2 + $0x9c] sm:$0xe] }
 0x19b   : > { %v2121_v15 = vsel %vm15727_vm11, %v2116_v9, %v2120_v1  ;;  %v12386_v16 = vcombine.low %v6425_v5, %v6428_v12  ;;  %v2129_v18 = vor.u32 %v2128_v13, %v2125_v23  ;;  %v12339_v2 = vrot.slane %v6241_v3, 9  ;;  %v1441_v6 = vld [vmem:[#allocation2 + $0x174] sm:$0xf]  ;;  %v1442_v12 = vld [vmem:[#allocation2 + $0x178] sm:$0xf] }
 0x19c   : > { %v12074_v17 = vcombine.low %v2111_v11, %v2121_v15  ;;  %v2144_v41 = vrot.slane %v2142_v14, 5  ;;  %v2139_v21 = vor.u32 %v2138_v19, %v2134_v32  ;;  %v6431_v24 = vrot.slane %v14875_v22, 5 }
 0x19d   : > { %13862 = vmatmul.mubr.bf16.gmra.mrb[16].mxu0 %v12386_v16  ;;  %v6434_v60 = vrot.slane %v14876_v25, 5  ;;  %v2147_v28 = vshrl.u32 %v1437_v8, 16  ;;  %v2130_v29 = vrot.slane %v2129_v18, 4  ;;  %v2150_v30 = vshll.u32 %v1437_v8, 16  ;;  %v6244_v25 = vld [vmem:[#allocation2 + $0xa8] sm:$0xe] }
 0x19e   : > { %13494 = vmatmul.mubr.bf16.gmra.mrb[48].mxu1 %v12074_v17  ;;  %v2156_v31 = vshll.u32 %v1438_v50, 16  ;;  %v2160_v33 = vshrl.u32 %v1438_v50, 16  ;;  %v2140_v35 = vrot.slane %v2139_v21, 4  ;;  %v6432_v36 = vsel %vm15895_vm14, %v12339_v2, %v6431_v24  ;;  %v14880_v21 = vld [vmem:[#allocation2 + $0xa4] sm:$0x1] }
 0x19f   : > { %v6433_v38 = vrot.slane %v6431_v24, 4  ;;  %v2149_v40 = vrot.slane %v2147_v28, 4  ;;  %v2135_v43 = vsel %vm15727_vm11, %v2130_v29, %v2134_v32  ;;  %v2152_v44 = vrot.slane %v2150_v30, 5  ;;  %v1492_v32 = vld [vmem:[#allocation2 + $0x17c] sm:$0x1] }
 0x1a0   : > { %v2158_v45 = vrot.slane %v2156_v31, 5  ;;  %v2162_v47 = vrot.slane %v2160_v33, 4  ;;  %v2145_v48 = vsel %vm15727_vm11, %v2140_v35, %v2144_v41  ;;  %v2166_v49 = vshll.u32 %v1490_v37, 16  ;;  %v14879_v41 = vld [vmem:[#allocation2 + $0xa0] sm:$0xf] }
 0x1a1   : > { %v6435_v26 = vsel %vm15895_vm14, %v6433_v38, %v6434_v60  ;;  %v12340_v51 = vrot.slane %v6242_v20, 9  ;;  %v12075_v53 = vcombine.low %v2135_v43, %v2145_v48  ;;  %v2153_v55 = vor.u32 %v2152_v44, %v2149_v40  ;;  %v1443_v31 = vld [vmem:[#allocation2 + $0x180] sm:$0xf]  ;;  %v1444_v44 = vld [vmem:[#allocation2 + $0x184] sm:$0xf] }
 0x1a2   : > { %v12387_v54 = vcombine.low %v6432_v36, %v6435_v26  ;;  %v2163_v57 = vor.u32 %v2162_v47, %v2158_v45  ;;  %v2168_v59 = vrot.slane %v2166_v49, 5  ;;  %v6438_v63 = vrot.slane %v14877_v62, 5 }
 0x1a3   : > { %v6441_v1 = vrot.slane %v14878_v0, 5  ;;  %v2171_v61 = vshrl.u32 %v1439_v34, 16  ;;  %13497 = vmatprep.mubr.bf16.mxu1 %v12075_v53  ;;  %v2154_v56 = vrot.slane %v2153_v55, 4  ;;  %v2174_v4 = vshll.u32 %v1439_v34, 16  ;;  %v1493_v55 = vld [vmem:[#allocation2 + $0x188] sm:$0x1] }
 0x1a4   : > { %13865 = vmatprep.mubr.bf16.mxu0 %v12387_v54  ;;  %v2164_v3 = vrot.slane %v2163_v57, 4  ;;  %v2180_v5 = vshll.u32 %v1440_v42, 16  ;;  %v6439_v7 = vsel %vm15895_vm14, %v12340_v51, %v6438_v63  ;;  %v6440_v8 = vrot.slane %v6438_v63, 4  ;;  %v6245_v57 = vld [vmem:[#allocation2 + $0xb4] sm:$0xe] }
 0x1a5   : > { %v2173_v9 = vrot.slane %v2171_v61, 4  ;;  %v2184_v23 = vshrl.u32 %v1440_v42, 16  ;;  %v2159_v10 = vsel %vm15727_vm11, %v2154_v56, %v2158_v45  ;;  %v2176_v50 = vrot.slane %v2174_v4, 5  ;;  %v14882_v63 = vld [vmem:[#allocation2 + $0xb0] sm:$0x1] }
 0x1a6   : > { %v2169_v46 = vsel %vm15727_vm11, %v2164_v3, %v2168_v59  ;;  %v2182_v11 = vrot.slane %v2180_v5, 5  ;;  %v6442_v14 = vsel %vm15895_vm14, %v6440_v8, %v6441_v1  ;;  %v2190_v16 = vshll.u32 %v1491_v58, 16  ;;  %v14881_v59 = vld [vmem:[#allocation2 + $0xac] sm:$0xf] }
 0x1a7   : > { %v12076_v13 = vcombine.low %v2159_v10, %v2169_v46  ;;  %v2186_v15 = vrot.slane %v2184_v23, 4  ;;  %v12388_v19 = vcombine.low %v6439_v7, %v6442_v14  ;;  %v2177_v17 = vor.u32 %v2176_v50, %v2173_v9  ;;  %v1445_v4 = vld [vmem:[#allocation2 + $0x18c] sm:$0xf]  ;;  %v16029_v14 = vld [vmem:[#allocation2 + $0x190] sm:$0xf] }
 0x1a8   : > { %v12341_v18 = vrot.slane %v6243_v39, 9  ;;  %v6445_v2 = vrot.slane %v14879_v41, 5  ;;  %v2192_v20 = vrot.slane %v2190_v16, 5  ;;  %v6448_v22 = vrot.slane %v14880_v21, 5  ;;  %v14883_v41 = vld [vmem:[#allocation2 + $0xb8] sm:$0xf] }
 0x1a9   : > { %13498 = vmatmul.mubr.bf16.gmra.mrb[52].mxu1 %v12076_v13  ;;  %v2187_v37 = vor.u32 %v2186_v15, %v2182_v11  ;;  %v2195_v24 = vshrl.u32 %v1441_v6, 16  ;;  %13866 = vmatmul.mubr.bf16.gmra.mrb[20].mxu0 %v12388_v19  ;;  %v2178_v60 = vrot.slane %v2177_v17, 4  ;;  %v2198_v30 = vshll.u32 %v1441_v6, 16  ;;  %v1494_v17 = vld [vmem:[#allocation2 + $0x194] sm:$0x1] }
 0x1aa   : > { %v6446_v28 = vsel %vm15895_vm14, %v12341_v18, %v6445_v2  ;;  %v6447_v29 = vrot.slane %v6445_v2, 4  ;;  %v2204_v35 = vshll.u32 %v1442_v12, 16  ;;  %v2208_v36 = vshrl.u32 %v1442_v12, 16 }
 0x1ab   : > { %v2188_v33 = vrot.slane %v2187_v37, 4  ;;  %v2197_v34 = vrot.slane %v2195_v24, 4  ;;  %v2183_v38 = vsel %vm15727_vm11, %v2178_v60, %v2182_v11  ;;  %v2200_v42 = vrot.slane %v2198_v30, 5  ;;  %v14884_v37 = vld [vmem:[#allocation2 + $0xbc] sm:$0x1] }
 0x1ac   : > { %v6449_v40 = vsel %vm15895_vm14, %v6447_v29, %v6448_v22  ;;  %v2214_v43 = vshll.u32 %v1492_v32, 16  ;;  %v2206_v48 = vrot.slane %v2204_v35, 5  ;;  %v2210_v26 = vrot.slane %v2208_v36, 4  ;;  %v6246_v22 = vld [vmem:[#allocation2 + $0xc0] sm:$0xe] }
 0x1ad   : > { %v2193_v45 = vsel %vm15727_vm11, %v2188_v33, %v2192_v20  ;;  %v12389_v47 = vcombine.low %v6446_v28, %v6449_v40  ;;  %v2201_v51 = vor.u32 %v2200_v42, %v2197_v34  ;;  %v12342_v54 = vrot.slane %v6244_v25, 9  ;;  %v4870_v40 = vld [vmem:[#allocation2 + $0xe8] sm:$0xf]  ;;  %v6247_v42 = vld [vmem:[#allocation2 + $0xe4] sm:$0xe] }
 0x1ae   : > { %v12077_v49 = vcombine.low %v2183_v38, %v2193_v45  ;;  %v2216_v53 = vrot.slane %v2214_v43, 5  ;;  %v2211_v58 = vor.u32 %v2210_v26, %v2206_v48  ;;  %v6452_v62 = vrot.slane %v14881_v59, 5 }
 0x1af   : > { %13869 = vmatprep.mubr.bf16.mxu0 %v12389_v47  ;;  %v6455_v0 = vrot.slane %v14882_v63, 5  ;;  %v2219_v1 = vshrl.u32 %v1443_v31, 16  ;;  %v2202_v61 = vrot.slane %v2201_v51, 4  ;;  %v2222_v39 = vshll.u32 %v1443_v31, 16  ;;  %v14885_v51 = vld [vmem:[#allocation2 + $0xc4] sm:$0xf] }
 0x1b0   : > { %13501 = vmatprep.mubr.bf16.mxu1 %v12077_v49  ;;  %v2228_v56 = vshll.u32 %v1444_v44, 16  ;;  %v2232_v3 = vshrl.u32 %v1444_v44, 16  ;;  %v2212_v5 = vrot.slane %v2211_v58, 4  ;;  %v6453_v6 = vsel %vm15895_vm14, %v12342_v54, %v6452_v62  ;;  %v4871_v54 = vld [vmem:[#allocation2 + $0xec] sm:$0x1] }
 0x1b1   : > { %v6454_v7 = vrot.slane %v6452_v62, 4  ;;  %v2221_v8 = vrot.slane %v2219_v1, 4  ;;  %v2207_v9 = vsel %vm15727_vm11, %v2202_v61, %v2206_v48  ;;  %v2224_v23 = vrot.slane %v2222_v39, 5  ;;  %v14886_v58 = vld [vmem:[#allocation2 + $0xc8] sm:$0x1] }
 0x1b2   : > { %v2230_v10 = vrot.slane %v2228_v56, 5  ;;  %v2234_v46 = vrot.slane %v2232_v3, 4  ;;  %v2217_v50 = vsel %vm15727_vm11, %v2212_v5, %v2216_v53  ;;  %v2238_v12 = vshll.u32 %v1493_v55, 16  ;;  %v16043_v61 = vld [vmem:[#allocation2 + $0xf4] sm:$0xf] }
 0x1b3   : > { %v6456_v11 = vsel %vm15895_vm14, %v6454_v7, %v6455_v0  ;;  %v12343_v13 = vrot.slane %v6245_v57, 9  ;;  %v12078_v15 = vcombine.low %v2207_v9, %v2217_v50  ;;  %v2225_v32 = vor.u32 %v2224_v23, %v2221_v8  ;;  %v16045_v39 = vld [vmem:[#allocation2 + $0xf8] sm:$0x1]  ;;  %v6248_v56 = vld [vmem:[#allocation2 + $0xf0] sm:$0xe] }
 0x1b4   : > { %v12390_v16 = vcombine.low %v6453_v6, %v6456_v11  ;;  %v2235_v19 = vor.u32 %v2234_v46, %v2230_v10  ;;  %v2240_v18 = vrot.slane %v2238_v12, 5  ;;  %v6459_v2 = vrot.slane %v14883_v41, 5  ;;  %v14887_v8 = vld [vmem:[#allocation2] sm:$0xf]  ;;  %v16051_v9 = vld [vmem:[#allocation2 + $0x4] sm:$0xf] }
 0x1b5   : > { %v6462_v20 = vrot.slane %v14884_v37, 5  ;;  %v2243_v21 = vshrl.u32 %v1445_v4, 16  ;;  %13502 = vmatmul.mubr.bf16.gmra.mrb[56].mxu1 %v12078_v15  ;;  %v2226_v24 = vrot.slane %v2225_v32, 4  ;;  %v2246_v60 = vshll.u32 %v1445_v4, 16  ;;  %v6249_v46 = vld [vmem:[#allocation2 + $0xfc] sm:$0xe] }
 0x1b6   : > { %13870 = vmatmul.mubr.bf16.gmra.mrb[24].mxu0 %v12390_v16  ;;  %v2236_v25 = vrot.slane %v2235_v19, 4  ;;  %v2252_v28 = vshll.u32 %v16029_v14, 16  ;;  %v6460_v29 = vsel %vm15895_vm14, %v12343_v13, %v6459_v2  ;;  %v6461_v30 = vrot.slane %v6459_v2, 4  ;;  %v4877_v15 = vld [vmem:[#allocation2 + $0x104] sm:$0x1] }
 0x1b7   : > { %v2245_v31 = vrot.slane %v2243_v21, 4  ;;  %v2256_v33 = vshrl.u32 %v16029_v14, 16  ;;  %v2231_v34 = vsel %vm15727_vm11, %v2226_v24, %v2230_v10  ;;  %v2248_v36 = vrot.slane %v2246_v60, 5  ;;  %v4876_v10 = vld [vmem:[#allocation2 + $0x100] sm:$0xf] }
 0x1b8   : > { %v2241_v35 = vsel %vm15727_vm11, %v2236_v25, %v2240_v18  ;;  %v2254_v38 = vrot.slane %v2252_v28, 5  ;;  %v6463_v44 = vsel %vm15895_vm14, %v6461_v30, %v6462_v20  ;;  %v2262_v47 = vshll.u32 %v1494_v17, 16  ;;  %v4879_v32 = vld [vmem:[#allocation2 + $0x10c] sm:$0xf]  ;;  %v6250_v19 = vld [vmem:[#allocation2 + $0x108] sm:$0xe] }
 0x1b9   : > { %v12079_v43 = vcombine.low %v2231_v34, %v2241_v35  ;;  %v2258_v45 = vrot.slane %v2256_v33, 4  ;;  %v12391_v48 = vcombine.low %v6460_v29, %v6463_v44  ;;  %v2249_v26 = vor.u32 %v2248_v36, %v2245_v31  ;;  %v4880_v20 = vld [vmem:[#allocation2 + $0x110] sm:$0x1]  ;;  %v4882_v21 = vld [vmem:[#allocation2 + $0x118] sm:$0xf] }
 0x1ba   : > { %v12344_v49 = vrot.slane %v6246_v22, 9  ;;  %v6466_v53 = vrot.slane %v14885_v51, 5  ;;  %v2264_v57 = vrot.slane %v2262_v47, 5  ;;  %v6469_v59 = vrot.slane %v14886_v58, 5  ;;  %v6251_v28 = vld [vmem:[#allocation2 + $0x114] sm:$0xe] }
 0x1bb   : > { %13505 = vmatprep.mubr.bf16.mxu1 %v12079_v43  ;;  %v2259_v55 = vor.u32 %v2258_v45, %v2254_v38  ;;  %13873 = vmatprep.mubr.bf16.mxu0 %v12391_v48  ;;  %v2250_v62 = vrot.slane %v2249_v26, 4  ;;  %v12345_v1 = vrot.slane %v6247_v42, 9  ;;  %v6473_v4 = vrot.slane %v4870_v40, 5  ;;  %v4883_v31 = vld [vmem:[#allocation2 + $0x11c] sm:$0x1]  ;;  %v14731_v58 = vld [vmem:[%s15155_s27 + $0x88] sm:$0xff]  }
 0x1bc   : > { %v6467_v63 = vsel %vm15895_vm14, %v12344_v49, %v6466_v53  ;;  %v6468_v0 = vrot.slane %v6466_v53, 4  ;;  %v6476_v5 = vrot.slane %v4871_v54, 5  ;;  %v12089_v23 = vcombine.low %v14887_v8, %v16051_v9  ;;  %v14889_v40 = vld [vmem:[#allocation2 + $0xc] sm:$0xf]  ;;  %v16068_v42 = vld [vmem:[#allocation2 + $0x10] sm:$0xf] }
 0x1bd   : > { %v2260_v3 = vrot.slane %v2259_v55, 4  ;;  %v2255_v6 = vsel %vm15727_vm11, %v2250_v62, %v2254_v38  ;;  %v6474_v12 = vsel %vm15895_vm14, %v12345_v1, %v6473_v4  ;;  %v6475_v13 = vrot.slane %v6473_v4, 4  ;;  %v4885_v38 = vld [vmem:[#allocation2 + $0x124] sm:$0xf]  ;;  %v14891_v48 = vld [vmem:[#allocation2 + $0x18] sm:$0xf] }
 0x1be   : > { %v6470_v7 = vsel %vm15895_vm14, %v6468_v0, %v6469_v59  ;;  %v12346_v18 = vrot.slane %v6248_v56, 9  ;;  %v6480_v41 = vrot.slane %v16043_v61, 5  ;;  %v6483_v2 = vrot.slane %v16045_v39, 5  ;;  %v16071_v26 = vld [vmem:[#allocation2 + $0x1c] sm:$0xf]  ;;  %v14893_v4 = vld [vmem:[%s15155_s27 + $0x80] sm:$0xff]  }
 0x1bf   : > { %v2265_v50 = vsel %vm15727_vm11, %v2260_v3, %v2264_v57  ;;  %v12392_v11 = vcombine.low %v6467_v63, %v6470_v7  ;;  %v6477_v17 = vsel %vm15895_vm14, %v6475_v13, %v6476_v5  ;;  %v12347_v25 = vrot.slane %v6249_v46, 9  ;;  %v4886_v59 = vld [vmem:[#allocation2 + $0x128] sm:$0x1]  ;;  %v4888_v62 = vld [vmem:[#allocation2 + $0x130] sm:$0xf] }
 0x1c0   : > { %v12080_v16 = vcombine.low %v2255_v6, %v2265_v50  ;;  %v12393_v37 = vcombine.low %v6474_v12, %v6477_v17  ;;  %v6481_v22 = vsel %vm15895_vm14, %v12346_v18, %v6480_v41  ;;  %v6482_v24 = vrot.slane %v6480_v41, 4  ;;  %v6252_v56 = vld [vmem:[#allocation2 + $0x120] sm:$0xe]  ;;  %v6253_v7 = vld [vmem:[#allocation2 + $0x12c] sm:$0xe] }
 0x1c1   : > { %13874 = vmatmul.mubr.bf16.gmra.mrb[28].mxu0 %v12392_v11  ;;  %v6487_v60 = vrot.slane %v4876_v10, 5  ;;  %v6490_v29 = vrot.slane %v4877_v15, 5  ;;  %v12348_v30 = vrot.slane %v6250_v19, 9  ;;  %v6494_v36 = vrot.slane %v4879_v32, 5  ;;  %v14737_v10 = vld [vmem:[%s15155_s27 + $0x90] sm:$0xff]  }
 0x1c2   : > { %13506 = vmatmul.mubr.bf16.gmra.mrb[60].mxu1 %v12080_v16  ;;  %13877 = vmatprep.mubr.bf16.mxu0 %v12393_v37  ;;  %v6484_v33 = vsel %vm15895_vm14, %v6482_v24, %v6483_v2  ;;  %v12090_v43 = vcombine.low %v14889_v40, %v16068_v42  ;;  %v6497_v45 = vrot.slane %v4880_v20, 5  ;;  %v12349_v47 = vrot.slane %v6251_v28, 9  ;;  %v4891_v12 = vld [vmem:[#allocation2 + $0x13c] sm:$0xf]  ;;  %v14894_v13 = vld [vmem:[#allocation2 + $0x24] sm:$0xf] }
 0x1c3   : > { %13525 = vmatprep.mubr.bf16.mxu1 %v12089_v23  ;;  %v6488_v34 = vsel %vm15895_vm14, %v12347_v25, %v6487_v60  ;;  %v6489_v35 = vrot.slane %v6487_v60, 4  ;;  %v12394_v44 = vcombine.low %v6481_v22, %v6484_v33  ;;  %v12091_v49 = vcombine.low %v14891_v48, %v16071_v26  ;;  %v4889_v23 = vld [vmem:[#allocation2 + $0x134] sm:$0x1]  ;;  %v16087_v15 = vld [vmem:[#allocation2 + $0x28] sm:$0xf]  ;;  %v14743_v22 = vld [vmem:[%s15155_s27 + $0x98] sm:$0xff]  }
 0x1c4   : > { %v6496_v53 = vrot.slane %v6494_v36, 4  ;;  %v6501_v54 = vrot.slane %v4882_v21, 5  ;;  %v6504_v57 = vrot.slane %v4883_v31, 5  ;;  %v6495_v0 = vsel %vm15895_vm14, %v12348_v30, %v6494_v36  ;;  %v14896_v18 = vld [vmem:[#allocation2 + $0x30] sm:$0xf]  ;;  %v14750_v36 = vld [vmem:[%s15155_s27 + $0xa0] sm:$0xff]  }
 0x1c5   : > { %v6491_v51 = vsel %vm15895_vm14, %v6489_v35, %v6490_v29  ;;  %v6508_v3 = vrot.slane %v4885_v38, 5  ;;  %v6515_v8 = vrot.slane %v4888_v62, 5  ;;  %v12350_v50 = vrot.slane %v6252_v56, 9  ;;  %v16090_v41 = vld [vmem:[#allocation2 + $0x34] sm:$0xf] }
 0x1c6   : > { %v12395_v55 = vcombine.low %v6488_v34, %v6491_v51  ;;  %v6503_v63 = vrot.slane %v6501_v54, 4  ;;  %v6498_v1 = vsel %vm15895_vm14, %v6496_v53, %v6497_v45  ;;  %v6502_v5 = vsel %vm15895_vm14, %v12349_v47, %v6501_v54  ;;  %v4894_v21 = vld [vmem:[#allocation2 + $0x148] sm:$0xf]  ;;  %v4892_v24 = vld [vmem:[#allocation2 + $0x140] sm:$0x1] }
 0x1c7   : > { %v12396_v46 = vcombine.low %v6495_v0, %v6498_v1  ;;  %v6511_v11 = vrot.slane %v4886_v59, 5  ;;  %v12092_v16 = vcombine.low %v14894_v13, %v16087_v15  ;;  %v6510_v19 = vrot.slane %v6508_v3, 4  ;;  %v6254_v28 = vld [vmem:[#allocation2 + $0x138] sm:$0xe]  ;;  %v4895_v33 = vld [vmem:[#allocation2 + $0x14c] sm:$0x1] }
 0x1c8   : > { %v6505_v6 = vsel %vm15895_vm14, %v6503_v63, %v6504_v57  ;;  %v12351_v17 = vrot.slane %v6253_v7, 9  ;;  %v12093_v2 = vcombine.low %v14896_v18, %v16090_v41  ;;  %v6517_v37 = vrot.slane %v6515_v8, 4  ;;  %v6255_v34 = vld [vmem:[#allocation2 + $0x144] sm:$0xe]  ;;  %v14898_v45 = vld [vmem:[#allocation2 + $0x3c] sm:$0xf] }
 0x1c9   : > { %13878 = vmatmul.mubr.bf16.gmra.mrb[32].mxu0 %v12394_v44  ;;  %v12397_v32 = vcombine.low %v6502_v5, %v6505_v6  ;;  %v6518_v20 = vrot.slane %v4889_v23, 5  ;;  %v6509_v25 = vsel %vm15895_vm14, %v12350_v50, %v6508_v3  ;;  %v6512_v60 = vsel %vm15895_vm14, %v6510_v19, %v6511_v11  ;;  %v4897_v44 = vld [vmem:[#allocation2 + $0x154] sm:$0xf]  ;;  %v16103_v47 = vld [vmem:[#allocation2 + $0x40] sm:$0xf]  ;;  %v14760_v63 = vld [vmem:[%s15155_s27 + $0xa8] sm:$0xff]  }
 0x1ca   : > { %13526 = vmatmul.mubr.bf16.vlgmr.msra.gmra.mrb[0].mxu1 %v12090_v43  ;;  %13881 = vmatprep.mubr.bf16.mxu0 %v12395_v55  ;;  %v6522_v29 = vrot.slane %v4891_v12, 5  ;;  %v6516_v30 = vsel %vm15895_vm14, %v12351_v17, %v6515_v8  ;;  %v6529_v35 = vrot.slane %v4894_v21, 5  ;;  %v12398_v38 = vcombine.low %v6509_v25, %v6512_v60  ;;  %v14900_v54 = vld [vmem:[#allocation2 + $0x48] sm:$0xf]  ;;  %v16106_v55 = vld [vmem:[#allocation2 + $0x4c] sm:$0xf] }
 0x1cb   : > { %13590 = vmatpush3.bf16.msra.mxu1 %v14893_v4  ;;  %13529 = vmatprep.mubr.bf16.mxu1 %v12091_v49  ;;  %v6519_v31 = vsel %vm15895_vm14, %v6517_v37, %v6518_v20  ;;  %v12352_v40 = vrot.slane %v6254_v28, 9  ;;  %v6525_v43 = vrot.slane %v4892_v24, 5  ;;  %v12094_v48 = vcombine.low %v14898_v45, %v16103_v47  ;;  %v4900_v62 = vld [vmem:[#allocation2 + $0x160] sm:$0xf]  ;;  %v4898_v56 = vld [vmem:[#allocation2 + $0x158] sm:$0x1] }
 0x1cc   : > { %13591 = vmatprep.subr.bf16.mxu1 %v14731_v58  ;;  %v12399_v49 = vcombine.low %v6516_v30, %v6519_v31  ;;  %v6524_v51 = vrot.slane %v6522_v29, 4  ;;  %v12353_v53 = vrot.slane %v6255_v34, 9  ;;  %v12095_v57 = vcombine.low %v14900_v54, %v16106_v55  ;;  %v6256_v3 = vld [vmem:[#allocation2 + $0x150] sm:$0xe]  ;;  %v4901_v7 = vld [vmem:[#allocation2 + $0x164] sm:$0x1] }
 0x1cd   : > { %v6532_v59 = vrot.slane %v4895_v33, 5  ;;  %v6523_v0 = vsel %vm15895_vm14, %v12352_v40, %v6522_v29  ;;  %v6536_v4 = vrot.slane %v4897_v44, 5  ;;  %v6257_v8 = vld [vmem:[#allocation2 + $0x15c] sm:$0xe]  ;;  %v6543_v23 = vrot.slane %v4900_v62, 5  ;;  %v16135_v40 = vld [vmem:[%s15155_s27 + $0xc0] sm:$0xff]  }
 0x1ce   : > { %v6526_v1 = vsel %vm15895_vm14, %v6524_v51, %v6525_v43  ;;  %v6530_v5 = vsel %vm15895_vm14, %v12353_v53, %v6529_v35  ;;  %v12354_v50 = vrot.slane %v6256_v3, 9  ;;  %v6539_v11 = vrot.slane %v4898_v56, 5  ;;  %v4903_v12 = vld [vmem:[#allocation2 + $0x16c] sm:$0xf]  ;;  %v14902_v13 = vld [vmem:[#allocation2 + $0x54] sm:$0xf] }
 0x1cf   : > { %13592 = vmatpush3.bf16.msra.mxu1 %v14731_v58  ;;  %v6531_v58 = vrot.slane %v6529_v35, 4  ;;  %v6538_v17 = vrot.slane %v6536_v4, 4  ;;  %v12355_v18 = vrot.slane %v6257_v8, 9  ;;  %v14904_v37 = vld [vmem:[#allocation2 + $0x60] sm:$0xf]  ;;  %v6546_v24 = vrot.slane %v4901_v7, 5 }
 0x1d0   : > { %13593 = vmatprep.subr.bf16.mxu1 %v14737_v10  ;;  %v16122_v20 = vld [vmem:[#allocation2 + $0x64] sm:$0xf]  ;;  %v6258_v25 = vld [vmem:[#allocation2 + $0x168] sm:$0xe]  ;;  %v14780_v60 = vld [vmem:[%s15155_s27 + $0xb8] sm:$0xff]   ;;  %v6537_v29 = vsel %vm15895_vm14, %v12354_v50, %v6536_v4  ;;  %v6550_v31 = vrot.slane %v4903_v12, 5 }
 0x1d1   : > { %13882 = vmatmul.mubr.bf16.gmra.mrb[36].mxu0 %v12396_v46  ;;  %v6533_v6 = vsel %vm15895_vm14, %v6531_v58, %v6532_v59  ;;  %v12400_v46 = vcombine.low %v6523_v0, %v6526_v1  ;;  %v12097_v21 = vcombine.low %v14904_v37, %v16122_v20  ;;  %v4904_v28 = vld [vmem:[#allocation2 + $0x170] sm:$0x1]  ;;  %v6540_v30 = vsel %vm15895_vm14, %v6538_v17, %v6539_v11  ;;  %v4907_v33 = vld [vmem:[#allocation2 + $0x17c] sm:$0x1]  ;;  %v14906_v43 = vld [vmem:[#allocation2 + $0x6c] sm:$0xf] }
 0x1d2   : > { %13530 = vmatmul.mubr.bf16.gmra.mrb[4].mxu1 %v12092_v16  ;;  %13885 = vmatprep.mubr.bf16.mxu0 %v12397_v32  ;;  %v16119_v16 = vld [vmem:[#allocation2 + $0x58] sm:$0xf]  ;;  %v12401_v19 = vcombine.low %v6530_v5, %v6533_v6  ;;  %v6544_v34 = vsel %vm15895_vm14, %v12355_v18, %v6543_v23  ;;  %v16137_v44 = vld [vmem:[#allocation2 + $0x70] sm:$0xf]  ;;  %v4909_v51 = vld [vmem:[#allocation2 + $0x184] sm:$0xf] }
 0x1d3   : > { %13533 = vmatprep.mubr.bf16.mxu1 %v12093_v2  ;;  %13594 = vmatpush3.bf16.msra.mxu1 %v14737_v10  ;;  %v14770_v10 = vld [vmem:[%s15155_s27 + $0xb0] sm:$0xff]   ;;  %v12096_v32 = vcombine.low %v14902_v13, %v16119_v16  ;;  %v4906_v2 = vld [vmem:[#allocation2 + $0x178] sm:$0xf]  ;;  %v12098_v45 = vcombine.low %v14906_v43, %v16137_v44  ;;  %v6552_v54 = vrot.slane %v6550_v31, 4  ;;  %v16140_v62 = vld [vmem:[#allocation2 + $0x7c] sm:$0xf] }
 0x1d4   : > { %13595 = vmatprep.subr.bf16.mxu1 %v14743_v22  ;;  %v14908_v59 = vld [vmem:[#allocation2 + $0x78] sm:$0xf]  ;;  %v6560_v1 = vrot.slane %v4907_v33, 5  ;;  %v4912_v56 = vld [vmem:[#allocation2 + $0x190] sm:$0xf]  ;;  %v6564_v7 = vrot.slane %v4909_v51, 5 }
 0x1d5   : > { %v4910_v5 = vld [vmem:[#allocation2 + $0x188] sm:$0x1]  ;;  %v6260_v6 = vld [vmem:[#allocation2 + $0x180] sm:$0xe]  ;;  %v4913_v50 = vld [vmem:[#allocation2 + $0x194] sm:$0x1] }
 0x1d6   : > { %v12358_v12 = vrot.slane %v6260_v6, 9  ;;  %v6567_v13 = vrot.slane %v4910_v5, 5  ;;  %v16152_v17 = vld [vmem:[#allocation2 + $0x88] sm:$0xf]  ;;  %v6566_v37 = vrot.slane %v6564_v7, 4  ;;  %v14748_v5 = vld [vmem:[#allocation2 + $0x18] sm:$0xff]  }
 0x1d7   : > { %13596 = vmatpush3.bf16.msra.mxu1 %v14743_v22  ;;  %v6545_v22 = vrot.slane %v6543_v23, 4  ;;  %v14920_v6 = vld [vmem:[#allocation2 + $0xd8] sm:$0xf]  ;;  %vm10785_vm1 = vsmask.f32 (!%p12618_p5), 256  ;;  %vm11435_vm3 = vcmask (!%p12618_p5), 1040384  }
 0x1d8   : > { %13597 = vmatprep.subr.bf16.mxu1 %v14750_v36  ;;  %vm10786_vm2 = vsmask.f32 (!%p12618_p5), 4368  ;;  %vm18884_vm6 = vmand (!%p12618_p5), %vm11435_vm3, %vm10785_vm1 }
 0x1d9   : > { %13886 = vmatmul.mubr.bf16.gmra.mrb[40].mxu0 %v12398_v38  ;;  %v6547_v35 = vsel %vm15895_vm14, %v6545_v22, %v6546_v24  ;;  %v6557_v38 = vrot.slane %v4906_v2, 5  ;;  %v14912_v22 = vld [vmem:[#allocation2 + $0x90] sm:$0xf]  ;;  %v16155_v24 = vld [vmem:[#allocation2 + $0x94] sm:$0xf]  ;;  %vm18874_vm5 = vmor (!%p12618_p5), %vm10785_vm1, %vm10786_vm2 }
 0x1da   : > { %13534 = vmatmul.mubr.bf16.gmra.mrb[8].mxu1 %v12094_v48  ;;  %13889 = vmatprep.mubr.bf16.mxu0 %v12399_v49  ;;  %v12402_v48 = vcombine.low %v6537_v29, %v6540_v30  ;;  %v12356_v49 = vrot.slane %v6258_v25, 9  ;;  %v12403_v53 = vcombine.low %v6544_v34, %v6547_v35  ;;  %v12101_v25 = vcombine.low %v14912_v22, %v16155_v24  ;;  %v16191_v22 = vld [vmem:[#allocation2 + $0x100] sm:$0xf] }
 0x1db   : > { %13537 = vmatprep.mubr.bf16.mxu1 %v12095_v57  ;;  %13598 = vmatpush3.bf16.msra.mxu1 %v14750_v36  ;;  %v6259_v36 = vld [vmem:[#allocation2 + $0x174] sm:$0xe]  ;;  %v6553_v57 = vrot.slane %v4904_v28, 5  ;;  %v6559_v0 = vrot.slane %v6557_v38, 4  ;;  %v6574_v28 = vrot.slane %v4913_v50, 5  ;;  %v6565_v29 = vsel %vm15895_vm14, %v12358_v12, %v6564_v7 }
 0x1dc   : > { %13599 = vmatprep.subr.bf16.mxu1 %v14760_v63  ;;  %v12357_v58 = vrot.slane %v6259_v36, 9  ;;  %v6551_v3 = vsel %vm15895_vm14, %v12356_v49, %v6550_v31  ;;  %v6568_v30 = vsel %vm15895_vm14, %v6566_v37, %v6567_v13  ;;  %v6262_v31 = vld [vmem:[#allocation2 + $0x198] sm:$0xe]  ;;  %v4916_v36 = vld [vmem:[#allocation2 + $0x1a0] sm:$0x1] }
 0x1dd   : > { %v6554_v4 = vsel %vm15895_vm14, %v6552_v54, %v6553_v57  ;;  %v6561_v23 = vsel %vm15895_vm14, %v6559_v0, %v6560_v1  ;;  %v12360_v43 = vrot.slane %v6262_v31, 9  ;;  %v6581_v54 = vrot.slane %v4916_v36, 5  ;;  %v14916_v57 = vld [vmem:[#allocation2 + $0xa8] sm:$0xf]  ;;  %v16179_v7 = vld [vmem:[#allocation2 + $0xdc] sm:$0xf] }
 0x1de   : > { %v6558_v8 = vsel %vm15895_vm14, %v12357_v58, %v6557_v38  ;;  %v12404_v11 = vcombine.low %v6551_v3, %v6554_v4  ;;  %v12406_v38 = vcombine.low %v6565_v29, %v6568_v30  ;;  %v16169_v58 = vld [vmem:[#allocation2 + $0xac] sm:$0xf]  ;;  %v16176_v3 = vld [vmem:[#allocation2 + $0xb8] sm:$0xf]  ;;  %v16185_v12 = vld [vmem:[#allocation2 + $0xf4] sm:$0xf] }
 0x1df   : > { %13600 = vmatpush3.bf16.msra.mxu1 %v14760_v63  ;;  %v12099_v63 = vcombine.low %v14908_v59, %v16140_v62  ;;  %v12405_v2 = vcombine.low %v6558_v8, %v6561_v23  ;;  %v12103_v59 = vcombine.low %v14916_v57, %v16169_v58  ;;  %v12105_v8 = vcombine.low %v14920_v6, %v16179_v7  ;;  %v14751_v23 = vld [vmem:[#allocation2 + $0x24] sm:$0xff]   ;;  %v14756_v37 = vld [vmem:[#allocation2 + $0x3c] sm:$0xff]   ;;  %v16194_v29 = vld [vmem:[#allocation2 + $0x10c] sm:$0xf] }
 0x1e0   : > { %13601 = vmatprep.subr.bf16.mxu1 %v14770_v10  ;;  %v14782_v31 = vld [vmem:[%s15155_s27 + $0x1d8] sm:$0xff]   ;;  %v14766_v57 = vld [vmem:[#allocation2 + $0x6c] sm:$0xff]  }
 0x1e1   : > { %13890 = vmatmul.mubr.bf16.gmra.mrb[44].mxu0 %v12400_v46  ;;  %v6571_v46 = vrot.slane %v4912_v56, 5  ;;  %v14918_v56 = vld [vmem:[#allocation2 + $0xb4] sm:$0xf]  ;;  %v16199_v36 = vld [vmem:[#allocation2 + $0x118] sm:$0xf] }
 0x1e2   : > { %13538 = vmatmul.mubr.bf16.gmra.mrb[12].mxu1 %v12096_v32  ;;  %13893 = vmatprep.mubr.bf16.mxu0 %v12401_v19  ;;  %v4915_v32 = vld [vmem:[#allocation2 + $0x19c] sm:$0xf]  ;;  %v14910_v19 = vld [vmem:[#allocation2 + $0x84] sm:$0xf]  ;;  %v12104_v4 = vcombine.low %v14918_v56, %v16176_v3  ;;  %v14937_v56 = vld [vmem:[#allocation2 + $0x138] sm:$0xf] }
 0x1e3   : > { %13541 = vmatprep.mubr.bf16.mxu1 %v12097_v21  ;;  %13602 = vmatpush3.bf16.msra.mxu1 %v14770_v10  ;;  %v6261_v10 = vld [vmem:[#allocation2 + $0x18c] sm:$0xe]  ;;  %v12100_v18 = vcombine.low %v14910_v19, %v16152_v17  ;;  %v6578_v33 = vrot.slane %v4915_v32, 5  ;;  %v14754_v32 = vld [vmem:[#allocation2 + $0x30] sm:$0xff]   ;;  %v14808_v6 = vld [vmem:[%s15155_s27 + $0x1f8] sm:$0xff]  }
 0x1e4   : > { %13603 = vmatprep.subr.bf16.mxu1 %v14780_v60  ;;  %v12359_v21 = vrot.slane %v6261_v10, 9  ;;  %v14922_v10 = vld [vmem:[#allocation2 + $0xe4] sm:$0xf]  ;;  %v14762_v19 = vld [vmem:[%s15155_s27 + $0x1c8] sm:$0xff]  }
 0x1e6   : > { %v6572_v34 = vsel %vm15895_vm14, %v12359_v21, %v6571_v46  ;;  %v14927_v21 = vld [vmem:[#allocation2 + $0xfc] sm:$0xf] }
 0x1e7   : > { %13604 = vmatpush3.bf16.msra.mxu1 %v14780_v60  ;;  %v6573_v60 = vrot.slane %v6571_v46, 4  ;;  %v16182_v46 = vld [vmem:[#allocation2 + $0xe8] sm:$0xf] }
 0x1e8   : > { %13669 = vmatprep.subr.bf16.mxu1 %v16135_v40  ;;  %v12106_v50 = vcombine.low %v14922_v10, %v16182_v46  ;;  %v14939_v10 = vld [vmem:[#allocation2 + $0x144] sm:$0xf] }
 0x1e9   : > { %13894 = vmatmul.mubr.bf16.gmra.mrb[48].mxu0 %v12402_v48  ;;  %v6575_v35 = vsel %vm15895_vm14, %v6573_v60, %v6574_v28  ;;  %v16166_v48 = vld [vmem:[#allocation2 + $0xa0] sm:$0xf]  ;;  %v14758_v60 = vld [vmem:[#allocation2 + $0x48] sm:$0xff]  }
 0x1ea   : > { %13542 = vmatmul.mubr.bf16.gmra.mrb[16].mxu1 %v12098_v45  ;;  %13897 = vmatprep.mubr.bf16.mxu0 %v12403_v53  ;;  %v14914_v45 = vld [vmem:[#allocation2 + $0x9c] sm:$0xf]  ;;  %v12407_v51 = vcombine.low %v6572_v34, %v6575_v35  ;;  %v6580_v53 = vrot.slane %v6578_v33, 4  ;;  %v14929_v28 = vld [vmem:[#allocation2 + $0x108] sm:$0xf]  ;;  %v14761_v34 = vld [vmem:[#allocation2 + $0x54] sm:$0xff]  }
 0x1eb   : > { %13545 = vmatprep.mubr.bf16.mxu1 %v12099_v63  ;;  %v12102_v49 = vcombine.low %v14914_v45, %v16166_v48  ;;  %v6579_v63 = vsel %vm15895_vm14, %v12360_v43, %v6578_v33  ;;  %v12109_v30 = vcombine.low %v14929_v28, %v16194_v29  ;;  %v14790_v33 = vld [vmem:[%s15155_s27 + $0x1e0] sm:$0xff]   ;;  %v14931_v35 = vld [vmem:[#allocation2 + $0x114] sm:$0xf]  ;;  %v3385_v28 = vrot.slane %v16068_v42, 5 }
 0x1ec   : > { %v6582_v0 = vsel %vm15895_vm14, %v6580_v53, %v6581_v54  ;;  %v14764_v43 = vld [vmem:[#allocation2 + $0x60] sm:$0xff]   ;;  %v14796_v53 = vld [vmem:[%s15155_s27 + $0x1e8] sm:$0xff]   ;;  %v14802_v54 = vld [vmem:[%s15155_s27 + $0x1f0] sm:$0xff]  }
 0x1ed   : > { %v12408_v1 = vcombine.low %v6579_v63, %v6582_v0  ;;  %v14933_v45 = vld [vmem:[#allocation2 + $0x120] sm:$0xf]  ;;  %v16207_v63 = vld [vmem:[#allocation2 + $0x130] sm:$0xf]  ;;  %v3387_v42 = vrot.slane %v3385_v28, 4 }
 0x1ee   : > { %19433 = vst [vmem:[#allocation4_spill] sm:$0xff] %v16207_v63 }
 0x1f1   : > { %13898 = vmatmul.mubr.bf16.gmra.mrb[52].mxu0 %v12404_v11  ;;  %v14924_v11 = vld [vmem:[#allocation2 + $0xf0] sm:$0xf] }
 0x1f2   : > { %13546 = vmatmul.mubr.bf16.gmra.mrb[20].mxu1 %v12100_v18  ;;  %13901 = vmatprep.mubr.bf16.mxu0 %v12405_v2  ;;  %v12107_v13 = vcombine.low %v14924_v11, %v16185_v12  ;;  %v14926_v18 = vld [vmem:[%s15155_s27 + $0x1c0] sm:$0xff]   ;;  %v14772_v2 = vld [vmem:[%s15155_s27 + $0x1d0] sm:$0xff]  }
 0x1f3   : > { %13549 = vmatprep.mubr.bf16.mxu1 %v12101_v25  ;;  %v12108_v25 = vcombine.low %v14927_v21, %v16191_v22  ;;  %v3277_v21 = vld [vmem:[#allocation2] sm:$0xe] }
 0x1f9   : > { %13902 = vmatmul.mubr.bf16.gmra.mrb[56].mxu0 %v12406_v38  ;;  %v12110_v38 = vcombine.low %v14931_v35, %v16199_v36 }
 0x1fa   : > { %13550 = vmatmul.mubr.bf16.gmra.mrb[24].mxu1 %v12102_v49  ;;  %13905 = vmatprep.mubr.bf16.mxu0 %v12407_v51  ;;  %v16202_v49 = vld [vmem:[#allocation2 + $0x124] sm:$0xf] }
 0x1fb   : > { %13553 = vmatprep.mubr.bf16.mxu1 %v12103_v59  ;;  %19432 = vst [vmem:[#allocation3_spill] sm:$0xff] %v16202_v49  ;;  %v12111_v51 = vcombine.low %v14933_v45, %v16202_v49  ;;  %v14935_v59 = vld [vmem:[#allocation2 + $0x12c] sm:$0xf]  ;;  %v14776_v45 = vld [vmem:[#allocation2 + $0x9c] sm:$0xff]  }
 0x1fc   : > { %v12112_v0 = vcombine.low %v14935_v59, %v16207_v63  ;;  %v14945_v59 = vld [vmem:[#allocation2 + $0x20] sm:$0x1] }
 0x201   : > { %13906 = vmatmul.mubr.bf16.gmra.mrb[60].mxu0 %v12408_v1  ;;  %v14768_v1 = vld [vmem:[#allocation2 + $0x78] sm:$0xff]  }
 0x202   : > { %13554 = vmatmul.mubr.bf16.gmra.mrb[28].mxu1 %v12104_v4  ;;  %13925 = vmatprep.mubr.bf16.mxu0 %v14748_v5  ;;  %v16210_v4 = vld [vmem:[#allocation2 + $0x13c] sm:$0xf] }
 0x203   : > { %13557 = vmatprep.mubr.bf16.mxu1 %v12105_v8  ;;  %19434 = vst [vmem:[#allocation5_spill] sm:$0xff] %v16210_v4  ;;  %v12113_v5 = vcombine.low %v14937_v56, %v16210_v4  ;;  %v14812_v8 = vld [vmem:[%s15155_s27 + $0x200] sm:$0xff]   ;;  %v14946_v56 = vld [vmem:[#allocation2 + $0x15c] sm:$0xf] }
 0x204   : > { %v3288_v4 = vld [vmem:[#allocation2 + $0x84] sm:$0xe] }
 0x209   : > { %13926 = vmatmul.mubr.bf16.vlgmr.msra.gmra.mrb[0].mxu0 %v14751_v23  ;;  %v14771_v23 = vld [vmem:[#allocation2 + $0x84] sm:$0xff]  }
 0x20a   : > { %13558 = vmatmul.mubr.bf16.gmra.mrb[32].mxu1 %v12106_v50  ;;  %13990 = vmatpush3.bf16.msra.mxu0 %v14926_v18  ;;  %v14940_v50 = vld [vmem:[#allocation2 + $0x148] sm:$0xf]  ;;  %v14941_v18 = vld [vmem:[#allocation2 + $0x150] sm:$0xf] }
 0x20b   : > { %13561 = vmatprep.mubr.bf16.mxu1 %v12107_v13  ;;  %13929 = vmatprep.mubr.bf16.mxu0 %v14754_v32  ;;  %v12114_v11 = vcombine.low %v14939_v10, %v14940_v50  ;;  %v14774_v13 = vld [vmem:[#allocation2 + $0x90] sm:$0xff]   ;;  %v5335_v32 = vshll.u32 %v16043_v61, 16  ;;  %v14948_v50 = vld [vmem:[#allocation2 + $0x168] sm:$0xf] }
 0x20c   : > { %13991 = vmatprep.subr.bf16.mxu0 %v14762_v19  ;;  %v14958_v10 = vld [vmem:[#allocation2 + $0x50] sm:$0x1] }
 0x20e   : > { %13992 = vmatpush3.bf16.msra.mxu0 %v14762_v19  ;;  %v5339_v19 = vshrl.u32 %v16043_v61, 16  ;;  %v16220_v61 = vrot.slane %v5335_v32, 5 }
 0x20f   : > { %13993 = vmatprep.subr.bf16.mxu0 %v14772_v2 }
 0x210   : > { %19435 = vst [vmem:[#allocation6_spill] sm:$0xff] %v16220_v61  ;;  %v16222_v35 = vrot.slane %v5339_v19, 4  ;;  %v3281_v19 = vld [vmem:[#allocation2 + $0x30] sm:$0xe] }
 0x211   : > { %13930 = vmatmul.mubr.bf16.gmra.mrb[4].mxu0 %v14756_v37 }
 0x212   : > { %13562 = vmatmul.mubr.bf16.gmra.mrb[36].mxu1 %v12108_v25  ;;  %13933 = vmatprep.mubr.bf16.mxu0 %v14758_v60  ;;  %v3378_v25 = vrot.slane %v16051_v9, 5  ;;  %v3278_v60 = vld [vmem:[#allocation2 + $0xc] sm:$0xe]  ;;  %19436 = vst [vmem:[#allocation7_spill] sm:$0xff] %v16222_v35  ;;  %v14961_v35 = vld [vmem:[#allocation2 + $0x74] sm:$0x1] }
 0x213   : > { %13565 = vmatprep.mubr.bf16.mxu1 %v12109_v30  ;;  %13994 = vmatpush3.bf16.msra.mxu0 %v14772_v2  ;;  %v14942_v2 = vld [vmem:[#allocation2 + $0x154] sm:$0xf]  ;;  %v3279_v30 = vld [vmem:[#allocation2 + $0x18] sm:$0xe] }
 0x214   : > { %13995 = vmatprep.subr.bf16.mxu0 %v14782_v31  ;;  %v12115_v37 = vcombine.low %v14941_v18, %v14942_v2 }
 0x217   : > { %13996 = vmatpush3.bf16.msra.mxu0 %v14782_v31  ;;  %v3392_v31 = vrot.slane %v16071_v26, 5  ;;  %v3395_v26 = vrot.slane %v14945_v59, 5  ;;  %v3406_v59 = vrot.slane %v16090_v41, 5 }
 0x218   : > { %13997 = vmatprep.subr.bf16.mxu0 %v14790_v33 }
 0x219   : > { %13934 = vmatmul.mubr.bf16.gmra.mrb[8].mxu0 %v14761_v34 }
 0x21a   : > { %13566 = vmatmul.mubr.bf16.gmra.mrb[40].mxu1 %v12110_v38  ;;  %13937 = vmatprep.mubr.bf16.mxu0 %v14764_v43  ;;  %v12129_v38 = vrot.slane %v3277_v21, 9  ;;  %v14944_v43 = vld [vmem:[#allocation2 + $0x14] sm:$0x1] }
 0x21b   : > { %13569 = vmatprep.mubr.bf16.mxu1 %v12111_v51  ;;  %13998 = vmatpush3.bf16.msra.mxu0 %v14790_v33  ;;  %v14943_v33 = vld [vmem:[#allocation2 + $0x8] sm:$0x1]  ;;  %v3388_v9 = vrot.slane %v14944_v43, 5  ;;  %v3380_v51 = vrot.slane %v3378_v25, 4  ;;  %v14954_v43 = vld [vmem:[#allocation2 + $0x184] sm:$0xf] }
 0x21c   : > { %13999 = vmatprep.subr.bf16.mxu0 %v14796_v53  ;;  %v3381_v34 = vrot.slane %v14943_v33, 5  ;;  %v16230_v32 = vsel %vm15895_vm14, %v12129_v38, %v3378_v25 }
 0x21d   : > { %v16246_v21 = vsel %vm15895_vm14, %v3387_v42, %v3388_v9  ;;  %v3283_v42 = vld [vmem:[#allocation2 + $0x48] sm:$0xe] }
 0x21f   : > { %14000 = vmatpush3.bf16.msra.mxu0 %v14796_v53  ;;  %v12130_v53 = vrot.slane %v3278_v60, 9 }
 0x220   : > { %14001 = vmatprep.subr.bf16.mxu0 %v14802_v54 }
 0x221   : > { %13938 = vmatmul.mubr.bf16.gmra.mrb[12].mxu0 %v14766_v57  ;;  %v3394_v57 = vrot.slane %v3392_v31, 4  ;;  %v16238_v18 = vsel %vm15895_vm14, %v12130_v53, %v3385_v28  ;;  %v14951_v28 = vld [vmem:[#allocation2 + $0x174] sm:$0xf]  ;;  %v12133_v53 = vrot.slane %v3281_v19, 9  ;;  %v3285_v19 = vld [vmem:[#allocation2 + $0x60] sm:$0xe] }
 0x222   : > { %13570 = vmatmul.mubr.bf16.gmra.mrb[44].mxu1 %v12112_v0  ;;  %13941 = vmatprep.mubr.bf16.mxu0 %v14768_v1  ;;  %v3280_v0 = vld [vmem:[#allocation2 + $0x24] sm:$0xe]  ;;  %v3399_v1 = vrot.slane %v16087_v15, 5  ;;  %v16234_v15 = vsel %vm15895_vm14, %v3380_v51, %v3381_v34  ;;  %v14952_v34 = vld [vmem:[#allocation2 + $0x178] sm:$0xf]  ;;  %v12137_v9 = vrot.slane %v3285_v19, 9 }
 0x223   : > { %13573 = vmatprep.mubr.bf16.mxu1 %v12113_v5  ;;  %14002 = vmatpush3.bf16.msra.mxu0 %v14802_v54  ;;  %v12131_v54 = vrot.slane %v3279_v30, 9  ;;  %v14947_v5 = vld [vmem:[#allocation2 + $0x160] sm:$0xf]  ;;  %v16250_v25 = vsel %vm15895_vm14, %v3394_v57, %v3395_v26  ;;  %v14950_v30 = vld [vmem:[#allocation2 + $0x2c] sm:$0x1]  ;;  %v12118_v38 = vcombine.low %v14951_v28, %v14952_v34  ;;  %v3413_v26 = vrot.slane %v16103_v47, 5 }
 0x224   : > { %14003 = vmatprep.subr.bf16.mxu0 %v14808_v6  ;;  %v3401_v60 = vrot.slane %v3399_v1, 4  ;;  %v3402_v33 = vrot.slane %v14950_v30, 5  ;;  %v14956_v47 = vld [vmem:[#allocation2 + $0x38] sm:$0x1]  ;;  %v3434_v30 = vrot.slane %v16122_v20, 5  ;;  %v14784_v28 = vld [vmem:[#allocation2 + $0xc0] sm:$0xff]   ;;  %v16277_v34 = vsel %vm15895_vm14, %v12133_v53, %v3406_v59 }
 0x225   : > { %v16242_v2 = vsel %vm15895_vm14, %v12131_v54, %v3392_v31  ;;  %v14953_v31 = vld [vmem:[#allocation2 + $0x180] sm:$0xf]  ;;  %v3282_v54 = vld [vmem:[#allocation2 + $0x3c] sm:$0xe]  ;;  %v14959_v20 = vld [vmem:[#allocation2 + $0x5c] sm:$0x1] }
 0x226   : > { %v12119_v51 = vcombine.low %v14953_v31, %v14954_v43  ;;  %v16272_v41 = vsel %vm15895_vm14, %v3401_v60, %v3402_v33  ;;  %v12135_v31 = vrot.slane %v3283_v42, 9  ;;  %v3441_v43 = vrot.slane %v16137_v44, 5 }
 0x227   : > { %14004 = vmatpush3.bf16.msra.mxu0 %v14808_v6  ;;  %v12116_v6 = vcombine.low %v14946_v56, %v14947_v5  ;;  %v3284_v56 = vld [vmem:[#allocation2 + $0x54] sm:$0xe]  ;;  %v3415_v60 = vrot.slane %v3413_v26, 4  ;;  %v3430_v57 = vrot.slane %v14959_v20, 5  ;;  %v3436_v42 = vrot.slane %v3434_v30, 4 }
 0x228   : > { %14069 = vmatprep.subr.bf16.mxu0 %v14812_v8  ;;  %v14778_v8 = vld [vmem:[#allocation2 + $0xa8] sm:$0xff]   ;;  %v3455_v20 = vrot.slane %v16152_v17, 5  ;;  %v12140_v19 = vrot.slane %v3288_v4, 9  ;;  %v3469_v4 = vrot.slane %v16166_v48, 5  ;;  %v19439_v48 = vcombine.low %v16230_v32, %v16234_v15  ;;  %v14966_v15 = vld [vmem:[#allocation2 + $0xb0] sm:$0x1] }
 0x229   : > { %13942 = vmatmul.mubr.bf16.gmra.mrb[16].mxu0 %v14771_v23  ;;  %v3408_v23 = vrot.slane %v3406_v59, 4  ;;  %v3443_v59 = vrot.slane %v3441_v43, 4 }
 0x22a   : > { %13574 = vmatmul.mubr.bf16.gmra.mrb[48].mxu1 %v12114_v11  ;;  %13945 = vmatprep.mubr.bf16.mxu0 %v14774_v13  ;;  %v14949_v11 = vld [vmem:[#allocation2 + $0x16c] sm:$0xf] }
 0x22b   : > { %13577 = vmatprep.mubr.bf16.mxu1 %v12115_v37  ;;  %v12117_v13 = vcombine.low %v14948_v50, %v14949_v11  ;;  %v12132_v37 = vrot.slane %v3280_v0, 9  ;;  %v3420_v0 = vrot.slane %v16106_v55, 5  ;;  %v3427_v50 = vrot.slane %v16119_v16, 5  ;;  %v14781_v11 = vld [vmem:[#allocation2 + $0xb4] sm:$0xff]   ;;  %v3286_v16 = vld [vmem:[#allocation2 + $0x6c] sm:$0xe] }
 0x22c   : > { %v3409_v55 = vrot.slane %v14956_v47, 5  ;;  %v3423_v47 = vrot.slane %v14958_v10, 5  ;;  %v12138_v44 = vrot.slane %v3286_v16, 9  ;;  %v3444_v10 = vrot.slane %v14961_v35, 5  ;;  %v3290_v16 = vld [vmem:[#allocation2 + $0x9c] sm:$0xe] }
 0x22d   : > { %v3422_v33 = vrot.slane %v3420_v0, 4  ;;  %v3429_v5 = vrot.slane %v3427_v50, 4 }
 0x22f   : > { %v16300_v35 = vsel %vm15895_vm14, %v3422_v33, %v3423_v47  ;;  %v16308_v17 = vsel %vm15895_vm14, %v3429_v5, %v3430_v57  ;;  %v14787_v57 = vld [vmem:[#allocation2 + $0xf0] sm:$0xff]   ;;  %v16324_v5 = vsel %vm15895_vm14, %v3443_v59, %v3444_v10  ;;  %v7804_v33 = vld [vmem:[#allocation2 + $0x18] sm:$0xf]  ;;  %v7805_v47 = vld [vmem:[#allocation2 + $0x1c] sm:$0xf]  ;;  %v3476_v10 = vrot.slane %v16169_v58, 5 }
 0x230   : > { %19437 = vst [vmem:[#allocation8_spill] sm:$0xff] %v16324_v5  ;;  %v12142_v58 = vrot.slane %v3290_v16, 9  ;;  %v3479_v16 = vrot.slane %v14966_v15, 5  ;;  %v14794_v5 = vld [vmem:[%s15155_s27 + $0xc8] sm:$0xff]  }
 0x231   : > { %13946 = vmatmul.mubr.bf16.gmra.mrb[20].mxu0 %v14776_v45  ;;  %v16252_v45 = vld [vmem:[#allocation2 + $0x18c] sm:$0xf]  ;;  %v3478_v32 = vrot.slane %v3476_v10, 4 }
 0x232   : > { %13578 = vmatmul.mubr.bf16.gmra.mrb[52].mxu1 %v12116_v6  ;;  %13949 = vmatprep.mubr.bf16.mxu0 %v14778_v8  ;;  %v16267_v8 = vsel %vm15895_vm14, %v12132_v37, %v3399_v1  ;;  %v14957_v1 = vld [vmem:[#allocation2 + $0x44] sm:$0x1]  ;;  %v12136_v6 = vrot.slane %v3284_v56, 9  ;;  %v3448_v56 = vrot.slane %v16140_v62, 5 }
 0x233   : > { %13581 = vmatprep.mubr.bf16.mxu1 %v12117_v13  ;;  %v12134_v13 = vrot.slane %v3282_v54, 9  ;;  %v3416_v37 = vrot.slane %v14957_v1, 5  ;;  %v3287_v54 = vld [vmem:[#allocation2 + $0x78] sm:$0xe]  ;;  %v14960_v1 = vld [vmem:[#allocation2 + $0x68] sm:$0x1] }
 0x234   : > { %v3437_v61 = vrot.slane %v14960_v1, 5  ;;  %v16304_v62 = vsel %vm15895_vm14, %v12136_v6, %v3427_v50  ;;  %v14962_v6 = vld [vmem:[#allocation2 + $0x80] sm:$0x1]  ;;  %v7901_v1 = vshrl.u32 %v7804_v33, 16 }
 0x235   : > { %v16282_v53 = vsel %vm15895_vm14, %v12134_v13, %v3413_v26  ;;  %v16292_v26 = vsel %vm15895_vm14, %v3415_v60, %v3416_v37  ;;  %v16320_v13 = vsel %vm15895_vm14, %v12138_v44, %v3441_v43  ;;  %v3451_v50 = vrot.slane %v14962_v6, 5  ;;  %v14963_v37 = vld [vmem:[#allocation2 + $0x8c] sm:$0x1] }
 0x236   : > { %v3462_v60 = vrot.slane %v16155_v24, 5  ;;  %v19438_v6 = vcombine.low %v16252_v45, %v16029_v14  ;;  %v7904_v24 = vshll.u32 %v7804_v33, 16  ;;  %v7910_v14 = vshll.u32 %v7805_v47, 16 }
 0x237   : > { %v7914_v45 = vshrl.u32 %v7805_v47, 16  ;;  %v14791_v47 = vld [vmem:[#allocation2 + $0x108] sm:$0xff]   ;;  %v7903_v43 = vrot.slane %v7901_v1, 4  ;;  %v16383_v1 = vsel %vm15895_vm14, %v12142_v58, %v3469_v4 }
 0x238   : > { %v3464_v33 = vrot.slane %v3462_v60, 4 }
 0x239   : > { %13950 = vmatmul.mubr.bf16.gmra.mrb[24].mxu0 %v14781_v11  ;;  %v16288_v11 = vsel %vm15895_vm14, %v3408_v23, %v3409_v55  ;;  %v16312_v23 = vsel %vm15895_vm14, %v12137_v9, %v3434_v30  ;;  %v14786_v55 = vld [vmem:[#allocation2 + $0xcc] sm:$0xff]   ;;  %v3450_v9 = vrot.slane %v3448_v56, 4  ;;  %v3457_v30 = vrot.slane %v3455_v20, 4 }
 0x23a   : > { %13582 = vmatmul.mubr.bf16.gmra.mrb[56].mxu1 %v12118_v38  ;;  %13953 = vmatprep.mubr.bf16.mxu0 %v14784_v28  ;;  %v16296_v38 = vsel %vm15895_vm14, %v12135_v31, %v3420_v0  ;;  %v16316_v0 = vsel %vm15895_vm14, %v3436_v42, %v3437_v61  ;;  %v3289_v28 = vld [vmem:[#allocation2 + $0x90] sm:$0xe]  ;;  %v3458_v31 = vrot.slane %v14963_v37, 5  ;;  %v14965_v42 = vld [vmem:[#allocation2 + $0xa4] sm:$0x1]  ;;  %v7906_v61 = vrot.slane %v7904_v24, 5 }
 0x23b   : > { %13585 = vmatprep.mubr.bf16.mxu1 %v12119_v51  ;;  %v12139_v51 = vrot.slane %v3287_v54, 9  ;;  %v12141_v59 = vrot.slane %v3289_v28, 9  ;;  %v16352_v37 = vsel %vm15895_vm14, %v3450_v9, %v3451_v50  ;;  %v14789_v28 = vld [vmem:[#allocation2 + $0xfc] sm:$0xff]   ;;  %v3472_v54 = vrot.slane %v14965_v42, 5 }
 0x23c   : > { %v16359_v50 = vsel %vm15895_vm14, %v12140_v19, %v3455_v20  ;;  %v16363_v9 = vsel %vm15895_vm14, %v3457_v30, %v3458_v31  ;;  %v3483_v42 = vrot.slane %v16176_v3, 5  ;;  %v7806_v31 = vld [vmem:[#allocation2 + $0x20] sm:$0x1]  ;;  %v7916_v49 = vrot.slane %v7914_v45, 4 }
 0x23d   : > { %v16340_v44 = vsel %vm15895_vm14, %v12139_v51, %v3448_v56  ;;  %v14964_v56 = vld [vmem:[#allocation2 + $0x98] sm:$0x1]  ;;  %v16375_v15 = vsel %vm15895_vm14, %v12141_v59, %v3462_v60  ;;  %v14967_v59 = vld [vmem:[#allocation2 + $0xbc] sm:$0x1]  ;;  %v7907_v58 = vor.u32 %v7906_v61, %v7903_v43  ;;  %v14969_v61 = vld [vmem:[#allocation2 + $0xec] sm:$0x1] }
 0x23e   : > { %v3465_v51 = vrot.slane %v14964_v56, 5  ;;  %v3485_v60 = vrot.slane %v3483_v42, 4  ;;  %v3500_v30 = vrot.slane %v14969_v61, 5  ;;  %v19446_v61 = vcombine.low %v16267_v8, %v16272_v41  ;;  %v14795_v8 = vld [vmem:[#allocation2 + $0x12c] sm:$0xff]  }
 0x240   : > { %v16379_v3 = vsel %vm15895_vm14, %v3464_v33, %v3465_v51  ;;  %v7808_v51 = vld [vmem:[#allocation2 + $0x28] sm:$0xf]  ;;  %v19442_v33 = vcombine.low %v16238_v18, %v16246_v21  ;;  %v14800_v18 = vld [vmem:[%s15155_s27 + $0xd0] sm:$0xff]  }
 0x241   : > { %13954 = vmatmul.mubr.bf16.gmra.mrb[28].mxu0 %v14786_v55  ;;  %v3291_v55 = vld [vmem:[#allocation2 + $0xa8] sm:$0xe]  ;;  %v7938_v43 = vshrl.u32 %v7808_v51, 16 }
 0x242   : > { %13586 = vmatmul.mubr.bf16.gmra.mrb[60].mxu1 %v19438_v6  ;;  %13957 = vmatprep.mubr.bf16.mxu0 %v14787_v57  ;;  %v7807_v57 = vld [vmem:[#allocation2 + $0x24] sm:$0xf]  ;;  %v3471_v6 = vrot.slane %v3469_v4, 4  ;;  %v12143_v56 = vrot.slane %v3291_v55, 9  ;;  %v16370_v55 = vrot.slane %v7910_v14, 5  ;;  %v16398_v4 = vsel %vm15895_vm14, %v3478_v32, %v3479_v16 }
 0x243   : > { %13605 = vmatprep.mubr.bf16.mxu1 %v19439_v48  ;;  %v3292_v48 = vld [vmem:[#allocation2 + $0xb4] sm:$0xe]  ;;  %v7925_v63 = vshrl.u32 %v7807_v57, 16  ;;  %v7928_v20 = vshll.u32 %v7807_v57, 16  ;;  %v3486_v57 = vrot.slane %v14967_v59, 5  ;;  %19443 = vst [vmem:[#allocation11_spill] sm:$0xff] %v16398_v4 }
 0x244   : > { %v12144_v24 = vrot.slane %v3292_v48, 9  ;;  %v16387_v14 = vsel %vm15895_vm14, %v3471_v6, %v3472_v54  ;;  %v16391_v45 = vsel %vm15895_vm14, %v12143_v56, %v3476_v10  ;;  %v3293_v54 = vld [vmem:[#allocation2 + $0xd8] sm:$0xe]  ;;  %v7920_v10 = vshll.u32 %v7806_v31, 16  ;;  %v3294_v6 = vld [vmem:[#allocation2 + $0xe4] sm:$0xe] }
 0x245   : > { %19440 = vst [vmem:[#allocation9_spill] sm:$0xff] %v16387_v14  ;;  %19441 = vst [vmem:[#allocation10_spill] sm:$0xff] %v16391_v45  ;;  %v19444_v56 = vcombine.low %v16242_v2, %v16250_v25  ;;  %v14792_v48 = vld [vmem:[#allocation2 + $0x114] sm:$0xff]   ;;  %v7917_v21 = vor.u32 %v7916_v49, %v16370_v55  ;;  %v7927_v32 = vrot.slane %v7925_v63, 4  ;;  %v7930_v16 = vrot.slane %v7928_v20, 5  ;;  %v14793_v59 = vld [vmem:[#allocation2 + $0x120] sm:$0xff]  }
 0x246   : > { %v16416_v49 = vsel %vm15895_vm14, %v12144_v24, %v3483_v42  ;;  %v14968_v63 = vld [vmem:[#allocation2 + $0xe0] sm:$0x1]  ;;  %v7809_v20 = vld [vmem:[#allocation2 + $0x2c] sm:$0x1]  ;;  %v7810_v31 = vld [vmem:[#allocation2 + $0x30] sm:$0xf] }
 0x247   : > { %v3493_v25 = vrot.slane %v14968_v63, 5  ;;  %v7918_v19 = vrot.slane %v7917_v21, 4  ;;  %v7922_v14 = vrot.slane %v7920_v10, 5  ;;  %v7931_v4 = vor.u32 %v7930_v16, %v7927_v32  ;;  %v7811_v63 = vld [vmem:[#allocation2 + $0x34] sm:$0xf] }
 0x248   : > { %v7940_v24 = vrot.slane %v7938_v43, 4  ;;  %v7949_v45 = vshrl.u32 %v7810_v31, 16  ;;  %v3504_v10 = vrot.slane %v16185_v12, 5  ;;  %v7952_v21 = vshll.u32 %v7810_v31, 16  ;;  %v7814_v43 = vld [vmem:[#allocation2 + $0x40] sm:$0xf] }
 0x249   : > { %13958 = vmatmul.mubr.bf16.gmra.mrb[32].mxu0 %v14789_v28  ;;  %v3490_v28 = vrot.slane %v16179_v7, 5  ;;  %v12146_v7 = vrot.slane %v3294_v6, 9  ;;  %v3295_v6 = vld [vmem:[#allocation2 + $0xf0] sm:$0xe]  ;;  %v19445_v32 = vshll.u32 %v16045_v39, 16  ;;  %v7923_v41 = vsel %vm15727_vm11, %v7918_v19, %v7922_v14 }
 0x24a   : > { %13606 = vmatmul.mubr.bf16.vlgmr.msra.gmra.mrb[0].mxu1 %v19442_v33  ;;  %13961 = vmatprep.mubr.bf16.mxu0 %v14791_v47  ;;  %v3497_v47 = vrot.slane %v16182_v46, 5  ;;  %v12145_v46 = vrot.slane %v3293_v54, 9  ;;  %v7944_v54 = vshll.u32 %v7809_v20, 16  ;;  %v7813_v39 = vld [vmem:[#allocation2 + $0x3c] sm:$0xf]  ;;  %v7951_v31 = vrot.slane %v7949_v45, 4 }
 0x24b   : > { %13670 = vmatpush3.bf16.msra.mxu1 %v16135_v40  ;;  %13609 = vmatprep.mubr.bf16.mxu1 %v19444_v56  ;;  %v7934_v40 = vshll.u32 %v7808_v51, 16  ;;  %v3492_v33 = vrot.slane %v3490_v28, 4  ;;  %v7908_v56 = vrot.slane %v7907_v58, 4  ;;  %v14806_v51 = vld [vmem:[%s15155_s27 + $0xd8] sm:$0xff]   ;;  %v16423_v58 = vsel %vm15895_vm14, %v3485_v60, %v3486_v57 }
 0x24c   : > { %13671 = vmatprep.subr.bf16.mxu1 %v14794_v5  ;;  %v3499_v2 = vrot.slane %v3497_v47, 4  ;;  %v16432_v16 = vrot.slane %v19445_v32, 5  ;;  %v16446_v12 = vsel %vm15895_vm14, %v12146_v7, %v3497_v47  ;;  %v14811_v47 = vld [vmem:[%s15155_s27 + $0xe0] sm:$0xff]   ;;  %v16458_v7 = vrot.slane %v7931_v4, 4  ;;  %v14970_v20 = vld [vmem:[#allocation2 + $0xf8] sm:$0x1] }
 0x24d   : > { %v16419_v42 = vrot.slane %v7934_v40, 5  ;;  %v16439_v60 = vsel %vm15895_vm14, %v3492_v33, %v3493_v25  ;;  %v7913_v57 = vsel %vm15727_vm11, %v7908_v56, %v16370_v55  ;;  %v7958_v40 = vshll.u32 %v7811_v63, 16  ;;  %v7812_v14 = vld [vmem:[#allocation2 + $0x38] sm:$0x1]  ;;  %v7816_v32 = vld [vmem:[#allocation2 + $0x48] sm:$0xf] }
 0x24e   : > { %v7962_v55 = vshrl.u32 %v7811_v63, 16  ;;  %v3506_v25 = vrot.slane %v3504_v10, 4  ;;  %v3507_v19 = vrot.slane %v14970_v20, 5  ;;  %v7976_v33 = vshll.u32 %v7813_v39, 16  ;;  %v7815_v20 = vld [vmem:[#allocation2 + $0x44] sm:$0x1] }
 0x24f   : > { %13672 = vmatpush3.bf16.msra.mxu1 %v14794_v5  ;;  %v16427_v5 = vsel %vm15895_vm14, %v12145_v46, %v3490_v28  ;;  %v19447_v28 = vcombine.low %v16277_v34, %v16288_v11  ;;  %v14797_v46 = vld [vmem:[#allocation2 + $0x138] sm:$0xff]   ;;  %v7941_v34 = vor.u32 %v7940_v24, %v16419_v42  ;;  %v16461_v11 = vrot.slane %v7944_v54, 5 }
 0x250   : > { %13673 = vmatprep.subr.bf16.mxu1 %v14800_v18  ;;  %v7982_v56 = vshll.u32 %v7814_v43, 16  ;;  %v7986_v63 = vshrl.u32 %v7814_v43, 16  ;;  %v12192_v4 = vcombine.low %v16416_v49, %v16423_v58  ;;  %v12193_v24 = vcombine.low %v16427_v5, %v16439_v60 }
 0x251   : > { %13962 = vmatmul.mubr.bf16.gmra.mrb[36].mxu0 %v14792_v48  ;;  %v16455_v48 = vsel %vm15895_vm14, %v3499_v2, %v3500_v30  ;;  %v7954_v30 = vrot.slane %v7952_v21, 5  ;;  %v16463_v2 = vld [vmem:[#allocation2 + $0xfc] sm:$0xe]  ;;  %v16469_v54 = vrot.slane %v7958_v40, 5  ;;  %v16471_v45 = vcombine.low %v7913_v57, %v7923_v41  ;;  %v7817_v41 = vld [vmem:[#allocation2 + $0x4c] sm:$0xf] }
 0x252   : > { %13610 = vmatmul.mubr.bf16.gmra.mrb[4].mxu1 %v19446_v61  ;;  %13965 = vmatprep.mubr.bf16.mxu0 %v14793_v59  ;;  %v7973_v59 = vshrl.u32 %v7813_v39, 16  ;;  %v7942_v61 = vrot.slane %v7941_v34, 4  ;;  %v14813_v39 = vld [vmem:[%s15155_s27 + $0xe8] sm:$0xff]   ;;  %v3511_v57 = vrot.slane %v16191_v22, 5  ;;  %v19448_v43 = vcombine.low %v16282_v53, %v16292_v26 }
 0x253   : > { %13613 = vmatprep.mubr.bf16.mxu1 %v19447_v28  ;;  %13674 = vmatpush3.bf16.msra.mxu1 %v14800_v18  ;;  %v12147_v18 = vrot.slane %v3295_v6, 9  ;;  %v7964_v6 = vrot.slane %v7962_v55, 4  ;;  %v7955_v40 = vor.u32 %v7954_v30, %v7951_v31  ;;  %v7968_v55 = vshll.u32 %v7812_v14, 16 }
 0x254   : > { %13675 = vmatprep.subr.bf16.mxu1 %v14806_v51  ;;  %v16488_v34 = vrot.slane %v7982_v56, 5  ;;  %v16495_v22 = vsel %vm15895_vm14, %v3506_v25, %v3507_v19  ;;  %v12148_v26 = vrot.slane %v16463_v2, 9  ;;  %v8000_v14 = vshll.u32 %v7816_v32, 16  ;;  %v14971_v19 = vld [vmem:[#allocation2 + $0x104] sm:$0x1] }
 0x255   : > { %v16482_v28 = vsel %vm15895_vm14, %v12147_v18, %v3504_v10  ;;  %v19449_v10 = vcombine.low %v16296_v38, %v16300_v35  ;;  %v7965_v53 = vor.u32 %v7964_v6, %v16469_v54  ;;  %v7947_v18 = vsel %vm15727_vm11, %v7942_v61, %v16461_v11  ;;  %v14815_v38 = vld [vmem:[%s15155_s27 + $0xf0] sm:$0xff]   ;;  %v14798_v35 = vld [vmem:[#allocation2 + $0x144] sm:$0xff]  }
 0x256   : > { %v8006_v31 = vshll.u32 %v7817_v41, 16  ;;  %v8010_v30 = vshrl.u32 %v7817_v41, 16  ;;  %v3513_v25 = vrot.slane %v3511_v57, 4  ;;  %v7992_v56 = vshll.u32 %v7815_v20, 16  ;;  %v3297_v11 = vld [vmem:[#allocation2 + $0x108] sm:$0xe] }
 0x257   : > { %13676 = vmatpush3.bf16.msra.mxu1 %v14806_v51  ;;  %v7937_v51 = vsel %vm15727_vm11, %v16458_v7, %v16419_v42  ;;  %v7975_v42 = vrot.slane %v7973_v59, 4  ;;  %v7978_v7 = vrot.slane %v7976_v33, 5  ;;  %v16503_v59 = vrot.slane %v7955_v40, 4  ;;  %v7819_v61 = vld [vmem:[#allocation2 + $0x54] sm:$0xf] }
 0x258   : > { %13677 = vmatprep.subr.bf16.mxu1 %v14811_v47  ;;  %v3514_v33 = vrot.slane %v14971_v19, 5  ;;  %v16509_v41 = vcombine.low %v7937_v51, %v7947_v18  ;;  %v8002_v20 = vrot.slane %v8000_v14, 5  ;;  %v7823_v40 = vld [vmem:[#allocation2 + $0x64] sm:$0xf] }
 0x259   : > { %13966 = vmatmul.mubr.bf16.gmra.mrb[40].mxu0 %v14795_v8  ;;  %v7988_v8 = vrot.slane %v7986_v63, 4  ;;  %v16505_v63 = vrot.slane %v7968_v55, 5  ;;  %v7979_v2 = vor.u32 %v7978_v7, %v7975_v42  ;;  %v16517_v55 = vsel %vm15895_vm14, %v12148_v26, %v3511_v57  ;;  %v7820_v57 = vld [vmem:[#allocation2 + $0x58] sm:$0xf]  ;;  %v7822_v26 = vld [vmem:[#allocation2 + $0x60] sm:$0xf] }
 0x25a   : > { %13614 = vmatmul.mubr.bf16.gmra.mrb[8].mxu1 %v19448_v43  ;;  %13969 = vmatprep.mubr.bf16.mxu0 %v14797_v46  ;;  %v7997_v46 = vshrl.u32 %v7816_v32, 16  ;;  %v3518_v32 = vrot.slane %v16194_v29, 5  ;;  %v16513_v43 = vrot.slane %v7965_v53, 4  ;;  %v16519_v42 = vrot.slane %v8006_v31, 5  ;;  %v14817_v29 = vld [vmem:[%s15155_s27 + $0xf8] sm:$0xff]  }
 0x25b   : > { %13617 = vmatprep.mubr.bf16.mxu1 %v19449_v10  ;;  %13678 = vmatpush3.bf16.msra.mxu1 %v14811_v47  ;;  %v14799_v47 = vld [vmem:[#allocation2 + $0x150] sm:$0xff]   ;;  %v7989_v6 = vor.u32 %v7988_v8, %v16488_v34  ;;  %v8012_v7 = vrot.slane %v8010_v30, 4  ;;  %v7961_v51 = vsel %vm15727_vm11, %v16503_v59, %v16469_v54  ;;  %v16528_v8 = vsel %vm15895_vm14, %v3513_v25, %v3514_v33 }
 0x25c   : > { %13679 = vmatprep.subr.bf16.mxu1 %v14813_v39  ;;  %v7818_v10 = vld [vmem:[#allocation2 + $0x50] sm:$0x1]  ;;  %v7999_v19 = vrot.slane %v7997_v46, 4  ;;  %v12149_v53 = vrot.slane %v3297_v11, 9  ;;  %v19450_v46 = vcombine.low %v16304_v62, %v16308_v17  ;;  %v7980_v18 = vrot.slane %v7979_v2, 4 }
 0x25d   : > { %v7990_v14 = vrot.slane %v7989_v6, 4  ;;  %v3520_v31 = vrot.slane %v3518_v32, 4  ;;  %v14972_v30 = vld [vmem:[#allocation2 + $0x110] sm:$0x1]  ;;  %v19451_v54 = vcombine.low %v16312_v23, %v16316_v0  ;;  %v7971_v59 = vsel %vm15727_vm11, %v16513_v43, %v16505_v63  ;;  %v14801_v6 = vld [vmem:[#allocation2 + $0x15c] sm:$0xff]  }
 0x25e   : > { %v8016_v25 = vshll.u32 %v7818_v10, 16  ;;  %v8021_v33 = vshrl.u32 %v7819_v61, 16  ;;  %v8024_v62 = vshll.u32 %v7819_v61, 16  ;;  %v8003_v17 = vor.u32 %v8002_v20, %v7999_v19  ;;  %v3298_v19 = vld [vmem:[#allocation2 + $0x114] sm:$0xe] }
 0x25f   : > { %13680 = vmatpush3.bf16.msra.mxu1 %v14813_v39  ;;  %v7994_v39 = vrot.slane %v7992_v56, 5  ;;  %v8030_v56 = vshll.u32 %v7820_v57, 16  ;;  %v8034_v2 = vshrl.u32 %v7820_v57, 16  ;;  %v8045_v11 = vshrl.u32 %v7822_v26, 16 }
 0x260   : > { %13681 = vmatprep.subr.bf16.mxu1 %v14815_v38  ;;  %v8054_v23 = vshll.u32 %v7823_v40, 16  ;;  %v8058_v0 = vshrl.u32 %v7823_v40, 16  ;;  %v7985_v63 = vsel %vm15727_vm11, %v7980_v18, %v16488_v34  ;;  %v16548_v61 = vsel %vm15895_vm14, %v12149_v53, %v3518_v32  ;;  %v14973_v18 = vld [vmem:[%s15155_s27 + $0x100] sm:$0xff]   ;;  %v7821_v32 = vld [vmem:[#allocation2 + $0x5c] sm:$0x1] }
 0x261   : > { %13970 = vmatmul.mubr.bf16.gmra.mrb[44].mxu0 %v14798_v35  ;;  %v3521_v35 = vrot.slane %v14972_v30, 5  ;;  %v14803_v30 = vld [vmem:[#allocation2 + $0x168] sm:$0xff]   ;;  %v8018_v10 = vrot.slane %v8016_v25, 5  ;;  %v3525_v40 = vrot.slane %v16199_v36, 5  ;;  %v8023_v20 = vrot.slane %v8021_v33, 4 }
 0x262   : > { %13618 = vmatmul.mubr.bf16.gmra.mrb[12].mxu1 %v19450_v46  ;;  %13973 = vmatprep.mubr.bf16.mxu0 %v14799_v47  ;;  %v8013_v47 = vor.u32 %v8012_v7, %v16519_v42  ;;  %v8048_v46 = vshll.u32 %v7822_v26, 16  ;;  %v8026_v7 = vrot.slane %v8024_v62, 5  ;;  %v8004_v57 = vrot.slane %v8003_v17, 4  ;;  %v7824_v17 = vld [vmem:[#allocation2 + $0x68] sm:$0x1] }
 0x263   : > { %13621 = vmatprep.mubr.bf16.mxu1 %v19451_v54  ;;  %13682 = vmatpush3.bf16.msra.mxu1 %v14815_v38  ;;  %v7995_v38 = vsel %vm15727_vm11, %v7990_v14, %v7994_v39  ;;  %v16552_v43 = vsel %vm15895_vm14, %v3520_v31, %v3521_v35  ;;  %v16555_v26 = vrot.slane %v8030_v56, 5  ;;  %v8036_v39 = vrot.slane %v8034_v2, 4  ;;  %v19452_v54 = vld [vmem:[#allocation8_spill] sm:$0xff]  ;;  %v14975_v56 = vld [vmem:[#allocation2 + $0x128] sm:$0x1] }
 0x264   : > { %13683 = vmatprep.subr.bf16.mxu1 %v14817_v29  ;;  %v8014_v34 = vrot.slane %v8013_v47, 4  ;;  %v8047_v53 = vrot.slane %v8045_v11, 4  ;;  %v8050_v14 = vrot.slane %v8048_v46, 5  ;;  %v16558_v31 = vrot.slane %v8054_v23, 5  ;;  %v14974_v2 = vld [vmem:[#allocation2 + $0x11c] sm:$0x1] }
 0x265   : > { %v8060_v35 = vrot.slane %v8058_v0, 4  ;;  %v19453_v36 = vcombine.low %v16320_v13, %v19452_v54  ;;  %v16567_v33 = vcombine.low %v7985_v63, %v7995_v38  ;;  %v12150_v62 = vrot.slane %v3298_v19, 9  ;;  %v19455_v11 = vld [vmem:[#allocation3_spill] sm:$0xff] }
 0x266   : > { %v19454_v47 = vcombine.low %v16340_v44, %v16352_v37  ;;  %v3528_v13 = vrot.slane %v14974_v2, 5  ;;  %v7826_v46 = vld [vmem:[#allocation2 + $0x70] sm:$0xf]  ;;  %v8009_v23 = vsel %vm15727_vm11, %v8004_v57, %v16519_v42  ;;  %v3527_v0 = vrot.slane %v3525_v40, 4  ;;  %v3299_v44 = vld [vmem:[#allocation2 + $0x120] sm:$0xe] }
 0x267   : > { %13684 = vmatpush3.bf16.msra.mxu1 %v14817_v29  ;;  %v16563_v29 = vcombine.low %v7961_v51, %v7971_v59  ;;  %v3532_v51 = vrot.slane %v19455_v11, 5  ;;  %v7825_v59 = vld [vmem:[#allocation2 + $0x6c] sm:$0xf]  ;;  %v8040_v63 = vshll.u32 %v7821_v32, 16  ;;  %v14804_v37 = vld [vmem:[#allocation2 + $0x174] sm:$0xff]   ;;  %v8019_v38 = vsel %vm15727_vm11, %v8014_v34, %v8018_v10 }
 0x268   : > { %14149 = vmatprep.subr.bf16.mxu1 %v14973_v18  ;;  %v8051_v19 = vor.u32 %v8050_v14, %v8047_v53  ;;  %v14805_v18 = vld [vmem:[#allocation2 + $0x180] sm:$0xff]   ;;  %v8069_v54 = vshrl.u32 %v7825_v59, 16  ;;  %v8082_v2 = vshrl.u32 %v7826_v46, 16  ;;  %v12151_v42 = vrot.slane %v3299_v44, 9  ;;  %v3300_v53 = vld [vmem:[#allocation2 + $0x12c] sm:$0xe] }
 0x269   : > { %13974 = vmatmul.mubr.bf16.gmra.mrb[48].mxu0 %v14801_v6  ;;  %v8027_v6 = vor.u32 %v8026_v7, %v8023_v20  ;;  %v8061_v20 = vor.u32 %v8060_v35, %v16558_v31  ;;  %v8064_v7 = vshll.u32 %v7824_v17, 16  ;;  %v3534_v57 = vrot.slane %v3532_v51, 4 }
 0x26a   : > { %13622 = vmatmul.mubr.bf16.gmra.mrb[16].mxu1 %v19453_v36  ;;  %13977 = vmatprep.mubr.bf16.mxu0 %v14803_v30  ;;  %v8037_v30 = vor.u32 %v8036_v39, %v16555_v26  ;;  %v8072_v36 = vshll.u32 %v7825_v59, 16  ;;  %v3535_v39 = vrot.slane %v14975_v56, 5  ;;  %v16582_v32 = vcombine.low %v8009_v23, %v8019_v38  ;;  %v19456_v59 = vld [vmem:[#allocation4_spill] sm:$0xff]  ;;  %v7827_v56 = vld [vmem:[#allocation2 + $0x74] sm:$0x1] }
 0x26b   : > { %13625 = vmatprep.mubr.bf16.mxu1 %v19454_v47  ;;  %v8078_v47 = vshll.u32 %v7826_v46, 16  ;;  %v8028_v11 = vrot.slane %v8027_v6, 4  ;;  %v16586_v25 = vsel %vm15895_vm14, %v12150_v62, %v3525_v40  ;;  %v8042_v34 = vrot.slane %v8040_v63, 5  ;;  %v7828_v6 = vld [vmem:[#allocation2 + $0x78] sm:$0xf] }
 0x26c   : > { %v8038_v10 = vrot.slane %v8037_v30, 4  ;;  %v8052_v14 = vrot.slane %v8051_v19, 4  ;;  %v8062_v35 = vrot.slane %v8061_v20, 4  ;;  %v8066_v17 = vrot.slane %v8064_v7, 5  ;;  %v7829_v19 = vld [vmem:[#allocation2 + $0x7c] sm:$0xf] }
 0x26d   : > { %v3539_v46 = vrot.slane %v19456_v59, 5  ;;  %v19457_v44 = vcombine.low %v16359_v50, %v16363_v9  ;;  %v8071_v23 = vrot.slane %v8069_v54, 4  ;;  %v8074_v38 = vrot.slane %v8072_v36, 5  ;;  %v3301_v36 = vld [vmem:[#allocation2 + $0x138] sm:$0xe] }
 0x26e   : > { %v16592_v40 = vrot.slane %v8078_v47, 5  ;;  %v8084_v62 = vrot.slane %v8082_v2, 4  ;;  %v19458_v30 = vcombine.low %v16375_v15, %v16379_v3  ;;  %v16599_v63 = vsel %vm15895_vm14, %v3527_v0, %v3528_v13  ;;  %v14807_v0 = vld [vmem:[#allocation2 + $0x18c] sm:$0xff]   ;;  %v14809_v47 = vld [vmem:[#allocation2 + $0x198] sm:$0xff]  }
 0x26f   : > { %v8033_v50 = vsel %vm15727_vm11, %v8028_v11, %v16555_v26  ;;  %v16606_v9 = vsel %vm15895_vm14, %v12151_v42, %v3532_v51  ;;  %v8043_v15 = vsel %vm15727_vm11, %v8038_v10, %v8042_v34  ;;  %v12152_v3 = vrot.slane %v3300_v53, 9 }
 0x270   : > { %v8093_v20 = vshrl.u32 %v7828_v6, 16  ;;  %v8096_v13 = vshll.u32 %v7828_v6, 16  ;;  %v8057_v26 = vsel %vm15727_vm11, %v8052_v14, %v16558_v31  ;;  %v3541_v7 = vrot.slane %v3539_v46, 4  ;;  %v14810_v31 = vld [vmem:[#allocation2 + $0x1a4] sm:$0xff]  }
 0x271   : > { %13978 = vmatmul.mubr.bf16.gmra.mrb[52].mxu0 %v14804_v37  ;;  %v16610_v37 = vsel %vm15895_vm14, %v3534_v57, %v3535_v39  ;;  %v8088_v54 = vshll.u32 %v7827_v56, 16  ;;  %v8067_v2 = vsel %vm15727_vm11, %v8062_v35, %v8066_v17  ;;  %v8075_v11 = vor.u32 %v8074_v38, %v8071_v23  ;;  %v19459_v57 = vld [vmem:[#allocation5_spill] sm:$0xff] }
 0x272   : > { %13626 = vmatmul.mubr.bf16.gmra.mrb[20].mxu1 %v19457_v44  ;;  %13981 = vmatprep.mubr.bf16.mxu0 %v14805_v18  ;;  %v14976_v18 = vld [vmem:[#allocation2 + $0x134] sm:$0x1]  ;;  %v8085_v42 = vor.u32 %v8084_v62, %v16592_v40  ;;  %v3546_v39 = vrot.slane %v19459_v57, 5  ;;  %v8102_v34 = vshll.u32 %v7829_v19, 16  ;;  %v8106_v53 = vshrl.u32 %v7829_v19, 16 }
 0x273   : > { %13629 = vmatprep.mubr.bf16.mxu1 %v19458_v30  ;;  %v3542_v51 = vrot.slane %v14976_v18, 5  ;;  %v16625_v14 = vcombine.low %v8033_v50, %v8043_v15  ;;  %v12153_v59 = vrot.slane %v3301_v36, 9  ;;  %v8095_v6 = vrot.slane %v8093_v20, 4  ;;  %v7831_v56 = vld [vmem:[#allocation2 + $0x84] sm:$0xf] }
 0x274   : > { %v8098_v44 = vrot.slane %v8096_v13, 5  ;;  %v16627_v35 = vcombine.low %v8057_v26, %v8067_v2  ;;  %v16631_v17 = vsel %vm15895_vm14, %v12152_v3, %v3539_v46  ;;  %v8090_v38 = vrot.slane %v8088_v54, 5  ;;  %v7832_v62 = vld [vmem:[#allocation2 + $0x88] sm:$0xf]  ;;  %v7834_v30 = vld [vmem:[#allocation2 + $0x90] sm:$0xf] }
 0x275   : > { %v16635_v23 = vsel %vm15895_vm14, %v3541_v7, %v3542_v51  ;;  %v19460_v50 = vld [vmem:[#allocation9_spill] sm:$0xff]  ;;  %v8076_v19 = vrot.slane %v8075_v11, 4  ;;  %v8086_v20 = vrot.slane %v8085_v42, 4  ;;  %v3548_v13 = vrot.slane %v3546_v39, 4  ;;  %v7835_v18 = vld [vmem:[#allocation2 + $0x94] sm:$0xf] }
 0x276   : > { %v19461_v15 = vcombine.low %v16383_v1, %v19460_v50  ;;  %v19462_v46 = vld [vmem:[#allocation10_spill] sm:$0xff]  ;;  %v19463_v3 = vld [vmem:[#allocation11_spill] sm:$0xff]  ;;  %v7830_v7 = vld [vmem:[#allocation2 + $0x80] sm:$0x1]  ;;  %v16643_v51 = vrot.slane %v8102_v34, 5  ;;  %v8108_v54 = vrot.slane %v8106_v53, 4  ;;  %v16647_v1 = vsel %vm15895_vm14, %v12153_v59, %v3546_v39 }
 0x277   : > { %v19464_v36 = vcombine.low %v19462_v46, %v19463_v3  ;;  %v8117_v2 = vshrl.u32 %v7831_v56, 16  ;;  %v8120_v57 = vshll.u32 %v7831_v56, 16  ;;  %v8126_v11 = vshll.u32 %v7832_v62, 16  ;;  %v3302_v50 = vld [vmem:[#allocation2 + $0x144] sm:$0xe] }
 0x278   : > { %v8130_v42 = vshrl.u32 %v7832_v62, 16  ;;  %v8150_v10 = vshll.u32 %v7835_v18, 16  ;;  %v8154_v46 = vshrl.u32 %v7835_v18, 16  ;;  %v8081_v34 = vsel %vm15727_vm11, %v8076_v19, %v16592_v40  ;;  %v7833_v19 = vld [vmem:[#allocation2 + $0x8c] sm:$0x1] }
 0x279   : > { %13982 = vmatmul.mubr.bf16.gmra.mrb[56].mxu0 %v14807_v0  ;;  %v14977_v0 = vld [vmem:[#allocation2 + $0x140] sm:$0x1]  ;;  %v8091_v53 = vsel %vm15727_vm11, %v8086_v20, %v8090_v38  ;;  %v8112_v39 = vshll.u32 %v7830_v7, 16  ;;  %v8109_v59 = vor.u32 %v8108_v54, %v16643_v51  ;;  %v8119_v62 = vrot.slane %v8117_v2, 4  ;;  %v7836_v2 = vld [vmem:[#allocation2 + $0x98] sm:$0x1] }
 0x27a   : > { %13630 = vmatmul.mubr.bf16.gmra.mrb[24].mxu1 %v19461_v15  ;;  %13985 = vmatprep.mubr.bf16.mxu0 %v14809_v47  ;;  %v3549_v26 = vrot.slane %v14977_v0, 5  ;;  %v8099_v47 = vor.u32 %v8098_v44, %v8095_v6  ;;  %v8141_v15 = vshrl.u32 %v7834_v30, 16  ;;  %v8144_v0 = vshll.u32 %v7834_v30, 16  ;;  %v14978_v6 = vld [vmem:[#allocation2 + $0x148] sm:$0xf] }
 0x27b   : > { %13633 = vmatprep.mubr.bf16.mxu1 %v19464_v36  ;;  %v3553_v44 = vrot.slane %v14978_v6, 5  ;;  %v8122_v30 = vrot.slane %v8120_v57, 5  ;;  %v12154_v18 = vrot.slane %v3302_v50, 9  ;;  %v16661_v36 = vrot.slane %v8126_v11, 5 }
 0x27c   : > { %v16656_v56 = vsel %vm15895_vm14, %v3548_v13, %v3549_v26  ;;  %v16659_v3 = vrot.slane %v8099_v47, 4  ;;  %v8132_v40 = vrot.slane %v8130_v42, 4  ;;  %v8143_v38 = vrot.slane %v8141_v15, 4  ;;  %v7838_v47 = vld [vmem:[#allocation2 + $0xa0] sm:$0xf] }
 0x27d   : > { %v8146_v20 = vrot.slane %v8144_v0, 5  ;;  %v16663_v21 = vrot.slane %v8150_v10, 5  ;;  %v8156_v13 = vrot.slane %v8154_v46, 4  ;;  %v12200_v26 = vcombine.low %v16631_v17, %v16635_v23  ;;  %v7837_v10 = vld [vmem:[#allocation2 + $0x9c] sm:$0xf] }
 0x27e   : > { %v16671_v7 = vcombine.low %v8081_v34, %v8091_v53  ;;  %v16675_v54 = vrot.slane %v8112_v39, 5  ;;  %v16680_v49 = vrot.slane %v8109_v59, 4  ;;  %v3555_v58 = vrot.slane %v3553_v44, 4  ;;  %v3303_v15 = vld [vmem:[#allocation2 + $0x150] sm:$0xe] }
 0x27f   : > { %v8123_v57 = vor.u32 %v8122_v30, %v8119_v62  ;;  %v16684_v11 = vsel %vm15895_vm14, %v12154_v18, %v3553_v44  ;;  %v8133_v42 = vor.u32 %v8132_v40, %v16661_v36  ;;  %v8136_v50 = vshll.u32 %v7833_v19, 16  ;;  %v14980_v0 = vld [vmem:[#allocation2 + $0x154] sm:$0xf]  ;;  %v14814_v44 = vld [vmem:[%s15155_s27 + $0x208] sm:$0xff]  }
 0x280   : > { %v3560_v46 = vrot.slane %v14980_v0, 5  ;;  %v8105_v5 = vsel %vm15727_vm11, %v16659_v3, %v16643_v51  ;;  %v8147_v60 = vor.u32 %v8146_v20, %v8143_v38  ;;  %v8160_v34 = vshll.u32 %v7836_v2, 16 }
 0x281   : > { %13986 = vmatmul.mubr.bf16.gmra.mrb[60].mxu0 %v14810_v31  ;;  %v8165_v53 = vshrl.u32 %v7837_v10, 16  ;;  %v8168_v39 = vshll.u32 %v7837_v10, 16  ;;  %v8174_v59 = vshll.u32 %v7838_v47, 16  ;;  %v8178_v6 = vshrl.u32 %v7838_v47, 16  ;;  %v7840_v10 = vld [vmem:[#allocation2 + $0xa8] sm:$0xf] }
 0x282   : > { %13634 = vmatmul.mubr.bf16.gmra.mrb[28].mxu1 %v12192_v4  ;;  %14005 = vmatprep.mubr.bf16.mxu0 %v16471_v45  ;;  %v14979_v4 = vld [vmem:[#allocation2 + $0x14c] sm:$0x1]  ;;  %v8115_v62 = vsel %vm15727_vm11, %v16680_v49, %v16675_v54  ;;  %v8124_v18 = vrot.slane %v8123_v57, 4  ;;  %v12155_v40 = vrot.slane %v3303_v15, 9  ;;  %v8134_v19 = vrot.slane %v8133_v42, 4 }
 0x283   : > { %13637 = vmatprep.mubr.bf16.mxu1 %v12193_v24  ;;  %v3556_v45 = vrot.slane %v14979_v4, 5  ;;  %v8157_v24 = vor.u32 %v8156_v13, %v16663_v21  ;;  %v8138_v38 = vrot.slane %v8136_v50, 5  ;;  %v3562_v20 = vrot.slane %v3560_v46, 4  ;;  %v14981_v13 = vld [vmem:[#allocation2 + $0x158] sm:$0x1] }
 0x284   : > { %v3563_v2 = vrot.slane %v14981_v13, 5  ;;  %v8148_v4 = vrot.slane %v8147_v60, 4  ;;  %v8162_v0 = vrot.slane %v8160_v34, 5  ;;  %v3304_v54 = vld [vmem:[#allocation2 + $0x15c] sm:$0xe]  ;;  %v8167_v42 = vrot.slane %v8165_v53, 4 }
 0x285   : > { %v16699_v30 = vsel %vm15895_vm14, %v3555_v58, %v3556_v45  ;;  %v8158_v47 = vrot.slane %v8157_v24, 4  ;;  %v14982_v49 = vld [vmem:[#allocation2 + $0x160] sm:$0xf]  ;;  %v19465_v58 = vcombine.low %v16446_v12, %v16455_v48  ;;  %v7839_v57 = vld [vmem:[#allocation2 + $0xa4] sm:$0x1]  ;;  %v8170_v50 = vrot.slane %v8168_v39, 5 }
 0x286   : > { %v3567_v31 = vrot.slane %v14982_v49, 5  ;;  %v14983_v45 = vld [vmem:[%s15155_s27 + $0x200] sm:$0xff]   ;;  %v16706_v15 = vrot.slane %v8174_v59, 5  ;;  %v8180_v13 = vrot.slane %v8178_v6, 4  ;;  %v8129_v60 = vsel %vm15727_vm11, %v8124_v18, %v16661_v36  ;;  %v14816_v12 = vld [vmem:[%s15155_s27 + $0x210] sm:$0xff]  }
 0x287   : > { %v16718_v48 = vsel %vm15895_vm14, %v12155_v40, %v3560_v46  ;;  %v3305_v24 = vld [vmem:[#allocation2 + $0x168] sm:$0xe]  ;;  %v8189_v34 = vshrl.u32 %v7840_v10, 16  ;;  %v8192_v53 = vshll.u32 %v7840_v10, 16  ;;  %v8139_v39 = vsel %vm15727_vm11, %v8134_v19, %v8138_v38  ;;  %v7841_v36 = vld [vmem:[#allocation2 + $0xac] sm:$0xf] }
 0x288   : > { %v8153_v46 = vsel %vm15727_vm11, %v8148_v4, %v16663_v21  ;;  %v8163_v6 = vsel %vm15727_vm11, %v8158_v47, %v8162_v0  ;;  %v3569_v18 = vrot.slane %v3567_v31, 4  ;;  %v8184_v40 = vshll.u32 %v7839_v57, 16  ;;  %v7843_v0 = vld [vmem:[#allocation2 + $0xb4] sm:$0xf]  ;;  %v14818_v57 = vld [vmem:[%s15155_s27 + $0x218] sm:$0xff]  }
 0x289   : > { %14006 = vmatmul.mubr.bf16.vlgmr.msra.gmra.mrb[0].mxu0 %v16509_v41  ;;  %v19466_v41 = vcombine.low %v16482_v28, %v16495_v22  ;;  %v16724_v28 = vsel %vm15895_vm14, %v3562_v20, %v3563_v2  ;;  %v12156_v22 = vrot.slane %v3304_v54, 9  ;;  %v8171_v19 = vor.u32 %v8170_v50, %v8167_v42  ;;  %v14985_v2 = vld [vmem:[#allocation2 + $0x16c] sm:$0xf] }
 0x28a   : > { %13638 = vmatmul.mubr.bf16.gmra.mrb[32].mxu1 %v19465_v58  ;;  %14070 = vmatpush3.bf16.msra.mxu0 %v14983_v45  ;;  %v8181_v38 = vor.u32 %v8180_v13, %v16706_v15  ;;  %v12157_v20 = vrot.slane %v3305_v24, 9  ;;  %v3574_v10 = vrot.slane %v14985_v2, 5  ;;  %v8191_v54 = vrot.slane %v8189_v34, 4  ;;  %v14986_v24 = vld [vmem:[#allocation2 + $0x170] sm:$0x1] }
 0x28b   : > { %13641 = vmatprep.mubr.bf16.mxu1 %v19466_v41  ;;  %14009 = vmatprep.mubr.bf16.mxu0 %v16563_v29  ;;  %v14984_v29 = vld [vmem:[#allocation2 + $0x164] sm:$0x1]  ;;  %v8194_v49 = vrot.slane %v8192_v53, 5  ;;  %v8198_v58 = vshll.u32 %v7841_v36, 16  ;;  %v8202_v45 = vshrl.u32 %v7841_v36, 16  ;;  %v16737_v21 = vcombine.low %v8105_v5, %v8115_v62 }
 0x28c   : > { %14071 = vmatprep.subr.bf16.mxu0 %v14814_v44  ;;  %v3570_v59 = vrot.slane %v14984_v29, 5  ;;  %v16741_v4 = vcombine.low %v8129_v60, %v8139_v39  ;;  %v12203_v47 = vcombine.low %v16718_v48, %v16724_v28  ;;  %v16747_v42 = vcombine.low %v8153_v46, %v8163_v6  ;;  %v7844_v5 = vld [vmem:[#allocation2 + $0xb8] sm:$0xf]  ;;  %v7846_v62 = vld [vmem:[#allocation2 + $0xc0] sm:$0xf] }
 0x28d   : > { %v16751_v50 = vsel %vm15895_vm14, %v12156_v22, %v3567_v31  ;;  %v8186_v3 = vrot.slane %v8184_v40, 5  ;;  %v19467_v13 = vcombine.low %v16517_v55, %v16528_v8  ;;  %v8182_v41 = vrot.slane %v8181_v38, 4  ;;  %v7847_v34 = vld [vmem:[#allocation2 + $0xc4] sm:$0xf]  ;;  %v7842_v55 = vld [vmem:[#allocation2 + $0xb0] sm:$0x1] }
 0x28e   : > { %14072 = vmatpush3.bf16.msra.mxu0 %v14814_v44  ;;  %v12202_v44 = vcombine.low %v16684_v11, %v16699_v30  ;;  %v16755_v51 = vsel %vm15895_vm14, %v3569_v18, %v3570_v59  ;;  %v3576_v60 = vrot.slane %v3574_v10, 4  ;;  %v3577_v31 = vrot.slane %v14986_v24, 5  ;;  %v3306_v29 = vld [vmem:[#allocation2 + $0x174] sm:$0xe]  ;;  %v14821_v18 = vld [vmem:[%s15155_s27 + $0x220] sm:$0xff]  }
 0x28f   : > { %14073 = vmatprep.subr.bf16.mxu0 %v14816_v12  ;;  %v19468_v53 = vcombine.low %v16548_v61, %v16552_v43  ;;  %v16766_v39 = vsel %vm15895_vm14, %v12157_v20, %v3574_v10  ;;  %v8195_v8 = vor.u32 %v8194_v49, %v8191_v54  ;;  %v16768_v22 = vrot.slane %v8198_v58, 5  ;;  %v14987_v58 = vld [vmem:[#allocation2 + $0x178] sm:$0xf]  ;;  %v7861_v30 = vld [vmem:[#allocation2 + $0x114] sm:$0xf] }
 0x290   : > { %v8213_v59 = vshrl.u32 %v7843_v0, 16  ;;  %v8216_v36 = vshll.u32 %v7843_v0, 16  ;;  %v8222_v46 = vshll.u32 %v7844_v5, 16  ;;  %v8226_v6 = vshrl.u32 %v7844_v5, 16  ;;  %v7845_v0 = vld [vmem:[#allocation2 + $0xbc] sm:$0x1] }
 0x291   : > { %14010 = vmatmul.mubr.bf16.gmra.mrb[4].mxu0 %v16567_v33  ;;  %v8172_v33 = vrot.slane %v8171_v19, 4  ;;  %v8237_v40 = vshrl.u32 %v7846_v62, 16  ;;  %v8240_v61 = vshll.u32 %v7846_v62, 16  ;;  %v8246_v43 = vshll.u32 %v7847_v34, 16 }
 0x292   : > { %13642 = vmatmul.mubr.bf16.gmra.mrb[36].mxu1 %v19467_v13  ;;  %14013 = vmatprep.mubr.bf16.mxu0 %v16582_v32  ;;  %v8204_v32 = vrot.slane %v8202_v45, 4  ;;  %v8187_v38 = vsel %vm15727_vm11, %v8182_v41, %v8186_v3  ;;  %v16778_v20 = vsel %vm15895_vm14, %v3576_v60, %v3577_v31  ;;  %v8208_v2 = vshll.u32 %v7842_v55, 16  ;;  %v14826_v3 = vld [vmem:[%s15155_s27 + $0x228] sm:$0xff]  }
 0x293   : > { %13645 = vmatprep.mubr.bf16.mxu1 %v19468_v53  ;;  %14074 = vmatpush3.bf16.msra.mxu0 %v14816_v12  ;;  %v8250_v12 = vshrl.u32 %v7847_v34, 16  ;;  %v8177_v19 = vsel %vm15727_vm11, %v8172_v33, %v16706_v15  ;;  %v16780_v10 = vrot.slane %v8195_v8, 4  ;;  %v12158_v49 = vrot.slane %v3306_v29, 9  ;;  %v7848_v55 = vld [vmem:[#allocation2 + $0xc8] sm:$0x1] }
 0x294   : > { %14075 = vmatprep.subr.bf16.mxu0 %v14818_v57  ;;  %v8205_v54 = vor.u32 %v8204_v32, %v16768_v22  ;;  %v3581_v45 = vrot.slane %v14987_v58, 5  ;;  %v8215_v5 = vrot.slane %v8213_v59, 4  ;;  %v8218_v15 = vrot.slane %v8216_v36, 5  ;;  %v7849_v8 = vld [vmem:[#allocation2 + $0xcc] sm:$0xf] }
 0x295   : > { %v16783_v62 = vrot.slane %v8222_v46, 5  ;;  %v8228_v13 = vrot.slane %v8226_v6, 4  ;;  %v8239_v33 = vrot.slane %v8237_v40, 4  ;;  %v8242_v41 = vrot.slane %v8240_v61, 5  ;;  %v14988_v29 = vld [vmem:[#allocation2 + $0x17c] sm:$0x1] }
 0x296   : > { %v16787_v60 = vrot.slane %v8246_v43, 5  ;;  %v8252_v24 = vrot.slane %v8250_v12, 4  ;;  %v19469_v31 = vcombine.low %v16586_v25, %v16599_v63  ;;  %v16795_v34 = vcombine.low %v8177_v19, %v8187_v38  ;;  %v7850_v36 = vld [vmem:[#allocation2 + $0xd0] sm:$0xf]  ;;  %v3307_v61 = vld [vmem:[#allocation2 + $0x180] sm:$0xe] }
 0x297   : > { %14076 = vmatpush3.bf16.msra.mxu0 %v14818_v57  ;;  %v12204_v57 = vcombine.low %v16751_v50, %v16755_v51  ;;  %v12205_v53 = vcombine.low %v16766_v39, %v16778_v20  ;;  %v19470_v32 = vcombine.low %v16606_v9, %v16610_v37  ;;  %v8206_v25 = vrot.slane %v8205_v54, 4  ;;  %v14989_v43 = vld [vmem:[#allocation2 + $0x184] sm:$0xf]  ;;  %v14831_v9 = vld [vmem:[%s15155_s27 + $0x230] sm:$0xff]  }
 0x298   : > { %14077 = vmatprep.subr.bf16.mxu0 %v14821_v18  ;;  %v3583_v63 = vrot.slane %v3581_v45, 4  ;;  %v8232_v59 = vshll.u32 %v7845_v0, 16  ;;  %v16804_v46 = vsel %vm15895_vm14, %v12158_v49, %v3581_v45  ;;  %v8219_v6 = vor.u32 %v8218_v15, %v8215_v5 }
 0x299   : > { %14014 = vmatmul.mubr.bf16.gmra.mrb[8].mxu0 %v16625_v14  ;;  %v8210_v14 = vrot.slane %v8208_v2, 5  ;;  %v8229_v40 = vor.u32 %v8228_v13, %v16783_v62  ;;  %v3588_v12 = vrot.slane %v14989_v43, 5  ;;  %v8201_v37 = vsel %vm15727_vm11, %v16780_v10, %v16768_v22 }
 0x29a   : > { %13646 = vmatmul.mubr.bf16.gmra.mrb[40].mxu1 %v19469_v31  ;;  %14017 = vmatprep.mubr.bf16.mxu0 %v16627_v35  ;;  %v3584_v35 = vrot.slane %v14988_v29, 5  ;;  %v8243_v19 = vor.u32 %v8242_v41, %v8239_v33  ;;  %v8256_v38 = vshll.u32 %v7848_v55, 16  ;;  %v8261_v2 = vshrl.u32 %v7849_v8, 16  ;;  %v14990_v33 = vld [vmem:[#allocation2 + $0x188] sm:$0x1] }
 0x29b   : > { %13649 = vmatprep.mubr.bf16.mxu1 %v19470_v32  ;;  %14078 = vmatpush3.bf16.msra.mxu0 %v14821_v18  ;;  %v8253_v18 = vor.u32 %v8252_v24, %v16787_v60  ;;  %v8264_v54 = vshll.u32 %v7849_v8, 16  ;;  %v8270_v49 = vshll.u32 %v7850_v36, 16  ;;  %v8274_v58 = vshrl.u32 %v7850_v36, 16  ;;  %v14836_v24 = vld [vmem:[%s15155_s27 + $0x238] sm:$0xff]   ;;  %v14991_v32 = vld [vmem:[#allocation2 + $0x190] sm:$0xf] }
 0x29c   : > { %14079 = vmatprep.subr.bf16.mxu0 %v14826_v3  ;;  %v8211_v45 = vsel %vm15727_vm11, %v8206_v25, %v8210_v14  ;;  %v16817_v0 = vsel %vm15895_vm14, %v3583_v63, %v3584_v35  ;;  %v8234_v5 = vrot.slane %v8232_v59, 5  ;;  %v12159_v15 = vrot.slane %v3307_v61, 9  ;;  %v3308_v14 = vld [vmem:[#allocation2 + $0x18c] sm:$0xe]  ;;  %v19471_v59 = vld [vmem:[#allocation7_spill] sm:$0xff] }
 0x29d   : > { %v8220_v22 = vrot.slane %v8219_v6, 4  ;;  %v8230_v10 = vrot.slane %v8229_v40, 4  ;;  %v3590_v13 = vrot.slane %v3588_v12, 4  ;;  %v3591_v41 = vrot.slane %v14990_v33, 5  ;;  %v19472_v36 = vld [vmem:[#allocation6_spill] sm:$0xff] }
 0x29e   : > { %v8244_v31 = vrot.slane %v8243_v19, 4  ;;  %v8254_v55 = vrot.slane %v8253_v18, 4  ;;  %v8258_v8 = vrot.slane %v8256_v38, 5  ;;  %v3595_v25 = vrot.slane %v14991_v32, 5  ;;  %v7853_v19 = vld [vmem:[#allocation2 + $0xf4] sm:$0xf] }
 0x29f   : > { %14080 = vmatpush3.bf16.msra.mxu0 %v14826_v3  ;;  %v8263_v3 = vrot.slane %v8261_v2, 4  ;;  %v8266_v63 = vrot.slane %v8264_v54, 5  ;;  %v16825_v29 = vrot.slane %v8270_v49, 5  ;;  %v8276_v35 = vrot.slane %v8274_v58, 4  ;;  %v14992_v38 = vld [vmem:[#allocation2 + $0x194] sm:$0x1] }
 0x2a0   : > { %14081 = vmatprep.subr.bf16.mxu0 %v14831_v9  ;;  %v19474_v40 = vcombine.low %v16647_v1, %v16656_v56  ;;  %v16835_v61 = vcombine.low %v8201_v37, %v8211_v45  ;;  %v12206_v17 = vcombine.low %v16804_v46, %v16817_v0  ;;  %v16841_v23 = vsel %vm15895_vm14, %v12159_v15, %v3588_v12  ;;  %v7855_v2 = vld [vmem:[#allocation2 + $0xfc] sm:$0xf] }
 0x2a1   : > { %14018 = vmatmul.mubr.bf16.gmra.mrb[12].mxu0 %v16671_v7  ;;  %v19473_v7 = vor.u32 %v19471_v59, %v19472_v36  ;;  %v8225_v43 = vsel %vm15727_vm11, %v8220_v22, %v16783_v62  ;;  %v8235_v1 = vsel %vm15727_vm11, %v8230_v10, %v8234_v5  ;;  %v16850_v56 = vsel %vm15895_vm14, %v3590_v13, %v3591_v41  ;;  %v7856_v5 = vld [vmem:[#allocation2 + $0x100] sm:$0xf]  ;;  %v7854_v41 = vld [vmem:[#allocation2 + $0xf8] sm:$0x1]  ;;  %v7859_v59 = vld [vmem:[#allocation2 + $0x10c] sm:$0xf] }
 0x2a2   : > { %13650 = vmatmul.mubr.bf16.gmra.mrb[44].mxu1 %v12200_v26  ;;  %14021 = vmatprep.mubr.bf16.mxu0 %v16737_v21  ;;  %v7851_v26 = vld [vmem:[#allocation2 + $0xd4] sm:$0x1]  ;;  %v7852_v21 = vld [vmem:[#allocation2 + $0xf0] sm:$0xf]  ;;  %v12160_v37 = vrot.slane %v3308_v14, 9  ;;  %v8249_v12 = vsel %vm15727_vm11, %v8244_v31, %v16787_v60  ;;  %v3597_v18 = vrot.slane %v3595_v25, 4  ;;  %v8267_v54 = vor.u32 %v8266_v63, %v8263_v3 }
 0x2a3   : > { %v16830_v6 = vrot.slane %v19473_v7, 4  ;;  %13653 = vmatprep.mubr.bf16.mxu1 %v19474_v40  ;;  %14082 = vmatpush3.bf16.msra.mxu0 %v14831_v9  ;;  %v8259_v9 = vsel %vm15727_vm11, %v8254_v55, %v8258_v8  ;;  %v3598_v62 = vrot.slane %v14992_v38, 5  ;;  %v8277_v49 = vor.u32 %v8276_v35, %v16825_v29  ;;  %v7871_v46 = vld [vmem:[#allocation2 + $0x13c] sm:$0xf] }
 0x2a4   : > { %14083 = vmatprep.subr.bf16.mxu0 %v14836_v24  ;;  %v8280_v58 = vshll.u32 %v7851_v26, 16  ;;  %v8285_v45 = vshrl.u32 %v7852_v21, 16  ;;  %v12207_v15 = vcombine.low %v16841_v23, %v16850_v56  ;;  %v8288_v22 = vshll.u32 %v7852_v21, 16 }
 0x2a5   : > { %v8294_v10 = vshll.u32 %v7853_v19, 16  ;;  %v8298_v13 = vshrl.u32 %v7853_v19, 16  ;;  %v16860_v60 = vcombine.low %v8225_v43, %v8235_v1  ;;  %v16864_v33 = vsel %vm15895_vm14, %v12160_v37, %v3595_v25  ;;  %v7862_v1 = vld [vmem:[#allocation2 + $0x118] sm:$0xf]  ;;  %v7857_v37 = vld [vmem:[#allocation2 + $0x104] sm:$0x1] }
 0x2a6   : > { %v8309_v31 = vshrl.u32 %v7855_v2, 16  ;;  %v8312_v55 = vshll.u32 %v7855_v2, 16  ;;  %v16867_v8 = vcombine.low %v8249_v12, %v8259_v9  ;;  %v16871_v14 = vsel %vm15895_vm14, %v3597_v18, %v3598_v62 }
 0x2a7   : > { %14084 = vmatpush3.bf16.msra.mxu0 %v14836_v24  ;;  %v8318_v32 = vshll.u32 %v7856_v5, 16  ;;  %v8322_v3 = vshrl.u32 %v7856_v5, 16  ;;  %v7858_v24 = vld [vmem:[#allocation2 + $0x108] sm:$0xf]  ;;  %v16877_v25 = vrot.slane %v8267_v54, 4  ;;  %v16879_v63 = vrot.slane %v8277_v49, 4 }
 0x2a8   : > { %v8287_v35 = vrot.slane %v8285_v45, 4  ;;  %v8290_v7 = vrot.slane %v8288_v22, 5  ;;  %v16886_v40 = vrot.slane %v8294_v10, 5  ;;  %v8300_v26 = vrot.slane %v8298_v13, 4 }
 0x2a9   : > { %14022 = vmatmul.mubr.bf16.gmra.mrb[16].mxu0 %v16741_v4  ;;  %v16881_v4 = vrot.slane %v8280_v58, 5  ;;  %v8304_v11 = vshll.u32 %v7854_v41, 16  ;;  %v8333_v21 = vshrl.u32 %v7858_v24, 16  ;;  %v8336_v43 = vshll.u32 %v7858_v24, 16  ;;  %v7864_v58 = vld [vmem:[#allocation2 + $0x120] sm:$0xf] }
 0x2aa   : > { %13654 = vmatmul.mubr.bf16.gmra.mrb[48].mxu1 %v12202_v44  ;;  %14025 = vmatprep.mubr.bf16.mxu0 %v16747_v42  ;;  %v8311_v44 = vrot.slane %v8309_v31, 4  ;;  %v8314_v42 = vrot.slane %v8312_v55, 5  ;;  %v16888_v19 = vrot.slane %v8318_v32, 5  ;;  %v8324_v12 = vrot.slane %v8322_v3, 4  ;;  %v7860_v41 = vld [vmem:[#allocation2 + $0x110] sm:$0x1] }
 0x2ab   : > { %13657 = vmatprep.mubr.bf16.mxu1 %v12203_v47  ;;  %v8342_v9 = vshll.u32 %v7859_v59, 16  ;;  %v8346_v18 = vshrl.u32 %v7859_v59, 16  ;;  %v8273_v48 = vsel %vm15727_vm11, %v16877_v25, %v16825_v29  ;;  %v8283_v28 = vsel %vm15727_vm11, %v16879_v63, %v16881_v4  ;;  %v7865_v24 = vld [vmem:[#allocation2 + $0x124] sm:$0xf] }
 0x2ac   : > { %v8357_v47 = vshrl.u32 %v7861_v30, 16  ;;  %v8360_v38 = vshll.u32 %v7861_v30, 16  ;;  %v8291_v62 = vor.u32 %v8290_v7, %v8287_v35  ;;  %v8301_v2 = vor.u32 %v8300_v26, %v16886_v40 }
 0x2ad   : > { %v8366_v54 = vshll.u32 %v7862_v1, 16  ;;  %v8370_v49 = vshrl.u32 %v7862_v1, 16  ;;  %v8315_v45 = vor.u32 %v8314_v42, %v8311_v44  ;;  %v8328_v5 = vshll.u32 %v7857_v37, 16 }
 0x2ae   : > { %v8335_v22 = vrot.slane %v8333_v21, 4  ;;  %v8338_v10 = vrot.slane %v8336_v43, 5  ;;  %v8306_v29 = vrot.slane %v8304_v11, 5  ;;  %v8325_v13 = vor.u32 %v8324_v12, %v16888_v19  ;;  %v7867_v12 = vld [vmem:[#allocation2 + $0x12c] sm:$0xf] }
 0x2af   : > { %v16901_v31 = vrot.slane %v8342_v9, 5  ;;  %v8348_v55 = vrot.slane %v8346_v18, 4  ;;  %v8359_v32 = vrot.slane %v8357_v47, 4  ;;  %v8362_v3 = vrot.slane %v8360_v38, 5  ;;  %v7868_v47 = vld [vmem:[#allocation2 + $0x130] sm:$0xf] }
 0x2b0   : > { %v8381_v25 = vshrl.u32 %v7864_v58, 16  ;;  %v8384_v63 = vshll.u32 %v7864_v58, 16  ;;  %v8302_v4 = vrot.slane %v8301_v2, 4  ;;  %v16910_v35 = vrot.slane %v8366_v54, 5  ;;  %v7866_v2 = vld [vmem:[#allocation2 + $0x128] sm:$0x1] }
 0x2b1   : > { %14026 = vmatmul.mubr.bf16.gmra.mrb[20].mxu0 %v16795_v34  ;;  %v8292_v34 = vrot.slane %v8291_v62, 4  ;;  %v8372_v59 = vrot.slane %v8370_v49, 4  ;;  %v8316_v7 = vrot.slane %v8315_v45, 4  ;;  %v8330_v26 = vrot.slane %v8328_v5, 5  ;;  %v7870_v62 = vld [vmem:[#allocation2 + $0x138] sm:$0xf] }
 0x2b2   : > { %13658 = vmatmul.mubr.bf16.gmra.mrb[52].mxu1 %v12204_v57  ;;  %14029 = vmatprep.mubr.bf16.mxu0 %v16835_v61  ;;  %v8339_v50 = vor.u32 %v8338_v10, %v8335_v22  ;;  %v8352_v51 = vshll.u32 %v7860_v41, 16  ;;  %v7863_v57 = vld [vmem:[#allocation2 + $0x11c] sm:$0x1]  ;;  %v8326_v61 = vrot.slane %v8325_v13, 4  ;;  %v8349_v11 = vor.u32 %v8348_v55, %v16901_v31 }
 0x2b3   : > { %13661 = vmatprep.mubr.bf16.mxu1 %v12205_v53  ;;  %v8390_v30 = vshll.u32 %v7865_v24, 16  ;;  %v8394_v44 = vshrl.u32 %v7865_v24, 16  ;;  %v12208_v42 = vcombine.low %v16864_v33, %v16871_v14  ;;  %v8363_v39 = vor.u32 %v8362_v3, %v8359_v32  ;;  %v4872_v3 = vld [vmem:[#allocation2 + $0xf0] sm:$0xf] }
 0x2b4   : > { %v8383_v20 = vrot.slane %v8381_v25, 4  ;;  %v8386_v53 = vrot.slane %v8384_v63, 5  ;;  %v12504_v21 = vcombine.low %v8273_v48, %v8283_v28  ;;  %v8297_v43 = vsel %vm15727_vm11, %v8292_v34, %v16886_v40  ;;  %v14819_v24 = vld [vmem:[#allocation2 + $0xc] sm:$0xff]  }
 0x2b5   : > { %v8373_v1 = vor.u32 %v8372_v59, %v16910_v35  ;;  %v8376_v37 = vshll.u32 %v7863_v57, 16  ;;  %v8307_v9 = vsel %vm15727_vm11, %v8302_v4, %v8306_v29  ;;  %v8321_v18 = vsel %vm15727_vm11, %v8316_v7, %v16888_v19 }
 0x2b6   : > { %v8340_v33 = vrot.slane %v8339_v50, 4  ;;  %v8354_v14 = vrot.slane %v8352_v51, 5  ;;  %v8331_v48 = vsel %vm15727_vm11, %v8326_v61, %v8330_v26  ;;  %v8350_v40 = vrot.slane %v8349_v11, 4  ;;  %v7873_v50 = vld [vmem:[#allocation2 + $0x144] sm:$0xf] }
 0x2b7   : > { %v16927_v28 = vrot.slane %v8390_v30, 5  ;;  %v8396_v38 = vrot.slane %v8394_v44, 4  ;;  %v8364_v19 = vrot.slane %v8363_v39, 4  ;;  %v8387_v54 = vor.u32 %v8386_v53, %v8383_v20  ;;  %v7874_v53 = vld [vmem:[#allocation2 + $0x148] sm:$0xf] }
 0x2b8   : > { %v8405_v49 = vshrl.u32 %v7867_v12, 16  ;;  %v8408_v58 = vshll.u32 %v7867_v12, 16  ;;  %v8378_v45 = vrot.slane %v8376_v37, 5  ;;  %v8414_v5 = vshll.u32 %v7868_v47, 16  ;;  %v7876_v37 = vld [vmem:[#allocation2 + $0x150] sm:$0xf] }
 0x2b9   : > { %14030 = vmatmul.mubr.bf16.gmra.mrb[24].mxu0 %v16860_v60  ;;  %v8374_v60 = vrot.slane %v8373_v1, 4  ;;  %v8418_v22 = vshrl.u32 %v7868_v47, 16  ;;  %v12505_v10 = vcombine.low %v8297_v43, %v8307_v9  ;;  %v16936_v29 = vcombine.low %v8321_v18, %v8331_v48  ;;  %v14820_v47 = vld [vmem:[#allocation2 + $0x18] sm:$0xff]  }
 0x2ba   : > { %13662 = vmatmul.mubr.bf16.gmra.mrb[56].mxu1 %v12206_v17  ;;  %14033 = vmatprep.mubr.bf16.mxu0 %v16867_v8  ;;  %v8429_v0 = vshrl.u32 %v7870_v62, 16  ;;  %v8432_v17 = vshll.u32 %v7870_v62, 16  ;;  %v8345_v8 = vsel %vm15727_vm11, %v8340_v33, %v16901_v31  ;;  %v8355_v13 = vsel %vm15727_vm11, %v8350_v40, %v8354_v14  ;;  %v7869_v31 = vld [vmem:[#allocation2 + $0x134] sm:$0x1]  ;;  %v14822_v62 = vld [vmem:[#allocation2 + $0x24] sm:$0xff]  }
 0x2bb   : > { %13665 = vmatprep.mubr.bf16.mxu1 %v12207_v15  ;;  %v8397_v23 = vor.u32 %v8396_v38, %v16927_v28  ;;  %v8400_v56 = vshll.u32 %v7866_v2, 16  ;;  %v8369_v15 = vsel %vm15727_vm11, %v8364_v19, %v16910_v35  ;;  %v16947_v41 = vrot.slane %v8387_v54, 4  ;;  %v7877_v2 = vld [vmem:[#allocation2 + $0x154] sm:$0xf] }
 0x2bc   : > { %v8407_v55 = vrot.slane %v8405_v49, 4  ;;  %v8410_v32 = vrot.slane %v8408_v58, 5  ;;  %v8379_v25 = vsel %vm15727_vm11, %v8374_v60, %v8378_v45  ;;  %v16951_v63 = vrot.slane %v8414_v5, 5 }
 0x2bd   : > { %v8420_v34 = vrot.slane %v8418_v22, 4  ;;  %v8438_v4 = vshll.u32 %v7871_v46, 16  ;;  %v8431_v59 = vrot.slane %v8429_v0, 4  ;;  %v8434_v7 = vrot.slane %v8432_v17, 5 }
 0x2be   : > { %v8442_v26 = vshrl.u32 %v7871_v46, 16  ;;  %v5326_v51 = vshrl.u32 %v4872_v3, 16  ;;  %v12507_v35 = vcombine.low %v8345_v8, %v8355_v13  ;;  %v16953_v57 = vrot.slane %v8397_v23, 4  ;;  %v7875_v8 = vld [vmem:[#allocation2 + $0x14c] sm:$0x1] }
 0x2bf   : > { %v16955_v61 = vrot.slane %v8400_v56, 5  ;;  %v5329_v11 = vshll.u32 %v4872_v3, 16  ;;  %v16957_v30 = vcombine.low %v8369_v15, %v8379_v25  ;;  %v8393_v44 = vsel %vm15727_vm11, %v16947_v41, %v16927_v28 }
 0x2c0   : > { %v8411_v39 = vor.u32 %v8410_v32, %v8407_v55  ;;  %v8424_v20 = vshll.u32 %v7869_v31, 16  ;;  %v16964_v43 = vrot.slane %v8438_v4, 5  ;;  %v8453_v1 = vshrl.u32 %v7873_v50, 16  ;;  %v14994_v4 = vld [vmem:[%s15155_s27 + $0x108] sm:$0xff]  }
 0x2c1   : > { %14034 = vmatmul.mubr.bf16.gmra.mrb[28].mxu0 %v12504_v21  ;;  %v8421_v21 = vor.u32 %v8420_v34, %v16951_v63  ;;  %v5328_v12 = vrot.slane %v5326_v51, 4  ;;  %v8435_v9 = vor.u32 %v8434_v7, %v8431_v59  ;;  %v8444_v18 = vrot.slane %v8442_v26, 4 }
 0x2c2   : > { %13666 = vmatmul.mubr.bf16.gmra.mrb[60].mxu1 %v12208_v42  ;;  %14037 = vmatprep.mubr.bf16.mxu0 %v12505_v10  ;;  %v7872_v42 = vld [vmem:[#allocation2 + $0x140] sm:$0x1]  ;;  %v8456_v33 = vshll.u32 %v7873_v50, 16  ;;  %v5331_v14 = vrot.slane %v5329_v11, 5  ;;  %v8403_v48 = vsel %vm15727_vm11, %v16953_v57, %v16955_v61  ;;  %v8462_v40 = vshll.u32 %v7874_v53, 16  ;;  %v14823_v11 = vld [vmem:[#allocation2 + $0x30] sm:$0xff]  }
 0x2c3   : > { %13685 = vmatprep.mubr.bf16.mxu1 %v14819_v24  ;;  %v8466_v28 = vshrl.u32 %v7874_v53, 16  ;;  %v5348_v38 = vsel %vm15727_vm11, %v16830_v6, %v16432_v16  ;;  %v16974_v19 = vrot.slane %v8424_v20, 5  ;;  %v8477_v54 = vshrl.u32 %v7876_v37, 16  ;;  %v7879_v10 = vld [vmem:[#allocation2 + $0x15c] sm:$0xf]  ;;  %v14993_v24 = vld [vmem:[%s15155_s27 + $0x100] sm:$0xff]  }
 0x2c4   : > { %v8480_v49 = vshll.u32 %v7876_v37, 16  ;;  %v5332_v58 = vor.u32 %v5331_v14, %v5328_v12  ;;  %v16976_v60 = vrot.slane %v8411_v39, 4  ;;  %v16978_v45 = vrot.slane %v8421_v21, 4  ;;  %v7880_v6 = vld [vmem:[#allocation2 + $0x160] sm:$0xf] }
 0x2c5   : > { %v8448_v5 = vshll.u32 %v7872_v42, 16  ;;  %v8455_v22 = vrot.slane %v8453_v1, 4  ;;  %v16980_v46 = vrot.slane %v8435_v9, 4  ;;  %v8445_v0 = vor.u32 %v8444_v18, %v16964_v43  ;;  %v7878_v57 = vld [vmem:[#allocation2 + $0x158] sm:$0x1]  ;;  %v14824_v39 = vld [vmem:[#allocation2 + $0x3c] sm:$0xff]  }
 0x2c6   : > { %v8458_v16 = vrot.slane %v8456_v33, 5  ;;  %v5333_v17 = vrot.slane %v5332_v58, 4  ;;  %v16984_v13 = vrot.slane %v8462_v40, 5  ;;  %v8468_v23 = vrot.slane %v8466_v28, 4  ;;  %v7882_v1 = vld [vmem:[#allocation2 + $0x168] sm:$0xf] }
 0x2c7   : > { %v8486_v56 = vshll.u32 %v7877_v2, 16  ;;  %v8490_v15 = vshrl.u32 %v7877_v2, 16  ;;  %v8479_v41 = vrot.slane %v8477_v54, 4  ;;  %v8482_v55 = vrot.slane %v8480_v49, 5  ;;  %v7883_v18 = vld [vmem:[#allocation2 + $0x16c] sm:$0xf] }
 0x2c8   : > { %v8501_v32 = vshrl.u32 %v7879_v10, 16  ;;  %v5338_v3 = vsel %vm15727_vm11, %v5333_v17, %v19472_v36  ;;  %v8510_v25 = vshll.u32 %v7880_v6, 16  ;;  %v8514_v31 = vshrl.u32 %v7880_v6, 16  ;;  %v14825_v6 = vld [vmem:[#allocation2 + $0x48] sm:$0xff]  }
 0x2c9   : > { %14038 = vmatmul.mubr.bf16.gmra.mrb[32].mxu0 %v16936_v29  ;;  %v8504_v29 = vshll.u32 %v7879_v10, 16  ;;  %v16990_v34 = vcombine.low %v5338_v3, %v5348_v38  ;;  %v8446_v59 = vrot.slane %v8445_v0, 4  ;;  %v8450_v7 = vrot.slane %v8448_v5, 5  ;;  %v7886_v0 = vld [vmem:[#allocation2 + $0x178] sm:$0xf] }
 0x2ca   : > { %13686 = vmatmul.mubr.bf16.vlgmr.msra.gmra.mrb[0].mxu1 %v14820_v47  ;;  %14041 = vmatprep.mubr.bf16.mxu0 %v12507_v35  ;;  %v8459_v26 = vor.u32 %v8458_v16, %v8455_v22  ;;  %v8472_v50 = vshll.u32 %v7875_v8, 16  ;;  %v12509_v51 = vcombine.low %v8393_v44, %v8403_v48  ;;  %v8469_v35 = vor.u32 %v8468_v23, %v16984_v13  ;;  %v14995_v48 = vld [vmem:[%s15155_s27 + $0x110] sm:$0xff]   ;;  %v14996_v16 = vld [vmem:[%s15155_s27 + $0x118] sm:$0xff]   ;;  %v7889_v3 = vld [vmem:[#allocation2 + $0x184] sm:$0xf] }
 0x2cb   : > { %14157 = vmatpush3.bf16.msra.mxu1 %v14993_v24  ;;  %13689 = vmatprep.mubr.bf16.mxu1 %v14822_v62  ;;  %v16994_v61 = vrot.slane %v8486_v56, 5  ;;  %v8492_v36 = vrot.slane %v8490_v15, 4  ;;  %v8417_v20 = vsel %vm15727_vm11, %v16976_v60, %v16951_v63  ;;  %v8427_v53 = vsel %vm15727_vm11, %v16978_v45, %v16974_v19  ;;  %v7885_v45 = vld [vmem:[#allocation2 + $0x174] sm:$0xf]  ;;  %v7888_v15 = vld [vmem:[#allocation2 + $0x180] sm:$0xf] }
 0x2cc   : > { %14150 = vmatprep.subr.bf16.mxu1 %v14994_v4  ;;  %v8441_v44 = vsel %vm15727_vm11, %v16980_v46, %v16964_v43  ;;  %v8483_v21 = vor.u32 %v8482_v55, %v8479_v41  ;;  %v8503_v37 = vrot.slane %v8501_v32, 4  ;;  %v8506_v12 = vrot.slane %v8504_v29, 5  ;;  %v7881_v43 = vld [vmem:[#allocation2 + $0x164] sm:$0x1]  ;;  %v7884_v46 = vld [vmem:[#allocation2 + $0x170] sm:$0x1] }
 0x2cd   : > { %v17008_v42 = vrot.slane %v8510_v25, 5  ;;  %v8516_v9 = vrot.slane %v8514_v31, 4  ;;  %v8451_v63 = vsel %vm15727_vm11, %v8446_v59, %v8450_v7  ;;  %v17012_v33 = vrot.slane %v8459_v26, 4  ;;  %v14827_v24 = vld [vmem:[#allocation2 + $0x54] sm:$0xff]  }
 0x2ce   : > { %v17014_v14 = vrot.slane %v8472_v50, 5  ;;  %v8496_v47 = vshll.u32 %v7878_v57, 16  ;;  %v8470_v40 = vrot.slane %v8469_v35, 4  ;;  %v8493_v28 = vor.u32 %v8492_v36, %v16994_v61 }
 0x2cf   : > { %14158 = vmatpush3.bf16.msra.mxu1 %v14994_v4  ;;  %v8525_v38 = vshrl.u32 %v7882_v1, 16  ;;  %v8528_v62 = vshll.u32 %v7882_v1, 16  ;;  %v8534_v19 = vshll.u32 %v7883_v18, 16  ;;  %v8538_v2 = vshrl.u32 %v7883_v18, 16 }
 0x2d0   : > { %14151 = vmatprep.subr.bf16.mxu1 %v14995_v48  ;;  %v8484_v54 = vrot.slane %v8483_v21, 4  ;;  %v8507_v49 = vor.u32 %v8506_v12, %v8503_v37  ;;  %v8517_v58 = vor.u32 %v8516_v9, %v17008_v42  ;;  %v8520_v60 = vshll.u32 %v7881_v43, 16  ;;  %v7887_v37 = vld [vmem:[#allocation2 + $0x17c] sm:$0x1]  ;;  %v7890_v43 = vld [vmem:[#allocation2 + $0x188] sm:$0x1] }
 0x2d1   : > { %14042 = vmatmul.mubr.bf16.gmra.mrb[36].mxu0 %v16957_v30  ;;  %v12510_v5 = vcombine.low %v8417_v20, %v8427_v53  ;;  %v12511_v30 = vcombine.low %v8441_v44, %v8451_v63  ;;  %v8465_v22 = vsel %vm15727_vm11, %v17012_v33, %v16984_v13  ;;  %v8498_v10 = vrot.slane %v8496_v47, 5  ;;  %v7891_v33 = vld [vmem:[#allocation2 + $0x18c] sm:$0xf] }
 0x2d2   : > { %13690 = vmatmul.mubr.bf16.gmra.mrb[4].mxu1 %v14823_v11  ;;  %14045 = vmatprep.mubr.bf16.mxu0 %v12509_v51  ;;  %v8475_v17 = vsel %vm15727_vm11, %v8470_v40, %v17014_v14  ;;  %v8494_v8 = vrot.slane %v8493_v28, 4  ;;  %v8527_v23 = vrot.slane %v8525_v38, 4  ;;  %v8530_v56 = vrot.slane %v8528_v62, 5  ;;  %v14997_v51 = vld [vmem:[%s15155_s27 + $0x120] sm:$0xff]   ;;  %v14998_v14 = vld [vmem:[%s15155_s27 + $0x128] sm:$0xff]  }
 0x2d3   : > { %13693 = vmatprep.mubr.bf16.mxu1 %v14824_v39  ;;  %14159 = vmatpush3.bf16.msra.mxu1 %v14995_v48  ;;  %v17028_v41 = vrot.slane %v8534_v19, 5  ;;  %v8540_v55 = vrot.slane %v8538_v2, 4  ;;  %v8549_v32 = vshrl.u32 %v7885_v45, 16  ;;  %v8552_v13 = vshll.u32 %v7885_v45, 16 }
 0x2d4   : > { %14152 = vmatprep.subr.bf16.mxu1 %v14996_v16  ;;  %v8489_v29 = vsel %vm15727_vm11, %v8484_v54, %v16994_v61  ;;  %v8508_v25 = vrot.slane %v8507_v49, 4  ;;  %v8518_v31 = vrot.slane %v8517_v58, 4  ;;  %v8522_v4 = vrot.slane %v8520_v60, 5  ;;  %v7892_v54 = vld [vmem:[#allocation2 + $0x190] sm:$0xf] }
 0x2d5   : > { %v8558_v59 = vshll.u32 %v7886_v0, 16  ;;  %v8562_v7 = vshrl.u32 %v7886_v0, 16  ;;  %v8573_v26 = vshrl.u32 %v7888_v15, 16  ;;  %v8576_v50 = vshll.u32 %v7888_v15, 16  ;;  %v14829_v49 = vld [vmem:[#allocation2 + $0x6c] sm:$0xff]  }
 0x2d6   : > { %v8499_v35 = vsel %vm15727_vm11, %v8494_v8, %v8498_v10  ;;  %v8544_v57 = vshll.u32 %v7884_v46, 16  ;;  %v8582_v36 = vshll.u32 %v7889_v3, 16  ;;  %v8586_v11 = vshrl.u32 %v7889_v3, 16  ;;  %v7895_v10 = vld [vmem:[#allocation2 + $0x19c] sm:$0xf]  ;;  %v14999_v46 = vld [vmem:[%s15155_s27 + $0x130] sm:$0xff]  }
 0x2d7   : > { %14160 = vmatpush3.bf16.msra.mxu1 %v14996_v16  ;;  %v8531_v61 = vor.u32 %v8530_v56, %v8527_v23  ;;  %v8541_v39 = vor.u32 %v8540_v55, %v17028_v41  ;;  %v8551_v20 = vrot.slane %v8549_v32, 4  ;;  %v8554_v53 = vrot.slane %v8552_v13, 5 }
 0x2d8   : > { %14153 = vmatprep.subr.bf16.mxu1 %v14997_v51  ;;  %v12512_v44 = vcombine.low %v8465_v22, %v8475_v17  ;;  %v8513_v21 = vsel %vm15727_vm11, %v8508_v25, %v17008_v42  ;;  %v8523_v1 = vsel %vm15727_vm11, %v8518_v31, %v8522_v4  ;;  %v17042_v12 = vrot.slane %v8558_v59, 5  ;;  %v14828_v42 = vld [vmem:[#allocation2 + $0x60] sm:$0xff]   ;;  %v7894_v22 = vld [vmem:[#allocation2 + $0x198] sm:$0xf] }
 0x2d9   : > { %14046 = vmatmul.mubr.bf16.gmra.mrb[40].mxu0 %v12510_v5  ;;  %v8564_v9 = vrot.slane %v8562_v7, 4  ;;  %v8575_v18 = vrot.slane %v8573_v26, 4  ;;  %v8578_v63 = vrot.slane %v8576_v50, 5  ;;  %v12513_v47 = vcombine.low %v8489_v29, %v8499_v35  ;;  %v15000_v4 = vld [vmem:[%s15155_s27 + $0x138] sm:$0xff]  }
 0x2da   : > { %13694 = vmatmul.mubr.bf16.gmra.mrb[8].mxu1 %v14825_v6  ;;  %14049 = vmatprep.mubr.bf16.mxu0 %v12511_v30  ;;  %v8546_v48 = vrot.slane %v8544_v57, 5  ;;  %v17045_v40 = vrot.slane %v8582_v36, 5  ;;  %v8588_v28 = vrot.slane %v8586_v11, 4  ;;  %v8532_v38 = vrot.slane %v8531_v61, 4  ;;  %v14830_v59 = vld [vmem:[#allocation2 + $0x78] sm:$0xff]  }
 0x2db   : > { %13697 = vmatprep.mubr.bf16.mxu1 %v14827_v24  ;;  %14161 = vmatpush3.bf16.msra.mxu1 %v14997_v51  ;;  %v8542_v62 = vrot.slane %v8541_v39, 4  ;;  %v8555_v19 = vor.u32 %v8554_v53, %v8551_v20  ;;  %v8568_v2 = vshll.u32 %v7887_v37, 16  ;;  %v12514_v58 = vcombine.low %v8513_v21, %v8523_v1  ;;  %v14832_v51 = vld [vmem:[#allocation2 + $0x84] sm:$0xff]   ;;  %v7893_v57 = vld [vmem:[#allocation2 + $0x194] sm:$0x1] }
 0x2dc   : > { %14154 = vmatprep.subr.bf16.mxu1 %v14998_v14  ;;  %v8565_v60 = vor.u32 %v8564_v9, %v17042_v12  ;;  %v8579_v45 = vor.u32 %v8578_v63, %v8575_v18  ;;  %v8592_v5 = vshll.u32 %v7890_v43, 16  ;;  %v8597_v30 = vshrl.u32 %v7891_v33, 16  ;;  %v7897_v36 = vld [vmem:[#allocation2 + $0x1a4] sm:$0xf]  ;;  %v7898_v53 = vld [vmem:[#allocation2 + $0x1a8] sm:$0xf] }
 0x2dd   : > { %v8589_v0 = vor.u32 %v8588_v28, %v17045_v40  ;;  %v8600_v16 = vshll.u32 %v7891_v33, 16  ;;  %v8606_v6 = vshll.u32 %v7892_v54, 16  ;;  %v8610_v17 = vshrl.u32 %v7892_v54, 16  ;;  %v7896_v37 = vld [vmem:[#allocation2 + $0x1a0] sm:$0x1]  ;;  %v14833_v54 = vld [vmem:[#allocation2 + $0x90] sm:$0xff]  }
 0x2de   : > { %v8537_v8 = vsel %vm15727_vm11, %v8532_v38, %v17028_v41  ;;  %v8547_v23 = vsel %vm15727_vm11, %v8542_v62, %v8546_v48  ;;  %v8556_v56 = vrot.slane %v8555_v19, 4  ;;  %v8570_v15 = vrot.slane %v8568_v2, 5 }
 0x2df   : > { %14162 = vmatpush3.bf16.msra.mxu1 %v14998_v14  ;;  %v8621_v55 = vshrl.u32 %v7894_v22, 16  ;;  %v8624_v32 = vshll.u32 %v7894_v22, 16  ;;  %v8630_v13 = vshll.u32 %v7895_v10, 16  ;;  %v8634_v3 = vshrl.u32 %v7895_v10, 16 }
 0x2e0   : > { %14155 = vmatprep.subr.bf16.mxu1 %v14999_v46  ;;  %v8566_v24 = vrot.slane %v8565_v60, 4  ;;  %v8580_v29 = vrot.slane %v8579_v45, 4  ;;  %v8594_v25 = vrot.slane %v8592_v5, 5  ;;  %v8599_v31 = vrot.slane %v8597_v30, 4  ;;  %v14834_v5 = vld [vmem:[#allocation2 + $0x9c] sm:$0xff]  }
 0x2e1   : > { %14050 = vmatmul.mubr.bf16.gmra.mrb[44].mxu0 %v12512_v44  ;;  %v8590_v7 = vrot.slane %v8589_v0, 4  ;;  %v8602_v41 = vrot.slane %v8600_v16, 5  ;;  %v8608_v26 = vrot.slane %v8606_v6, 5  ;;  %v8612_v50 = vrot.slane %v8610_v17, 4 }
 0x2e2   : > { %13698 = vmatmul.mubr.bf16.gmra.mrb[12].mxu1 %v14828_v42  ;;  %14053 = vmatprep.mubr.bf16.mxu0 %v12513_v47  ;;  %v12515_v35 = vcombine.low %v8537_v8, %v8547_v23  ;;  %v8623_v11 = vrot.slane %v8621_v55, 4  ;;  %v8626_v61 = vrot.slane %v8624_v32, 5  ;;  %v8632_v39 = vrot.slane %v8630_v13, 5  ;;  %v9214_v32 = vld [vmem:[#allocation2 + $0x18] sm:$0xe] }
 0x2e3   : > { %13701 = vmatprep.mubr.bf16.mxu1 %v14829_v49  ;;  %14163 = vmatpush3.bf16.msra.mxu1 %v14999_v46  ;;  %v8636_v20 = vrot.slane %v8634_v3, 4  ;;  %v8561_v44 = vsel %vm15727_vm11, %v8556_v56, %v17042_v12  ;;  %v8571_v21 = vsel %vm15727_vm11, %v8566_v24, %v8570_v15  ;;  %v8585_v1 = vsel %vm15727_vm11, %v8580_v29, %v17045_v40  ;;  %v7899_v46 = vld [vmem:[#allocation2 + $0x1ac] sm:$0x1]  ;;  %v15001_v15 = vld [vmem:[#allocation2 + $0x1c] sm:$0xf] }
 0x2e4   : > { %14156 = vmatprep.subr.bf16.mxu1 %v15000_v4  ;;  %v8595_v9 = vsel %vm15727_vm11, %v8590_v7, %v8594_v25  ;;  %v8603_v18 = vor.u32 %v8602_v41, %v8599_v31  ;;  %v8613_v63 = vor.u32 %v8612_v50, %v8608_v26  ;;  %v8616_v33 = vshll.u32 %v7893_v57, 16  ;;  %v14835_v3 = vld [vmem:[#allocation2 + $0xa8] sm:$0xff]   ;;  %v15002_v41 = vld [vmem:[#allocation2 + $0x20] sm:$0x1] }
 0x2e5   : > { %v8645_v14 = vshrl.u32 %v7897_v36, 16  ;;  %v8648_v47 = vshll.u32 %v7897_v36, 16  ;;  %v8654_v12 = vshll.u32 %v7898_v53, 16  ;;  %v8658_v48 = vshrl.u32 %v7898_v53, 16  ;;  %v15003_v50 = vld [vmem:[#allocation2 + $0x28] sm:$0xf] }
 0x2e6   : > { %v8627_v43 = vor.u32 %v8626_v61, %v8623_v11  ;;  %v8637_v28 = vor.u32 %v8636_v20, %v8632_v39  ;;  %v8640_v42 = vshll.u32 %v7896_v37, 16  ;;  %v12516_v38 = vcombine.low %v8561_v44, %v8571_v21  ;;  %v9215_v36 = vld [vmem:[#allocation2 + $0x24] sm:$0xe]  ;;  %v9216_v53 = vld [vmem:[#allocation2 + $0x30] sm:$0xe] }
 0x2e7   : > { %14164 = vmatpush3.bf16.msra.mxu1 %v15000_v4  ;;  %v12517_v40 = vcombine.low %v8585_v1, %v8595_v9  ;;  %v8604_v62 = vrot.slane %v8603_v18, 4  ;;  %v8614_v19 = vrot.slane %v8613_v63, 4  ;;  %v8618_v2 = vrot.slane %v8616_v33, 5  ;;  %v14837_v4 = vld [vmem:[#allocation2 + $0xb4] sm:$0xff]   ;;  %v15005_v37 = vld [vmem:[#allocation2 + $0x2c] sm:$0x1] }
 0x2e8   : > { %v8647_v49 = vrot.slane %v8645_v14, 4  ;;  %v8656_v60 = vrot.slane %v8654_v12, 5  ;;  %v8660_v45 = vrot.slane %v8658_v48, 4  ;;  %v8628_v30 = vrot.slane %v8627_v43, 4  ;;  %v14838_v18 = vld [vmem:[#allocation2 + $0xc0] sm:$0xff]  }
 0x2e9   : > { %14054 = vmatmul.mubr.bf16.gmra.mrb[48].mxu0 %v12514_v58  ;;  %v8650_v58 = vrot.slane %v8648_v47, 5  ;;  %v8638_v22 = vrot.slane %v8637_v28, 4  ;;  %v8642_v10 = vrot.slane %v8640_v42, 5  ;;  %v8609_v0 = vsel %vm15727_vm11, %v8604_v62, %v8608_v26  ;;  %v14839_v33 = vld [vmem:[#allocation2 + $0xe4] sm:$0xff]   ;;  %v15006_v12 = vld [vmem:[#allocation2 + $0x38] sm:$0x1] }
 0x2ea   : > { %13702 = vmatmul.mubr.bf16.gmra.mrb[16].mxu1 %v14830_v59  ;;  %14057 = vmatprep.mubr.bf16.mxu0 %v12515_v35  ;;  %v8619_v16 = vsel %vm15727_vm11, %v8614_v19, %v8618_v2  ;;  %v8661_v17 = vor.u32 %v8660_v45, %v8656_v60  ;;  %v8664_v8 = vshll.u32 %v7899_v46, 16  ;;  %v8633_v23 = vsel %vm15727_vm11, %v8628_v30, %v8632_v39  ;;  %v15004_v39 = vld [vmem:[#allocation2 + $0x34] sm:$0xf]  ;;  %v9217_v42 = vld [vmem:[#allocation2 + $0x3c] sm:$0xe] }
 0x2eb   : > { %13705 = vmatprep.mubr.bf16.mxu1 %v14832_v51  ;;  %v8651_v6 = vor.u32 %v8650_v58, %v8647_v49  ;;  %v8643_v56 = vsel %vm15727_vm11, %v8638_v22, %v8642_v10  ;;  %v9344_v55 = vrot.slane %v15001_v15, 5  ;;  %v12518_v13 = vcombine.low %v8609_v0, %v8619_v16  ;;  %v9218_v62 = vld [vmem:[#allocation2 + $0x48] sm:$0xe]  ;;  %v15008_v19 = vld [vmem:[#allocation2 + $0x4c] sm:$0xf] }
 0x2ec   : > { %v12519_v24 = vcombine.low %v8633_v23, %v8643_v56  ;;  %v8662_v25 = vrot.slane %v8661_v17, 4  ;;  %v8666_v31 = vrot.slane %v8664_v8, 5  ;;  %v12529_v59 = vrot.slane %v9214_v32, 9  ;;  %v15009_v49 = vld [vmem:[#allocation2 + $0x58] sm:$0xf] }
 0x2ed   : > { %v8652_v29 = vrot.slane %v8651_v6, 4  ;;  %v9346_v7 = vrot.slane %v9344_v55, 4  ;;  %v9347_v26 = vrot.slane %v15002_v41, 5  ;;  %v9351_v51 = vrot.slane %v15003_v50, 5  ;;  %v15010_v30 = vld [vmem:[#allocation2 + $0x64] sm:$0xf] }
 0x2ee   : > { %v8667_v57 = vsel %vm15727_vm11, %v8662_v25, %v8666_v31  ;;  %v9345_v11 = vsel %vm15895_vm14, %v12529_v59, %v9344_v55  ;;  %v9358_v20 = vrot.slane %v15004_v39, 5  ;;  %v12530_v21 = vrot.slane %v9215_v36, 9  ;;  %v15011_v0 = vld [vmem:[#allocation2 + $0x44] sm:$0x1]  ;;  %v15012_v23 = vld [vmem:[#allocation2 + $0x50] sm:$0x1] }
 0x2ef   : > { %v8657_v35 = vsel %vm15727_vm11, %v8652_v29, %v8656_v60  ;;  %v9348_v61 = vsel %vm15895_vm14, %v9346_v7, %v9347_v26  ;;  %v9353_v1 = vrot.slane %v9351_v51, 4  ;;  %v9354_v9 = vrot.slane %v15005_v37, 5  ;;  %v14840_v55 = vld [vmem:[#allocation2 + $0xf0] sm:$0xff]   ;;  %v14841_v25 = vld [vmem:[#allocation2 + $0xfc] sm:$0xff]   ;;  %v9221_v7 = vld [vmem:[#allocation2 + $0x6c] sm:$0xe] }
 0x2f0   : > { %v12520_v44 = vcombine.low %v8657_v35, %v8667_v57  ;;  %v12577_v63 = vcombine.low %v9345_v11, %v9348_v61  ;;  %v12531_v14 = vrot.slane %v9216_v53, 9  ;;  %v9360_v47 = vrot.slane %v9358_v20, 4  ;;  %v15015_v41 = vld [vmem:[#allocation2 + $0x70] sm:$0xf]  ;;  %v9222_v11 = vld [vmem:[#allocation2 + $0x78] sm:$0xe] }
 0x2f1   : > { %14058 = vmatmul.mubr.bf16.gmra.mrb[52].mxu0 %v12516_v38  ;;  %v9361_v48 = vrot.slane %v15006_v12, 5  ;;  %v9352_v43 = vsel %vm15895_vm14, %v12530_v21, %v9351_v51  ;;  %v9355_v28 = vsel %vm15895_vm14, %v9353_v1, %v9354_v9  ;;  %v15007_v38 = vld [vmem:[#allocation2 + $0x40] sm:$0xf]  ;;  %v9372_v2 = vrot.slane %v15008_v19, 5  ;;  %v9223_v61 = vld [vmem:[#allocation2 + $0x84] sm:$0xe] }
 0x2f2   : > { %13706 = vmatmul.mubr.bf16.gmra.mrb[20].mxu1 %v14833_v54  ;;  %14061 = vmatprep.mubr.bf16.mxu0 %v12517_v40  ;;  %v9365_v40 = vrot.slane %v15007_v38, 5  ;;  %v9219_v54 = vld [vmem:[#allocation2 + $0x54] sm:$0xe]  ;;  %v9379_v58 = vrot.slane %v15009_v49, 5  ;;  %v9359_v60 = vsel %vm15895_vm14, %v12531_v14, %v9358_v20  ;;  %v9386_v22 = vrot.slane %v15010_v30, 5 }
 0x2f3   : > { %13709 = vmatprep.mubr.bf16.mxu1 %v14834_v5  ;;  %v9362_v45 = vsel %vm15895_vm14, %v9360_v47, %v9361_v48  ;;  %v9220_v5 = vld [vmem:[#allocation2 + $0x60] sm:$0xe]  ;;  %v12578_v10 = vcombine.low %v9352_v43, %v9355_v28  ;;  %v12532_v46 = vrot.slane %v9217_v42, 9  ;;  %v9368_v16 = vrot.slane %v15011_v0, 5  ;;  %v15017_v9 = vld [vmem:[#allocation2 + $0x74] sm:$0x1] }
 0x2f4   : > { %v12533_v6 = vrot.slane %v9218_v62, 9  ;;  %v9367_v17 = vrot.slane %v9365_v40, 4  ;;  %v9374_v8 = vrot.slane %v9372_v2, 4  ;;  %v9375_v56 = vrot.slane %v15012_v23, 5  ;;  %v9224_v28 = vld [vmem:[#allocation2 + $0x90] sm:$0xe] }
 0x2f5   : > { %v12534_v15 = vrot.slane %v9219_v54, 9  ;;  %v12579_v32 = vcombine.low %v9359_v60, %v9362_v45  ;;  %v12535_v29 = vrot.slane %v9220_v5, 9  ;;  %v9388_v31 = vrot.slane %v9386_v22, 4  ;;  %v14842_v42 = vld [vmem:[#allocation2 + $0x108] sm:$0xff]   ;;  %v15019_v19 = vld [vmem:[#allocation2 + $0x80] sm:$0x1] }
 0x2f6   : > { %v9393_v26 = vrot.slane %v15015_v41, 5  ;;  %v9366_v50 = vsel %vm15895_vm14, %v12532_v46, %v9365_v40  ;;  %v9369_v51 = vsel %vm15895_vm14, %v9367_v17, %v9368_v16  ;;  %v9373_v35 = vsel %vm15895_vm14, %v12533_v6, %v9372_v2  ;;  %v4869_v54 = vld [vmem:[#allocation2 + $0xe4] sm:$0xf]  ;;  %v14843_v49 = vld [vmem:[#allocation2 + $0x114] sm:$0xff]   ;;  %v15020_v45 = vld [vmem:[#allocation2 + $0x8c] sm:$0x1] }
 0x2f7   : > { %v9376_v57 = vsel %vm15895_vm14, %v9374_v8, %v9375_v56  ;;  %v17100_v36 = vsel %vm15895_vm14, %v12534_v15, %v9379_v58  ;;  %v17108_v20 = vsel %vm15895_vm14, %v12535_v29, %v9386_v22  ;;  %v12536_v53 = vrot.slane %v9221_v7, 9  ;;  %v15021_v30 = vld [vmem:[#allocation2 + $0x94] sm:$0xf]  ;;  %v9225_v16 = vld [vmem:[#allocation2 + $0x9c] sm:$0xe] }
 0x2f8   : > { %v9395_v37 = vrot.slane %v9393_v26, 4  ;;  %v12537_v14 = vrot.slane %v9222_v11, 9  ;;  %v12538_v47 = vrot.slane %v9223_v61, 9  ;;  %v12580_v12 = vcombine.low %v9366_v50, %v9369_v51  ;;  %v15022_v6 = vld [vmem:[#allocation2 + $0xa0] sm:$0xf] }
 0x2f9   : > { %14062 = vmatmul.mubr.bf16.gmra.mrb[56].mxu0 %v12518_v13  ;;  %v9381_v13 = vrot.slane %v9379_v58, 4  ;;  %v12581_v48 = vcombine.low %v9373_v35, %v9376_v57  ;;  %v17120_v40 = vsel %vm15895_vm14, %v12536_v53, %v9393_v26  ;;  %v9403_v2 = vrot.slane %v15019_v19, 5  ;;  %v9226_v8 = vld [vmem:[#allocation2 + $0xa8] sm:$0xe]  ;;  %v9227_v23 = vld [vmem:[#allocation2 + $0xb4] sm:$0xe] }
 0x2fa   : > { %13710 = vmatmul.mubr.bf16.gmra.mrb[24].mxu1 %v14835_v3  ;;  %14065 = vmatprep.mubr.bf16.mxu0 %v12519_v24  ;;  %v15013_v3 = vld [vmem:[#allocation2 + $0x5c] sm:$0x1]  ;;  %v9410_v5 = vrot.slane %v15020_v45, 5  ;;  %v9414_v22 = vrot.slane %v15021_v30, 5  ;;  %v12539_v0 = vrot.slane %v9224_v28, 9  ;;  %v9421_v17 = vrot.slane %v15022_v6, 5 }
 0x2fb   : > { %13713 = vmatprep.mubr.bf16.mxu1 %v14837_v4  ;;  %v9382_v24 = vrot.slane %v15013_v3, 5  ;;  %v15014_v4 = vld [vmem:[#allocation2 + $0x68] sm:$0x1]  ;;  %v5302_v56 = vshrl.u32 %v4869_v54, 16  ;;  %v5305_v15 = vshll.u32 %v4869_v54, 16  ;;  %v12540_v41 = vrot.slane %v9225_v16, 9 }
 0x2fc   : > { %v9389_v59 = vrot.slane %v15014_v4, 5  ;;  %v15024_v29 = vld [vmem:[#allocation2 + $0x98] sm:$0x1]  ;;  %v9416_v7 = vrot.slane %v9414_v22, 4  ;;  %v9423_v51 = vrot.slane %v9421_v17, 4  ;;  %v12541_v11 = vrot.slane %v9226_v8, 9 }
 0x2fd   : > { %v17104_v39 = vsel %vm15895_vm14, %v9381_v13, %v9382_v24  ;;  %v15026_v26 = vld [vmem:[#allocation2 + $0xb8] sm:$0xf]  ;;  %v15027_v35 = vld [vmem:[#allocation2 + $0xa4] sm:$0x1]  ;;  %v12542_v61 = vrot.slane %v9227_v23, 9  ;;  %v5304_v53 = vrot.slane %v5302_v56, 4 }
 0x2fe   : > { %v17112_v1 = vsel %vm15895_vm14, %v9388_v31, %v9389_v59  ;;  %v12582_v43 = vcombine.low %v17100_v36, %v17104_v39  ;;  %v15025_v31 = vld [vmem:[#allocation2 + $0xac] sm:$0xf]  ;;  %v9435_v50 = vrot.slane %v15026_v26, 5  ;;  %v9424_v57 = vrot.slane %v15027_v35, 5  ;;  %v15031_v54 = vld [vmem:[#allocation2 + $0xd0] sm:$0xf] }
 0x2ff   : > { %v12583_v38 = vcombine.low %v17108_v20, %v17112_v1  ;;  %v9428_v4 = vrot.slane %v15025_v31, 5  ;;  %v9229_v30 = vld [vmem:[#allocation2 + $0xcc] sm:$0xe]  ;;  %v15033_v8 = vld [vmem:[#allocation2 + $0xec] sm:$0x1] }
 0x300   : > { %v17160_v45 = vsel %vm15895_vm14, %v9423_v51, %v9424_v57  ;;  %v17171_v16 = vsel %vm15895_vm14, %v12542_v61, %v9435_v50  ;;  %v5321_v23 = vshll.u32 %v15033_v8, 16  ;;  %v9230_v56 = vld [vmem:[#allocation2 + $0xf0] sm:$0xe]  ;;  %v4875_v35 = vld [vmem:[#allocation2 + $0xfc] sm:$0xf] }
 0x301   : > { %14066 = vmatmul.mubr.bf16.gmra.mrb[60].mxu0 %v12520_v44  ;;  %v15016_v44 = vld [vmem:[#allocation2 + $0x7c] sm:$0xf]  ;;  %v12545_v1 = vrot.slane %v9230_v56, 9  ;;  %v15040_v56 = vld [vmem:[#allocation2 + $0x104] sm:$0x1] }
 0x302   : > { %13714 = vmatmul.mubr.bf16.gmra.mrb[28].mxu1 %v14838_v18  ;;  %14085 = vmatprep.mubr.bf16.mxu0 %v12577_v63  ;;  %v9400_v21 = vrot.slane %v15016_v44, 5  ;;  %v9396_v18 = vrot.slane %v15017_v9, 5  ;;  %v15018_v63 = vld [vmem:[#allocation2 + $0x88] sm:$0xf]  ;;  %v5307_v44 = vrot.slane %v5305_v15, 5  ;;  %v14844_v9 = vld [vmem:[#allocation2 + $0x120] sm:$0xff]  }
 0x303   : > { %13717 = vmatprep.mubr.bf16.mxu1 %v14839_v33  ;;  %v9407_v33 = vrot.slane %v15018_v63, 5  ;;  %v9430_v63 = vrot.slane %v9428_v4, 4  ;;  %v5323_v51 = vrot.slane %v5321_v23, 5  ;;  %v14846_v57 = vld [vmem:[#allocation2 + $0x138] sm:$0xff]  }
 0x304   : > { %v9402_v62 = vrot.slane %v9400_v21, 4  ;;  %v17124_v58 = vsel %vm15895_vm14, %v9395_v37, %v9396_v18  ;;  %v17148_v18 = vsel %vm15895_vm14, %v12539_v0, %v9414_v22  ;;  %v15032_v22 = vld [vmem:[#allocation2 + $0xf4] sm:$0xf]  ;;  %v5308_v6 = vor.u32 %v5307_v44, %v5304_v53  ;;  %v14847_v53 = vld [vmem:[#allocation2 + $0x144] sm:$0xff]  }
 0x305   : > { %v9409_v60 = vrot.slane %v9407_v33, 4  ;;  %v17132_v46 = vsel %vm15895_vm14, %v12538_v47, %v9407_v33  ;;  %v12584_v3 = vcombine.low %v17120_v40, %v17124_v58  ;;  %v15028_v33 = vld [vmem:[#allocation2 + $0xb0] sm:$0x1]  ;;  %v15029_v47 = vld [vmem:[#allocation2 + $0xc4] sm:$0xf]  ;;  %v9456_v0 = vrot.slane %v15032_v22, 5 }
 0x306   : > { %v17138_v24 = vsel %vm15895_vm14, %v9402_v62, %v9403_v2  ;;  %v15030_v62 = vld [vmem:[#allocation2 + $0xbc] sm:$0x1]  ;;  %v9228_v2 = vld [vmem:[#allocation2 + $0xc0] sm:$0xe]  ;;  %v5309_v26 = vrot.slane %v5308_v6, 4 }
 0x307   : > { %v17142_v59 = vsel %vm15895_vm14, %v9409_v60, %v9410_v5  ;;  %v9438_v19 = vrot.slane %v15030_v62, 5  ;;  %v17156_v60 = vsel %vm15895_vm14, %v12540_v41, %v9421_v17  ;;  %v17164_v5 = vsel %vm15895_vm14, %v12541_v11, %v9428_v4  ;;  %v15036_v4 = vld [vmem:[#allocation2 + $0xf8] sm:$0x1] }
 0x308   : > { %v12543_v36 = vrot.slane %v9228_v2, 9  ;;  %v12586_v41 = vcombine.low %v17132_v46, %v17142_v59  ;;  %v12588_v61 = vcombine.low %v17156_v60, %v17160_v45  ;;  %v15037_v2 = vld [vmem:[#allocation2 + $0x100] sm:$0xf]  ;;  %v15046_v59 = vld [vmem:[#allocation2 + $0x110] sm:$0x1] }
 0x309   : > { %14086 = vmatmul.mubr.bf16.vlgmr.msra.gmra.mrb[0].mxu0 %v12578_v10  ;;  %v17128_v10 = vsel %vm15895_vm14, %v12537_v14, %v9400_v21  ;;  %v9431_v14 = vrot.slane %v15028_v33, 5  ;;  %v4878_v33 = vld [vmem:[#allocation2 + $0x108] sm:$0xf] }
 0x30a   : > { %13718 = vmatmul.mubr.bf16.gmra.mrb[32].mxu1 %v14840_v55  ;;  %14089 = vmatprep.mubr.bf16.mxu0 %v12579_v32  ;;  %v15023_v55 = vld [vmem:[#allocation2 + $0xe8] sm:$0xf]  ;;  %v12585_v20 = vcombine.low %v17128_v10, %v17138_v24  ;;  %v5377_v22 = vshll.u32 %v4878_v33, 16 }
 0x30b   : > { %13721 = vmatprep.mubr.bf16.mxu1 %v14841_v25  ;;  %v5311_v32 = vshll.u32 %v15023_v55, 16  ;;  %v5315_v13 = vshrl.u32 %v15023_v55, 16  ;;  %v9417_v25 = vrot.slane %v15024_v29, 5  ;;  %v17179_v15 = vsel %vm15895_vm14, %v9430_v63, %v9431_v14 }
 0x30c   : > { %v12589_v10 = vcombine.low %v17164_v5, %v17179_v15  ;;  %v17215_v14 = vsel %vm15895_vm14, %v12545_v1, %v9456_v0 }
 0x30d   : > { %v17144_v21 = vrot.slane %v5311_v32, 5  ;;  %v5317_v37 = vrot.slane %v5315_v13, 4  ;;  %v17152_v28 = vsel %vm15895_vm14, %v9416_v7, %v9417_v25  ;;  %v12544_v13 = vrot.slane %v9229_v30, 9  ;;  %v15035_v25 = vld [vmem:[#allocation2 + $0xd4] sm:$0x1] }
 0x30e   : > { %v9452_v31 = vrot.slane %v15035_v25, 5  ;;  %v9459_v7 = vrot.slane %v15036_v4, 5  ;;  %v12587_v11 = vcombine.low %v17148_v18, %v17152_v28  ;;  %v5374_v30 = vshrl.u32 %v4878_v33, 16 }
 0x30f   : > { %v5318_v17 = vor.u32 %v5317_v37, %v17144_v21  ;;  %v5314_v62 = vsel %vm15727_vm11, %v5309_v26, %v17144_v21  ;;  %v15039_v21 = vld [vmem:[#allocation2 + $0x100] sm:$0xf] }
 0x310   : > { %v9463_v8 = vrot.slane %v15039_v21, 5  ;;  %v5376_v4 = vrot.slane %v5374_v30, 4 }
 0x311   : > { %14090 = vmatmul.mubr.bf16.gmra.mrb[4].mxu0 %v12580_v12  ;;  %v9442_v12 = vrot.slane %v15029_v47, 5 }
 0x312   : > { %13722 = vmatmul.mubr.bf16.gmra.mrb[36].mxu1 %v14842_v42  ;;  %14093 = vmatprep.mubr.bf16.mxu0 %v12581_v48  ;;  %v14845_v48 = vld [vmem:[#allocation2 + $0x12c] sm:$0xff]   ;;  %v9437_v42 = vrot.slane %v9435_v50, 4  ;;  %v5319_v50 = vrot.slane %v5318_v17, 4 }
 0x313   : > { %13725 = vmatprep.mubr.bf16.mxu1 %v14843_v49  ;;  %v9449_v49 = vrot.slane %v15031_v54, 5  ;;  %v9444_v39 = vrot.slane %v9442_v12, 4  ;;  %v17199_v44 = vsel %vm15895_vm14, %v12543_v36, %v9442_v12  ;;  %v9231_v12 = vld [vmem:[#allocation2 + $0xfc] sm:$0xe]  ;;  %v5359_v54 = vshll.u32 %v15037_v2, 16 }
 0x314   : > { %v17183_v32 = vsel %vm15895_vm14, %v9437_v42, %v9438_v19  ;;  %v5353_v42 = vshll.u32 %v4875_v35, 16  ;;  %v5324_v19 = vsel %vm15727_vm11, %v5319_v50, %v5323_v51  ;;  %v9466_v36 = vrot.slane %v15040_v56, 5  ;;  %v14849_v51 = vld [vmem:[#allocation2 + $0x15c] sm:$0xff]   ;;  %v9233_v56 = vld [vmem:[#allocation2 + $0x114] sm:$0xe] }
 0x315   : > { %v9451_v29 = vrot.slane %v9449_v49, 4  ;;  %v12590_v24 = vcombine.low %v17171_v16, %v17183_v32 }
 0x317   : > { %v17211_v63 = vsel %vm15895_vm14, %v9451_v29, %v9452_v31  ;;  %v17237_v29 = vrot.slane %v5359_v54, 5  ;;  %v9232_v31 = vld [vmem:[#allocation2 + $0x108] sm:$0xe] }
 0x319   : > { %14094 = vmatmul.mubr.bf16.gmra.mrb[8].mxu0 %v12582_v43  ;;  %v15034_v43 = vld [vmem:[#allocation2 + $0xc8] sm:$0x1] }
 0x31a   : > { %13726 = vmatmul.mubr.bf16.gmra.mrb[40].mxu1 %v14844_v9  ;;  %14097 = vmatprep.mubr.bf16.mxu0 %v12583_v38  ;;  %v9445_v55 = vrot.slane %v15034_v43, 5  ;;  %v9458_v38 = vrot.slane %v9456_v0, 4  ;;  %v17207_v9 = vsel %vm15895_vm14, %v12544_v13, %v9449_v49  ;;  %v5363_v49 = vshrl.u32 %v15037_v2, 16  ;;  %v15038_v0 = vld [vmem:[#allocation2 + $0x10c] sm:$0xf] }
 0x31b   : > { %13729 = vmatprep.mubr.bf16.mxu1 %v14845_v48  ;;  %v5350_v48 = vshrl.u32 %v4875_v35, 16  ;;  %v5383_v6 = vshll.u32 %v15038_v0, 16  ;;  %v5387_v17 = vshrl.u32 %v15038_v0, 16  ;;  %v12592_v58 = vcombine.low %v17207_v9, %v17211_v63 }
 0x31c   : > { %v17203_v37 = vsel %vm15895_vm14, %v9444_v39, %v9445_v55  ;;  %v17219_v47 = vsel %vm15895_vm14, %v9458_v38, %v9459_v7  ;;  %v5355_v43 = vrot.slane %v5353_v42, 5  ;;  %v4881_v55 = vld [vmem:[#allocation2 + $0x114] sm:$0xf]  ;;  %v17235_v13 = vcombine.low %v5314_v62, %v5324_v19  ;;  %v15043_v62 = vld [vmem:[#allocation2 + $0x118] sm:$0xf] }
 0x31d   : > { %v12591_v40 = vcombine.low %v17199_v44, %v17203_v37  ;;  %v12593_v23 = vcombine.low %v17215_v14, %v17219_v47  ;;  %v5352_v39 = vrot.slane %v5350_v48, 4  ;;  %v5365_v25 = vrot.slane %v5363_v49, 4  ;;  %v14848_v38 = vld [vmem:[#allocation2 + $0x150] sm:$0xff]  }
 0x31e   : > { %v5379_v7 = vrot.slane %v5377_v22, 5  ;;  %v17239_v26 = vrot.slane %v5383_v6, 5  ;;  %v5389_v50 = vrot.slane %v5387_v17, 4  ;;  %v9465_v35 = vrot.slane %v9463_v8, 4  ;;  %v15044_v22 = vld [vmem:[#allocation2 + $0x118] sm:$0xf] }
 0x31f   : > { %v5398_v33 = vshrl.u32 %v4881_v55, 16  ;;  %v5356_v48 = vor.u32 %v5355_v43, %v5352_v39  ;;  %v12547_v42 = vrot.slane %v9232_v31, 9  ;;  %v5407_v19 = vshll.u32 %v15043_v62, 16  ;;  %v15045_v6 = vld [vmem:[#allocation2 + $0x110] sm:$0x1] }
 0x320   : > { %v5411_v2 = vshrl.u32 %v15043_v62, 16  ;;  %v5366_v49 = vor.u32 %v5365_v25, %v17237_v29  ;;  %v9477_v0 = vrot.slane %v15044_v22, 5  ;;  %v9473_v17 = vrot.slane %v15045_v6, 5  ;;  %v4884_v25 = vld [vmem:[#allocation2 + $0x120] sm:$0xf] }
 0x321   : > { %14098 = vmatmul.mubr.bf16.gmra.mrb[12].mxu0 %v12584_v3  ;;  %v12546_v3 = vrot.slane %v9231_v12, 9  ;;  %v5401_v12 = vshll.u32 %v4881_v55, 16  ;;  %v5380_v21 = vor.u32 %v5379_v7, %v5376_v4  ;;  %v5390_v46 = vor.u32 %v5389_v50, %v17239_v26  ;;  %v15047_v4 = vld [vmem:[#allocation2 + $0x11c] sm:$0x1]  ;;  %v14850_v50 = vld [vmem:[#allocation2 + $0x168] sm:$0xff]  }
 0x322   : > { %13730 = vmatmul.mubr.bf16.gmra.mrb[44].mxu1 %v14846_v57  ;;  %14101 = vmatprep.mubr.bf16.mxu0 %v12585_v20  ;;  %v15041_v20 = vld [vmem:[#allocation2 + $0x10c] sm:$0xf]  ;;  %v15042_v57 = vld [vmem:[#allocation2 + $0x104] sm:$0x1]  ;;  %v5400_v39 = vrot.slane %v5398_v33, 4  ;;  %v5357_v55 = vrot.slane %v5356_v48, 4 }
 0x323   : > { %13733 = vmatprep.mubr.bf16.mxu1 %v14847_v53  ;;  %v9470_v1 = vrot.slane %v15041_v20, 5  ;;  %v5369_v53 = vshll.u32 %v15042_v57, 16  ;;  %v17246_v54 = vsel %vm15895_vm14, %v12546_v3, %v9463_v8  ;;  %v17255_v3 = vsel %vm15895_vm14, %v9465_v35, %v9466_v36  ;;  %v9234_v33 = vld [vmem:[#allocation2 + $0x120] sm:$0xe]  ;;  %v15050_v22 = vld [vmem:[#allocation2 + $0x124] sm:$0xf] }
 0x324   : > { %v5403_v43 = vrot.slane %v5401_v12, 5  ;;  %v17261_v28 = vrot.slane %v5407_v19, 5  ;;  %v5367_v31 = vrot.slane %v5366_v49, 4  ;;  %v12548_v20 = vrot.slane %v9233_v56, 9  ;;  %v15048_v12 = vld [vmem:[#allocation2 + $0x124] sm:$0xf] }
 0x325   : > { %v9472_v30 = vrot.slane %v9470_v1, 4  ;;  %v5371_v8 = vrot.slane %v5369_v53, 5  ;;  %v17259_v18 = vsel %vm15895_vm14, %v12547_v42, %v9470_v1  ;;  %v9480_v7 = vrot.slane %v15047_v4, 5  ;;  %v14851_v53 = vld [vmem:[#allocation2 + $0x174] sm:$0xff]  }
 0x326   : > { %v5391_v35 = vrot.slane %v5390_v46, 4  ;;  %v5404_v1 = vor.u32 %v5403_v43, %v5400_v39  ;;  %v9484_v48 = vrot.slane %v15048_v12, 5  ;;  %v5422_v42 = vshrl.u32 %v4884_v25, 16  ;;  %v4887_v43 = vld [vmem:[#allocation2 + $0x12c] sm:$0xf] }
 0x327   : > { %v17265_v36 = vsel %vm15895_vm14, %v9472_v30, %v9473_v17  ;;  %v5425_v62 = vshll.u32 %v4884_v25, 16  ;;  %v5431_v6 = vshll.u32 %v15050_v22, 16  ;;  %v5362_v30 = vsel %vm15727_vm11, %v5357_v55, %v17237_v29  ;;  %v15051_v29 = vld [vmem:[#allocation2 + $0x128] sm:$0x1] }
 0x328   : > { %v5372_v17 = vsel %vm15727_vm11, %v5367_v31, %v5371_v8  ;;  %v9486_v56 = vrot.slane %v9484_v48, 4  ;;  %v5424_v8 = vrot.slane %v5422_v42, 4  ;;  %v12595_v25 = vcombine.low %v17259_v18, %v17265_v36  ;;  %v17315_v42 = vld [vmem:[#allocation2 + $0x12c] sm:$0xe] }
 0x329   : > { %14102 = vmatmul.mubr.bf16.gmra.mrb[16].mxu0 %v12586_v41  ;;  %v5393_v41 = vshll.u32 %v15046_v59, 16  ;;  %v5435_v59 = vshrl.u32 %v15050_v22, 16  ;;  %v5427_v39 = vrot.slane %v5425_v62, 5  ;;  %v17292_v5 = vrot.slane %v5431_v6, 5  ;;  %v15054_v6 = vld [vmem:[#allocation2 + $0x13c] sm:$0xf] }
 0x32a   : > { %13734 = vmatmul.mubr.bf16.gmra.mrb[48].mxu1 %v14848_v38  ;;  %14105 = vmatprep.mubr.bf16.mxu0 %v12587_v11  ;;  %v5413_v11 = vrot.slane %v5411_v2, 4  ;;  %v9479_v38 = vrot.slane %v9477_v0, 4  ;;  %v15049_v2 = vld [vmem:[#allocation2 + $0x11c] sm:$0x1] }
 0x32b   : > { %13737 = vmatprep.mubr.bf16.mxu1 %v14849_v51  ;;  %v5381_v51 = vrot.slane %v5380_v21, 4  ;;  %v5395_v57 = vrot.slane %v5393_v41, 5  ;;  %v5417_v49 = vshll.u32 %v15049_v2, 16  ;;  %v17278_v21 = vsel %vm15895_vm14, %v12548_v20, %v9477_v0  ;;  %v14852_v20 = vld [vmem:[#allocation2 + $0x180] sm:$0xff]  }
 0x32c   : > { %v5414_v19 = vor.u32 %v5413_v11, %v17261_v28  ;;  %v17282_v46 = vsel %vm15895_vm14, %v9479_v38, %v9480_v7  ;;  %v9487_v0 = vrot.slane %v15051_v29, 5  ;;  %v5405_v41 = vrot.slane %v5404_v1, 4  ;;  %v15055_v29 = vld [vmem:[#allocation2 + $0x130] sm:$0xf] }
 0x32d   : > { %v5386_v60 = vsel %vm15727_vm11, %v5381_v51, %v17239_v26  ;;  %v5396_v45 = vsel %vm15727_vm11, %v5391_v35, %v5395_v57  ;;  %v5419_v11 = vrot.slane %v5417_v49, 5  ;;  %v5437_v15 = vrot.slane %v5435_v59, 4  ;;  %v4890_v51 = vld [vmem:[#allocation2 + $0x138] sm:$0xf]  ;;  %v14853_v35 = vld [vmem:[#allocation2 + $0x18c] sm:$0xff]  }
 0x32e   : > { %v5415_v55 = vrot.slane %v5414_v19, 4  ;;  %v17296_v26 = vcombine.low %v5362_v30, %v5372_v17  ;;  %v12596_v31 = vcombine.low %v17278_v21, %v17282_v46  ;;  %v17302_v38 = vcombine.low %v5386_v60, %v5396_v45  ;;  %v15053_v19 = vld [vmem:[#allocation2 + $0x130] sm:$0xf] }
 0x32f   : > { %v5446_v7 = vshrl.u32 %v4887_v43, 16  ;;  %v5410_v57 = vsel %vm15727_vm11, %v5405_v41, %v17261_v28  ;;  %v5428_v1 = vor.u32 %v5427_v39, %v5424_v8  ;;  %v5438_v62 = vor.u32 %v5437_v15, %v17292_v5  ;;  %v4893_v41 = vld [vmem:[#allocation2 + $0x144] sm:$0xf]  ;;  %v15056_v8 = vld [vmem:[#allocation2 + $0x134] sm:$0x1] }
 0x330   : > { %v5455_v2 = vshll.u32 %v15053_v19, 16  ;;  %v5459_v49 = vshrl.u32 %v15053_v19, 16  ;;  %v5470_v28 = vshrl.u32 %v4890_v51, 16  ;;  %v5473_v22 = vshll.u32 %v4890_v51, 16 }
 0x331   : > { %14106 = vmatmul.mubr.bf16.gmra.mrb[20].mxu0 %v12588_v61  ;;  %v12549_v61 = vrot.slane %v9234_v33, 9  ;;  %v15052_v33 = vld [vmem:[#allocation2 + $0x128] sm:$0x1]  ;;  %v5479_v59 = vshll.u32 %v15054_v6, 16  ;;  %v5483_v30 = vshrl.u32 %v15054_v6, 16  ;;  %v12550_v60 = vrot.slane %v17315_v42, 9 }
 0x332   : > { %13738 = vmatmul.mubr.bf16.gmra.mrb[52].mxu1 %v14850_v50  ;;  %14109 = vmatprep.mubr.bf16.mxu0 %v12589_v10  ;;  %v12594_v10 = vcombine.low %v17246_v54, %v17255_v3  ;;  %v5449_v50 = vshll.u32 %v4887_v43, 16  ;;  %v5441_v12 = vshll.u32 %v15052_v33, 16  ;;  %v5448_v45 = vrot.slane %v5446_v7, 4  ;;  %v15067_v3 = vld [vmem:[#allocation2 + $0x158] sm:$0x1] }
 0x333   : > { %13741 = vmatprep.mubr.bf16.mxu1 %v14851_v53  ;;  %v17306_v4 = vsel %vm15895_vm14, %v12549_v61, %v9484_v48  ;;  %v17313_v53 = vsel %vm15895_vm14, %v9486_v56, %v9487_v0  ;;  %v5420_v48 = vsel %vm15727_vm11, %v5415_v55, %v5419_v11  ;;  %v5429_v32 = vrot.slane %v5428_v1, 4 }
 0x334   : > { %v12597_v17 = vcombine.low %v17306_v4, %v17313_v53  ;;  %v5451_v61 = vrot.slane %v5449_v50, 5  ;;  %v17329_v16 = vcombine.low %v5410_v57, %v5420_v48  ;;  %v9491_v0 = vrot.slane %v15055_v29, 5  ;;  %v15057_v50 = vld [vmem:[#allocation2 + $0x13c] sm:$0xf] }
 0x335   : > { %v5439_v56 = vrot.slane %v5438_v62, 4  ;;  %v9494_v39 = vrot.slane %v15056_v8, 5  ;;  %v17331_v44 = vrot.slane %v5455_v2, 5  ;;  %v5461_v37 = vrot.slane %v5459_v49, 4  ;;  %v15059_v2 = vld [vmem:[#allocation2 + $0x134] sm:$0x1] }
 0x336   : > { %v5472_v43 = vrot.slane %v5470_v28, 4  ;;  %v5475_v55 = vrot.slane %v5473_v22, 5  ;;  %v17333_v11 = vrot.slane %v5479_v59, 5  ;;  %v5485_v15 = vrot.slane %v5483_v30, 4  ;;  %v15060_v22 = vld [vmem:[#allocation2 + $0x140] sm:$0x1] }
 0x337   : > { %v5452_v7 = vor.u32 %v5451_v61, %v5448_v45  ;;  %v9498_v51 = vrot.slane %v15057_v50, 5  ;;  %v5497_v57 = vshll.u32 %v4893_v41, 16  ;;  %v5434_v1 = vsel %vm15727_vm11, %v5429_v32, %v17292_v5  ;;  %v15061_v30 = vld [vmem:[#allocation2 + $0x140] sm:$0x1] }
 0x338   : > { %v9493_v33 = vrot.slane %v9491_v0, 4  ;;  %v5462_v19 = vor.u32 %v5461_v37, %v17331_v44  ;;  %v5465_v49 = vshll.u32 %v15059_v2, 16  ;;  %v9501_v6 = vrot.slane %v15060_v22, 5  ;;  %v4896_v37 = vld [vmem:[#allocation2 + $0x150] sm:$0xf] }
 0x339   : > { %14110 = vmatmul.mubr.bf16.gmra.mrb[24].mxu0 %v12590_v24  ;;  %v5443_v24 = vrot.slane %v5441_v12, 5  ;;  %v15058_v12 = vld [vmem:[#allocation2 + $0x148] sm:$0xf]  ;;  %v5476_v59 = vor.u32 %v5475_v55, %v5472_v43  ;;  %v5486_v5 = vor.u32 %v5485_v15, %v17333_v11  ;;  %v5489_v45 = vshll.u32 %v15061_v30, 16  ;;  %v9237_v43 = vld [vmem:[#allocation2 + $0x144] sm:$0xe] }
 0x33a   : > { %13742 = vmatmul.mubr.bf16.gmra.mrb[56].mxu1 %v14852_v20  ;;  %14113 = vmatprep.mubr.bf16.mxu0 %v12591_v40  ;;  %v9236_v40 = vld [vmem:[#allocation2 + $0x138] sm:$0xe]  ;;  %v5503_v42 = vshll.u32 %v15058_v12, 16  ;;  %v5507_v48 = vshrl.u32 %v15058_v12, 16  ;;  %v5453_v61 = vrot.slane %v5452_v7, 4  ;;  %v9500_v32 = vrot.slane %v9498_v51, 4 }
 0x33b   : > { %13745 = vmatprep.mubr.bf16.mxu1 %v14853_v35  ;;  %v14854_v20 = vld [vmem:[#allocation2 + $0x198] sm:$0xff]   ;;  %v5494_v35 = vshrl.u32 %v4893_v41, 16  ;;  %v5444_v62 = vsel %vm15727_vm11, %v5439_v56, %v5443_v24  ;;  %v12551_v28 = vrot.slane %v9236_v40, 9  ;;  %v5499_v29 = vrot.slane %v5497_v57, 5 }
 0x33c   : > { %v17351_v9 = vsel %vm15895_vm14, %v12550_v60, %v9491_v0  ;;  %v17355_v63 = vsel %vm15895_vm14, %v9493_v33, %v9494_v39  ;;  %v5509_v41 = vrot.slane %v5507_v48, 4  ;;  %v17359_v56 = vcombine.low %v5434_v1, %v5444_v62 }
 0x33d   : > { %v5496_v24 = vrot.slane %v5494_v35, 4  ;;  %v5463_v14 = vrot.slane %v5462_v19, 4  ;;  %v5467_v47 = vrot.slane %v5465_v49, 5  ;;  %v5477_v60 = vrot.slane %v5476_v59, 4  ;;  %v9238_v35 = vld [vmem:[#allocation2 + $0x150] sm:$0xe] }
 0x33e   : > { %v5487_v0 = vrot.slane %v5486_v5, 4  ;;  %v5491_v40 = vrot.slane %v5489_v45, 5  ;;  %v5458_v39 = vsel %vm15727_vm11, %v5453_v61, %v17331_v44  ;;  %v17370_v55 = vsel %vm15895_vm14, %v9500_v32, %v9501_v6  ;;  %v15065_v44 = vld [vmem:[#allocation2 + $0x14c] sm:$0x1]  ;;  %v15066_v49 = vld [vmem:[#allocation2 + $0x154] sm:$0xf] }
 0x33f   : > { %v5500_v15 = vor.u32 %v5499_v29, %v5496_v24  ;;  %v5518_v1 = vshrl.u32 %v4896_v37, 16  ;;  %v5521_v33 = vshll.u32 %v4896_v37, 16  ;;  %v5468_v12 = vsel %vm15727_vm11, %v5463_v14, %v5467_v47  ;;  %v4899_v61 = vld [vmem:[#allocation2 + $0x15c] sm:$0xf] }
 0x340   : > { %v9508_v62 = vrot.slane %v15065_v44, 5  ;;  %v5482_v19 = vsel %vm15727_vm11, %v5477_v60, %v17333_v11  ;;  %v5492_v2 = vsel %vm15727_vm11, %v5487_v0, %v5491_v40  ;;  %v5531_v22 = vshrl.u32 %v15066_v49, 16 }
 0x341   : > { %14114 = vmatmul.mubr.bf16.gmra.mrb[28].mxu0 %v12592_v58  ;;  %v17357_v58 = vrot.slane %v5503_v42, 5  ;;  %v12552_v42 = vrot.slane %v9237_v43, 9  ;;  %v5501_v6 = vrot.slane %v5500_v15, 4  ;;  %v12553_v54 = vrot.slane %v9238_v35, 9  ;;  %v15068_v43 = vld [vmem:[#allocation2 + $0x158] sm:$0x1] }
 0x342   : > { %13746 = vmatmul.mubr.bf16.gmra.mrb[60].mxu1 %v14854_v20  ;;  %14117 = vmatprep.mubr.bf16.mxu0 %v12593_v23  ;;  %v15062_v23 = vld [vmem:[#allocation2 + $0x148] sm:$0xf]  ;;  %v15063_v20 = vld [vmem:[#allocation2 + $0x14c] sm:$0x1]  ;;  %v5520_v30 = vrot.slane %v5518_v1, 4  ;;  %v5523_v45 = vrot.slane %v5521_v33, 5  ;;  %v12598_v32 = vcombine.low %v17351_v9, %v17355_v63 }
 0x343   : > { %13797 = vmatprep.mubr.bf16.mxu1 %v17235_v13  ;;  %v9505_v8 = vrot.slane %v15062_v23, 5  ;;  %v17363_v13 = vsel %vm15895_vm14, %v12551_v28, %v9498_v51  ;;  %v5513_v7 = vshll.u32 %v15063_v20, 16  ;;  %v5510_v50 = vor.u32 %v5509_v41, %v17357_v58  ;;  %v15064_v51 = vld [vmem:[#allocation2 + $0x154] sm:$0xf]  ;;  %v4902_v41 = vld [vmem:[#allocation2 + $0x168] sm:$0xf] }
 0x344   : > { %v9512_v57 = vrot.slane %v15064_v51, 5  ;;  %v5527_v28 = vshll.u32 %v15066_v49, 16  ;;  %v12599_v18 = vcombine.low %v17363_v13, %v17370_v55  ;;  %v5533_v29 = vrot.slane %v5531_v22, 4  ;;  %v9239_v23 = vld [vmem:[#allocation2 + $0x15c] sm:$0xe] }
 0x345   : > { %v9507_v48 = vrot.slane %v9505_v8, 4  ;;  %v5515_v59 = vrot.slane %v5513_v7, 5  ;;  %v5511_v11 = vrot.slane %v5510_v50, 4  ;;  %v17396_v36 = vsel %vm15895_vm14, %v12552_v42, %v9505_v8  ;;  %v15069_v15 = vld [vmem:[#allocation2 + $0x160] sm:$0xf] }
 0x346   : > { %v9514_v5 = vrot.slane %v9512_v57, 4  ;;  %v17404_v24 = vrot.slane %v5527_v28, 5  ;;  %v5506_v14 = vsel %vm15727_vm11, %v5501_v6, %v17357_v58  ;;  %v17411_v47 = vsel %vm15895_vm14, %v12553_v54, %v9512_v57  ;;  %v15070_v1 = vld [vmem:[#allocation2 + $0x160] sm:$0xf]  ;;  %v15072_v22 = vld [vmem:[#allocation2 + $0x164] sm:$0x1] }
 0x347   : > { %v5542_v8 = vshrl.u32 %v4899_v61, 16  ;;  %v5545_v37 = vshll.u32 %v4899_v61, 16  ;;  %v5516_v60 = vsel %vm15727_vm11, %v5511_v11, %v5515_v59  ;;  %v5524_v40 = vor.u32 %v5523_v45, %v5520_v30  ;;  %v15073_v6 = vld [vmem:[#allocation2 + $0x164] sm:$0x1]  ;;  %v15074_v61 = vld [vmem:[#allocation2 + $0x178] sm:$0xf] }
 0x348   : > { %v5551_v20 = vshll.u32 %v15069_v15, 16  ;;  %v5555_v58 = vshrl.u32 %v15069_v15, 16  ;;  %v5566_v7 = vshrl.u32 %v4902_v41, 16  ;;  %v5569_v50 = vshll.u32 %v4902_v41, 16  ;;  %v15076_v15 = vld [vmem:[#allocation2 + $0x170] sm:$0x1] }
 0x349   : > { %14118 = vmatmul.mubr.bf16.gmra.mrb[32].mxu0 %v12594_v10  ;;  %v9515_v10 = vrot.slane %v15067_v3, 5  ;;  %v5534_v51 = vor.u32 %v5533_v29, %v17404_v24  ;;  %v12554_v57 = vrot.slane %v9239_v23, 9  ;;  %v9519_v33 = vrot.slane %v15070_v1, 5  ;;  %v15077_v9 = vld [vmem:[#allocation2 + $0x170] sm:$0x1] }
 0x34a   : > { %13798 = vmatmul.mubr.bf16.vlgmr.msra.gmra.mrb[32].mxu1 %v16990_v34  ;;  %14121 = vmatprep.mubr.bf16.mxu0 %v12595_v25  ;;  %v17390_v34 = vcombine.low %v5458_v39, %v5468_v12  ;;  %v17398_v25 = vcombine.low %v5482_v19, %v5492_v2  ;;  %v5537_v39 = vshll.u32 %v15068_v43, 16  ;;  %v5544_v12 = vrot.slane %v5542_v8, 4  ;;  %v4905_v2 = vld [vmem:[#allocation2 + $0x174] sm:$0xf]  ;;  %v15075_v8 = vld [vmem:[#allocation2 + $0x16c] sm:$0xf] }
 0x34b   : > { %13801 = vmatprep.mubr.bf16.mxu1 %v17296_v26  ;;  %v17402_v26 = vsel %vm15895_vm14, %v9507_v48, %v9508_v62  ;;  %v17417_v0 = vsel %vm15895_vm14, %v9514_v5, %v9515_v10  ;;  %v5547_v42 = vrot.slane %v5545_v37, 5  ;;  %v15071_v48 = vld [vmem:[#allocation2 + $0x16c] sm:$0xf]  ;;  %v17430_v46 = vcombine.low %v5506_v14, %v5516_v60  ;;  %v9240_v10 = vld [vmem:[#allocation2 + $0x168] sm:$0xe] }
 0x34c   : > { %v12600_v35 = vcombine.low %v17396_v36, %v17402_v26  ;;  %v5575_v44 = vshll.u32 %v15071_v48, 16  ;;  %v5579_v21 = vshrl.u32 %v15071_v48, 16  ;;  %v17434_v62 = vrot.slane %v5524_v40, 4 }
 0x34d   : > { %v17436_v19 = vrot.slane %v5537_v39, 5  ;;  %v5557_v4 = vrot.slane %v5555_v58, 4  ;;  %v5568_v53 = vrot.slane %v5566_v7, 4  ;;  %v17440_v49 = vrot.slane %v5534_v51, 4  ;;  %v9241_v58 = vld [vmem:[#allocation2 + $0x174] sm:$0xe] }
 0x34e   : > { %v9521_v28 = vrot.slane %v9519_v33, 4  ;;  %v5561_v59 = vshll.u32 %v15073_v6, 16  ;;  %v17444_v54 = vsel %vm15895_vm14, %v12554_v57, %v9519_v33  ;;  %v5548_v3 = vor.u32 %v5547_v42, %v5544_v12  ;;  %v9242_v6 = vld [vmem:[#allocation2 + $0x180] sm:$0xe] }
 0x34f   : > { %v17446_v11 = vrot.slane %v5575_v44, 5  ;;  %v5581_v5 = vrot.slane %v5579_v21, 4  ;;  %v5590_v30 = vshrl.u32 %v4905_v2, 16  ;;  %v5593_v45 = vshll.u32 %v4905_v2, 16  ;;  %v15080_v2 = vld [vmem:[#allocation2 + $0x17c] sm:$0x1] }
 0x350   : > { %v5599_v29 = vshll.u32 %v15074_v61, 16  ;;  %v5603_v41 = vshrl.u32 %v15074_v61, 16  ;;  %v5530_v14 = vsel %vm15727_vm11, %v17434_v62, %v17404_v24  ;;  %v9526_v37 = vrot.slane %v15075_v8, 5  ;;  %v15082_v61 = vld [vmem:[#allocation2 + $0x184] sm:$0xf] }
 0x351   : > { %14122 = vmatmul.mubr.bf16.gmra.mrb[36].mxu0 %v12596_v31  ;;  %v12601_v31 = vcombine.low %v17411_v47, %v17417_v0  ;;  %v17460_v43 = vrot.slane %v5561_v59, 5  ;;  %v12555_v39 = vrot.slane %v9240_v10, 9  ;;  %v17466_v7 = vrot.slane %v5548_v3, 4  ;;  %v15081_v59 = vld [vmem:[#allocation2 + $0x184] sm:$0xf] }
 0x352   : > { %13802 = vmatmul.mubr.bf16.gmra.mrb[36].mxu1 %v17302_v38  ;;  %14125 = vmatprep.mubr.bf16.mxu0 %v12597_v17  ;;  %v17438_v38 = vrot.slane %v5551_v20, 5  ;;  %v5571_v17 = vrot.slane %v5569_v50, 5  ;;  %v5585_v20 = vshll.u32 %v15076_v15, 16  ;;  %v9529_v63 = vrot.slane %v15077_v9, 5  ;;  %v15078_v50 = vld [vmem:[#allocation2 + $0x178] sm:$0xf] }
 0x353   : > { %13805 = vmatprep.mubr.bf16.mxu1 %v17329_v16  ;;  %v9522_v16 = vrot.slane %v15072_v22, 5  ;;  %v9533_v51 = vrot.slane %v15078_v50, 5  ;;  %v5592_v57 = vrot.slane %v5590_v30, 4  ;;  %v5595_v1 = vrot.slane %v5593_v45, 5  ;;  %v4908_v22 = vld [vmem:[#allocation2 + $0x180] sm:$0xf] }
 0x354   : > { %v5558_v23 = vor.u32 %v5557_v4, %v17438_v38  ;;  %v5572_v60 = vor.u32 %v5571_v17, %v5568_v53  ;;  %v17470_v33 = vrot.slane %v5599_v29, 5  ;;  %v5605_v12 = vrot.slane %v5603_v41, 4  ;;  %v15079_v53 = vld [vmem:[#allocation2 + $0x17c] sm:$0x1]  ;;  %v15084_v47 = vld [vmem:[#allocation2 + $0x190] sm:$0xf] }
 0x355   : > { %v17458_v40 = vsel %vm15895_vm14, %v9521_v28, %v9522_v16  ;;  %v9528_v42 = vrot.slane %v9526_v37, 4  ;;  %v12556_v13 = vrot.slane %v9241_v58, 9  ;;  %v5540_v55 = vsel %vm15727_vm11, %v17440_v49, %v17436_v19 }
 0x356   : > { %v5573_v48 = vrot.slane %v5572_v60, 4  ;;  %v5587_v44 = vrot.slane %v5585_v20, 5  ;;  %v9535_v4 = vrot.slane %v9533_v51, 4  ;;  %v9536_v17 = vrot.slane %v15079_v53, 5 }
 0x357   : > { %v5609_v28 = vshll.u32 %v15080_v2, 16  ;;  %v5554_v19 = vsel %vm15727_vm11, %v17466_v7, %v17438_v38  ;;  %v5596_v49 = vor.u32 %v5595_v1, %v5592_v57  ;;  %v5606_v16 = vor.u32 %v5605_v12, %v17470_v33  ;;  %v9243_v12 = vld [vmem:[#allocation2 + $0x18c] sm:$0xe] }
 0x358   : > { %v9530_v10 = vsel %vm15895_vm14, %v9528_v42, %v9529_v63  ;;  %v17497_v38 = vsel %vm15895_vm14, %v12556_v13, %v9533_v51  ;;  %v5614_v30 = vshrl.u32 %v4908_v22, 16  ;;  %v5617_v45 = vshll.u32 %v4908_v22, 16  ;;  %v4914_v42 = vld [vmem:[#allocation2 + $0x198] sm:$0xf] }
 0x359   : > { %14126 = vmatmul.mubr.bf16.gmra.mrb[40].mxu0 %v12598_v32  ;;  %v5582_v32 = vor.u32 %v5581_v5, %v17446_v11  ;;  %v5578_v5 = vsel %vm15727_vm11, %v5573_v48, %v17446_v11  ;;  %v5623_v29 = vshll.u32 %v15082_v61, 16  ;;  %v5627_v41 = vshrl.u32 %v15082_v61, 16 }
 0x35a   : > { %13806 = vmatmul.mubr.bf16.gmra.mrb[40].mxu1 %v17359_v56  ;;  %14129 = vmatprep.mubr.bf16.mxu0 %v12599_v18  ;;  %v5559_v56 = vrot.slane %v5558_v23, 4  ;;  %v12602_v18 = vcombine.low %v17444_v54, %v17458_v40  ;;  %v9540_v54 = vrot.slane %v15081_v59, 5  ;;  %v4911_v23 = vld [vmem:[#allocation2 + $0x18c] sm:$0xf]  ;;  %v17510_v8 = vsel %vm15895_vm14, %v9535_v4, %v9536_v17  ;;  %v15083_v40 = vld [vmem:[#allocation2 + $0x188] sm:$0x1] }
 0x35b   : > { %13809 = vmatprep.mubr.bf16.mxu1 %v17390_v34  ;;  %v17480_v34 = vsel %vm15895_vm14, %v12555_v39, %v9526_v37  ;;  %v5583_v21 = vrot.slane %v5582_v32, 4  ;;  %v5611_v36 = vrot.slane %v5609_v28, 5  ;;  %v12557_v26 = vrot.slane %v9242_v6, 9  ;;  %v15086_v4 = vld [vmem:[#allocation2 + $0x190] sm:$0xf] }
 0x35c   : > { %v5564_v3 = vsel %vm15727_vm11, %v5559_v56, %v17460_v43  ;;  %v5607_v37 = vrot.slane %v5606_v16, 4  ;;  %v9542_v60 = vrot.slane %v9540_v54, 4  ;;  %v5638_v43 = vshrl.u32 %v4911_v23, 16  ;;  %v15087_v17 = vld [vmem:[#allocation2 + $0x19c] sm:$0xf] }
 0x35d   : > { %v5588_v11 = vsel %vm15727_vm11, %v5583_v21, %v5587_v44  ;;  %v5641_v39 = vshll.u32 %v4911_v23, 16  ;;  %v5647_v0 = vshll.u32 %v15084_v47, 16  ;;  %v5616_v15 = vrot.slane %v5614_v30, 4  ;;  %v9244_v28 = vld [vmem:[#allocation2 + $0x198] sm:$0xe] }
 0x35e   : > { %v5619_v20 = vrot.slane %v5617_v45, 5  ;;  %v17513_v58 = vrot.slane %v5623_v29, 5  ;;  %v5629_v7 = vrot.slane %v5627_v41, 4  ;;  %v12315_v9 = vcombine.low %v5554_v19, %v5564_v3  ;;  %v15088_v19 = vld [vmem:[#allocation2 + $0x19c] sm:$0xf] }
 0x35f   : > { %v12603_v63 = vcombine.low %v17480_v34, %v9530_v10  ;;  %v12316_v32 = vcombine.low %v5578_v5, %v5588_v11  ;;  %v12604_v50 = vcombine.low %v17497_v38, %v17510_v8  ;;  %v9541_v57 = vsel %vm15895_vm14, %v12557_v26, %v9540_v54  ;;  %v15089_v3 = vld [vmem:[#allocation2 + $0x194] sm:$0x1]  ;;  %v15091_v11 = vld [vmem:[#allocation2 + $0x1a0] sm:$0x1] }
 0x360   : > { %v5640_v24 = vrot.slane %v5638_v43, 4  ;;  %v5643_v62 = vrot.slane %v5641_v39, 5  ;;  %v5612_v48 = vsel %vm15727_vm11, %v5607_v37, %v5611_v36  ;;  %v5620_v13 = vor.u32 %v5619_v20, %v5616_v15  ;;  %v15090_v45 = vld [vmem:[#allocation2 + $0x194] sm:$0x1]  ;;  %v15092_v15 = vld [vmem:[#allocation2 + $0x1a8] sm:$0xf] }
 0x361   : > { %14130 = vmatmul.mubr.bf16.gmra.mrb[44].mxu0 %v12600_v35  ;;  %v5597_v35 = vrot.slane %v5596_v49, 4  ;;  %v12558_v21 = vrot.slane %v9243_v12, 9  ;;  %v9547_v53 = vrot.slane %v15086_v4, 5  ;;  %v9554_v2 = vrot.slane %v15087_v17, 5 }
 0x362   : > { %13810 = vmatmul.mubr.bf16.gmra.mrb[44].mxu1 %v17398_v25  ;;  %14133 = vmatprep.mubr.bf16.mxu0 %v12601_v31  ;;  %v9543_v25 = vrot.slane %v15083_v40, 5  ;;  %v5651_v31 = vshrl.u32 %v15084_v47, 16  ;;  %v5662_v22 = vshrl.u32 %v4914_v42, 16  ;;  %v5671_v49 = vshll.u32 %v15088_v19, 16 }
 0x363   : > { %13813 = vmatprep.mubr.bf16.mxu1 %v17430_v46  ;;  %v12314_v46 = vcombine.low %v5530_v14, %v5540_v55  ;;  %v5602_v51 = vsel %vm15727_vm11, %v5597_v35, %v17470_v33  ;;  %v17530_v14 = vrot.slane %v5647_v0, 5  ;;  %v5630_v33 = vor.u32 %v5629_v7, %v17513_v58  ;;  %v15085_v55 = vld [vmem:[#allocation2 + $0x188] sm:$0x1] }
 0x364   : > { %v9544_v1 = vsel %vm15895_vm14, %v9542_v60, %v9543_v25  ;;  %v5653_v56 = vrot.slane %v5651_v31, 4  ;;  %v5633_v34 = vshll.u32 %v15085_v55, 16  ;;  %v5675_v16 = vshrl.u32 %v15088_v19, 16 }
 0x365   : > { %v12605_v44 = vcombine.low %v9541_v57, %v9544_v1  ;;  %v12317_v6 = vcombine.low %v5602_v51, %v5612_v48  ;;  %v5644_v59 = vor.u32 %v5643_v62, %v5640_v24  ;;  %v5657_v10 = vshll.u32 %v15089_v3, 16 }
 0x366   : > { %v5654_v54 = vor.u32 %v5653_v56, %v17530_v14  ;;  %v5621_v5 = vrot.slane %v5620_v13, 4  ;;  %v5631_v38 = vrot.slane %v5630_v33, 4  ;;  %v5635_v30 = vrot.slane %v5633_v34, 5  ;;  %v15094_v56 = vld [vmem:[#allocation2 + $0x1ac] sm:$0x1] }
 0x367   : > { %v9550_v61 = vrot.slane %v15090_v45, 5  ;;  %v9549_v29 = vrot.slane %v9547_v53, 4  ;;  %v12559_v41 = vrot.slane %v9244_v28, 9  ;;  %v9556_v23 = vrot.slane %v9554_v2, 4 }
 0x368   : > { %v9557_v8 = vrot.slane %v15091_v11, 5  ;;  %v5664_v36 = vrot.slane %v5662_v22, 4  ;;  %v5673_v35 = vrot.slane %v5671_v49, 5  ;;  %v5677_v37 = vrot.slane %v5675_v16, 4 }
 0x369   : > { %14134 = vmatmul.mubr.bf16.gmra.mrb[48].mxu0 %v12602_v18  ;;  %v5665_v18 = vshll.u32 %v4914_v42, 16  ;;  %v5645_v60 = vrot.slane %v5644_v59, 4  ;;  %v5655_v40 = vrot.slane %v5654_v54, 4  ;;  %v5659_v25 = vrot.slane %v5657_v10, 5 }
 0x36a   : > { %13814 = vmatmul.mubr.bf16.gmra.mrb[48].mxu1 %v12314_v46  ;;  %14137 = vmatprep.mubr.bf16.mxu0 %v12603_v63  ;;  %v5626_v43 = vsel %vm15727_vm11, %v5621_v5, %v17513_v58  ;;  %v9548_v39 = vsel %vm15895_vm14, %v12558_v21, %v9547_v53  ;;  %v5636_v47 = vsel %vm15727_vm11, %v5631_v38, %v5635_v30  ;;  %v9561_v20 = vrot.slane %v15092_v15, 5 }
 0x36b   : > { %13817 = vmatprep.mubr.bf16.mxu1 %v12315_v9  ;;  %v5667_v26 = vrot.slane %v5665_v18, 5  ;;  %v9551_v0 = vsel %vm15895_vm14, %v9549_v29, %v9550_v61  ;;  %v9555_v31 = vsel %vm15895_vm14, %v12559_v41, %v9554_v2  ;;  %v9558_v58 = vsel %vm15895_vm14, %v9556_v23, %v9557_v8  ;;  %v15093_v9 = vld [vmem:[#allocation2 + $0x1a0] sm:$0x1] }
 0x36c   : > { %v5678_v46 = vor.u32 %v5677_v37, %v5673_v35  ;;  %v5681_v63 = vshll.u32 %v15093_v9, 16  ;;  %v5660_v51 = vsel %vm15727_vm11, %v5655_v40, %v5659_v25  ;;  %v12318_v57 = vcombine.low %v5626_v43, %v5636_v47 }
 0x36d   : > { %v5668_v7 = vor.u32 %v5667_v26, %v5664_v36  ;;  %v12606_v1 = vcombine.low %v9548_v39, %v9551_v0  ;;  %v12607_v12 = vcombine.low %v9555_v31, %v9558_v58  ;;  %v9563_v62 = vrot.slane %v9561_v20, 4 }
 0x36e   : > { %v9564_v42 = vrot.slane %v15094_v56, 5  ;;  %v5679_v33 = vrot.slane %v5678_v46, 4  ;;  %v5683_v55 = vrot.slane %v5681_v63, 5 }
 0x36f   : > { %v5669_v13 = vrot.slane %v5668_v7, 4 }
 0x370   : > { %v9565_v34 = vsel %vm15895_vm14, %v9563_v62, %v9564_v42  ;;  %v5684_v21 = vsel %vm15727_vm11, %v5679_v33, %v5683_v55 }
 0x371   : > { %14138 = vmatmul.mubr.bf16.gmra.mrb[52].mxu0 %v12604_v50  ;;  %v5650_v50 = vsel %vm15727_vm11, %v5645_v60, %v17530_v14 }
 0x372   : > { %13818 = vmatmul.mubr.bf16.gmra.mrb[52].mxu1 %v12316_v32  ;;  %14141 = vmatprep.mubr.bf16.mxu0 %v12605_v44  ;;  %v9245_v32 = vld [vmem:[#allocation2 + $0x1a4] sm:$0xe]  ;;  %v12319_v48 = vcombine.low %v5650_v50, %v5660_v51  ;;  %v5674_v44 = vsel %vm15727_vm11, %v5669_v13, %v5673_v35 }
 0x373   : > { %13821 = vmatprep.mubr.bf16.mxu1 %v12317_v6  ;;  %v12560_v24 = vrot.slane %v9245_v32, 9  ;;  %v12320_v53 = vcombine.low %v5674_v44, %v5684_v21 }
 0x375   : > { %v9562_v14 = vsel %vm15895_vm14, %v12560_v24, %v9561_v20 }
 0x376   : > { %v12608_v4 = vcombine.low %v9562_v14, %v9565_v34 }
 0x379   : > { %14142 = vmatmul.mubr.bf16.gmra.mrb[56].mxu0 %v12606_v1 }
 0x37a   : > { %13822 = vmatmul.mubr.bf16.gmra.mrb[56].mxu1 %v12318_v57  ;;  %14145 = vmatprep.mubr.bf16.mxu0 %v12607_v12 }
 0x37b   : > { %13825 = vmatprep.mubr.bf16.mxu1 %v12319_v48 }
 0x381   : > { %14146 = vmatmul.mubr.bf16.gmra.mrb[60].mxu0 %v12608_v4 }
 0x382   : > { %13826 = vmatmul.mubr.bf16.gmra.mrb[60].mxu1 %v12320_v53 }
 0x39d   : > { %v13687_v17 = vpop.f32.mrb[0].mxu1 }
 0x39e   : > { %v4502_v2 = vpop.f32.mrb[1].mxu1 }
 0x39f   : > { %v13688_v28 = vpop.f32.mrb[2].mxu1 }
 0x3a0   : > { %v4505_v22 = vpop.f32.mrb[3].mxu1 }
 0x3a5   : > { %v13691_v18 = vpop.f32.mrb[4].mxu1 }
 0x3a6   : > { %v4518_v19 = vpop.f32.mrb[5].mxu1 }
 0x3a7   : > { %v13692_v49 = vpop.f32.mrb[6].mxu1 }
 0x3a8   : > { %v4521_v27 = vpop.f32.mrb[7].mxu1 }
 0x3ad   : > { %v13695_v16 = vpop.f32.mrb[8].mxu1 }
 0x3ae   : > { %v4534_v6 = vpop.f32.mrb[9].mxu1 }
 0x3af   : > { %v13696_v59 = vpop.f32.mrb[10].mxu1 }
 0x3b0   : > { %v4537_v54 = vpop.f32.mrb[11].mxu1 }
 0x3b5   : > { %v13699_v3 = vpop.f32.mrb[12].mxu1 }
 0x3b6   : > { %v4550_v10 = vpop.f32.mrb[13].mxu1 }
 0x3b7   : > { %v13700_v52 = vpop.f32.mrb[14].mxu1 }
 0x3b8   : > { %v4553_v5 = vpop.f32.mrb[15].mxu1 }
 0x3bd   : > { %v17562_v38 = vpop.f32.mrb[16].mxu1 }
 0x3be   : > { %v17564_v30 = vpop.f32.mrb[17].mxu1 }
 0x3bf   : > { %v17566_v45 = vpop.f32.mrb[18].mxu1 }
 0x3c0   : > { %v17568_v61 = vpop.f32.mrb[19].mxu1 }
 0x3c5   : > { %v17570_v29 = vpop.f32.mrb[20].mxu1 }
 0x3c6   : > { %v17572_v41 = vpop.f32.mrb[21].mxu1 }
 0x3c7   : > { %v17574_v23 = vpop.f32.mrb[22].mxu1 }
 0x3c8   : > { %v17576_v11 = vpop.f32.mrb[23].mxu1 }
 0x3cd   : > { %v17578_v8 = vpop.f32.mrb[24].mxu1 }
 0x3ce   : > { %v17580_v36 = vpop.f32.mrb[25].mxu1 }
 0x3cf   : > { %v17582_v26 = vpop.f32.mrb[26].mxu1 }
 0x3d0   : > { %v17584_v35 = vpop.f32.mrb[27].mxu1 }
 0x3d5   : > { %v17586_v37 = vpop.f32.mrb[28].mxu1 }
 0x3d6   : > { %v17588_v60 = vpop.f32.mrb[29].mxu1 }
 0x3d7   : > { %v17590_v40 = vpop.f32.mrb[30].mxu1 }
 0x3d8   : > { %v17592_v25 = vpop.f32.mrb[31].mxu1 }
 0x3dc   : > { %v14087_v43 = vpop.f32.mrb[0].mxu0 }
 0x3dd   : > { %v17594_v39 = vadd.f32 %v14087_v43, %v13687_v17  ;;  %v9793_v47 = vpop.f32.mrb[1].mxu0 }
 0x3de   : > { %v17596_v0 = vadd.f32 %v9793_v47, %v4502_v2  ;;  %v14088_v31 = vpop.f32.mrb[2].mxu0 }
 0x3df   : > { %v17598_v15 = vadd.f32 %v14088_v31, %v13688_v28  ;;  %v9796_v20 = vpop.f32.mrb[3].mxu0 }
 0x3e0   : > { %v17600_v58 = vadd.f32 %v9796_v20, %v4505_v22 }
 0x3e2   : > { %v10112_v7 = vadd.f32 %v17600_v58, %v17596_v0 }
 0x3e4   : > { %v10113_v46 = vadd.f32 %v17594_v39, %v10112_v7  ;;  %v14091_v9 = vpop.f32.mrb[4].mxu0 }
 0x3e5   : > { %v17605_v63 = vadd.f32 %v14091_v9, %v13691_v18  ;;  %v9809_v32 = vpop.f32.mrb[5].mxu0 }
 0x3e6   : > { %v17607_v50 = vadd.f32 %v9809_v32, %v4518_v19  ;;  %v10114_v51 = vadd.f32 %v17598_v15, %v10113_v46  ;;  %v14092_v57 = vpop.f32.mrb[6].mxu0 }
 0x3e7   : > { %v17610_v1 = vadd.f32 %v14092_v57, %v13692_v49  ;;  %v9812_v12 = vpop.f32.mrb[7].mxu0 }
 0x3e8   : > { %v10115_v24 = vadd.f32 %v17607_v50, %v10114_v51  ;;  %v17613_v62 = vadd.f32 %v9812_v12, %v4521_v27 }
 0x3ea   : > { %v10116_v56 = vadd.f32 %v17613_v62, %v10115_v24 }
 0x3ec   : > { %v10117_v42 = vadd.f32 %v17605_v63, %v10116_v56  ;;  %v14095_v48 = vpop.f32.mrb[8].mxu0 }
 0x3ed   : > { %v17617_v13 = vadd.f32 %v14095_v48, %v13695_v16  ;;  %v9825_v33 = vpop.f32.mrb[9].mxu0 }
 0x3ee   : > { %v17619_v55 = vadd.f32 %v9825_v33, %v4534_v6  ;;  %v10118_v14 = vadd.f32 %v17610_v1, %v10117_v42  ;;  %v14096_v34 = vpop.f32.mrb[10].mxu0 }
 0x3ef   : > { %v17622_v44 = vadd.f32 %v14096_v34, %v13696_v59  ;;  %v9828_v21 = vpop.f32.mrb[11].mxu0 }
 0x3f0   : > { %v10119_v4 = vadd.f32 %v17619_v55, %v10118_v14  ;;  %v17625_v53 = vadd.f32 %v9828_v21, %v4537_v54 }
 0x3f2   : > { %v10120_v17 = vadd.f32 %v17625_v53, %v10119_v4 }
 0x3f4   : > { %v10121_v2 = vadd.f32 %v17617_v13, %v10120_v17  ;;  %v14099_v28 = vpop.f32.mrb[12].mxu0 }
 0x3f5   : > { %v17629_v22 = vadd.f32 %v14099_v28, %v13699_v3  ;;  %v9841_v18 = vpop.f32.mrb[13].mxu0 }
 0x3f6   : > { %v17631_v19 = vadd.f32 %v9841_v18, %v4550_v10  ;;  %v10122_v49 = vadd.f32 %v17622_v44, %v10121_v2  ;;  %v14100_v27 = vpop.f32.mrb[14].mxu0 }
 0x3f7   : > { %v17634_v16 = vadd.f32 %v14100_v27, %v13700_v52  ;;  %v9844_v6 = vpop.f32.mrb[15].mxu0 }
 0x3f8   : > { %v10123_v59 = vadd.f32 %v17631_v19, %v10122_v49  ;;  %v17637_v54 = vadd.f32 %v9844_v6, %v4553_v5 }
 0x3fa   : > { %v10124_v43 = vadd.f32 %v17637_v54, %v10123_v59 }
 0x3fc   : > { %v10125_v47 = vadd.f32 %v17629_v22, %v10124_v43  ;;  %v14103_v31 = vpop.f32.mrb[16].mxu0 }
 0x3fd   : > { %v17642_v3 = vadd.f32 %v14103_v31, %v17562_v38  ;;  %v9857_v10 = vpop.f32.mrb[17].mxu0 }
 0x3fe   : > { %v17645_v20 = vadd.f32 %v9857_v10, %v17564_v30  ;;  %v10126_v52 = vadd.f32 %v17634_v16, %v10125_v47  ;;  %v14104_v7 = vpop.f32.mrb[18].mxu0 }
 0x3ff   : > { %v17649_v46 = vadd.f32 %v14104_v7, %v17566_v45  ;;  %v9860_v5 = vpop.f32.mrb[19].mxu0 }
 0x400   : > { %v10127_v9 = vadd.f32 %v17645_v20, %v10126_v52  ;;  %v17653_v32 = vadd.f32 %v9860_v5, %v17568_v61 }
 0x402   : > { %v10128_v51 = vadd.f32 %v17653_v32, %v10127_v9 }
 0x404   : > { %v10129_v38 = vadd.f32 %v17642_v3, %v10128_v51  ;;  %v14107_v57 = vpop.f32.mrb[20].mxu0 }
 0x405   : > { %v17658_v30 = vadd.f32 %v14107_v57, %v17570_v29  ;;  %v9873_v12 = vpop.f32.mrb[21].mxu0 }
 0x406   : > { %v17661_v24 = vadd.f32 %v9873_v12, %v17572_v41  ;;  %v10130_v45 = vadd.f32 %v17649_v46, %v10129_v38  ;;  %v14108_v56 = vpop.f32.mrb[22].mxu0 }
 0x407   : > { %v17665_v42 = vadd.f32 %v14108_v56, %v17574_v23  ;;  %v9876_v61 = vpop.f32.mrb[23].mxu0 }
 0x408   : > { %v10131_v48 = vadd.f32 %v17661_v24, %v10130_v45  ;;  %v17669_v33 = vadd.f32 %v9876_v61, %v17576_v11 }
 0x40a   : > { %v10132_v14 = vadd.f32 %v17669_v33, %v10131_v48 }
 0x40c   : > { %v10133_v29 = vadd.f32 %v17658_v30, %v10132_v14  ;;  %v14111_v34 = vpop.f32.mrb[24].mxu0 }
 0x40d   : > { %v17674_v41 = vadd.f32 %v14111_v34, %v17578_v8  ;;  %v9889_v21 = vpop.f32.mrb[25].mxu0 }
 0x40e   : > { %v17677_v4 = vadd.f32 %v9889_v21, %v17580_v36  ;;  %v10134_v23 = vadd.f32 %v17665_v42, %v10133_v29  ;;  %v14112_v17 = vpop.f32.mrb[26].mxu0 }
 0x40f   : > { %19475 = vst [vmem:[#allocation8_spill] sm:$0xff] %v17674_v41  ;;  %v17681_v2 = vadd.f32 %v14112_v17, %v17582_v26  ;;  %v9892_v11 = vpop.f32.mrb[27].mxu0 }
 0x410   : > { %v10135_v28 = vadd.f32 %v17677_v4, %v10134_v23  ;;  %v17685_v18 = vadd.f32 %v9892_v11, %v17584_v35 }
 0x411   : > { %19476 = vst [vmem:[#allocation3_spill] sm:$0xff] %v17681_v2 }
 0x412   : > { %19477 = vst [vmem:[#allocation4_spill] sm:$0xff] %v17685_v18  ;;  %v10136_v49 = vadd.f32 %v17685_v18, %v10135_v28 }
 0x414   : > { %v10137_v8 = vadd.f32 %v17674_v41, %v10136_v49  ;;  %v14115_v27 = vpop.f32.mrb[28].mxu0 }
 0x415   : > { %v17690_v36 = vadd.f32 %v14115_v27, %v17586_v37  ;;  %v9905_v6 = vpop.f32.mrb[29].mxu0 }
 0x416   : > { %v17693_v59 = vadd.f32 %v9905_v6, %v17588_v60  ;;  %v10138_v26 = vadd.f32 %v17681_v2, %v10137_v8  ;;  %v14116_v43 = vpop.f32.mrb[30].mxu0 }
 0x417   : > { %19478 = vst [vmem:[#allocation5_spill] sm:$0xff] %v17690_v36  ;;  %v17697_v47 = vadd.f32 %v14116_v43, %v17590_v40  ;;  %v9908_v35 = vpop.f32.mrb[31].mxu0 }
 0x418   : > { %19479 = vst [vmem:[#allocation9_spill] sm:$0xff] %v17693_v59  ;;  %v10139_v31 = vadd.f32 %v17693_v59, %v10138_v26  ;;  %v17701_v10 = vadd.f32 %v9908_v35, %v17592_v25 }
 0x419   : > { %19480 = vst [vmem:[#allocation10_spill] sm:$0xff] %v17697_v47 }
 0x41a   : > { %19481 = vst [vmem:[#allocation11_spill] sm:$0xff] %v17701_v10  ;;  %v10140_v52 = vadd.f32 %v17701_v10, %v10139_v31 }
 0x41c   : > { %v10141_v37 = vadd.f32 %v17690_v36, %v10140_v52  ;;  %v14119_v7 = vpop.f32.mrb[32].mxu0 }
 0x41d   : > { %v13799_v5 = vpop.f32.mrb[32].mxu1  ;;  %v9921_v60 = vpop.f32.mrb[33].mxu0 }
 0x41e   : > { %v17705_v9 = vadd.f32 %v14119_v7, %v13799_v5  ;;  %v6040_v51 = vpop.f32.mrb[33].mxu1  ;;  %v10142_v38 = vadd.f32 %v17697_v47, %v10141_v37  ;;  %v14120_v40 = vpop.f32.mrb[34].mxu0 }
 0x41f   : > { %v17708_v57 = vadd.f32 %v9921_v60, %v6040_v51  ;;  %v13800_v12 = vpop.f32.mrb[34].mxu1  ;;  %v9924_v45 = vpop.f32.mrb[35].mxu0 }
 0x420   : > { %19482 = vst [vmem:[#allocation7_spill] sm:$0xff] %v17705_v9  ;;  %v17710_v56 = vadd.f32 %v14120_v40, %v13800_v12  ;;  %v6043_v25 = vpop.f32.mrb[35].mxu1 }
 0x421   : > { %19483 = vst [vmem:[#allocation6_spill] sm:$0xff] %v17708_v57  ;;  %v10143_v61 = vadd.f32 %v17708_v57, %v10142_v38  ;;  %v17713_v48 = vadd.f32 %v9924_v45, %v6043_v25 }
 0x422   : > { %19484 = vst [vmem:[#allocation12_spill] sm:$0xff] %v17710_v56 }
 0x423   : > { %19485 = vst [vmem:[#allocation13_spill] sm:$0xff] %v17713_v48  ;;  %v10144_v14 = vadd.f32 %v17713_v48, %v10143_v61 }
 0x424   : > { %v14123_v29 = vpop.f32.mrb[36].mxu0 }
 0x425   : > { %v10145_v34 = vadd.f32 %v17705_v9, %v10144_v14  ;;  %v13803_v21 = vpop.f32.mrb[36].mxu1  ;;  %v9937_v23 = vpop.f32.mrb[37].mxu0 }
 0x426   : > { %v17717_v17 = vadd.f32 %v14123_v29, %v13803_v21  ;;  %v6056_v11 = vpop.f32.mrb[37].mxu1  ;;  %v14124_v28 = vpop.f32.mrb[38].mxu0 }
 0x427   : > { %v17719_v49 = vadd.f32 %v9937_v23, %v6056_v11  ;;  %v10146_v8 = vadd.f32 %v17710_v56, %v10145_v34  ;;  %v13804_v27 = vpop.f32.mrb[38].mxu1  ;;  %v9940_v6 = vpop.f32.mrb[39].mxu0 }
 0x428   : > { %19486 = vst [vmem:[#allocation14_spill] sm:$0xff] %v17717_v17  ;;  %v17722_v26 = vadd.f32 %v14124_v28, %v13804_v27  ;;  %v6059_v43 = vpop.f32.mrb[39].mxu1 }
 0x429   : > { %19487 = vst [vmem:[#allocation15_spill] sm:$0xff] %v17719_v49  ;;  %v10147_v35 = vadd.f32 %v17719_v49, %v10146_v8  ;;  %v17725_v31 = vadd.f32 %v9940_v6, %v6059_v43 }
 0x42a   : > { %19488 = vst [vmem:[#allocation16_spill] sm:$0xff] %v17722_v26 }
 0x42b   : > { %19489 = vst [vmem:[#allocation17_spill] sm:$0xff] %v17725_v31  ;;  %v10148_v52 = vadd.f32 %v17725_v31, %v10147_v35 }
 0x42c   : > { %v14127_v37 = vpop.f32.mrb[40].mxu0 }
 0x42d   : > { %v10149_v7 = vadd.f32 %v17717_v17, %v10148_v52  ;;  %v13807_v5 = vpop.f32.mrb[40].mxu1  ;;  %v9953_v60 = vpop.f32.mrb[41].mxu0 }
 0x42e   : > { %v17729_v51 = vadd.f32 %v14127_v37, %v13807_v5  ;;  %v6072_v38 = vpop.f32.mrb[41].mxu1  ;;  %v14128_v40 = vpop.f32.mrb[42].mxu0 }
 0x42f   : > { %v17731_v12 = vadd.f32 %v9953_v60, %v6072_v38  ;;  %v10150_v45 = vadd.f32 %v17722_v26, %v10149_v7  ;;  %v13808_v25 = vpop.f32.mrb[42].mxu1  ;;  %v9956_v61 = vpop.f32.mrb[43].mxu0 }
 0x430   : > { %19490 = vst [vmem:[#allocation18_spill] sm:$0xff] %v17729_v51  ;;  %v17734_v14 = vadd.f32 %v14128_v40, %v13808_v25  ;;  %v6075_v29 = vpop.f32.mrb[43].mxu1 }
 0x431   : > { %19491 = vst [vmem:[#allocation19_spill] sm:$0xff] %v17731_v12  ;;  %v10151_v34 = vadd.f32 %v17731_v12, %v10150_v45  ;;  %v17737_v21 = vadd.f32 %v9956_v61, %v6075_v29 }
 0x432   : > { %19492 = vst [vmem:[#allocation20_spill] sm:$0xff] %v17734_v14 }
 0x433   : > { %19493 = vst [vmem:[#allocation21_spill] sm:$0xff] %v17737_v21  ;;  %v10152_v23 = vadd.f32 %v17737_v21, %v10151_v34 }
 0x434   : > { %v14131_v11 = vpop.f32.mrb[44].mxu0 }
 0x435   : > { %v10153_v28 = vadd.f32 %v17729_v51, %v10152_v23  ;;  %v13811_v8 = vpop.f32.mrb[44].mxu1  ;;  %v9969_v27 = vpop.f32.mrb[45].mxu0 }
 0x436   : > { %v17741_v6 = vadd.f32 %v14131_v11, %v13811_v8  ;;  %v6088_v43 = vpop.f32.mrb[45].mxu1  ;;  %v14132_v35 = vpop.f32.mrb[46].mxu0 }
 0x437   : > { %v17743_v52 = vadd.f32 %v9969_v27, %v6088_v43  ;;  %v10154_v37 = vadd.f32 %v17734_v14, %v10153_v28  ;;  %v13812_v7 = vpop.f32.mrb[46].mxu1  ;;  %v9972_v5 = vpop.f32.mrb[47].mxu0 }
 0x438   : > { %v17746_v60 = vadd.f32 %v14132_v35, %v13812_v7  ;;  %v6091_v38 = vpop.f32.mrb[47].mxu1 }
 0x439   : > { %19494 = vst [vmem:[#allocation22_spill] sm:$0xff] %v17743_v52  ;;  %v10155_v40 = vadd.f32 %v17743_v52, %v10154_v37  ;;  %v17749_v45 = vadd.f32 %v9972_v5, %v6091_v38 }
 0x43b   : > { %v10156_v25 = vadd.f32 %v17749_v45, %v10155_v40 }
 0x43c   : > { %v14135_v61 = vpop.f32.mrb[48].mxu0 }
 0x43d   : > { %v10157_v29 = vadd.f32 %v17741_v6, %v10156_v25  ;;  %v13815_v34 = vpop.f32.mrb[48].mxu1  ;;  %v9985_v23 = vpop.f32.mrb[49].mxu0 }
 0x43e   : > { %v17753_v11 = vadd.f32 %v14135_v61, %v13815_v34  ;;  %v6104_v8 = vpop.f32.mrb[49].mxu1  ;;  %v14136_v28 = vpop.f32.mrb[50].mxu0 }
 0x43f   : > { %v17755_v27 = vadd.f32 %v9985_v23, %v6104_v8  ;;  %v10158_v43 = vadd.f32 %v17746_v60, %v10157_v29  ;;  %v13816_v35 = vpop.f32.mrb[50].mxu1  ;;  %v9988_v7 = vpop.f32.mrb[51].mxu0 }
 0x440   : > { %v17758_v37 = vadd.f32 %v14136_v28, %v13816_v35  ;;  %v6107_v5 = vpop.f32.mrb[51].mxu1 }
 0x441   : > { %v10159_v38 = vadd.f32 %v17755_v27, %v10158_v43  ;;  %v17761_v40 = vadd.f32 %v9988_v7, %v6107_v5 }
 0x443   : > { %v10160_v25 = vadd.f32 %v17761_v40, %v10159_v38 }
 0x444   : > { %v14139_v52 = vpop.f32.mrb[52].mxu0 }
 0x445   : > { %v10161_v61 = vadd.f32 %v17753_v11, %v10160_v25  ;;  %v13819_v34 = vpop.f32.mrb[52].mxu1  ;;  %v10001_v14 = vpop.f32.mrb[53].mxu0 }
 0x446   : > { %v14217_v23 = vadd.f32 %v14139_v52, %v13819_v34  ;;  %v6120_v8 = vpop.f32.mrb[53].mxu1  ;;  %v14140_v51 = vpop.f32.mrb[54].mxu0 }
 0x447   : > { %v14218_v29 = vadd.f32 %v10001_v14, %v6120_v8  ;;  %v10162_v21 = vadd.f32 %v17758_v37, %v10161_v61  ;;  %v13820_v28 = vpop.f32.mrb[54].mxu1  ;;  %v10004_v35 = vpop.f32.mrb[55].mxu0 }
 0x448   : > { %v14219_v12 = vadd.f32 %v14140_v51, %v13820_v28  ;;  %v6123_v26 = vpop.f32.mrb[55].mxu1 }
 0x449   : > { %v10163_v43 = vadd.f32 %v14218_v29, %v10162_v21  ;;  %v14220_v7 = vadd.f32 %v10004_v35, %v6123_v26 }
 0x44b   : > { %v10164_v5 = vadd.f32 %v14220_v7, %v10163_v43 }
 0x44c   : > { %v14143_v17 = vpop.f32.mrb[56].mxu0 }
 0x44d   : > { %v10165_v38 = vadd.f32 %v14217_v23, %v10164_v5  ;;  %v13823_v31 = vpop.f32.mrb[56].mxu1  ;;  %v10017_v49 = vpop.f32.mrb[57].mxu0 }
 0x44e   : > { %v14221_v25 = vadd.f32 %v14143_v17, %v13823_v31  ;;  %v6136_v56 = vpop.f32.mrb[57].mxu1  ;;  %v14144_v9 = vpop.f32.mrb[58].mxu0 }
 0x44f   : > { %v14222_v52 = vadd.f32 %v10017_v49, %v6136_v56  ;;  %v10166_v34 = vadd.f32 %v14219_v12, %v10165_v38  ;;  %v13824_v48 = vpop.f32.mrb[58].mxu1  ;;  %v10020_v14 = vpop.f32.mrb[59].mxu0 }
 0x450   : > { %v14223_v8 = vadd.f32 %v14144_v9, %v13824_v48  ;;  %v6139_v61 = vpop.f32.mrb[59].mxu1 }
 0x451   : > { %v10167_v57 = vadd.f32 %v14222_v52, %v10166_v34  ;;  %v14224_v47 = vadd.f32 %v10020_v14, %v6139_v61 }
 0x453   : > { %v10168_v51 = vadd.f32 %v14224_v47, %v10167_v57 }
 0x454   : > { %v14147_v28 = vpop.f32.mrb[60].mxu0 }
 0x455   : > { %v10169_v21 = vadd.f32 %v14221_v25, %v10168_v51  ;;  %v13827_v26 = vpop.f32.mrb[60].mxu1  ;;  %v10033_v35 = vpop.f32.mrb[61].mxu0 }
 0x456   : > { %v14225_v43 = vadd.f32 %v14147_v28, %v13827_v26  ;;  %v6152_v5 = vpop.f32.mrb[61].mxu1  ;;  %v14148_v36 = vpop.f32.mrb[62].mxu0 }
 0x457   : > { %v14226_v10 = vadd.f32 %v10033_v35, %v6152_v5  ;;  %v10170_v17 = vadd.f32 %v14223_v8, %v10169_v21  ;;  %v13828_v31 = vpop.f32.mrb[62].mxu1  ;;  %v10036_v59 = vpop.f32.mrb[63].mxu0 }
 0x458   : > { %v14227_v56 = vadd.f32 %v14148_v36, %v13828_v31  ;;  %v6155_v49 = vpop.f32.mrb[63].mxu1 }
 0x459   : > { %v10171_v38 = vadd.f32 %v14226_v10, %v10170_v17  ;;  %v14228_v2 = vadd.f32 %v10036_v59, %v6155_v49 }
 0x45b   : > { %v10172_v9 = vadd.f32 %v14228_v2, %v10171_v38 }
 0x45d   : > { %v10173_v48 = vadd.f32 %v14225_v43, %v10172_v9 }
 0x45f   : > { %v10174_v34 = vadd.f32 %v14227_v56, %v10173_v48 }
 0x461   : > { %v10175_v14 = vrot.slane %v10174_v34, 4 }
 0x463   : > { %v10176_v57 = vadd.f32 %v10175_v14, %v10174_v34 }
 0x465   : > { %v10177_v61 = vrot.slane %v10176_v57, 2 }
 0x467   : > { %v10178_v51 = vadd.f32 %v10177_v61, %v10176_v57 }
 0x469   : > { %v10179_v41 = vrot.slane %v10178_v51, 1 }
 0x46b   : > { %v10180_v18 = vadd.f32 %v10179_v41, %v10178_v51 }
 0x46d   : > { %v17766_v28 = vmul.f32 0.001953125, %v10180_v18 }
 0x46f   : > { %v17770_v21 = vsub.f32 %v17749_v45, %v17766_v28  ;;  %v17774_v36 = vsub.f32 %v17741_v6, %v17766_v28  ;;  %v17778_v59 = vsub.f32 %v17746_v60, %v17766_v28  ;;  %v17782_v26 = vsub.f32 %v17755_v27, %v17766_v28 }
 0x470   : > { %v17786_v41 = vsub.f32 %v17761_v40, %v17766_v28  ;;  %v17790_v18 = vsub.f32 %v17753_v11, %v17766_v28  ;;  %v17794_v6 = vsub.f32 %v17758_v37, %v17766_v28  ;;  %v17797_v45 = vsub.f32 %v14218_v29, %v17766_v28 }
 0x471   : > { %v17800_v60 = vsub.f32 %v14220_v7, %v17766_v28  ;;  %v17803_v27 = vsub.f32 %v14217_v23, %v17766_v28  ;;  %v17806_v40 = vsub.f32 %v14219_v12, %v17766_v28  ;;  %v17809_v35 = vsub.f32 %v14222_v52, %v17766_v28 }
 0x472   : > { %v17812_v11 = vsub.f32 %v14224_v47, %v17766_v28  ;;  %v17815_v37 = vsub.f32 %v14221_v25, %v17766_v28  ;;  %v17818_v29 = vsub.f32 %v14223_v8, %v17766_v28  ;;  %v17821_v7 = vsub.f32 %v14226_v10, %v17766_v28 }
 0x473   : > { %v17824_v23 = vsub.f32 %v14228_v2, %v17766_v28  ;;  %v17827_v12 = vsub.f32 %v14225_v43, %v17766_v28  ;;  %v17830_v52 = vsub.f32 %v14227_v56, %v17766_v28  ;;  %v17834_v47 = vsub.f32 %v17596_v0, %v17766_v28 }
 0x474   : > { %19495 = vst [vmem:[#allocation23_spill] sm:$0xff] %v17812_v11  ;;  %19496 = vst [vmem:[#allocation24_spill] sm:$0xff] %v17815_v37  ;;  %v17838_v25 = vsub.f32 %v17600_v58, %v17766_v28  ;;  %v17842_v10 = vsub.f32 %v17594_v39, %v17766_v28  ;;  %v17850_v43 = vsub.f32 %v17598_v15, %v17766_v28 }
 0x475   : > { %19497 = vst [vmem:[#allocation25_spill] sm:$0xff] %v17818_v29  ;;  %19498 = vst [vmem:[#allocation26_spill] sm:$0xff] %v17821_v7  ;;  %v10246_v2 = vmul.f32 %v17834_v47, %v17834_v47  ;;  %v17854_v0 = vsub.f32 %v17607_v50, %v17766_v28  ;;  %v17860_v39 = vsub.f32 %v17613_v62, %v17766_v28 }
 0x476   : > { %19499 = vst [vmem:[#allocation27_spill] sm:$0xff] %v17830_v52  ;;  %v10247_v8 = vmul.f32 %v17838_v25, %v17838_v25  ;;  %v10248_v58 = vmul.f32 %v17842_v10, %v17842_v10  ;;  %v10249_v17 = vmul.f32 %v17850_v43, %v17850_v43  ;;  %v17866_v15 = vsub.f32 %v17605_v63, %v17766_v28 }
 0x477   : > { %v10250_v50 = vmul.f32 %v17854_v0, %v17854_v0  ;;  %v17872_v49 = vsub.f32 %v17610_v1, %v17766_v28  ;;  %v10251_v62 = vmul.f32 %v17860_v39, %v17860_v39  ;;  %v17878_v9 = vsub.f32 %v17619_v55, %v17766_v28 }
 0x478   : > { %v10310_v5 = vadd.f32 %v10247_v8, %v10246_v2  ;;  %v10252_v63 = vmul.f32 %v17866_v15, %v17866_v15  ;;  %v17884_v34 = vsub.f32 %v17625_v53, %v17766_v28  ;;  %v17890_v57 = vsub.f32 %v17617_v13, %v17766_v28 }
 0x479   : > { %v10253_v1 = vmul.f32 %v17872_v49, %v17872_v49  ;;  %v10254_v55 = vmul.f32 %v17878_v9, %v17878_v9  ;;  %v17896_v51 = vsub.f32 %v17622_v44, %v17766_v28  ;;  %v17902_v8 = vsub.f32 %v17631_v19, %v17766_v28 }
 0x47a   : > { %v10311_v31 = vadd.f32 %v10310_v5, %v10248_v58  ;;  %v10255_v53 = vmul.f32 %v17884_v34, %v17884_v34  ;;  %v10256_v13 = vmul.f32 %v17890_v57, %v17890_v57  ;;  %v17908_v5 = vsub.f32 %v17637_v54, %v17766_v28 }
 0x47b   : > { %v10257_v44 = vmul.f32 %v17896_v51, %v17896_v51  ;;  %v10258_v19 = vmul.f32 %v17902_v8, %v17902_v8 }
 0x47c   : > { %v10312_v56 = vadd.f32 %v10311_v31, %v10249_v17  ;;  %v17914_v31 = vsub.f32 %v17629_v22, %v17766_v28  ;;  %v10259_v54 = vmul.f32 %v17908_v5, %v17908_v5 }
 0x47e   : > { %v10313_v38 = vadd.f32 %v10312_v56, %v10250_v50  ;;  %v17920_v56 = vsub.f32 %v17634_v16, %v17766_v28  ;;  %v10260_v22 = vmul.f32 %v17914_v31, %v17914_v31 }
 0x480   : > { %v10314_v48 = vadd.f32 %v10313_v38, %v10251_v62  ;;  %v17926_v38 = vsub.f32 %v17645_v20, %v17766_v28  ;;  %v10261_v16 = vmul.f32 %v17920_v56, %v17920_v56 }
 0x482   : > { %v10315_v14 = vadd.f32 %v10314_v48, %v10252_v63  ;;  %v17932_v48 = vsub.f32 %v17653_v32, %v17766_v28  ;;  %v10262_v20 = vmul.f32 %v17926_v38, %v17926_v38 }
 0x484   : > { %v10316_v61 = vadd.f32 %v10315_v14, %v10253_v1  ;;  %v17938_v14 = vsub.f32 %v17642_v3, %v17766_v28  ;;  %v10263_v32 = vmul.f32 %v17932_v48, %v17932_v48 }
 0x486   : > { %v10317_v2 = vadd.f32 %v10316_v61, %v10254_v55  ;;  %v17944_v61 = vsub.f32 %v17649_v46, %v17766_v28  ;;  %v10264_v3 = vmul.f32 %v17938_v14, %v17938_v14 }
 0x488   : > { %v10318_v58 = vadd.f32 %v10317_v2, %v10255_v53  ;;  %v17950_v2 = vsub.f32 %v17661_v24, %v17766_v28  ;;  %v10265_v46 = vmul.f32 %v17944_v61, %v17944_v61 }
 0x48a   : > { %v10319_v17 = vadd.f32 %v10318_v58, %v10256_v13  ;;  %v17956_v58 = vsub.f32 %v17669_v33, %v17766_v28  ;;  %v10266_v24 = vmul.f32 %v17950_v2, %v17950_v2 }
 0x48c   : > { %v10320_v50 = vadd.f32 %v10319_v17, %v10257_v44  ;;  %v17962_v17 = vsub.f32 %v17658_v30, %v17766_v28  ;;  %v10267_v33 = vmul.f32 %v17956_v58, %v17956_v58 }
 0x48e   : > { %v10321_v62 = vadd.f32 %v10320_v50, %v10258_v19  ;;  %v17968_v50 = vsub.f32 %v17665_v42, %v17766_v28  ;;  %v10268_v30 = vmul.f32 %v17962_v17, %v17962_v17 }
 0x490   : > { %v10322_v63 = vadd.f32 %v10321_v62, %v10259_v54  ;;  %v17974_v62 = vsub.f32 %v17677_v4, %v17766_v28  ;;  %v10269_v42 = vmul.f32 %v17968_v50, %v17968_v50 }
 0x492   : > { %v10323_v1 = vadd.f32 %v10322_v63, %v10260_v22  ;;  %v19500_v63 = vld [vmem:[#allocation4_spill] sm:$0xff]  ;;  %v10270_v4 = vmul.f32 %v17974_v62, %v17974_v62 }
 0x494   : > { %v10324_v55 = vadd.f32 %v10323_v1, %v10261_v16  ;;  %v17980_v16 = vsub.f32 %v19500_v63, %v17766_v28 }
 0x496   : > { %v10325_v53 = vadd.f32 %v10324_v55, %v10262_v20  ;;  %v19501_v20 = vld [vmem:[#allocation8_spill] sm:$0xff] }
 0x497   : > { %v17986_v55 = vsub.f32 %v19501_v20, %v17766_v28 }
 0x498   : > { %v10326_v13 = vadd.f32 %v10325_v53, %v10263_v32  ;;  %v19502_v53 = vld [vmem:[#allocation3_spill] sm:$0xff] }
 0x49a   : > { %v10327_v44 = vadd.f32 %v10326_v13, %v10264_v3  ;;  %v17992_v3 = vsub.f32 %v19502_v53, %v17766_v28  ;;  %v10271_v13 = vmul.f32 %v17980_v16, %v17980_v16 }
 0x49c   : > { %v10328_v19 = vadd.f32 %v10327_v44, %v10265_v46  ;;  %v19503_v44 = vld [vmem:[#allocation9_spill] sm:$0xff] }
 0x49e   : > { %v10329_v54 = vadd.f32 %v10328_v19, %v10266_v24  ;;  %v17998_v24 = vsub.f32 %v19503_v44, %v17766_v28  ;;  %v10272_v19 = vmul.f32 %v17986_v55, %v17986_v55  ;;  %v19511_v44 = vld [vmem:[#allocation6_spill] sm:$0xff] }
 0x4a0   : > { %v10330_v22 = vadd.f32 %v10329_v54, %v10267_v33  ;;  %19504 = vst [vmem:[#allocation4_spill] sm:$0xff] %v17998_v24  ;;  %v19505_v54 = vld [vmem:[#allocation11_spill] sm:$0xff]  ;;  %v10274_v20 = vmul.f32 %v17998_v24, %v17998_v24 }
 0x4a2   : > { %v10331_v1 = vadd.f32 %v10330_v22, %v10268_v30  ;;  %v18004_v30 = vsub.f32 %v19505_v54, %v17766_v28  ;;  %v10273_v22 = vmul.f32 %v17992_v3, %v17992_v3  ;;  %v18022_v54 = vsub.f32 %v19511_v44, %v17766_v28  ;;  %v19517_v44 = vld [vmem:[#allocation12_spill] sm:$0xff] }
 0x4a4   : > { %v10332_v32 = vadd.f32 %v10331_v1, %v10269_v42  ;;  %19506 = vst [vmem:[#allocation8_spill] sm:$0xff] %v18004_v30  ;;  %v19507_v42 = vld [vmem:[#allocation5_spill] sm:$0xff]  ;;  %19512 = vst [vmem:[#allocation11_spill] sm:$0xff] %v18022_v54 }
 0x4a5   : > { %v18010_v1 = vsub.f32 %v19507_v42, %v17766_v28  ;;  %v19513_v42 = vld [vmem:[#allocation13_spill] sm:$0xff] }
 0x4a6   : > { %v10333_v46 = vadd.f32 %v10332_v32, %v10270_v4  ;;  %v19509_v32 = vld [vmem:[#allocation10_spill] sm:$0xff]  ;;  %v18028_v24 = vsub.f32 %v19513_v42, %v17766_v28  ;;  %v19519_v42 = vld [vmem:[#allocation15_spill] sm:$0xff] }
 0x4a7   : > { %19508 = vst [vmem:[#allocation3_spill] sm:$0xff] %v18010_v1  ;;  %v18016_v53 = vsub.f32 %v19509_v32, %v17766_v28  ;;  %v19515_v32 = vld [vmem:[#allocation7_spill] sm:$0xff] }
 0x4a8   : > { %v10334_v33 = vadd.f32 %v10333_v46, %v10271_v13  ;;  %v10275_v13 = vmul.f32 %v18004_v30, %v18004_v30  ;;  %19514 = vst [vmem:[#allocation5_spill] sm:$0xff] %v18028_v24  ;;  %v18034_v30 = vsub.f32 %v19515_v32, %v17766_v28  ;;  %v19521_v32 = vld [vmem:[#allocation17_spill] sm:$0xff] }
 0x4a9   : > { %19510 = vst [vmem:[#allocation9_spill] sm:$0xff] %v18016_v53 }
 0x4aa   : > { %v10335_v63 = vadd.f32 %v10334_v33, %v10272_v19  ;;  %v10276_v19 = vmul.f32 %v18010_v1, %v18010_v1  ;;  %19516 = vst [vmem:[#allocation10_spill] sm:$0xff] %v18034_v30  ;;  %v18040_v1 = vsub.f32 %v19517_v44, %v17766_v28  ;;  %v19523_v44 = vld [vmem:[#allocation14_spill] sm:$0xff] }
 0x4ac   : > { %v10336_v4 = vadd.f32 %v10335_v63, %v10273_v22  ;;  %v10277_v22 = vmul.f32 %v18016_v53, %v18016_v53  ;;  %19518 = vst [vmem:[#allocation6_spill] sm:$0xff] %v18040_v1  ;;  %v18046_v53 = vsub.f32 %v19519_v42, %v17766_v28  ;;  %v19525_v42 = vld [vmem:[#allocation16_spill] sm:$0xff] }
 0x4ae   : > { %v10337_v46 = vadd.f32 %v10336_v4, %v10274_v20  ;;  %v10278_v20 = vmul.f32 %v18022_v54, %v18022_v54  ;;  %19520 = vst [vmem:[#allocation13_spill] sm:$0xff] %v18046_v53  ;;  %v18052_v54 = vsub.f32 %v19521_v32, %v17766_v28  ;;  %v19527_v32 = vld [vmem:[#allocation19_spill] sm:$0xff] }
 0x4b0   : > { %v10338_v33 = vadd.f32 %v10337_v46, %v10275_v13  ;;  %v10279_v13 = vmul.f32 %v18028_v24, %v18028_v24  ;;  %19522 = vst [vmem:[#allocation7_spill] sm:$0xff] %v18052_v54  ;;  %v18058_v24 = vsub.f32 %v19523_v44, %v17766_v28  ;;  %v19528_v44 = vld [vmem:[#allocation21_spill] sm:$0xff] }
 0x4b2   : > { %v10339_v63 = vadd.f32 %v10338_v33, %v10276_v19  ;;  %v10280_v19 = vmul.f32 %v18034_v30, %v18034_v30  ;;  %19524 = vst [vmem:[#allocation12_spill] sm:$0xff] %v18058_v24  ;;  %v18064_v30 = vsub.f32 %v19525_v42, %v17766_v28  ;;  %v19530_v42 = vld [vmem:[#allocation18_spill] sm:$0xff] }
 0x4b4   : > { %v10340_v4 = vadd.f32 %v10339_v63, %v10277_v22  ;;  %v10281_v22 = vmul.f32 %v18040_v1, %v18040_v1  ;;  %19526 = vst [vmem:[#allocation15_spill] sm:$0xff] %v18064_v30  ;;  %v18070_v1 = vsub.f32 %v19527_v32, %v17766_v28  ;;  %v19531_v32 = vld [vmem:[#allocation20_spill] sm:$0xff] }
 0x4b6   : > { %v10341_v46 = vadd.f32 %v10340_v4, %v10278_v20  ;;  %v10282_v20 = vmul.f32 %v18046_v53, %v18046_v53  ;;  %v18076_v53 = vsub.f32 %v19528_v44, %v17766_v28  ;;  %v19532_v44 = vld [vmem:[#allocation22_spill] sm:$0xff] }
 0x4b8   : > { %v10342_v33 = vadd.f32 %v10341_v46, %v10279_v13  ;;  %v10283_v13 = vmul.f32 %v18052_v54, %v18052_v54  ;;  %19529 = vst [vmem:[#allocation17_spill] sm:$0xff] %v18076_v53  ;;  %v18082_v54 = vsub.f32 %v19530_v42, %v17766_v28 }
 0x4ba   : > { %v10343_v63 = vadd.f32 %v10342_v33, %v10280_v19  ;;  %v10284_v19 = vmul.f32 %v18058_v24, %v18058_v24  ;;  %v18088_v24 = vsub.f32 %v19531_v32, %v17766_v28 }
 0x4bc   : > { %v10344_v4 = vadd.f32 %v10343_v63, %v10281_v22  ;;  %v10285_v22 = vmul.f32 %v18064_v30, %v18064_v30  ;;  %v18094_v30 = vsub.f32 %v19532_v44, %v17766_v28  ;;  %v10289_v42 = vmul.f32 %v18088_v24, %v18088_v24 }
 0x4bd   : > { %v10292_v28 = vmul.f32 %v17774_v36, %v17774_v36  ;;  %v10293_v44 = vmul.f32 %v17778_v59, %v17778_v59 }
 0x4be   : > { %v10345_v46 = vadd.f32 %v10344_v4, %v10282_v20  ;;  %v10286_v20 = vmul.f32 %v18070_v1, %v18070_v1 }
 0x4c0   : > { %v10346_v33 = vadd.f32 %v10345_v46, %v10283_v13  ;;  %v10287_v13 = vmul.f32 %v18076_v53, %v18076_v53  ;;  %v10291_v53 = vmul.f32 %v17770_v21, %v17770_v21 }
 0x4c2   : > { %v10347_v63 = vadd.f32 %v10346_v33, %v10284_v19  ;;  %v10288_v19 = vmul.f32 %v18082_v54, %v18082_v54 }
 0x4c4   : > { %v10348_v4 = vadd.f32 %v10347_v63, %v10285_v22  ;;  %v10290_v63 = vmul.f32 %v18094_v30, %v18094_v30 }
 0x4c6   : > { %v10349_v46 = vadd.f32 %v10348_v4, %v10286_v20 }
 0x4c8   : > { %v10350_v33 = vadd.f32 %v10349_v46, %v10287_v13  ;;  %v10294_v46 = vmul.f32 %v17782_v26, %v17782_v26 }
 0x4ca   : > { %v10351_v22 = vadd.f32 %v10350_v33, %v10288_v19  ;;  %v10295_v33 = vmul.f32 %v17786_v41, %v17786_v41 }
 0x4cc   : > { %v10352_v32 = vadd.f32 %v10351_v22, %v10289_v42  ;;  %v10296_v22 = vmul.f32 %v17790_v18, %v17790_v18 }
 0x4ce   : > { %v10353_v20 = vadd.f32 %v10352_v32, %v10290_v63  ;;  %v10297_v32 = vmul.f32 %v17794_v6, %v17794_v6 }
 0x4d0   : > { %v10354_v4 = vadd.f32 %v10353_v20, %v10291_v53  ;;  %v10298_v20 = vmul.f32 %v17797_v45, %v17797_v45 }
 0x4d2   : > { %v10355_v13 = vadd.f32 %v10354_v4, %v10292_v28  ;;  %v10299_v4 = vmul.f32 %v17800_v60, %v17800_v60 }
 0x4d4   : > { %v10356_v19 = vadd.f32 %v10355_v13, %v10293_v44  ;;  %v10300_v13 = vmul.f32 %v17803_v27, %v17803_v27 }
 0x4d6   : > { %v10357_v42 = vadd.f32 %v10356_v19, %v10294_v46  ;;  %v10301_v19 = vmul.f32 %v17806_v40, %v17806_v40 }
 0x4d8   : > { %v10358_v63 = vadd.f32 %v10357_v42, %v10295_v33  ;;  %v10302_v42 = vmul.f32 %v17809_v35, %v17809_v35 }
 0x4da   : > { %v10359_v53 = vadd.f32 %v10358_v63, %v10296_v22  ;;  %v10303_v63 = vmul.f32 %v17812_v11, %v17812_v11 }
 0x4dc   : > { %v10360_v28 = vadd.f32 %v10359_v53, %v10297_v32  ;;  %v10304_v53 = vmul.f32 %v17815_v37, %v17815_v37 }
 0x4de   : > { %v10361_v44 = vadd.f32 %v10360_v28, %v10298_v20  ;;  %v10305_v28 = vmul.f32 %v17818_v29, %v17818_v29 }
 0x4e0   : > { %v10362_v46 = vadd.f32 %v10361_v44, %v10299_v4  ;;  %v10306_v44 = vmul.f32 %v17821_v7, %v17821_v7 }
 0x4e2   : > { %v10363_v33 = vadd.f32 %v10362_v46, %v10300_v13  ;;  %v10307_v46 = vmul.f32 %v17824_v23, %v17824_v23 }
 0x4e4   : > { %v10364_v22 = vadd.f32 %v10363_v33, %v10301_v19  ;;  %v10308_v33 = vmul.f32 %v17827_v12, %v17827_v12 }
 0x4e6   : > { %v10365_v32 = vadd.f32 %v10364_v22, %v10302_v42  ;;  %v10309_v22 = vmul.f32 %v17830_v52, %v17830_v52 }
 0x4e8   : > { %v10366_v20 = vadd.f32 %v10365_v32, %v10303_v63 }
 0x4ea   : > { %v10367_v4 = vadd.f32 %v10366_v20, %v10304_v53 }
 0x4ec   : > { %v10368_v13 = vadd.f32 %v10367_v4, %v10305_v28 }
 0x4ee   : > { %v10369_v19 = vadd.f32 %v10368_v13, %v10306_v44  ;;  %v10385_v44 = vlaneseq }
 0x4f0   : > { %v10370_v42 = vadd.f32 %v10369_v19, %v10307_v46  ;;  %v10386_v13 = vshrl.u32 %v10385_v44, 7  ;;  %v10380_v46 = vld [vmem:[%s207_s21] sm:$0x1]  ;;  %v19539_v44 = vld [vmem:[#allocation10_spill] sm:$0xff] }
 0x4f2   : > { %v10371_v63 = vadd.f32 %v10370_v42, %v10308_v33  ;;  %v10387_v19 = vsub.s32 0, %v10386_v13 }
 0x4f4   : > { %v10372_v32 = vadd.f32 %v10371_v63, %v10309_v22  ;;  %v19533_v22 = vld [vmem:[#allocation4_spill] sm:$0xff] }
 0x4f5   : > { %v19534_v63 = vld [vmem:[#allocation8_spill] sm:$0xff] }
 0x4f6   : > { %v10373_v29 = vrot.slane %v10372_v32, 4 }
 0x4f8   : > { %v10374_v53 = vadd.f32 %v10373_v29, %v10372_v32  ;;  %v19535_v32 = vld [vmem:[#allocation3_spill] sm:$0xff] }
 0x4fa   : > { %v10375_v20 = vrot.slane %v10374_v53, 2 }
 0x4fc   : > { %v10376_v37 = vadd.f32 %v10375_v20, %v10374_v53  ;;  %v19536_v53 = vld [vmem:[#allocation9_spill] sm:$0xff]  ;;  %v19537_v20 = vld [vmem:[#allocation11_spill] sm:$0xff] }
 0x4fe   : > { %v10377_v7 = vrot.slane %v10376_v37, 1 }
 0x500   : > { %v10378_v28 = vadd.f32 %v10377_v7, %v10376_v37 }
 0x502   : > { %v10379_v4 = vmul.f32 0.001953125, %v10378_v28  ;;  %v19538_v28 = vld [vmem:[#allocation5_spill] sm:$0xff] }
 0x504   : > { %v10381_v11 = vadd.f32 1e-05, %v10379_v4 }
 0x506   : > { %14855 = vrsqrt.f32 %v10381_v11 }
 0x510   : > { %v14856_v52 = vpop.eup %14855 }
 0x511   : > { %v10383_v33 = vmul.f32 %v14856_v52, %v10380_v46  ;;  %v19540_v46 = vld [vmem:[#allocation6_spill] sm:$0xff] }
 0x513   : > { %v18145_v42 = vrot.slane %v10383_v33, %v10387_v19  ;;  %v19542_v33 = vld [vmem:[#allocation13_spill] sm:$0xff] }
 0x515   : > { %v18149_v29 = vmul.f32 %v18145_v42, %v17834_v47  ;;  %v18153_v37 = vmul.f32 %v18145_v42, %v17838_v25  ;;  %v18157_v11 = vmul.f32 %v18145_v42, %v17842_v10  ;;  %v18161_v7 = vmul.f32 %v18145_v42, %v17850_v43 }
 0x516   : > { %v18165_v52 = vmul.f32 %v18145_v42, %v17854_v0  ;;  %v18169_v47 = vmul.f32 %v18145_v42, %v17860_v39  ;;  %v18173_v25 = vmul.f32 %v18145_v42, %v17866_v15  ;;  %v18177_v10 = vmul.f32 %v18145_v42, %v17872_v49 }
 0x517   : > { %v18181_v43 = vmul.f32 %v18145_v42, %v17878_v9  ;;  %v18185_v0 = vmul.f32 %v18145_v42, %v17884_v34  ;;  %v18189_v39 = vmul.f32 %v18145_v42, %v17890_v57  ;;  %v18193_v15 = vmul.f32 %v18145_v42, %v17896_v51 }
 0x518   : > { %v18197_v49 = vmul.f32 %v18145_v42, %v17902_v8  ;;  %v18201_v9 = vmul.f32 %v18145_v42, %v17908_v5  ;;  %v18205_v34 = vmul.f32 %v18145_v42, %v17914_v31  ;;  %v18209_v57 = vmul.f32 %v18145_v42, %v17920_v56 }
 0x519   : > { %v18213_v51 = vmul.f32 %v18145_v42, %v17926_v38  ;;  %v18217_v8 = vmul.f32 %v18145_v42, %v17932_v48  ;;  %v18221_v5 = vmul.f32 %v18145_v42, %v17938_v14  ;;  %v18225_v31 = vmul.f32 %v18145_v42, %v17944_v61 }
 0x51a   : > { %v18229_v56 = vmul.f32 %v18145_v42, %v17950_v2  ;;  %v18233_v38 = vmul.f32 %v18145_v42, %v17956_v58  ;;  %v18237_v48 = vmul.f32 %v18145_v42, %v17962_v17  ;;  %v18241_v14 = vmul.f32 %v18145_v42, %v17968_v50 }
 0x51b   : > { %v18245_v61 = vmul.f32 %v18145_v42, %v17974_v62  ;;  %v18249_v2 = vmul.f32 %v18145_v42, %v17980_v16  ;;  %v18253_v58 = vmul.f32 %v18145_v42, %v17986_v55  ;;  %v18257_v17 = vmul.f32 %v18145_v42, %v17992_v3 }
 0x51c   : > { %v18261_v50 = vmul.f32 %v18145_v42, %v19533_v22  ;;  %v18265_v62 = vmul.f32 %v18145_v42, %v19534_v63  ;;  %v18269_v16 = vmul.f32 %v18145_v42, %v19535_v32  ;;  %v18273_v55 = vmul.f32 %v18145_v42, %v19536_v53  ;;  %v19543_v63 = vld [vmem:[#allocation7_spill] sm:$0xff]  ;;  %v19544_v53 = vld [vmem:[#allocation12_spill] sm:$0xff] }
 0x51d   : > { %v18277_v3 = vmul.f32 %v18145_v42, %v19537_v20  ;;  %v18281_v4 = vmul.f32 %v18145_v42, %v19538_v28  ;;  %v18285_v13 = vmul.f32 %v18145_v42, %v19539_v44  ;;  %v18289_v19 = vmul.f32 %v18145_v42, %v19540_v46  ;;  %v19545_v28 = vld [vmem:[#allocation15_spill] sm:$0xff] }
 0x51e   : > { %v18293_v22 = vmul.f32 %v18145_v42, %v19542_v33  ;;  %v18297_v32 = vmul.f32 %v18145_v42, %v19543_v63  ;;  %v18301_v20 = vmul.f32 %v18145_v42, %v19544_v53  ;;  %v18305_v44 = vmul.f32 %v18145_v42, %v19545_v28 }
 0x51f   : > { %19541 = vst [vmem:[#allocation14_spill] sm:$0xff] %v18289_v19  ;;  %v18309_v46 = vmul.f32 %v18145_v42, %v18070_v1  ;;  %v19546_v19 = vld [vmem:[#allocation17_spill] sm:$0xff]  ;;  %v18317_v63 = vmul.f32 %v18145_v42, %v18082_v54  ;;  %v18321_v53 = vmul.f32 %v18145_v42, %v18088_v24  ;;  %v18325_v28 = vmul.f32 %v18145_v42, %v18094_v30 }
 0x520   : > { %v18313_v33 = vmul.f32 %v18145_v42, %v19546_v19  ;;  %v18329_v1 = vmul.f32 %v18145_v42, %v17770_v21  ;;  %v18333_v19 = vmul.f32 %v18145_v42, %v17774_v36  ;;  %v18337_v54 = vmul.f32 %v18145_v42, %v17778_v59 }
 0x521   : > { %v18341_v24 = vmul.f32 %v18145_v42, %v17782_v26  ;;  %v18345_v30 = vmul.f32 %v18145_v42, %v17786_v41  ;;  %v18349_v21 = vmul.f32 %v18145_v42, %v17790_v18  ;;  %v18353_v36 = vmul.f32 %v18145_v42, %v17794_v6  ;;  %v18376_v6 = vld [vmem:[%s210_s24] ss:$0 sm:$0xff] }
 0x522   : > { %v18357_v59 = vmul.f32 %v18145_v42, %v17797_v45  ;;  %v18361_v26 = vmul.f32 %v18145_v42, %v17800_v60  ;;  %v18365_v41 = vmul.f32 %v18145_v42, %v17803_v27  ;;  %v18369_v18 = vmul.f32 %v18145_v42, %v17806_v40  ;;  %v19552_v60 = vld [vmem:[#allocation23_spill] sm:$0xff]  ;;  %v19554_v27 = vld [vmem:[#allocation24_spill] sm:$0xff]  ;;  %v19555_v40 = vld [vmem:[#allocation25_spill] sm:$0xff] }
 0x523   : > { %19547 = vst [vmem:[#allocation16_spill] sm:$0xff] %v18353_v36  ;;  %v18380_v45 = vmul.f32 %v18145_v42, %v17809_v35  ;;  %v18400_v35 = vmul.f32 %v18145_v42, %v17824_v23  ;;  %v18420_v23 = vadd.f32 %v18376_v6, %v18157_v11  ;;  %v18440_v11 = vadd.f32 %v18376_v6, %v18177_v10 }
 0x524   : > { %19548 = vst [vmem:[#allocation19_spill] sm:$0xff] %v18357_v59  ;;  %19549 = vst [vmem:[#allocation21_spill] sm:$0xff] %v18361_v26  ;;  %v18384_v26 = vmul.f32 %v18145_v42, %v19552_v60  ;;  %v19556_v59 = vld [vmem:[#allocation26_spill] sm:$0xff]  ;;  %v18404_v60 = vmul.f32 %v18145_v42, %v17827_v12  ;;  %v18424_v12 = vadd.f32 %v18376_v6, %v18161_v7 }
 0x525   : > { %19550 = vst [vmem:[#allocation18_spill] sm:$0xff] %v18365_v41  ;;  %19551 = vst [vmem:[#allocation20_spill] sm:$0xff] %v18369_v18  ;;  %v18388_v41 = vmul.f32 %v18145_v42, %v19554_v27  ;;  %v18392_v18 = vmul.f32 %v18145_v42, %v19555_v40  ;;  %v18396_v36 = vmul.f32 %v18145_v42, %v19556_v59 }
 0x526   : > { %19553 = vst [vmem:[#allocation22_spill] sm:$0xff] %v18384_v26  ;;  %v19557_v26 = vld [vmem:[#allocation27_spill] sm:$0xff]  ;;  %v18412_v40 = vadd.f32 %v18376_v6, %v18149_v29  ;;  %v18416_v59 = vadd.f32 %v18376_v6, %v18153_v37  ;;  %v18432_v29 = vadd.f32 %v18376_v6, %v18169_v47  ;;  %v18436_v37 = vadd.f32 %v18376_v6, %v18173_v25 }
 0x527   : > { %v18408_v27 = vmul.f32 %v18145_v42, %v19557_v26  ;;  %v18428_v42 = vadd.f32 %v18376_v6, %v18165_v52  ;;  %v18444_v7 = vadd.f32 %v18376_v6, %v18181_v43  ;;  %v18448_v52 = vadd.f32 %v18376_v6, %v18185_v0  ;;  %v19558_v26 = vld [vmem:[#allocation14_spill] sm:$0xff] }
 0x528   : > { %v18452_v47 = vadd.f32 %v18376_v6, %v18189_v39  ;;  %v18456_v25 = vadd.f32 %v18376_v6, %v18193_v15  ;;  %v18460_v10 = vadd.f32 %v18376_v6, %v18197_v49  ;;  %v18464_v43 = vadd.f32 %v18376_v6, %v18201_v9 }
 0x529   : > { %v18468_v0 = vadd.f32 %v18376_v6, %v18205_v34  ;;  %v18472_v39 = vadd.f32 %v18376_v6, %v18209_v57  ;;  %v18476_v15 = vadd.f32 %v18376_v6, %v18213_v51  ;;  %v18480_v49 = vadd.f32 %v18376_v6, %v18217_v8 }
 0x52a   : > { %v18484_v9 = vadd.f32 %v18376_v6, %v18221_v5  ;;  %v18488_v34 = vadd.f32 %v18376_v6, %v18225_v31  ;;  %v18492_v57 = vadd.f32 %v18376_v6, %v18229_v56  ;;  %v18496_v51 = vadd.f32 %v18376_v6, %v18233_v38 }
 0x52b   : > { %v18500_v8 = vadd.f32 %v18376_v6, %v18237_v48  ;;  %v18504_v5 = vadd.f32 %v18376_v6, %v18241_v14  ;;  %v18508_v31 = vadd.f32 %v18376_v6, %v18245_v61  ;;  %v18512_v56 = vadd.f32 %v18376_v6, %v18249_v2 }
 0x52c   : > { %v18516_v38 = vadd.f32 %v18376_v6, %v18253_v58  ;;  %v18520_v48 = vadd.f32 %v18376_v6, %v18257_v17  ;;  %v18524_v14 = vadd.f32 %v18376_v6, %v18261_v50  ;;  %v18528_v61 = vadd.f32 %v18376_v6, %v18265_v62 }
 0x52d   : > { %v18532_v2 = vadd.f32 %v18376_v6, %v18269_v16  ;;  %v18536_v58 = vadd.f32 %v18376_v6, %v18273_v55  ;;  %v18540_v17 = vadd.f32 %v18376_v6, %v18277_v3  ;;  %v18544_v50 = vadd.f32 %v18376_v6, %v18281_v4 }
 0x52e   : > { %v18548_v62 = vadd.f32 %v18376_v6, %v18285_v13  ;;  %v18552_v16 = vadd.f32 %v18376_v6, %v19558_v26  ;;  %v18556_v55 = vadd.f32 %v18376_v6, %v18293_v22  ;;  %v18560_v3 = vadd.f32 %v18376_v6, %v18297_v32 }
 0x52f   : > { %v18564_v4 = vadd.f32 %v18376_v6, %v18301_v20  ;;  %v18568_v13 = vadd.f32 %v18376_v6, %v18305_v44  ;;  %v18572_v26 = vadd.f32 %v18376_v6, %v18309_v46  ;;  %v18576_v22 = vadd.f32 %v18376_v6, %v18313_v33 }
 0x530   : > { %v18580_v32 = vadd.f32 %v18376_v6, %v18317_v63  ;;  %v18584_v20 = vadd.f32 %v18376_v6, %v18321_v53  ;;  %v18588_v44 = vadd.f32 %v18376_v6, %v18325_v28  ;;  %v18592_v46 = vadd.f32 %v18376_v6, %v18329_v1 }
 0x531   : > { %v18596_v33 = vadd.f32 %v18376_v6, %v18333_v19  ;;  %v18600_v63 = vadd.f32 %v18376_v6, %v18337_v54  ;;  %v18604_v53 = vadd.f32 %v18376_v6, %v18341_v24  ;;  %v18608_v28 = vadd.f32 %v18376_v6, %v18345_v30 }
 0x532   : > { %19559 = vst [vmem:[#allocation4_spill] sm:$0xff] %v18592_v46  ;;  %v18612_v1 = vadd.f32 %v18376_v6, %v18349_v21  ;;  %v19564_v46 = vld [vmem:[#allocation16_spill] sm:$0xff] }
 0x533   : > { %19560 = vst [vmem:[#allocation8_spill] sm:$0xff] %v18596_v33  ;;  %19561 = vst [vmem:[#allocation3_spill] sm:$0xff] %v18600_v63  ;;  %v18616_v19 = vadd.f32 %v18376_v6, %v19564_v46  ;;  %v19566_v33 = vld [vmem:[#allocation19_spill] sm:$0xff]  ;;  %v19567_v63 = vld [vmem:[#allocation21_spill] sm:$0xff]  ;;  %v18636_v46 = vadd.f32 %v18376_v6, %v18380_v45  ;;  %v18656_v45 = vadd.f32 %v18376_v6, %v18400_v35  ;;  %v18676_v35 = vmax.f32 %v18424_v12, 0.0 }
 0x534   : > { %19562 = vst [vmem:[#allocation9_spill] sm:$0xff] %v18604_v53  ;;  %19563 = vst [vmem:[#allocation11_spill] sm:$0xff] %v18608_v28  ;;  %v18620_v54 = vadd.f32 %v18376_v6, %v19566_v33  ;;  %v18624_v24 = vadd.f32 %v18376_v6, %v19567_v63  ;;  %v19568_v53 = vld [vmem:[#allocation18_spill] sm:$0xff]  ;;  %v19569_v28 = vld [vmem:[#allocation20_spill] sm:$0xff]  ;;  %v18644_v63 = vadd.f32 %v18376_v6, %v18388_v41  ;;  %v18700_v12 = vmax.f32 %v18456_v25, 0.0 }
 0x535   : > { %19565 = vst [vmem:[#allocation5_spill] sm:$0xff] %v18616_v19  ;;  %v18628_v30 = vadd.f32 %v18376_v6, %v19568_v53  ;;  %v18632_v21 = vadd.f32 %v18376_v6, %v19569_v28  ;;  %v19570_v19 = vld [vmem:[#allocation22_spill] sm:$0xff]  ;;  %v18648_v53 = vadd.f32 %v18376_v6, %v18392_v18  ;;  %v18652_v28 = vadd.f32 %v18376_v6, %v18396_v36 }
 0x536   : > { %v18640_v33 = vadd.f32 %v18376_v6, %v19570_v19  ;;  %19571 = vst [vmem:[#allocation10_spill] sm:$0xff] %v18644_v63  ;;  %19572 = vst [vmem:[#allocation6_spill] sm:$0xff] %v18656_v45  ;;  %v18660_v19 = vadd.f32 %v18376_v6, %v18404_v60  ;;  %v18664_v41 = vadd.f32 %v18376_v6, %v18408_v27  ;;  %v18667_v63 = vmax.f32 %v18412_v40, 0.0 }
 0x537   : > { %v18670_v18 = vmax.f32 %v18416_v59, 0.0  ;;  %v18673_v36 = vmax.f32 %v18420_v23, 0.0  ;;  %19576 = vst [vmem:[#allocation15_spill] sm:$0xff] %v18676_v35  ;;  %v18679_v45 = vmax.f32 %v18428_v42, 0.0  ;;  %v18682_v60 = vmax.f32 %v18432_v29, 0.0 }
 0x538   : > { %19573 = vst [vmem:[#allocation13_spill] sm:$0xff] %v18667_v63  ;;  %v18685_v6 = vmax.f32 %v18436_v37, 0.0  ;;  %v18688_v27 = vmax.f32 %v18440_v11, 0.0  ;;  %v18691_v40 = vmax.f32 %v18444_v7, 0.0  ;;  %v18694_v59 = vmax.f32 %v18448_v52, 0.0 }
 0x539   : > { %19574 = vst [vmem:[#allocation7_spill] sm:$0xff] %v18670_v18  ;;  %19575 = vst [vmem:[#allocation12_spill] sm:$0xff] %v18673_v36  ;;  %v18697_v23 = vmax.f32 %v18452_v47, 0.0  ;;  %v18703_v42 = vmax.f32 %v18460_v10, 0.0  ;;  %v18706_v29 = vmax.f32 %v18464_v43, 0.0  ;;  %v18709_v37 = vmax.f32 %v18468_v0, 0.0 }
 0x53a   : > { %19577 = vst [vmem:[#allocation17_spill] sm:$0xff] %v18679_v45  ;;  %19578 = vst [vmem:[#allocation23_spill] sm:$0xff] %v18682_v60  ;;  %v18712_v11 = vmax.f32 %v18472_v39, 0.0  ;;  %v18715_v7 = vmax.f32 %v18476_v15, 0.0  ;;  %v18718_v52 = vmax.f32 %v18480_v49, 0.0  ;;  %v18721_v47 = vmax.f32 %v18484_v9, 0.0 }
 0x53b   : > { %19579 = vst [vmem:[#allocation24_spill] sm:$0xff] %v18685_v6  ;;  %v18724_v25 = vmax.f32 %v18488_v34, 0.0  ;;  %v18727_v10 = vmax.f32 %v18492_v57, 0.0  ;;  %v18730_v43 = vmax.f32 %v18496_v51, 0.0  ;;  %v18733_v0 = vmax.f32 %v18500_v8, 0.0 }
 0x53c   : > { %19580 = vst [vmem:[#allocation25_spill] sm:$0xff] %v18718_v52  ;;  %v18736_v39 = vmax.f32 %v18504_v5, 0.0  ;;  %v18739_v15 = vmax.f32 %v18508_v31, 0.0  ;;  %v18742_v49 = vmax.f32 %v18512_v56, 0.0  ;;  %v18745_v9 = vmax.f32 %v18516_v38, 0.0 }
 0x53d   : > { %v18748_v34 = vmax.f32 %v18520_v48, 0.0  ;;  %v18751_v57 = vmax.f32 %v18524_v14, 0.0  ;;  %v18754_v51 = vmax.f32 %v18528_v61, 0.0  ;;  %v18757_v8 = vmax.f32 %v18532_v2, 0.0 }
 0x53e   : > { %v18760_v5 = vmax.f32 %v18536_v58, 0.0  ;;  %v18763_v31 = vmax.f32 %v18540_v17, 0.0  ;;  %v18766_v56 = vmax.f32 %v18544_v50, 0.0  ;;  %v18769_v38 = vmax.f32 %v18548_v62, 0.0 }
 0x53f   : > { %v18772_v48 = vmax.f32 %v18552_v16, 0.0  ;;  %v18775_v14 = vmax.f32 %v18556_v55, 0.0  ;;  %v18778_v61 = vmax.f32 %v18560_v3, 0.0  ;;  %v18781_v2 = vmax.f32 %v18564_v4, 0.0  ;;  %v19587_v3 = vld [vmem:[#allocation4_spill] sm:$0xff] }
 0x540   : > { %v18784_v58 = vmax.f32 %v18568_v13, 0.0  ;;  %v18787_v17 = vmax.f32 %v18572_v26, 0.0  ;;  %v18790_v50 = vmax.f32 %v18576_v22, 0.0  ;;  %v18793_v62 = vmax.f32 %v18580_v32, 0.0  ;;  %v19589_v13 = vld [vmem:[#allocation8_spill] sm:$0xff]  ;;  %v19591_v26 = vld [vmem:[#allocation3_spill] sm:$0xff] }
 0x541   : > { %19581 = vst [vmem:[#allocation26_spill] sm:$0xff] %v18772_v48  ;;  %v18796_v16 = vmax.f32 %v18584_v20, 0.0  ;;  %v18799_v55 = vmax.f32 %v18588_v44, 0.0  ;;  %v18802_v4 = vmax.f32 %v19587_v3, 0.0  ;;  %v19593_v22 = vld [vmem:[#allocation9_spill] sm:$0xff]  ;;  %v19595_v32 = vld [vmem:[#allocation11_spill] sm:$0xff] }
 0x542   : > { %19582 = vst [vmem:[#allocation27_spill] sm:$0xff] %v18784_v58  ;;  %19583 = vst [vmem:[#allocation14_spill] sm:$0xff] %v18787_v17  ;;  %v18805_v58 = vmax.f32 %v19589_v13, 0.0  ;;  %v18808_v17 = vmax.f32 %v19591_v26, 0.0  ;;  %v18817_v20 = vmax.f32 %v18612_v1, 0.0  ;;  %v19598_v44 = vld [vmem:[#allocation5_spill] sm:$0xff] }
 0x543   : > { %19584 = vst [vmem:[#allocation16_spill] sm:$0xff] %v18790_v50  ;;  %19585 = vst [vmem:[#allocation19_spill] sm:$0xff] %v18793_v62  ;;  %v18811_v50 = vmax.f32 %v19593_v22, 0.0  ;;  %v18814_v62 = vmax.f32 %v19595_v32, 0.0  ;;  %v18823_v3 = vmax.f32 %v18620_v54, 0.0  ;;  %v18826_v13 = vmax.f32 %v18624_v24, 0.0 }
 0x544   : > { %19586 = vst [vmem:[#allocation21_spill] sm:$0xff] %v18799_v55  ;;  %19588 = vst [vmem:[#allocation18_spill] sm:$0xff] %v18802_v4  ;;  %v18820_v55 = vmax.f32 %v19598_v44, 0.0  ;;  %v18829_v26 = vmax.f32 %v18628_v30, 0.0  ;;  %v18832_v22 = vmax.f32 %v18632_v21, 0.0  ;;  %v18835_v32 = vmax.f32 %v18636_v46, 0.0 }
 0x545   : > { %19590 = vst [vmem:[#allocation20_spill] sm:$0xff] %v18805_v58  ;;  %19592 = vst [vmem:[#allocation22_spill] sm:$0xff] %v18808_v17  ;;  %v18838_v1 = vmax.f32 %v18640_v33, 0.0  ;;  %v19606_v44 = vld [vmem:[#allocation10_spill] sm:$0xff]  ;;  %v18844_v54 = vmax.f32 %v18648_v53, 0.0  ;;  %v18847_v24 = vmax.f32 %v18652_v28, 0.0  ;;  %v12750_v33 = vpack.c.bf16 (!%p12618_p5), %v18667_v63, %v18667_v63 }
 0x546   : > { %19594 = vst [vmem:[#allocation4_spill] sm:$0xff] %v18811_v50  ;;  %19596 = vst [vmem:[#allocation8_spill] sm:$0xff] %v18814_v62  ;;  %v19610_v30 = vld [vmem:[#allocation6_spill] sm:$0xff]  ;;  %v18853_v21 = vmax.f32 %v18660_v19, 0.0  ;;  %v18856_v46 = vmax.f32 %v18664_v41, 0.0  ;;  %v12751_v53 = vpack.c.bf16 (!%p12618_p5), %v18670_v18, %v18670_v18  ;;  %v12752_v28 = vpack.c.bf16 (!%p12618_p5), %v18673_v36, %v18673_v36 }
 0x547   : > { %19597 = vst [vmem:[#allocation3_spill] sm:$0xff] %v18817_v20  ;;  %19599 = vst [vmem:[#allocation9_spill] sm:$0xff] %v18820_v55  ;;  %v18841_v55 = vmax.f32 %v19606_v44, 0.0  ;;  %10592 = sbr.rel (%p12618_p5) target bundleno = 1478 (0x5c6), region = 44  ;;  %v10789_v19 = vshrl.u32 (!%p12618_p5), %v12750_v33, 16  ;;  %v10792_v41 = vshll.u32 (!%p12618_p5), %v12750_v33, 16  ;;  %v12754_v18 = vpack.c.bf16 (!%p12618_p5), %v18679_v45, %v18679_v45 }
 0x548   : > { %19600 = vst [vmem:[#allocation11_spill] sm:$0xff] %v18823_v3  ;;  %19601 = vst [vmem:[#allocation5_spill] sm:$0xff] %v18826_v13  ;;  %v10797_v44 = vshrl.u32 (!%p12618_p5), %v12751_v53, 16  ;;  %v10806_v63 = vshrl.u32 (!%p12618_p5), %v12752_v28, 16  ;;  %v11440_v20 = vld [vmem:[#allocation2 + $0x18] sm:$0xf] (!%p12618_p5) }
 0x549   : > { %19602 = vst [vmem:[#allocation28_spill] sm:$0xff] %v18829_v26  ;;  %19603 = vst [vmem:[#allocation29_spill] sm:$0xff] %v18832_v22  ;;  %v18850_v26 = vmax.f32 %v19610_v30, 0.0  ;;  %v10800_v30 = vshll.u32 (!%p12618_p5), %v12751_v53, 16  ;;  %v12755_v53 = vpack.c.bf16 (!%p12618_p5), %v18682_v60, %v18682_v60  ;;  %v10826_v4 = vshll.u32 (!%p12618_p5), %v12754_v18, 16 }
 0x54a   : > { %19604 = vst [vmem:[#allocation30_spill] sm:$0xff] %v18835_v32  ;;  %19605 = vst [vmem:[#allocation31_spill] sm:$0xff] %v18838_v1  ;;  %v10799_v33 = vrot.slane (!%p12618_p5), %v10797_v44, 7  ;;  %v10808_v45 = vrot.slane (!%p12618_p5), %v10806_v63, 7  ;;  %v10823_v32 = vshrl.u32 (!%p12618_p5), %v12754_v18, 16 }
 0x54b   : > { %19607 = vst [vmem:[#allocation10_spill] sm:$0xff] %v18841_v55  ;;  %19608 = vst [vmem:[#allocation32_spill] sm:$0xff] %v18844_v54  ;;  %v11431_v54 = vld [vmem:[#allocation2 + $0xc] sm:$0xf] (!%p12618_p5) }
 0x54c   : > { %19609 = vst [vmem:[#allocation33_spill] sm:$0xff] %v18847_v24  ;;  %19611 = vst [vmem:[#allocation6_spill] sm:$0xff] %v18850_v26  ;;  %v12753_v26 = vpack.c.bf16 (!%p12618_p5), %v18676_v35, %v18676_v35  ;;  %v10791_v24 = vrot.slane (!%p12618_p5), %v10789_v19, 7  ;;  %v11437_v19 = vld [vmem:[#allocation2 + $0x14] sm:$0x1] (!%p12618_p5)  ;;  %v10802_v44 = vor.u32 (!%p12618_p5), %v10800_v30, %v10799_v33  ;;  %v10804_v3 = vrot.slane (!%p12618_p5), %v10799_v33, 4 }
 0x54d   : > { %19612 = vst [vmem:[#allocation34_spill] sm:$0xff] %v18853_v21  ;;  %19613 = vst [vmem:[#allocation35_spill] sm:$0xff] %v18856_v46  ;;  %v10809_v21 = vshll.u32 (!%p12618_p5), %v12752_v28, 16  ;;  %v12756_v28 = vpack.c.bf16 (!%p12618_p5), %v18685_v6, %v18685_v6  ;;  %v10812_v62 = vrot.slane (!%p12618_p5), %v10808_v45, 4  ;;  %v10825_v6 = vrot.slane (!%p12618_p5), %v10823_v32, 7 }
 0x54e   : > { %v10814_v55 = vshrl.u32 %v12753_v26, 16  ;;  %v10817_v1 = vshll.u32 %v12753_v26, 16  ;;  %v10794_v22 = vor.u32 %v10792_v41, %v10791_v24  ;;  %v10795_v13 = vrot.slane %v10791_v24, 4  ;;  %v11444_v26 = vld [vmem:[#allocation2 + $0x20] sm:$0x1] }
 0x54f   : > { %v10811_v60 = vor.u32 %v10809_v21, %v10808_v45  ;;  %v11438_v63 = vsel %vm18884_vm6, %v10804_v3, %v11437_v19  ;;  %v11447_v32 = vld [vmem:[#allocation2 + $0x24] sm:$0xf]  ;;  %v10829_v21 = vrot.slane %v10825_v6, 4  ;;  %v10834_v41 = vshll.u32 %v12755_v53, 16 }
 0x550   : > { %v10816_v50 = vrot.slane %v10814_v55, 7  ;;  %v11432_v17 = vsel %vm18865_vm4, %v10794_v22, %v11431_v54  ;;  %v10803_v58 = vsel %vm18874_vm5, %v10795_v13, %v10802_v44  ;;  %11439 = vst [vmem:[#allocation2 + $0x14] sm:$0x1] %v11438_v63  ;;  %v10828_v22 = vor.u32 %v10826_v4, %v10825_v6 }
 0x551   : > { %11433 = vst [vmem:[#allocation2 + $0xc] sm:$0xf] %v11432_v17  ;;  %11434 = vst [vmem:[#allocation2 + $0x10] sm:$0xf] %v10803_v58  ;;  %v11441_v24 = vsel %vm18865_vm4, %v10811_v60, %v11440_v20  ;;  %v10831_v54 = vshrl.u32 %v12755_v53, 16  ;;  %v10840_v13 = vshrl.u32 %v12756_v28, 16  ;;  %v12757_v17 = vpack.c.bf16 %v18688_v27, %v18688_v27 }
 0x552   : > { %v10819_v45 = vor.u32 %v10817_v1, %v10816_v50  ;;  %v10821_v55 = vrot.slane %v10816_v50, 4  ;;  %11442 = vst [vmem:[#allocation2 + $0x18] sm:$0xf] %v11441_v24  ;;  %v10843_v58 = vshll.u32 %v12756_v28, 16  ;;  %v11448_v60 = vsel %vm18865_vm4, %v10828_v22, %v11447_v32  ;;  %v11451_v20 = vld [vmem:[#allocation2 + $0x2c] sm:$0x1] }
 0x553   : > { %v10833_v50 = vrot.slane %v10831_v54, 7  ;;  %v10842_v6 = vrot.slane %v10840_v13, 7  ;;  %v12758_v4 = vpack.c.bf16 %v18691_v40, %v18691_v40  ;;  %11449 = vst [vmem:[#allocation2 + $0x24] sm:$0xf] %v11448_v60  ;;  %v10848_v1 = vshrl.u32 %v12757_v17, 16 }
 0x554   : > { %v10820_v3 = vsel %vm18874_vm5, %v10812_v62, %v10819_v45  ;;  %v11445_v18 = vsel %vm18884_vm6, %v10821_v55, %v11444_v26  ;;  %v11454_v62 = vld [vmem:[#allocation2 + $0x30] sm:$0xf]  ;;  %v10851_v30 = vshll.u32 %v12757_v17, 16  ;;  %v12759_v33 = vpack.c.bf16 %v18694_v59, %v18694_v59  ;;  %v11458_v13 = vld [vmem:[#allocation2 + $0x38] sm:$0x1] }
 0x555   : > { %11443 = vst [vmem:[#allocation2 + $0x1c] sm:$0xf] %v10820_v3  ;;  %11446 = vst [vmem:[#allocation2 + $0x20] sm:$0x1] %v11445_v18  ;;  %v12760_v53 = vpack.c.bf16 %v18697_v23, %v18697_v23  ;;  %v10836_v28 = vor.u32 %v10834_v41, %v10833_v50  ;;  %v10838_v19 = vrot.slane %v10833_v50, 4  ;;  %v10845_v44 = vor.u32 %v10843_v58, %v10842_v6 }
 0x556   : > { %v10846_v63 = vrot.slane %v10842_v6, 4  ;;  %v10850_v26 = vrot.slane %v10848_v1, 7  ;;  %v10857_v24 = vshrl.u32 %v12758_v4, 16  ;;  %v10860_v45 = vshll.u32 %v12758_v4, 16  ;;  %v11461_v60 = vld [vmem:[#allocation2 + $0x3c] sm:$0xf] }
 0x557   : > { %v10865_v55 = vshrl.u32 %v12759_v33, 16  ;;  %v10837_v32 = vsel %vm18874_vm5, %v10829_v21, %v10836_v28  ;;  %v11452_v22 = vsel %vm18884_vm6, %v10838_v19, %v11451_v20  ;;  %v11455_v54 = vsel %vm18865_vm4, %v10845_v44, %v11454_v62 }
 0x558   : > { %v10868_v3 = vshll.u32 %v12759_v33, 16  ;;  %11450 = vst [vmem:[#allocation2 + $0x28] sm:$0xf] %v10837_v32  ;;  %11453 = vst [vmem:[#allocation2 + $0x2c] sm:$0x1] %v11452_v22  ;;  %v10853_v41 = vor.u32 %v10851_v30, %v10850_v26  ;;  %v10855_v18 = vrot.slane %v10850_v26, 4  ;;  %v12761_v21 = vpack.c.bf16 %v18700_v12, %v18700_v12 }
 0x559   : > { %11456 = vst [vmem:[#allocation2 + $0x30] sm:$0xf] %v11455_v54  ;;  %v10859_v58 = vrot.slane %v10857_v24, 7  ;;  %v10867_v17 = vrot.slane %v10865_v55, 7  ;;  %v10874_v50 = vshrl.u32 %v12760_v53, 16  ;;  %v10877_v6 = vshll.u32 %v12760_v53, 16 }
 0x55a   : > { %v12762_v4 = vpack.c.bf16 %v18703_v42, %v18703_v42  ;;  %v10854_v20 = vsel %vm18874_vm5, %v10846_v63, %v10853_v41  ;;  %v11459_v62 = vsel %vm18884_vm6, %v10855_v18, %v11458_v13  ;;  %v11465_v33 = vld [vmem:[#allocation2 + $0x44] sm:$0x1]  ;;  %v10882_v44 = vshrl.u32 %v12761_v21, 16  ;;  %v11468_v24 = vld [vmem:[#allocation2 + $0x48] sm:$0xf] }
 0x55b   : > { %v10862_v1 = vor.u32 %v10860_v45, %v10859_v58  ;;  %v10863_v30 = vrot.slane %v10859_v58, 4  ;;  %11457 = vst [vmem:[#allocation2 + $0x34] sm:$0xf] %v10854_v20  ;;  %11460 = vst [vmem:[#allocation2 + $0x38] sm:$0x1] %v11459_v62  ;;  %v10870_v28 = vor.u32 %v10868_v3, %v10867_v17  ;;  %v10872_v19 = vrot.slane %v10867_v17, 4 }
 0x55c   : > { %v10876_v53 = vrot.slane %v10874_v50, 7  ;;  %v10885_v55 = vshll.u32 %v12761_v21, 16  ;;  %v10891_v32 = vshrl.u32 %v12762_v4, 16  ;;  %v10894_v22 = vshll.u32 %v12762_v4, 16  ;;  %v11475_v50 = vld [vmem:[#allocation2 + $0x54] sm:$0xf] }
 0x55d   : > { %v11462_v26 = vsel %vm18865_vm4, %v10862_v1, %v11461_v60  ;;  %v10871_v63 = vsel %vm18874_vm5, %v10863_v30, %v10870_v28  ;;  %v11466_v45 = vsel %vm18884_vm6, %v10872_v19, %v11465_v33  ;;  %v10884_v3 = vrot.slane %v10882_v44, 7  ;;  %v11472_v60 = vld [vmem:[#allocation2 + $0x50] sm:$0x1] }
 0x55e   : > { %11463 = vst [vmem:[#allocation2 + $0x3c] sm:$0xf] %v11462_v26  ;;  %v10879_v54 = vor.u32 %v10877_v6, %v10876_v53  ;;  %v10880_v13 = vrot.slane %v10876_v53, 4  ;;  %11464 = vst [vmem:[#allocation2 + $0x40] sm:$0xf] %v10871_v63  ;;  %v10893_v41 = vrot.slane %v10891_v32, 7  ;;  %v12763_v18 = vpack.c.bf16 %v18706_v29, %v18706_v29 }
 0x55f   : > { %11467 = vst [vmem:[#allocation2 + $0x44] sm:$0x1] %v11466_v45  ;;  %v12764_v58 = vpack.c.bf16 %v18709_v37, %v18709_v37  ;;  %v12765_v21 = vpack.c.bf16 %v18712_v11, %v18712_v11  ;;  %v12766_v6 = vpack.c.bf16 %v18715_v7, %v18715_v7  ;;  %v12767_v4 = vpack.c.bf16 %v18718_v52, %v18718_v52  ;;  %v11486_v52 = vld [vmem:[#allocation2 + $0x68] sm:$0x1] }
 0x560   : > { %v11469_v17 = vsel %vm18865_vm4, %v10879_v54, %v11468_v24  ;;  %v10887_v20 = vor.u32 %v10885_v55, %v10884_v3  ;;  %v10889_v62 = vrot.slane %v10884_v3, 4  ;;  %v10896_v1 = vor.u32 %v10894_v22, %v10893_v41  ;;  %v11479_v22 = vld [vmem:[#allocation2 + $0x5c] sm:$0x1]  ;;  %v11482_v3 = vld [vmem:[#allocation2 + $0x60] sm:$0xf] }
 0x561   : > { %11470 = vst [vmem:[#allocation2 + $0x48] sm:$0xf] %v11469_v17  ;;  %v10897_v30 = vrot.slane %v10893_v41, 4  ;;  %v10899_v33 = vshrl.u32 %v12763_v18, 16  ;;  %v10902_v28 = vshll.u32 %v12763_v18, 16  ;;  %v10908_v19 = vshrl.u32 %v12764_v58, 16 }
 0x562   : > { %v10911_v53 = vshll.u32 %v12764_v58, 16  ;;  %v10888_v44 = vsel %vm18874_vm5, %v10880_v13, %v10887_v20  ;;  %v11473_v26 = vsel %vm18884_vm6, %v10889_v62, %v11472_v60  ;;  %v11476_v24 = vsel %vm18865_vm4, %v10896_v1, %v11475_v50 }
 0x563   : > { %v10916_v32 = vshrl.u32 %v12765_v21, 16  ;;  %11471 = vst [vmem:[#allocation2 + $0x4c] sm:$0xf] %v10888_v44  ;;  %11474 = vst [vmem:[#allocation2 + $0x50] sm:$0x1] %v11473_v26  ;;  %v10901_v55 = vrot.slane %v10899_v33, 7 }
 0x564   : > { %11477 = vst [vmem:[#allocation2 + $0x54] sm:$0xf] %v11476_v24  ;;  %v10910_v63 = vrot.slane %v10908_v19, 7  ;;  %v10919_v45 = vshll.u32 %v12765_v21, 16  ;;  %v10925_v54 = vshrl.u32 %v12766_v6, 16  ;;  %v10928_v18 = vshll.u32 %v12766_v6, 16 }
 0x565   : > { %v10918_v41 = vrot.slane %v10916_v32, 7  ;;  %v10933_v58 = vshrl.u32 %v12767_v4, 16  ;;  %v10936_v13 = vshll.u32 %v12767_v4, 16  ;;  %v10904_v17 = vor.u32 %v10902_v28, %v10901_v55  ;;  %v11489_v19 = vld [vmem:[#allocation2 + $0x6c] sm:$0xf] }
 0x566   : > { %v10906_v20 = vrot.slane %v10901_v55, 4  ;;  %v10913_v60 = vor.u32 %v10911_v53, %v10910_v63  ;;  %v10914_v62 = vrot.slane %v10910_v63, 4  ;;  %v10927_v44 = vrot.slane %v10925_v54, 7  ;;  %v11493_v32 = vld [vmem:[#allocation2 + $0x74] sm:$0x1] }
 0x567   : > { %v10921_v50 = vor.u32 %v10919_v45, %v10918_v41  ;;  %v10923_v1 = vrot.slane %v10918_v41, 4  ;;  %v10935_v26 = vrot.slane %v10933_v58, 7  ;;  %v10905_v33 = vsel %vm18874_vm5, %v10897_v30, %v10904_v17 }
 0x568   : > { %v11480_v21 = vsel %vm18884_vm6, %v10906_v20, %v11479_v22  ;;  %v11483_v6 = vsel %vm18865_vm4, %v10913_v60, %v11482_v3  ;;  %v12768_v4 = vpack.c.bf16 %v18721_v47, %v18721_v47  ;;  %11478 = vst [vmem:[#allocation2 + $0x58] sm:$0xf] %v10905_v33  ;;  %v10930_v30 = vor.u32 %v10928_v18, %v10927_v44  ;;  %v11496_v20 = vld [vmem:[#allocation2 + $0x78] sm:$0xf] }
 0x569   : > { %11481 = vst [vmem:[#allocation2 + $0x5c] sm:$0x1] %v11480_v21  ;;  %11484 = vst [vmem:[#allocation2 + $0x60] sm:$0xf] %v11483_v6  ;;  %v10922_v28 = vsel %vm18874_vm5, %v10914_v62, %v10921_v50  ;;  %v11487_v53 = vsel %vm18884_vm6, %v10923_v1, %v11486_v52  ;;  %v10931_v24 = vrot.slane %v10927_v44, 4  ;;  %v10938_v55 = vor.u32 %v10936_v13, %v10935_v26 }
 0x56a   : > { %11485 = vst [vmem:[#allocation2 + $0x64] sm:$0xf] %v10922_v28  ;;  %11488 = vst [vmem:[#allocation2 + $0x68] sm:$0x1] %v11487_v53  ;;  %v10940_v22 = vrot.slane %v10935_v26, 4  ;;  %v10942_v63 = vshrl.u32 %v12768_v4, 16  ;;  %v11490_v54 = vsel %vm18865_vm4, %v10930_v30, %v11489_v19  ;;  %v12769_v3 = vpack.c.bf16 %v18724_v25, %v18724_v25 }
 0x56b   : > { %v10945_v45 = vshll.u32 %v12768_v4, 16  ;;  %v12770_v41 = vpack.c.bf16 %v18727_v10, %v18727_v10  ;;  %v12771_v52 = vpack.c.bf16 %v18730_v43, %v18730_v43  ;;  %11491 = vst [vmem:[#allocation2 + $0x6c] sm:$0xf] %v11490_v54  ;;  %v10939_v18 = vsel %vm18874_vm5, %v10931_v24, %v10938_v55  ;;  %v11500_v30 = vld [vmem:[#allocation2 + $0x80] sm:$0x1] }
 0x56c   : > { %v11494_v58 = vsel %vm18884_vm6, %v10940_v22, %v11493_v32  ;;  %v10944_v13 = vrot.slane %v10942_v63, 7  ;;  %v12772_v17 = vpack.c.bf16 %v18733_v0, %v18733_v0  ;;  %11492 = vst [vmem:[#allocation2 + $0x70] sm:$0xf] %v10939_v18  ;;  %v10950_v60 = vshrl.u32 %v12769_v3, 16  ;;  %v11503_v24 = vld [vmem:[#allocation2 + $0x84] sm:$0xf] }
 0x56d   : > { %11495 = vst [vmem:[#allocation2 + $0x74] sm:$0x1] %v11494_v58  ;;  %v10953_v62 = vshll.u32 %v12769_v3, 16  ;;  %v10959_v50 = vshrl.u32 %v12770_v41, 16  ;;  %v10962_v1 = vshll.u32 %v12770_v41, 16  ;;  %v10967_v33 = vshrl.u32 %v12771_v52, 16 }
 0x56e   : > { %v10947_v44 = vor.u32 %v10945_v45, %v10944_v13  ;;  %v10948_v26 = vrot.slane %v10944_v13, 4  ;;  %v10970_v21 = vshll.u32 %v12771_v52, 16  ;;  %v10952_v6 = vrot.slane %v10950_v60, 7  ;;  %v11507_v41 = vld [vmem:[#allocation2 + $0x8c] sm:$0x1] }
 0x56f   : > { %v10961_v19 = vrot.slane %v10959_v50, 7  ;;  %v10976_v4 = vshrl.u32 %v12772_v17, 16  ;;  %v10979_v28 = vshll.u32 %v12772_v17, 16  ;;  %v10969_v32 = vrot.slane %v10967_v33, 7  ;;  %v11510_v50 = vld [vmem:[#allocation2 + $0x90] sm:$0xf] }
 0x570   : > { %v11497_v53 = vsel %vm18865_vm4, %v10947_v44, %v11496_v20  ;;  %v12773_v55 = vpack.c.bf16 %v18736_v39, %v18736_v39  ;;  %v12774_v22 = vpack.c.bf16 %v18739_v15, %v18739_v15  ;;  %v10955_v63 = vor.u32 %v10953_v62, %v10952_v6 }
 0x571   : > { %11498 = vst [vmem:[#allocation2 + $0x78] sm:$0xf] %v11497_v53  ;;  %v10957_v45 = vrot.slane %v10952_v6, 4  ;;  %v10964_v54 = vor.u32 %v10962_v1, %v10961_v19  ;;  %v10965_v3 = vrot.slane %v10961_v19, 4  ;;  %v10972_v52 = vor.u32 %v10970_v21, %v10969_v32 }
 0x572   : > { %v10974_v18 = vrot.slane %v10969_v32, 4  ;;  %v10978_v58 = vrot.slane %v10976_v4, 7  ;;  %v10984_v13 = vshrl.u32 %v12773_v55, 16  ;;  %v10956_v17 = vsel %vm18874_vm5, %v10948_v26, %v10955_v63 }
 0x573   : > { %v11501_v20 = vsel %vm18884_vm6, %v10957_v45, %v11500_v30  ;;  %v11504_v60 = vsel %vm18865_vm4, %v10964_v54, %v11503_v24  ;;  %v10987_v44 = vshll.u32 %v12773_v55, 16  ;;  %11499 = vst [vmem:[#allocation2 + $0x7c] sm:$0xf] %v10956_v17  ;;  %v10973_v62 = vsel %vm18874_vm5, %v10965_v3, %v10972_v52  ;;  %v11514_v30 = vld [vmem:[#allocation2 + $0x98] sm:$0x1] }
 0x574   : > { %11502 = vst [vmem:[#allocation2 + $0x80] sm:$0x1] %v11501_v20  ;;  %11505 = vst [vmem:[#allocation2 + $0x84] sm:$0xf] %v11504_v60  ;;  %v11508_v1 = vsel %vm18884_vm6, %v10974_v18, %v11507_v41  ;;  %v10981_v33 = vor.u32 %v10979_v28, %v10978_v58  ;;  %v10982_v21 = vrot.slane %v10978_v58, 4  ;;  %v10986_v26 = vrot.slane %v10984_v13, 7 }
 0x575   : > { %11506 = vst [vmem:[#allocation2 + $0x88] sm:$0xf] %v10973_v62  ;;  %11509 = vst [vmem:[#allocation2 + $0x8c] sm:$0x1] %v11508_v1  ;;  %v10993_v6 = vshrl.u32 %v12774_v22, 16  ;;  %v10996_v19 = vshll.u32 %v12774_v22, 16  ;;  %v12775_v4 = vpack.c.bf16 %v18742_v49, %v18742_v49  ;;  %v12776_v24 = vpack.c.bf16 %v18745_v9, %v18745_v9 }
 0x576   : > { %v11511_v53 = vsel %vm18865_vm4, %v10981_v33, %v11510_v50  ;;  %v12777_v32 = vpack.c.bf16 %v18748_v34, %v18748_v34  ;;  %v12778_v28 = vpack.c.bf16 %v18751_v57, %v18751_v57  ;;  %v10989_v55 = vor.u32 %v10987_v44, %v10986_v26  ;;  %v11517_v54 = vld [vmem:[#allocation2 + $0x9c] sm:$0xf]  ;;  %v11521_v33 = vld [vmem:[#allocation2 + $0xa4] sm:$0x1] }
 0x577   : > { %11512 = vst [vmem:[#allocation2 + $0x90] sm:$0xf] %v11511_v53  ;;  %v10991_v63 = vrot.slane %v10986_v26, 4  ;;  %v10995_v22 = vrot.slane %v10993_v6, 7  ;;  %v11001_v45 = vshrl.u32 %v12775_v4, 16  ;;  %v11004_v3 = vshll.u32 %v12775_v4, 16 }
 0x578   : > { %v11010_v41 = vshrl.u32 %v12776_v24, 16  ;;  %v11013_v52 = vshll.u32 %v12776_v24, 16  ;;  %v11018_v18 = vshrl.u32 %v12777_v32, 16  ;;  %v10990_v58 = vsel %vm18874_vm5, %v10982_v21, %v10989_v55  ;;  %v11524_v26 = vld [vmem:[#allocation2 + $0xa8] sm:$0xf] }
 0x579   : > { %v11515_v13 = vsel %vm18884_vm6, %v10991_v63, %v11514_v30  ;;  %v10998_v17 = vor.u32 %v10996_v19, %v10995_v22  ;;  %v10999_v20 = vrot.slane %v10995_v22, 4  ;;  %11513 = vst [vmem:[#allocation2 + $0x94] sm:$0xf] %v10990_v58  ;;  %v11003_v60 = vrot.slane %v11001_v45, 7  ;;  %v11528_v55 = vld [vmem:[#allocation2 + $0xb0] sm:$0x1] }
 0x57a   : > { %11516 = vst [vmem:[#allocation2 + $0x98] sm:$0x1] %v11515_v13  ;;  %v11012_v50 = vrot.slane %v11010_v41, 7  ;;  %v11020_v44 = vrot.slane %v11018_v18, 7  ;;  %v11021_v62 = vshll.u32 %v12777_v32, 16  ;;  %v11027_v6 = vshrl.u32 %v12778_v28, 16 }
 0x57b   : > { %v11518_v1 = vsel %vm18865_vm4, %v10998_v17, %v11517_v54  ;;  %v11030_v4 = vshll.u32 %v12778_v28, 16  ;;  %v12779_v21 = vpack.c.bf16 %v18754_v51, %v18754_v51  ;;  %v11006_v53 = vor.u32 %v11004_v3, %v11003_v60  ;;  %v11531_v18 = vld [vmem:[#allocation2 + $0xb4] sm:$0xf] }
 0x57c   : > { %11519 = vst [vmem:[#allocation2 + $0x9c] sm:$0xf] %v11518_v1  ;;  %v11008_v19 = vrot.slane %v11003_v60, 4  ;;  %v11015_v30 = vor.u32 %v11013_v52, %v11012_v50  ;;  %v11016_v24 = vrot.slane %v11012_v50, 4  ;;  %v11023_v63 = vor.u32 %v11021_v62, %v11020_v44  ;;  %v11535_v1 = vld [vmem:[#allocation2 + $0xbc] sm:$0x1] }
 0x57d   : > { %v11025_v22 = vrot.slane %v11020_v44, 4  ;;  %v11029_v45 = vrot.slane %v11027_v6, 7  ;;  %v11035_v32 = vshrl.u32 %v12779_v21, 16  ;;  %v11007_v54 = vsel %vm18874_vm5, %v10999_v20, %v11006_v53 }
 0x57e   : > { %v11522_v41 = vsel %vm18884_vm6, %v11008_v19, %v11521_v33  ;;  %v11525_v28 = vsel %vm18865_vm4, %v11015_v30, %v11524_v26  ;;  %v11038_v58 = vshll.u32 %v12779_v21, 16  ;;  %11520 = vst [vmem:[#allocation2 + $0xa0] sm:$0xf] %v11007_v54  ;;  %v11024_v3 = vsel %vm18874_vm5, %v11016_v24, %v11023_v63  ;;  %v11538_v54 = vld [vmem:[#allocation2 + $0xc0] sm:$0xf] }
 0x57f   : > { %11523 = vst [vmem:[#allocation2 + $0xa4] sm:$0x1] %v11522_v41  ;;  %11526 = vst [vmem:[#allocation2 + $0xa8] sm:$0xf] %v11525_v28  ;;  %v11529_v52 = vsel %vm18884_vm6, %v11025_v22, %v11528_v55  ;;  %v11032_v13 = vor.u32 %v11030_v4, %v11029_v45  ;;  %v11033_v17 = vrot.slane %v11029_v45, 4  ;;  %v11037_v20 = vrot.slane %v11035_v32, 7 }
 0x580   : > { %11527 = vst [vmem:[#allocation2 + $0xac] sm:$0xf] %v11024_v3  ;;  %11530 = vst [vmem:[#allocation2 + $0xb0] sm:$0x1] %v11529_v52  ;;  %v12780_v60 = vpack.c.bf16 %v18757_v8, %v18757_v8  ;;  %v12781_v50 = vpack.c.bf16 %v18760_v5, %v18760_v5  ;;  %v12782_v44 = vpack.c.bf16 %v18763_v31, %v18763_v31 }
 0x581   : > { %v11532_v62 = vsel %vm18865_vm4, %v11032_v13, %v11531_v18  ;;  %v12783_v33 = vpack.c.bf16 %v18766_v56, %v18766_v56  ;;  %v12784_v26 = vpack.c.bf16 %v18769_v38, %v18769_v38  ;;  %v12785_v6 = vpack.c.bf16 %v18772_v48, %v18772_v48  ;;  %v11542_v18 = vld [vmem:[#allocation2 + $0xc8] sm:$0x1] }
 0x582   : > { %11533 = vst [vmem:[#allocation2 + $0xb4] sm:$0xf] %v11532_v62  ;;  %v11040_v4 = vor.u32 %v11038_v58, %v11037_v20  ;;  %v11042_v21 = vrot.slane %v11037_v20, 4  ;;  %v11044_v53 = vshrl.u32 %v12780_v60, 16  ;;  %v11047_v19 = vshll.u32 %v12780_v60, 16 }
 0x583   : > { %v11052_v30 = vshrl.u32 %v12781_v50, 16  ;;  %v11055_v24 = vshll.u32 %v12781_v50, 16  ;;  %v11061_v55 = vshrl.u32 %v12782_v44, 16  ;;  %v11064_v63 = vshll.u32 %v12782_v44, 16  ;;  %v11545_v60 = vld [vmem:[#allocation2 + $0xe4] sm:$0xf] }
 0x584   : > { %v11041_v22 = vsel %vm18874_vm5, %v11033_v17, %v11040_v4  ;;  %v11536_v45 = vsel %vm18884_vm6, %v11042_v21, %v11535_v1  ;;  %v11046_v32 = vrot.slane %v11044_v53, 7  ;;  %v11069_v41 = vshrl.u32 %v12783_v33, 16  ;;  %v11549_v1 = vld [vmem:[#allocation2 + $0xec] sm:$0x1] }
 0x585   : > { %11534 = vst [vmem:[#allocation2 + $0xb8] sm:$0xf] %v11041_v22  ;;  %11537 = vst [vmem:[#allocation2 + $0xbc] sm:$0x1] %v11536_v45  ;;  %v11054_v28 = vrot.slane %v11052_v30, 7  ;;  %v11063_v58 = vrot.slane %v11061_v55, 7 }
 0x586   : > { %v11072_v3 = vshll.u32 %v12783_v33, 16  ;;  %v11078_v52 = vshrl.u32 %v12784_v26, 16  ;;  %v11049_v13 = vor.u32 %v11047_v19, %v11046_v32  ;;  %v11050_v20 = vrot.slane %v11046_v32, 4 }
 0x587   : > { %v11071_v50 = vrot.slane %v11069_v41, 7  ;;  %v11081_v44 = vshll.u32 %v12784_v26, 16  ;;  %v11057_v62 = vor.u32 %v11055_v24, %v11054_v28  ;;  %v11059_v17 = vrot.slane %v11054_v28, 4  ;;  %v11552_v24 = vld [vmem:[#allocation2 + $0xf0] sm:$0xf] }
 0x588   : > { %v11066_v4 = vor.u32 %v11064_v63, %v11063_v58  ;;  %v11067_v48 = vrot.slane %v11063_v58, 4  ;;  %v11539_v21 = vsel %vm18865_vm4, %v11049_v13, %v11538_v54  ;;  %v11080_v30 = vrot.slane %v11078_v52, 7  ;;  %v11556_v52 = vld [vmem:[#allocation2 + $0xf8] sm:$0x1]  ;;  %v19620_v13 = vld [vmem:[#allocation27_spill] sm:$0xff] }
 0x589   : > { %v11074_v53 = vor.u32 %v11072_v3, %v11071_v50  ;;  %v11076_v22 = vrot.slane %v11071_v50, 4  ;;  %11540 = vst [vmem:[#allocation2 + $0xc0] sm:$0xf] %v11539_v21  ;;  %v11058_v33 = vsel %vm18874_vm5, %v11050_v20, %v11057_v62  ;;  %v11543_v19 = vsel %vm18884_vm6, %v11059_v17, %v11542_v18 }
 0x58a   : > { %v11546_v26 = vsel %vm18865_vm4, %v11066_v4, %v11545_v60  ;;  %v11086_v55 = vshrl.u32 %v12785_v6, 16  ;;  %11541 = vst [vmem:[#allocation2 + $0xc4] sm:$0xf] %v11058_v33  ;;  %11544 = vst [vmem:[#allocation2 + $0xc8] sm:$0x1] %v11543_v19  ;;  %v11083_v32 = vor.u32 %v11081_v44, %v11080_v30  ;;  %v11084_v54 = vrot.slane %v11080_v30, 4 }
 0x58b   : > { %11547 = vst [vmem:[#allocation2 + $0xe4] sm:$0xf] %v11546_v26  ;;  %v11075_v63 = vsel %vm18874_vm5, %v11067_v48, %v11074_v53  ;;  %v11550_v45 = vsel %vm18884_vm6, %v11076_v22, %v11549_v1  ;;  %v11089_v28 = vshll.u32 %v12785_v6, 16  ;;  %v12786_v18 = vpack.c.bf16 %v18775_v14, %v18775_v14  ;;  %v19621_v60 = vld [vmem:[#allocation14_spill] sm:$0xff]  ;;  %v11559_v19 = vld [vmem:[#allocation2 + $0xfc] sm:$0xf] }
 0x58c   : > { %11548 = vst [vmem:[#allocation2 + $0xe8] sm:$0xf] %v11075_v63  ;;  %11551 = vst [vmem:[#allocation2 + $0xec] sm:$0x1] %v11550_v45  ;;  %v11088_v41 = vrot.slane %v11086_v55, 7  ;;  %v12787_v58 = vpack.c.bf16 %v18778_v61, %v18778_v61  ;;  %v11553_v3 = vsel %vm18865_vm4, %v11083_v32, %v11552_v24  ;;  %v12788_v48 = vpack.c.bf16 %v18781_v2, %v18781_v2 }
 0x58d   : > { %v12789_v20 = vpack.c.bf16 %v19620_v13, %v19620_v13  ;;  %v12790_v50 = vpack.c.bf16 %v19621_v60, %v19621_v60  ;;  %11554 = vst [vmem:[#allocation2 + $0xf0] sm:$0xf] %v11553_v3  ;;  %v11095_v62 = vshrl.u32 %v12786_v18, 16  ;;  %v11098_v17 = vshll.u32 %v12786_v18, 16  ;;  %v11563_v55 = vld [vmem:[#allocation2 + $0x104] sm:$0x1] }
 0x58e   : > { %v11091_v6 = vor.u32 %v11089_v28, %v11088_v41  ;;  %v11093_v44 = vrot.slane %v11088_v41, 4  ;;  %v11103_v4 = vshrl.u32 %v12787_v58, 16  ;;  %v11106_v1 = vshll.u32 %v12787_v58, 16  ;;  %v11566_v18 = vld [vmem:[#allocation2 + $0x108] sm:$0xf] }
 0x58f   : > { %v11112_v21 = vshrl.u32 %v12788_v48, 16  ;;  %v11115_v53 = vshll.u32 %v12788_v48, 16  ;;  %v11097_v33 = vrot.slane %v11095_v62, 7  ;;  %v11120_v26 = vshrl.u32 %v12789_v20, 16 }
 0x590   : > { %v11092_v22 = vsel %vm18874_vm5, %v11084_v54, %v11091_v6  ;;  %v11557_v30 = vsel %vm18884_vm6, %v11093_v44, %v11556_v52  ;;  %v11105_v24 = vrot.slane %v11103_v4, 7  ;;  %v11123_v45 = vshll.u32 %v12789_v20, 16  ;;  %v11570_v52 = vld [vmem:[#allocation2 + $0x110] sm:$0x1] }
 0x591   : > { %11555 = vst [vmem:[#allocation2 + $0xf4] sm:$0xf] %v11092_v22  ;;  %11558 = vst [vmem:[#allocation2 + $0xf8] sm:$0x1] %v11557_v30  ;;  %v11114_v63 = vrot.slane %v11112_v21, 7  ;;  %v11129_v32 = vshrl.u32 %v12790_v50, 16  ;;  %v11100_v41 = vor.u32 %v11098_v17, %v11097_v33 }
 0x592   : > { %v11101_v28 = vrot.slane %v11097_v33, 4  ;;  %v11122_v58 = vrot.slane %v11120_v26, 7  ;;  %v11132_v3 = vshll.u32 %v12790_v50, 16  ;;  %v11108_v48 = vor.u32 %v11106_v1, %v11105_v24  ;;  %v11573_v1 = vld [vmem:[#allocation2 + $0x114] sm:$0xf]  ;;  %v19622_v21 = vld [vmem:[#allocation16_spill] sm:$0xff] }
 0x593   : > { %v11110_v54 = vrot.slane %v11105_v24, 4  ;;  %v11117_v13 = vor.u32 %v11115_v53, %v11114_v63  ;;  %v11118_v60 = vrot.slane %v11114_v63, 4  ;;  %v11560_v6 = vsel %vm18865_vm4, %v11100_v41, %v11559_v19  ;;  %v19624_v41 = vld [vmem:[#allocation21_spill] sm:$0xff] }
 0x594   : > { %v11125_v44 = vor.u32 %v11123_v45, %v11122_v58  ;;  %v11127_v62 = vrot.slane %v11122_v58, 4  ;;  %v11131_v4 = vrot.slane %v11129_v32, 7  ;;  %11561 = vst [vmem:[#allocation2 + $0xfc] sm:$0xf] %v11560_v6  ;;  %v11109_v20 = vsel %vm18874_vm5, %v11101_v28, %v11108_v48  ;;  %v11577_v6 = vld [vmem:[#allocation2 + $0x11c] sm:$0x1] }
 0x595   : > { %v11564_v17 = vsel %vm18884_vm6, %v11110_v54, %v11563_v55  ;;  %v11567_v50 = vsel %vm18865_vm4, %v11117_v13, %v11566_v18  ;;  %v12791_v53 = vpack.c.bf16 %v19622_v21, %v19622_v21  ;;  %11562 = vst [vmem:[#allocation2 + $0x100] sm:$0xf] %v11109_v20  ;;  %v19623_v55 = vld [vmem:[#allocation19_spill] sm:$0xff]  ;;  %v12793_v45 = vpack.c.bf16 %v18796_v16, %v18796_v16  ;;  %v19625_v18 = vld [vmem:[#allocation18_spill] sm:$0xff] }
 0x596   : > { %11565 = vst [vmem:[#allocation2 + $0x104] sm:$0x1] %v11564_v17  ;;  %11568 = vst [vmem:[#allocation2 + $0x108] sm:$0xf] %v11567_v50  ;;  %v11126_v22 = vsel %vm18874_vm5, %v11118_v60, %v11125_v44  ;;  %v11571_v30 = vsel %vm18884_vm6, %v11127_v62, %v11570_v52  ;;  %v11134_v33 = vor.u32 %v11132_v3, %v11131_v4  ;;  %v11135_v19 = vrot.slane %v11131_v4, 4  ;;  %v19626_v3 = vld [vmem:[#allocation20_spill] sm:$0xff] }
 0x597   : > { %11569 = vst [vmem:[#allocation2 + $0x10c] sm:$0xf] %v11126_v22  ;;  %11572 = vst [vmem:[#allocation2 + $0x110] sm:$0x1] %v11571_v30  ;;  %v11137_v26 = vshrl.u32 %v12791_v53, 16  ;;  %v11140_v24 = vshll.u32 %v12791_v53, 16  ;;  %v12792_v63 = vpack.c.bf16 %v19623_v55, %v19623_v55  ;;  %v12794_v28 = vpack.c.bf16 %v19624_v41, %v19624_v41 }
 0x598   : > { %v11574_v32 = vsel %vm18865_vm4, %v11134_v33, %v11573_v1  ;;  %v12795_v58 = vpack.c.bf16 %v19625_v18, %v19625_v18  ;;  %v12796_v48 = vpack.c.bf16 %v19626_v3, %v19626_v3  ;;  %v11154_v52 = vshrl.u32 %v12793_v45, 16  ;;  %v11580_v53 = vld [vmem:[#allocation2 + $0x120] sm:$0xf]  ;;  %v11584_v41 = vld [vmem:[#allocation2 + $0x128] sm:$0x1] }
 0x599   : > { %11575 = vst [vmem:[#allocation2 + $0x114] sm:$0xf] %v11574_v32  ;;  %v11139_v54 = vrot.slane %v11137_v26, 7  ;;  %v11146_v13 = vshrl.u32 %v12792_v63, 16  ;;  %v11149_v60 = vshll.u32 %v12792_v63, 16  ;;  %v11157_v44 = vshll.u32 %v12793_v45, 16 }
 0x59a   : > { %v11163_v62 = vshrl.u32 %v12794_v28, 16  ;;  %v11166_v4 = vshll.u32 %v12794_v28, 16  ;;  %v11171_v20 = vshrl.u32 %v12795_v58, 16  ;;  %v11156_v21 = vrot.slane %v11154_v52, 7  ;;  %v11587_v28 = vld [vmem:[#allocation2 + $0x12c] sm:$0xf] }
 0x59b   : > { %v11142_v17 = vor.u32 %v11140_v24, %v11139_v54  ;;  %v11144_v50 = vrot.slane %v11139_v54, 4  ;;  %v11148_v1 = vrot.slane %v11146_v13, 7  ;;  %v11174_v33 = vshll.u32 %v12795_v58, 16  ;;  %v11591_v13 = vld [vmem:[#allocation2 + $0x134] sm:$0x1] }
 0x59c   : > { %v11165_v22 = vrot.slane %v11163_v62, 7  ;;  %v11173_v30 = vrot.slane %v11171_v20, 7  ;;  %v11180_v55 = vshrl.u32 %v12796_v48, 16  ;;  %v11159_v24 = vor.u32 %v11157_v44, %v11156_v21 }
 0x59d   : > { %v11143_v26 = vsel %vm18874_vm5, %v11135_v19, %v11142_v17  ;;  %v11578_v63 = vsel %vm18884_vm6, %v11144_v50, %v11577_v6  ;;  %v11151_v32 = vor.u32 %v11149_v60, %v11148_v1  ;;  %v11152_v45 = vrot.slane %v11148_v1, 4  ;;  %v11594_v50 = vld [vmem:[#allocation2 + $0x138] sm:$0xf]  ;;  %v19627_v1 = vld [vmem:[#allocation22_spill] sm:$0xff] }
 0x59e   : > { %11576 = vst [vmem:[#allocation2 + $0x118] sm:$0xf] %v11143_v26  ;;  %11579 = vst [vmem:[#allocation2 + $0x11c] sm:$0x1] %v11578_v63  ;;  %v11161_v18 = vrot.slane %v11156_v21, 4  ;;  %v11168_v3 = vor.u32 %v11166_v4, %v11165_v22  ;;  %v11169_v54 = vrot.slane %v11165_v22, 4  ;;  %v11176_v52 = vor.u32 %v11174_v33, %v11173_v30 }
 0x59f   : > { %v11581_v58 = vsel %vm18865_vm4, %v11151_v32, %v11580_v53  ;;  %v11178_v62 = vrot.slane %v11173_v30, 4  ;;  %v11182_v19 = vrot.slane %v11180_v55, 7  ;;  %v11160_v60 = vsel %vm18874_vm5, %v11152_v45, %v11159_v24  ;;  %v19628_v30 = vld [vmem:[#allocation4_spill] sm:$0xff]  ;;  %v19630_v26 = vld [vmem:[#allocation3_spill] sm:$0xff] }
 0x5a0   : > { %11582 = vst [vmem:[#allocation2 + $0x120] sm:$0xf] %v11581_v58  ;;  %v11585_v6 = vsel %vm18884_vm6, %v11161_v18, %v11584_v41  ;;  %v11588_v44 = vsel %vm18865_vm4, %v11168_v3, %v11587_v28  ;;  %v11183_v20 = vshll.u32 %v12796_v48, 16  ;;  %11583 = vst [vmem:[#allocation2 + $0x124] sm:$0xf] %v11160_v60  ;;  %v11177_v4 = vsel %vm18874_vm5, %v11169_v54, %v11176_v52  ;;  %v19629_v33 = vld [vmem:[#allocation8_spill] sm:$0xff] }
 0x5a1   : > { %11586 = vst [vmem:[#allocation2 + $0x128] sm:$0x1] %v11585_v6  ;;  %11589 = vst [vmem:[#allocation2 + $0x12c] sm:$0xf] %v11588_v44  ;;  %v11592_v17 = vsel %vm18884_vm6, %v11178_v62, %v11591_v13  ;;  %v12797_v21 = vpack.c.bf16 %v19627_v1, %v19627_v1  ;;  %v11186_v53 = vrot.slane %v11182_v19, 4  ;;  %v12798_v48 = vpack.c.bf16 %v19628_v30, %v19628_v30  ;;  %v19631_v41 = vld [vmem:[#allocation9_spill] sm:$0xff] }
 0x5a2   : > { %11590 = vst [vmem:[#allocation2 + $0x130] sm:$0xf] %v11177_v4  ;;  %11593 = vst [vmem:[#allocation2 + $0x134] sm:$0x1] %v11592_v17  ;;  %v11185_v22 = vor.u32 %v11183_v20, %v11182_v19  ;;  %v12799_v55 = vpack.c.bf16 %v19629_v33, %v19629_v33  ;;  %v12800_v63 = vpack.c.bf16 %v19630_v26, %v19630_v26  ;;  %v19632_v24 = vld [vmem:[#allocation11_spill] sm:$0xff] }
 0x5a3   : > { %v11188_v32 = vshrl.u32 %v12797_v21, 16  ;;  %v11191_v45 = vshll.u32 %v12797_v21, 16  ;;  %v12801_v28 = vpack.c.bf16 %v19631_v41, %v19631_v41  ;;  %v12802_v18 = vpack.c.bf16 %v19632_v24, %v19632_v24  ;;  %v11598_v62 = vld [vmem:[#allocation2 + $0x140] sm:$0x1]  ;;  %v11601_v20 = vld [vmem:[#allocation2 + $0x144] sm:$0xf] }
 0x5a4   : > { %v11595_v3 = vsel %vm18865_vm4, %v11185_v22, %v11594_v50  ;;  %v11197_v54 = vshrl.u32 %v12798_v48, 16  ;;  %v11200_v13 = vshll.u32 %v12798_v48, 16  ;;  %v11205_v58 = vshrl.u32 %v12799_v55, 16  ;;  %v11605_v33 = vld [vmem:[#allocation2 + $0x14c] sm:$0x1] }
 0x5a5   : > { %11596 = vst [vmem:[#allocation2 + $0x138] sm:$0xf] %v11595_v3  ;;  %v11190_v52 = vrot.slane %v11188_v32, 7  ;;  %v11208_v19 = vshll.u32 %v12799_v55, 16  ;;  %v11214_v60 = vshrl.u32 %v12800_v63, 16  ;;  %v11217_v6 = vshll.u32 %v12800_v63, 16 }
 0x5a6   : > { %v11199_v44 = vrot.slane %v11197_v54, 7  ;;  %v11207_v4 = vrot.slane %v11205_v58, 7  ;;  %v11222_v17 = vshrl.u32 %v12801_v28, 16  ;;  %v11225_v1 = vshll.u32 %v12801_v28, 16  ;;  %v11608_v3 = vld [vmem:[#allocation2 + $0x150] sm:$0xf] }
 0x5a7   : > { %v11193_v21 = vor.u32 %v11191_v45, %v11190_v52  ;;  %v11195_v30 = vrot.slane %v11190_v52, 4  ;;  %v11216_v26 = vrot.slane %v11214_v60, 7  ;;  %v11231_v41 = vshrl.u32 %v12802_v18, 16  ;;  %v11612_v52 = vld [vmem:[#allocation2 + $0x158] sm:$0x1]  ;;  %v19633_v60 = vld [vmem:[#allocation5_spill] sm:$0xff] }
 0x5a8   : > { %v11202_v50 = vor.u32 %v11200_v13, %v11199_v44  ;;  %v11203_v22 = vrot.slane %v11199_v44, 4  ;;  %v11210_v48 = vor.u32 %v11208_v19, %v11207_v4  ;;  %v11212_v24 = vrot.slane %v11207_v4, 4  ;;  %v11615_v4 = vld [vmem:[#allocation2 + $0x15c] sm:$0xf] }
 0x5a9   : > { %v11194_v55 = vsel %vm18874_vm5, %v11186_v53, %v11193_v21  ;;  %v11599_v63 = vsel %vm18884_vm6, %v11195_v30, %v11598_v62  ;;  %v11219_v32 = vor.u32 %v11217_v6, %v11216_v26  ;;  %v11220_v54 = vrot.slane %v11216_v26, 4  ;;  %v19634_v21 = vld [vmem:[#allocation28_spill] sm:$0xff] }
 0x5aa   : > { %11597 = vst [vmem:[#allocation2 + $0x13c] sm:$0xf] %v11194_v55  ;;  %11600 = vst [vmem:[#allocation2 + $0x140] sm:$0x1] %v11599_v63  ;;  %v11602_v45 = vsel %vm18865_vm4, %v11202_v50, %v11601_v20  ;;  %v11211_v28 = vsel %vm18874_vm5, %v11203_v22, %v11210_v48  ;;  %v11606_v13 = vsel %vm18884_vm6, %v11212_v24, %v11605_v33  ;;  %v11224_v58 = vrot.slane %v11222_v17, 7  ;;  %v19635_v17 = vld [vmem:[#allocation29_spill] sm:$0xff] }
 0x5ab   : > { %11603 = vst [vmem:[#allocation2 + $0x144] sm:$0xf] %v11602_v45  ;;  %11604 = vst [vmem:[#allocation2 + $0x148] sm:$0xf] %v11211_v28  ;;  %v11609_v53 = vsel %vm18865_vm4, %v11219_v32, %v11608_v3  ;;  %v11233_v62 = vrot.slane %v11231_v41, 7  ;;  %v11234_v19 = vshll.u32 %v12802_v18, 16  ;;  %v12803_v6 = vpack.c.bf16 %v19633_v60, %v19633_v60 }
 0x5ac   : > { %11607 = vst [vmem:[#allocation2 + $0x14c] sm:$0x1] %v11606_v13  ;;  %11610 = vst [vmem:[#allocation2 + $0x150] sm:$0xf] %v11609_v53  ;;  %v11227_v44 = vor.u32 %v11225_v1, %v11224_v58  ;;  %v11229_v20 = vrot.slane %v11224_v58, 4  ;;  %v12804_v30 = vpack.c.bf16 %v19634_v21, %v19634_v21  ;;  %v12805_v33 = vpack.c.bf16 %v19635_v17, %v19635_v17  ;;  %v19636_v13 = vld [vmem:[#allocation30_spill] sm:$0xff] }
 0x5ad   : > { %v11236_v26 = vor.u32 %v11234_v19, %v11233_v62  ;;  %v11237_v50 = vrot.slane %v11233_v62, 4  ;;  %v11239_v22 = vshrl.u32 %v12803_v6, 16  ;;  %v11242_v48 = vshll.u32 %v12803_v6, 16  ;;  %v11619_v45 = vld [vmem:[#allocation2 + $0x164] sm:$0x1] }
 0x5ae   : > { %v11228_v18 = vsel %vm18874_vm5, %v11220_v54, %v11227_v44  ;;  %v11613_v41 = vsel %vm18884_vm6, %v11229_v20, %v11612_v52  ;;  %v11248_v24 = vshrl.u32 %v12804_v30, 16  ;;  %v11251_v1 = vshll.u32 %v12804_v30, 16  ;;  %v19637_v54 = vld [vmem:[#allocation31_spill] sm:$0xff]  ;;  %v19638_v52 = vld [vmem:[#allocation10_spill] sm:$0xff]  ;;  %v19639_v20 = vld [vmem:[#allocation32_spill] sm:$0xff] }
 0x5af   : > { %11611 = vst [vmem:[#allocation2 + $0x154] sm:$0xf] %v11228_v18  ;;  %11614 = vst [vmem:[#allocation2 + $0x158] sm:$0x1] %v11613_v41  ;;  %v11616_v3 = vsel %vm18865_vm4, %v11236_v26, %v11615_v4  ;;  %v11241_v55 = vrot.slane %v11239_v22, 7  ;;  %v11256_v63 = vshrl.u32 %v12805_v33, 16  ;;  %v12806_v58 = vpack.c.bf16 %v19636_v13, %v19636_v13 }
 0x5b0   : > { %v11259_v32 = vshll.u32 %v12805_v33, 16  ;;  %11617 = vst [vmem:[#allocation2 + $0x15c] sm:$0xf] %v11616_v3  ;;  %v11250_v28 = vrot.slane %v11248_v24, 7  ;;  %v12807_v53 = vpack.c.bf16 %v19637_v54, %v19637_v54  ;;  %v12808_v62 = vpack.c.bf16 %v19638_v52, %v19638_v52  ;;  %v11622_v6 = vld [vmem:[#allocation2 + $0x168] sm:$0xf] }
 0x5b1   : > { %v11244_v19 = vor.u32 %v11242_v48, %v11241_v55  ;;  %v11246_v60 = vrot.slane %v11241_v55, 4  ;;  %v11258_v44 = vrot.slane %v11256_v63, 7  ;;  %v12809_v4 = vpack.c.bf16 %v19639_v20, %v19639_v20  ;;  %v11626_v17 = vld [vmem:[#allocation2 + $0x170] sm:$0x1]  ;;  %v19641_v20 = vld [vmem:[#allocation6_spill] sm:$0xff] }
 0x5b2   : > { %v11253_v21 = vor.u32 %v11251_v1, %v11250_v28  ;;  %v11254_v30 = vrot.slane %v11250_v28, 4  ;;  %v11265_v33 = vshrl.u32 %v12806_v58, 16  ;;  %v11268_v26 = vshll.u32 %v12806_v58, 16  ;;  %v11629_v28 = vld [vmem:[#allocation2 + $0x174] sm:$0xf] }
 0x5b3   : > { %v11245_v22 = vsel %vm18874_vm5, %v11237_v50, %v11244_v19  ;;  %v11620_v18 = vsel %vm18884_vm6, %v11246_v60, %v11619_v45  ;;  %v11261_v41 = vor.u32 %v11259_v32, %v11258_v44  ;;  %v11263_v24 = vrot.slane %v11258_v44, 4  ;;  %v11633_v19 = vld [vmem:[#allocation2 + $0x17c] sm:$0x1] }
 0x5b4   : > { %11618 = vst [vmem:[#allocation2 + $0x160] sm:$0xf] %v11245_v22  ;;  %11621 = vst [vmem:[#allocation2 + $0x164] sm:$0x1] %v11620_v18  ;;  %v11623_v48 = vsel %vm18865_vm4, %v11253_v21, %v11622_v6  ;;  %v11267_v3 = vrot.slane %v11265_v33, 7  ;;  %v11273_v55 = vshrl.u32 %v12807_v53, 16  ;;  %v12811_v21 = vpack.c.bf16 %v19641_v20, %v19641_v20 }
 0x5b5   : > { %v11276_v1 = vshll.u32 %v12807_v53, 16  ;;  %11624 = vst [vmem:[#allocation2 + $0x168] sm:$0xf] %v11623_v48  ;;  %v11262_v63 = vsel %vm18874_vm5, %v11254_v30, %v11261_v41  ;;  %v11627_v50 = vsel %vm18884_vm6, %v11263_v24, %v11626_v17  ;;  %v11282_v13 = vshrl.u32 %v12808_v62, 16  ;;  %v19640_v53 = vld [vmem:[#allocation33_spill] sm:$0xff] }
 0x5b6   : > { %v11285_v45 = vshll.u32 %v12808_v62, 16  ;;  %11625 = vst [vmem:[#allocation2 + $0x16c] sm:$0xf] %v11262_v63  ;;  %11628 = vst [vmem:[#allocation2 + $0x170] sm:$0x1] %v11627_v50  ;;  %v11270_v32 = vor.u32 %v11268_v26, %v11267_v3  ;;  %v11271_v58 = vrot.slane %v11267_v3, 4  ;;  %v12810_v44 = vpack.c.bf16 %v19640_v53, %v19640_v53 }
 0x5b7   : > { %v11275_v54 = vrot.slane %v11273_v55, 7  ;;  %v11290_v52 = vshrl.u32 %v12809_v4, 16  ;;  %v11284_v60 = vrot.slane %v11282_v13, 7  ;;  %v11293_v6 = vshll.u32 %v12809_v4, 16  ;;  %v11636_v33 = vld [vmem:[#allocation2 + $0x180] sm:$0xf] }
 0x5b8   : > { %v11630_v30 = vsel %vm18865_vm4, %v11270_v32, %v11629_v28  ;;  %v11640_v41 = vld [vmem:[#allocation2 + $0x188] sm:$0x1]  ;;  %v11299_v24 = vshrl.u32 %v12810_v44, 16  ;;  %v11302_v48 = vshll.u32 %v12810_v44, 16  ;;  %v11307_v28 = vshrl.u32 %v12811_v21, 16 }
 0x5b9   : > { %v11278_v17 = vor.u32 %v11276_v1, %v11275_v54  ;;  %v11280_v62 = vrot.slane %v11275_v54, 4  ;;  %v11292_v22 = vrot.slane %v11290_v52, 7  ;;  %11631 = vst [vmem:[#allocation2 + $0x174] sm:$0xf] %v11630_v30  ;;  %v11287_v26 = vor.u32 %v11285_v45, %v11284_v60  ;;  %v19642_v54 = vld [vmem:[#allocation34_spill] sm:$0xff] }
 0x5ba   : > { %v11288_v18 = vrot.slane %v11284_v60, 4  ;;  %v11301_v50 = vrot.slane %v11299_v24, 7  ;;  %v11310_v13 = vshll.u32 %v12811_v21, 16  ;;  %v12812_v52 = vpack.c.bf16 %v19642_v54, %v19642_v54  ;;  %v11647_v20 = vld [vmem:[#allocation2 + $0x194] sm:$0x1] }
 0x5bb   : > { %v11279_v4 = vsel %vm18874_vm5, %v11271_v58, %v11278_v17  ;;  %v11634_v3 = vsel %vm18884_vm6, %v11280_v62, %v11633_v19  ;;  %v11295_v55 = vor.u32 %v11293_v6, %v11292_v22  ;;  %v11297_v63 = vrot.slane %v11292_v22, 4  ;;  %v11643_v58 = vld [vmem:[#allocation2 + $0x18c] sm:$0xf]  ;;  %v19643_v19 = vld [vmem:[#allocation35_spill] sm:$0xff] }
 0x5bc   : > { %11632 = vst [vmem:[#allocation2 + $0x178] sm:$0xf] %v11279_v4  ;;  %11635 = vst [vmem:[#allocation2 + $0x17c] sm:$0x1] %v11634_v3  ;;  %v11637_v1 = vsel %vm18865_vm4, %v11287_v26, %v11636_v33  ;;  %v12813_v60 = vpack.c.bf16 %v19643_v19, %v19643_v19  ;;  %v11304_v6 = vor.u32 %v11302_v48, %v11301_v50  ;;  %v11305_v53 = vrot.slane %v11301_v50, 4 }
 0x5bd   : > { %11638 = vst [vmem:[#allocation2 + $0x180] sm:$0xf] %v11637_v1  ;;  %v11296_v45 = vsel %vm18874_vm5, %v11288_v18, %v11295_v55  ;;  %v11641_v32 = vsel %vm18884_vm6, %v11297_v63, %v11640_v41  ;;  %v11309_v44 = vrot.slane %v11307_v28, 7  ;;  %v11316_v21 = vshrl.u32 %v12812_v52, 16  ;;  %v11650_v4 = vld [vmem:[#allocation2 + $0x198] sm:$0xf] }
 0x5be   : > { %11639 = vst [vmem:[#allocation2 + $0x184] sm:$0xf] %v11296_v45  ;;  %11642 = vst [vmem:[#allocation2 + $0x188] sm:$0x1] %v11641_v32  ;;  %v11319_v30 = vshll.u32 %v12812_v52, 16  ;;  %v11324_v17 = vshrl.u32 %v12813_v60, 16  ;;  %v11644_v33 = vsel %vm18865_vm4, %v11304_v6, %v11643_v58 }
 0x5bf   : > { %v11327_v62 = vshll.u32 %v12813_v60, 16  ;;  %v11312_v22 = vor.u32 %v11310_v13, %v11309_v44  ;;  %v11314_v26 = vrot.slane %v11309_v44, 4  ;;  %11645 = vst [vmem:[#allocation2 + $0x18c] sm:$0xf] %v11644_v33  ;;  %v11318_v18 = vrot.slane %v11316_v21, 7 }
 0x5c0   : > { %v11326_v41 = vrot.slane %v11324_v17, 7  ;;  %v11654_v3 = vld [vmem:[#allocation2 + $0x1a0] sm:$0x1] }
 0x5c1   : > { %v11313_v24 = vsel %vm18874_vm5, %v11305_v53, %v11312_v22  ;;  %v11648_v48 = vsel %vm18884_vm6, %v11314_v26, %v11647_v20  ;;  %v11321_v55 = vor.u32 %v11319_v30, %v11318_v18  ;;  %v11322_v63 = vrot.slane %v11318_v18, 4 }
 0x5c2   : > { %11646 = vst [vmem:[#allocation2 + $0x190] sm:$0xf] %v11313_v24  ;;  %11649 = vst [vmem:[#allocation2 + $0x194] sm:$0x1] %v11648_v48  ;;  %v11329_v1 = vor.u32 %v11327_v62, %v11326_v41  ;;  %v11331_v50 = vrot.slane %v11326_v41, 4 }
 0x5c3   : > { %v11651_v28 = vsel %vm18865_vm4, %v11321_v55, %v11650_v4 }
 0x5c4   : > { %v11330_v13 = vsel %vm18874_vm5, %v11322_v63, %v11329_v1  ;;  %v11655_v45 = vsel %vm18884_vm6, %v11331_v50, %v11654_v3  ;;  %11652 = vst [vmem:[#allocation2 + $0x198] sm:$0xf] %v11651_v28 }
 0x5c5   : > { %11653 = vst [vmem:[#allocation2 + $0x19c] sm:$0xf] %v11330_v13  ;;  %11656 = vst [vmem:[#allocation2 + $0x1a0] sm:$0x1] %v11655_v45 }
 0x5c6 PF: > { %p12683_p6 = scmp.ne.s32.totalorder %s15135_s16, 1 }
 0x5c7   : > { %v19644_v32 = vld [vmem:[#allocation13_spill] sm:$0xff] (!%p12683_p6)  ;;  %v19645_v58 = vld [vmem:[#allocation7_spill] sm:$0xff] (!%p12683_p6)  ;;  %v19646_v52 = vld [vmem:[#allocation12_spill] sm:$0xff] (!%p12683_p6)  ;;  %v12901_v44 = vpack.c.bf16 (!%p12683_p6), %v18694_v59, %v18691_v40  ;;  %v12906_v20 = vpack.c.bf16 (!%p12683_p6), %v18700_v12, %v18697_v23  ;;  %v12911_v21 = vpack.c.bf16 (!%p12683_p6), %v18706_v29, %v18703_v42  ;;  %v12916_v30 = vpack.c.bf16 (!%p12683_p6), %v18712_v11, %v18709_v37 }
 0x5c8   : > { %11660 = sbr.rel (%p12683_p6) target bundleno = 1498 (0x5da), region = 48  ;;  %v12881_v54 = vpack.c.bf16 (!%p12683_p6), %v19645_v58, %v19644_v32  ;;  %v19647_v19 = vld [vmem:[#allocation15_spill] sm:$0xff] (!%p12683_p6)  ;;  %v19648_v60 = vld [vmem:[#allocation17_spill] sm:$0xff] (!%p12683_p6)  ;;  %v19650_v53 = vld [vmem:[#allocation24_spill] sm:$0xff] (!%p12683_p6)  ;;  %v12926_v59 = vpack.c.bf16 (!%p12683_p6), %v18724_v25, %v18721_v47  ;;  %v12931_v23 = vpack.c.bf16 (!%p12683_p6), %v18730_v43, %v18727_v10  ;;  %v12936_v12 = vpack.c.bf16 (!%p12683_p6), %v18736_v39, %v18733_v0 }
 0x5c9   : > { %v12886_v46 = vpack.c.bf16 (!%p12683_p6), %v19647_v19, %v19646_v52  ;;  %v19649_v6 = vld [vmem:[#allocation23_spill] sm:$0xff] (!%p12683_p6)  ;;  %v12896_v35 = vpack.c.bf16 (!%p12683_p6), %v18688_v27, %v19650_v53  ;;  %v19651_v27 = vld [vmem:[#allocation25_spill] sm:$0xff] (!%p12683_p6)  ;;  %13041 = vst [vmem:[%s19362_s4 + $0x20] sm:$0xff] (!%p12683_p6), %v12901_v44   ;;  %13042 = vst [vmem:[%s19362_s4 + $0x28] sm:$0xff] (!%p12683_p6), %v12906_v20   ;;  %v12941_v42 = vpack.c.bf16 (!%p12683_p6), %v18742_v49, %v18739_v15 }
 0x5ca   : > { %v12891_v36 = vpack.c.bf16 (!%p12683_p6), %v19649_v6, %v19648_v60  ;;  %12882 = vst [vmem:[%s19362_s4] sm:$0xff] (!%p12683_p6), %v12881_v54   ;;  %v12921_v40 = vpack.c.bf16 (!%p12683_p6), %v19651_v27, %v18715_v7  ;;  %13043 = vst [vmem:[%s19362_s4 + $0x30] sm:$0xff] (!%p12683_p6), %v12911_v21   ;;  %v12946_v29 = vpack.c.bf16 (!%p12683_p6), %v18748_v34, %v18745_v9  ;;  %v19652_v47 = vld [vmem:[#allocation26_spill] sm:$0xff] (!%p12683_p6)  ;;  %v19653_v43 = vld [vmem:[#allocation27_spill] sm:$0xff] (!%p12683_p6) }
 0x5cb   : > { %13038 = vst [vmem:[%s19362_s4 + $0x8] sm:$0xff] (!%p12683_p6), %v12886_v46   ;;  %13040 = vst [vmem:[%s19362_s4 + $0x18] sm:$0xff] (!%p12683_p6), %v12896_v35   ;;  %v12951_v37 = vpack.c.bf16 (!%p12683_p6), %v18754_v51, %v18751_v57  ;;  %v12956_v11 = vpack.c.bf16 (!%p12683_p6), %v18760_v5, %v18757_v8  ;;  %v12961_v7 = vpack.c.bf16 (!%p12683_p6), %v18766_v56, %v18763_v31  ;;  %v19654_v39 = vld [vmem:[#allocation14_spill] sm:$0xff] (!%p12683_p6)  ;;  %v19655_v15 = vld [vmem:[#allocation16_spill] sm:$0xff] (!%p12683_p6) }
 0x5cc   : > { %13039 = vst [vmem:[%s19362_s4 + $0x10] sm:$0xff] (!%p12683_p6), %v12891_v36   ;;  %13044 = vst [vmem:[%s19362_s4 + $0x38] sm:$0xff] (!%p12683_p6), %v12916_v30   ;;  %v12966_v25 = vpack.c.bf16 (!%p12683_p6), %v19652_v47, %v18769_v38  ;;  %v12971_v10 = vpack.c.bf16 (!%p12683_p6), %v18778_v61, %v18775_v14  ;;  %v12976_v0 = vpack.c.bf16 (!%p12683_p6), %v19653_v43, %v18781_v2  ;;  %v19656_v9 = vld [vmem:[#allocation19_spill] sm:$0xff] (!%p12683_p6)  ;;  %v19657_v57 = vld [vmem:[#allocation21_spill] sm:$0xff] (!%p12683_p6) }
 0x5cd   : > { %13045 = vst [vmem:[%s19362_s4 + $0x40] sm:$0xff] (!%p12683_p6), %v12921_v40   ;;  %13046 = vst [vmem:[%s19362_s4 + $0x48] sm:$0xff] (!%p12683_p6), %v12926_v59   ;;  %v12981_v49 = vpack.c.bf16 (!%p12683_p6), %v19655_v15, %v19654_v39  ;;  %v12986_v34 = vpack.c.bf16 (!%p12683_p6), %v18796_v16, %v19656_v9  ;;  %v19658_v51 = vld [vmem:[#allocation18_spill] sm:$0xff] (!%p12683_p6)  ;;  %v19659_v5 = vld [vmem:[#allocation20_spill] sm:$0xff] (!%p12683_p6) }
 0x5ce   : > { %13047 = vst [vmem:[%s19362_s4 + $0x50] sm:$0xff] (!%p12683_p6), %v12931_v23   ;;  %13048 = vst [vmem:[%s19362_s4 + $0x58] sm:$0xff] (!%p12683_p6), %v12936_v12   ;;  %v12991_v8 = vpack.c.bf16 (!%p12683_p6), %v19658_v51, %v19657_v57  ;;  %v19660_v31 = vld [vmem:[#allocation22_spill] sm:$0xff] (!%p12683_p6)  ;;  %v19661_v38 = vld [vmem:[#allocation4_spill] sm:$0xff] (!%p12683_p6) }
 0x5cf   : > { %13049 = vst [vmem:[%s19362_s4 + $0x60] sm:$0xff] %v12941_v42   ;;  %13050 = vst [vmem:[%s19362_s4 + $0x68] sm:$0xff] %v12946_v29   ;;  %v12996_v56 = vpack.c.bf16 %v19660_v31, %v19659_v5  ;;  %v19662_v14 = vld [vmem:[#allocation8_spill] sm:$0xff]  ;;  %v19663_v2 = vld [vmem:[#allocation3_spill] sm:$0xff] }
 0x5d0   : > { %13051 = vst [vmem:[%s19362_s4 + $0x70] sm:$0xff] %v12951_v37   ;;  %13052 = vst [vmem:[%s19362_s4 + $0x78] sm:$0xff] %v12956_v11   ;;  %v13001_v61 = vpack.c.bf16 %v19662_v14, %v19661_v38  ;;  %v19664_v16 = vld [vmem:[#allocation9_spill] sm:$0xff]  ;;  %v19665_v62 = vld [vmem:[#allocation11_spill] sm:$0xff] }
 0x5d1   : > { %13053 = vst [vmem:[%s19362_s4 + $0x80] sm:$0xff] %v12961_v7   ;;  %13054 = vst [vmem:[%s19362_s4 + $0x88] sm:$0xff] %v12966_v25   ;;  %v13006_v17 = vpack.c.bf16 %v19664_v16, %v19663_v2  ;;  %v19666_v33 = vld [vmem:[#allocation5_spill] sm:$0xff]  ;;  %v19667_v26 = vld [vmem:[#allocation28_spill] sm:$0xff] }
 0x5d2   : > { %13055 = vst [vmem:[%s19362_s4 + $0x90] sm:$0xff] %v12971_v10   ;;  %13056 = vst [vmem:[%s19362_s4 + $0x98] sm:$0xff] %v12976_v0   ;;  %v13011_v22 = vpack.c.bf16 %v19666_v33, %v19665_v62  ;;  %v19668_v18 = vld [vmem:[#allocation29_spill] sm:$0xff]  ;;  %v19669_v24 = vld [vmem:[#allocation30_spill] sm:$0xff] }
 0x5d3   : > { %v13016_v41 = vpack.c.bf16 %v19668_v18, %v19667_v26  ;;  %13057 = vst [vmem:[%s19362_s4 + $0xa0] sm:$0xff] %v12981_v49   ;;  %13058 = vst [vmem:[%s19362_s4 + $0xa8] sm:$0xff] %v12986_v34   ;;  %v19670_v48 = vld [vmem:[#allocation31_spill] sm:$0xff]  ;;  %v19671_v3 = vld [vmem:[#allocation10_spill] sm:$0xff] }
 0x5d4   : > { %13059 = vst [vmem:[%s19362_s4 + $0xb0] sm:$0xff] %v12991_v8   ;;  %13060 = vst [vmem:[%s19362_s4 + $0xb8] sm:$0xff] %v12996_v56   ;;  %v13021_v4 = vpack.c.bf16 %v19670_v48, %v19669_v24  ;;  %v19672_v55 = vld [vmem:[#allocation32_spill] sm:$0xff]  ;;  %v19673_v1 = vld [vmem:[#allocation33_spill] sm:$0xff] }
 0x5d5   : > { %v13026_v63 = vpack.c.bf16 %v19672_v55, %v19671_v3  ;;  %v19674_v50 = vld [vmem:[#allocation6_spill] sm:$0xff]  ;;  %v19676_v45 = vld [vmem:[#allocation35_spill] sm:$0xff]  ;;  %13061 = vst [vmem:[%s19362_s4 + $0xc0] sm:$0xff] %v13001_v61   ;;  %13062 = vst [vmem:[%s19362_s4 + $0xc8] sm:$0xff] %v13006_v17  }
 0x5d6   : > { %v13031_v28 = vpack.c.bf16 %v19674_v50, %v19673_v1  ;;  %v19675_v13 = vld [vmem:[#allocation34_spill] sm:$0xff]  ;;  %13063 = vst [vmem:[%s19362_s4 + $0xd0] sm:$0xff] %v13011_v22   ;;  %13064 = vst [vmem:[%s19362_s4 + $0xd8] sm:$0xff] %v13016_v41  }
 0x5d7   : > { %v13036_v32 = vpack.c.bf16 %v19676_v45, %v19675_v13  ;;  %13065 = vst [vmem:[%s19362_s4 + $0xe0] sm:$0xff] %v13021_v4   ;;  %13066 = vst [vmem:[%s19362_s4 + $0xe8] sm:$0xff] %v13026_v63  }
 0x5d8   : > { %13067 = vst [vmem:[%s19362_s4 + $0xf0] sm:$0xff] %v13031_v28  }
 0x5d9   : > { %13068 = vst [vmem:[%s19362_s4 + $0xf8] sm:$0xff] %v13036_v32  }
 0x5da PF: > { %s14_s15 = sadd.s32 1, %s15101_s15  }
 0x5db   : > { %p11_p7 = scmp.ge.s32.totalorder %s14_s15, 4  }
 0x5dd   :  { %13 = sbr.rel (!%p11_p7) target bundleno = 1 (0x1), region = 92 }

</bundles_post_ra>
